<compile_context>
chip_gen: v7x
topology: tpu7x:2x2x1
jax: 0.10.0
libtpu: 0.0.40
codegen_flags: <defaults>
</compile_context>

<pallas_src>
import functools

import jax
import jax.numpy as jnp
from jax.experimental import pallas as pl
from jax.experimental.pallas import tpu as pltpu


def _round_up(x, m):
    return (x + m - 1) // m * m


def _tensorcores_per_chip():
    # v7x has 2 TensorCores per chip; v5e/v6e have 1.  Unknown -> assume 1
    # (safe: on a single core, splitting the batch only serializes the chain).
    try:
        kind = jax.devices()[0].device_kind.lower()
    except Exception:
        return 1
    return 2 if ("v7" in kind or "7x" in kind) else 1


def _sigmoid_one_eup(x):
    # sigmoid(x) == 0.5 * (1 + tanh(x / 2)): a single EUP transcendental on the
    # serial per-step chain instead of exp + reciprocal.
    return 0.5 * (1.0 + jnp.tanh(0.5 * x))


def _lstm_chunk_kernel(xw_ref, w_hh_ref, h_out_ref, h_ref, c_ref, *,
                       time_chunk, hidden, matmul_dtype):
    """One grid step == `time_chunk` LSTM timesteps for one batch tile.

    xw_ref:    (TC, TB, 4*H)  pre-activations x_t @ W_ih + (b_ih + b_hh)   (bf16)
    w_hh_ref:  (H, 4*H)       recurrent weight                             (bf16)
    h_out_ref: (TB, H)        last hidden state, written on the last chunk (f32)
    h_ref/c_ref: (TB, H)      f32 state scratch, persistent across time chunks
    PyTorch gate order: i, f, g, o.
    """
    t_idx = pl.program_id(1)

    @pl.when(t_idx == 0)
    def _():
        h_ref[...] = jnp.zeros_like(h_ref)
        c_ref[...] = jnp.zeros_like(c_ref)

    H = hidden

    def step(tt, carry):
        _, h_mm, c_prev = carry                               # h_mm: bf16 (TB, H)
        # Only the recurrent matmul sits on the serial critical path.
        gates = xw_ref[tt].astype(jnp.float32) + jnp.dot(
            h_mm, w_hh_ref[...], preferred_element_type=jnp.float32)  # (TB, 4H) f32
        # 128-lane-aligned gate slices (H padded to a multiple of 128).
        i_g = _sigmoid_one_eup(gates[:, 0 * H:1 * H])
        f_g = _sigmoid_one_eup(gates[:, 1 * H:2 * H])
        g_g = jnp.tanh(gates[:, 2 * H:3 * H])
        o_g = _sigmoid_one_eup(gates[:, 3 * H:4 * H])
        c_new = f_g * c_prev + i_g * g_g
        h_new = o_g * jnp.tanh(c_new)
        # bf16 shadow of h produced here (h_new still in vregs) so the cast does not
        # sit immediately before the next step's recurrent matmul.
        return h_new, h_new.astype(matmul_dtype), c_new

    # Unrolled inner loop: state lives in vregs across the chunk; scratch refs are
    # read/written once per grid step.
    h0 = h_ref[...]
    c0 = c_ref[...]
    h, _, c = jax.lax.fori_loop(0, time_chunk, step,
                                (h0, h0.astype(matmul_dtype), c0), unroll=True)
    h_ref[...] = h
    c_ref[...] = c

    # Final chunk: export the last hidden state (the Linear head runs in XLA).
    @pl.when(t_idx == pl.num_programs(1) - 1)
    def _():
        h_out_ref[...] = h


def _pick_vmem_limit(TC, TB, H_p, operand_itemsize):
    """vmem_limit_bytes from actual buffer sizes, capped per chip."""
    xw_bytes = 2 * TC * TB * 4 * H_p * operand_itemsize     # double-buffered stream
    whh_bytes = 2 * H_p * 4 * H_p * operand_itemsize        # worst case (2 buffers)
    out_bytes = 2 * TB * H_p * 4
    state_bytes = 2 * TB * H_p * 4
    needed = xw_bytes + whh_bytes + out_bytes + state_bytes + (4 << 20)  # headroom
    cap = 48 << 20                                           # safe default (v7x-ish)
    try:
        phys = pltpu.get_tpu_info().vmem_capacity_bytes      # 128 MiB v5e/v6e, 64 MiB v7x
        cap = min(int(phys) - (8 << 20), 100 << 20)
    except Exception:
        pass
    return int(min(max(needed, 32 << 20), cap))


def recurrent_classifier_forward(token_ids, params, *, time_chunk=32,
                                 batch_tile=None, matmul_dtype=jnp.bfloat16):
    """token_ids: (T, B) int32. Returns logits (B, classes) float32."""
    emb_table = params["emb"]          # (vocab, E)
    w_ih = params["w_ih"]              # (E, 4H)
    w_hh = params["w_hh"]              # (H, 4H)
    b = params["b"]                    # (1, 4H)  == b_ih + b_hh
    w_out = params["w_out"]            # (H, C)
    b_out = params["b_out"]            # (1, C)

    T, B = token_ids.shape
    H = w_hh.shape[0]

    # ---- hardware-aligned padded sizes --------------------------------------
    itemsize = jnp.dtype(matmul_dtype).itemsize
    sublane = 16 if itemsize == 2 else 8        # bf16 packs (16,128) per vreg tile
    B_p = _round_up(B, sublane)
    H_p = _round_up(H, 128)                     # 128-lane-aligned gate slices

    # Time chunk: default 32 to amortize ~0.35us/grid-step, but shrink if the
    # left-padding waste would exceed ~12.5% of the padded length.
    TC = max(8, int(time_chunk))
    while TC > 8 and (_round_up(T, TC) - T) * 8 > _round_up(T, TC):
        TC //= 2
    T_p = _round_up(T, TC)

    # Batch tile: split across both TensorCores on v7x; keep one tile on 1-TC chips.
    if batch_tile is not None:
        TB = int(batch_tile)
    elif _tensorcores_per_chip() >= 2 and B_p >= 16:
        TB = B_p // 2                           # multiple of 8 (B_p multiple of 16)
    else:
        TB = B_p
    assert B_p % TB == 0 and TB % 8 == 0

    # ---- pad parameters (zero padding is exact for the LSTM recurrence) ----
    def pad_gates(w):                  # (..., 4H) -> (..., 4*H_p), per-gate pad
        lead = w.shape[:-1]
        w4 = w.reshape(*lead, 4, H)
        w4 = jnp.pad(w4, [(0, 0)] * len(lead) + [(0, 0), (0, H_p - H)])
        return w4.reshape(*lead, 4 * H_p)

    w_ih_p = pad_gates(w_ih)                                   # (E, 4H_p)
    w_hh_p = pad_gates(jnp.pad(w_hh, ((0, H_p - H), (0, 0))))  # (H_p, 4H_p)
    b_p = pad_gates(b)                                         # (1, 4H_p)

    # ---- hoisted input projection: one big GEMM over all timesteps (XLA) ----
    x_emb = jnp.take(emb_table, token_ids.reshape(-1), axis=0)          # (T*B, E)
    xw = jnp.dot(x_emb.astype(matmul_dtype), w_ih_p.astype(matmul_dtype),
                 preferred_element_type=jnp.float32) + b_p              # f32
    xw = xw.reshape(T, B, 4 * H_p)
    # Left-pad time (zero pre-activations leave (h,c)=(0,0) unchanged) and pad
    # batch (padded rows stay harmless; sliced off at the end).
    xw = jnp.pad(xw, ((T_p - T, 0), (0, B_p - B), (0, 0)))
    xw = xw.astype(matmul_dtype)                                        # (T_p, B_p, 4H_p)

    kernel = functools.partial(_lstm_chunk_kernel, time_chunk=TC, hidden=H_p,
                               matmul_dtype=matmul_dtype)
    vmem_limit = _pick_vmem_limit(TC, TB, H_p, itemsize)
    w_hh_mm = w_hh_p.astype(matmul_dtype)

    def _run(single_buffer_whh):
        whh_spec_kwargs = {}
        if single_buffer_whh:
            # Constant index_map -> no pipelining benefit from 2 buffers; single
            # buffer halves the weight's VMEM footprint.
            whh_spec_kwargs["pipeline_mode"] = pl.Buffered(1)
        grid_spec = pltpu.PrefetchScalarGridSpec(
            num_scalar_prefetch=0,
            grid=(B_p // TB, T_p // TC),          # (batch tiles, time chunks)
            in_specs=[
                pl.BlockSpec((TC, TB, 4 * H_p), lambda bi, ti: (ti, bi, 0)),  # xW chunk
                pl.BlockSpec((H_p, 4 * H_p), lambda bi, ti: (0, 0),           # W_hh
                             **whh_spec_kwargs),
            ],
            out_specs=pl.BlockSpec((TB, H_p), lambda bi, ti: (bi, 0)),        # h_last
            scratch_shapes=[
                pltpu.VMEM((TB, H_p), jnp.float32),   # h state
                pltpu.VMEM((TB, H_p), jnp.float32),   # c state
            ],
        )
        return pl.pallas_call(
            kernel,
            out_shape=jax.ShapeDtypeStruct((B_p, H_p), jnp.float32),
            grid_spec=grid_spec,
            compiler_params=pltpu.CompilerParams(
                # Batch tiles are independent -> megacore-parallel on v7x; the
                # recurrence (time) axis is strictly sequential.
                dimension_semantics=("parallel", "arbitrary"),
                vmem_limit_bytes=vmem_limit,
            ),
        )(xw, w_hh_mm)

    try:
        h_last_p = _run(True)
    except Exception:
        # Fallback for JAX versions without pipeline_mode / Buffered(1) support.
        h_last_p = _run(False)

    # ---- Linear head in XLA (f32, HIGHEST precision) ------------------------
    h_last = h_last_p[:B, :H]
    logits = jnp.dot(h_last, w_out,
                     precision=jax.lax.Precision.HIGHEST) + b_out
    return logits


def init_params(key, vocab_size, emb_dim, hid_size, classes_count):
    """Deterministic parameter init matching the PyTorch module's shapes.
    PyTorch stores weight_ih as (4H, E), weight_hh as (4H, H), Linear weight as
    (C, H); we keep the transposed (input-major) layout for matmul."""
    k0, k1, k2, k3, k4, k5, k6 = jax.random.split(key, 7)
    s = 0.1
    return {
        "emb":   jax.random.normal(k0, (vocab_size, emb_dim), jnp.float32),
        "w_ih":  s * jax.random.normal(k1, (emb_dim, 4 * hid_size), jnp.float32),
        "w_hh":  s * jax.random.normal(k2, (hid_size, 4 * hid_size), jnp.float32),
        # b = b_ih + b_hh folded together (identical semantics)
        "b":     (s * jax.random.normal(k3, (1, 4 * hid_size), jnp.float32)
                  + s * jax.random.normal(k4, (1, 4 * hid_size), jnp.float32)),
        "w_out": s * jax.random.normal(k5, (hid_size, classes_count), jnp.float32),
        "b_out": s * jax.random.normal(k6, (1, classes_count), jnp.float32),
    }


def reference_forward(token_ids, params):
    """Pure-JAX f32 reference (mirrors PyTorch LSTM semantics)."""
    emb = jnp.take(params["emb"], token_ids, axis=0)     # (T, B, E)
    _, B, _ = emb.shape
    H = params["w_hh"].shape[0]
    h = jnp.zeros((B, H), jnp.float32)
    c = jnp.zeros((B, H), jnp.float32)
    hi = jax.lax.Precision.HIGHEST

    def step(carry, x_t):
        h, c = carry
        gates = (jnp.dot(x_t, params["w_ih"], precision=hi)
                 + jnp.dot(h, params["w_hh"], precision=hi)
                 + params["b"])
        i = jax.nn.sigmoid(gates[:, 0 * H:1 * H])
        f = jax.nn.sigmoid(gates[:, 1 * H:2 * H])
        g = jnp.tanh(gates[:, 2 * H:3 * H])
        o = jax.nn.sigmoid(gates[:, 3 * H:4 * H])
        c = f * c + i * g
        h = o * jnp.tanh(c)
        return (h, c), None

    (h, c), _ = jax.lax.scan(step, (h, c), emb)
    return jnp.dot(h, params["w_out"], precision=hi) + params["b_out"]


if __name__ == "__main__":
    # Small shapes consistent with the module's forward: inputs (seq_len, batch).
    vocab_size, emb_dim, hid_size, classes_count = 32, 16, 32, 2
    seq_len, batch = 16, 4

    key = jax.random.PRNGKey(0)
    k_tok, k_par = jax.random.split(key)
    token_ids = jax.random.randint(k_tok, (seq_len, batch), 0, vocab_size,
                                   dtype=jnp.int32)
    params = init_params(k_par, vocab_size, emb_dim, hid_size, classes_count)

    logits = recurrent_classifier_forward(token_ids, params)
    logits = jax.block_until_ready(logits)

    ref = reference_forward(token_ids, params)
    assert logits.shape == (batch, classes_count), logits.shape
    # bf16 MXU operands (gate math / cell state stay f32) => modest tolerance
    # vs. the f32 HIGHEST-precision reference.
    assert jnp.allclose(logits, ref, atol=3e-2, rtol=3e-2), (logits, ref)

    print("KERNEL_OK")
</pallas_src>

<mosaic_0001>
module attributes {stable_mosaic.version = 11 : i64} {
  func.func @_lstm_chunk_kernel(%arg0: i32, %arg1: i32, %arg2: memref<16x16x512xbf16, #tpu.memory_space<vmem>>, %arg3: memref<128x512xbf16, #tpu.memory_space<vmem>>, %arg4: memref<16x128xf32, #tpu.memory_space<vmem>>, %arg5: memref<16x128xf32, #tpu.memory_space<vmem>>, %arg6: memref<16x128xf32, #tpu.memory_space<vmem>>) attributes {dimension_semantics = [#tpu.dimension_semantics<parallel>, #tpu.dimension_semantics<arbitrary>], iteration_bounds = array<i64: 1, 1>, scalar_prefetch = 0 : i64, scratch_operands = 2 : i64, tpu.core_type = #tpu.core_type<tc>, window_params = [{transform_indices = @transform_0, window_bounds = array<i64: 16, 16, 512>}, {pipeline_mode = #tpu.pipeline_mode<synchronous>, transform_indices = @transform_1, window_bounds = array<i64: 128, 512>}, {transform_indices = @transform_2, window_bounds = array<i64: 16, 128>}]} {
    %c0_i32 = arith.constant 0 : i32
    %0 = arith.cmpi eq, %arg1, %c0_i32 : i32
    %1 = arith.extui %0 : i1 to i32
    %c0_i32_0 = arith.constant 0 : i32
    %2 = arith.cmpi ne, %1, %c0_i32_0 : i32
    scf.if %2 {
      %cst_234 = arith.constant 0.000000e+00 : f32
      %635 = vector.broadcast %cst_234 : f32 to vector<16x128xf32>
      %c0_235 = arith.constant 0 : index
      %c0_236 = arith.constant 0 : index
      %636 = vector.load %arg5[%c0_235, %c0_236] : memref<16x128xf32, #tpu.memory_space<vmem>>, vector<16x128xf32>
      tpu.vector_store %arg5[%c0_235, %c0_236], %635 {strides = array<i32>} : memref<16x128xf32, #tpu.memory_space<vmem>>, vector<16x128xf32>,
      %cst_237 = arith.constant 0.000000e+00 : f32
      %637 = vector.broadcast %cst_237 : f32 to vector<16x128xf32>
      %c0_238 = arith.constant 0 : index
      %c0_239 = arith.constant 0 : index
      %638 = vector.load %arg6[%c0_238, %c0_239] : memref<16x128xf32, #tpu.memory_space<vmem>>, vector<16x128xf32>
      tpu.vector_store %arg6[%c0_238, %c0_239], %637 {strides = array<i32>} : memref<16x128xf32, #tpu.memory_space<vmem>>, vector<16x128xf32>,
    } else {
    }
    %c0 = arith.constant 0 : index
    %c0_1 = arith.constant 0 : index
    %3 = vector.load %arg5[%c0, %c0_1] : memref<16x128xf32, #tpu.memory_space<vmem>>, vector<16x128xf32>
    %c0_2 = arith.constant 0 : index
    %c0_3 = arith.constant 0 : index
    %4 = vector.load %arg6[%c0_2, %c0_3] : memref<16x128xf32, #tpu.memory_space<vmem>>, vector<16x128xf32>
    %5 = arith.truncf %3 : vector<16x128xf32> to vector<16x128xbf16>
    %c0_i32_4 = arith.constant 0 : i32
    %6 = arith.index_cast %c0_i32_4 : i32 to index
    %c0_5 = arith.constant 0 : index
    %c0_6 = arith.constant 0 : index
    %7 = vector.load %arg2[%6, %c0_5, %c0_6] : memref<16x16x512xbf16, #tpu.memory_space<vmem>>, vector<1x16x512xbf16>
    %8 = vector.shape_cast %7 : vector<1x16x512xbf16> to vector<16x512xbf16>
    %9 = arith.extf %8 : vector<16x512xbf16> to vector<16x512xf32>
    %c0_7 = arith.constant 0 : index
    %c0_8 = arith.constant 0 : index
    %10 = vector.load %arg3[%c0_7, %c0_8] : memref<128x512xbf16, #tpu.memory_space<vmem>>, vector<128x512xbf16>
    %cst = arith.constant dense<0.000000e+00> : vector<16x512xf32>
    %11 = tpu.matmul %5, %10, %cst {dimension_numbers = #tpu.dot_dimension_numbers<[1], [0], [0], [1], [0, 0, 1, 1], [], []>} : vector<16x128xbf16>, vector<128x512xbf16>, vector<16x512xf32> -> vector<16x512xf32>
    %12 = arith.addf %9, %11 : vector<16x512xf32>
    %13 = vector.extract_strided_slice %12 {offsets = [0, 0], sizes = [16, 128], strides = [1, 1]} : vector<16x512xf32> to vector<16x128xf32>
    %cst_9 = arith.constant 5.000000e-01 : f32
    %14 = vector.broadcast %cst_9 : f32 to vector<16x128xf32>
    %15 = arith.mulf %14, %13 : vector<16x128xf32>
    %16 = math.tanh %15 : vector<16x128xf32>
    %cst_10 = arith.constant 1.000000e+00 : f32
    %17 = vector.broadcast %cst_10 : f32 to vector<16x128xf32>
    %18 = arith.addf %17, %16 : vector<16x128xf32>
    %cst_11 = arith.constant 5.000000e-01 : f32
    %19 = vector.broadcast %cst_11 : f32 to vector<16x128xf32>
    %20 = arith.mulf %19, %18 : vector<16x128xf32>
    %21 = vector.extract_strided_slice %12 {offsets = [0, 128], sizes = [16, 128], strides = [1, 1]} : vector<16x512xf32> to vector<16x128xf32>
    %cst_12 = arith.constant 5.000000e-01 : f32
    %22 = vector.broadcast %cst_12 : f32 to vector<16x128xf32>
    %23 = arith.mulf %22, %21 : vector<16x128xf32>
    %24 = math.tanh %23 : vector<16x128xf32>
    %cst_13 = arith.constant 1.000000e+00 : f32
    %25 = vector.broadcast %cst_13 : f32 to vector<16x128xf32>
    %26 = arith.addf %25, %24 : vector<16x128xf32>
    %cst_14 = arith.constant 5.000000e-01 : f32
    %27 = vector.broadcast %cst_14 : f32 to vector<16x128xf32>
    %28 = arith.mulf %27, %26 : vector<16x128xf32>
    %29 = vector.extract_strided_slice %12 {offsets = [0, 256], sizes = [16, 128], strides = [1, 1]} : vector<16x512xf32> to vector<16x128xf32>
    %30 = math.tanh %29 : vector<16x128xf32>
    %31 = vector.extract_strided_slice %12 {offsets = [0, 384], sizes = [16, 128], strides = [1, 1]} : vector<16x512xf32> to vector<16x128xf32>
    %cst_15 = arith.constant 5.000000e-01 : f32
    %32 = vector.broadcast %cst_15 : f32 to vector<16x128xf32>
    %33 = arith.mulf %32, %31 : vector<16x128xf32>
    %34 = math.tanh %33 : vector<16x128xf32>
    %cst_16 = arith.constant 1.000000e+00 : f32
    %35 = vector.broadcast %cst_16 : f32 to vector<16x128xf32>
    %36 = arith.addf %35, %34 : vector<16x128xf32>
    %cst_17 = arith.constant 5.000000e-01 : f32
    %37 = vector.broadcast %cst_17 : f32 to vector<16x128xf32>
    %38 = arith.mulf %37, %36 : vector<16x128xf32>
    %39 = arith.mulf %28, %4 : vector<16x128xf32>
    %40 = arith.mulf %20, %30 : vector<16x128xf32>
    %41 = arith.addf %39, %40 : vector<16x128xf32>
    %42 = math.tanh %41 : vector<16x128xf32>
    %43 = arith.mulf %38, %42 : vector<16x128xf32>
    %44 = arith.truncf %43 : vector<16x128xf32> to vector<16x128xbf16>
    %c1_i32 = arith.constant 1 : i32
    %45 = arith.index_cast %c1_i32 : i32 to index
    %c0_18 = arith.constant 0 : index
    %c0_19 = arith.constant 0 : index
    %46 = vector.load %arg2[%45, %c0_18, %c0_19] : memref<16x16x512xbf16, #tpu.memory_space<vmem>>, vector<1x16x512xbf16>
    %47 = vector.shape_cast %46 : vector<1x16x512xbf16> to vector<16x512xbf16>
    %48 = arith.extf %47 : vector<16x512xbf16> to vector<16x512xf32>
    %c0_20 = arith.constant 0 : index
    %c0_21 = arith.constant 0 : index
    %49 = vector.load %arg3[%c0_20, %c0_21] : memref<128x512xbf16, #tpu.memory_space<vmem>>, vector<128x512xbf16>
    %cst_22 = arith.constant dense<0.000000e+00> : vector<16x512xf32>
    %50 = tpu.matmul %44, %49, %cst_22 {dimension_numbers = #tpu.dot_dimension_numbers<[1], [0], [0], [1], [0, 0, 1, 1], [], []>} : vector<16x128xbf16>, vector<128x512xbf16>, vector<16x512xf32> -> vector<16x512xf32>
    %51 = arith.addf %48, %50 : vector<16x512xf32>
    %52 = vector.extract_strided_slice %51 {offsets = [0, 0], sizes = [16, 128], strides = [1, 1]} : vector<16x512xf32> to vector<16x128xf32>
    %cst_23 = arith.constant 5.000000e-01 : f32
    %53 = vector.broadcast %cst_23 : f32 to vector<16x128xf32>
    %54 = arith.mulf %53, %52 : vector<16x128xf32>
    %55 = math.tanh %54 : vector<16x128xf32>
    %cst_24 = arith.constant 1.000000e+00 : f32
    %56 = vector.broadcast %cst_24 : f32 to vector<16x128xf32>
    %57 = arith.addf %56, %55 : vector<16x128xf32>
    %cst_25 = arith.constant 5.000000e-01 : f32
    %58 = vector.broadcast %cst_25 : f32 to vector<16x128xf32>
    %59 = arith.mulf %58, %57 : vector<16x128xf32>
    %60 = vector.extract_strided_slice %51 {offsets = [0, 128], sizes = [16, 128], strides = [1, 1]} : vector<16x512xf32> to vector<16x128xf32>
    %cst_26 = arith.constant 5.000000e-01 : f32
    %61 = vector.broadcast %cst_26 : f32 to vector<16x128xf32>
    %62 = arith.mulf %61, %60 : vector<16x128xf32>
    %63 = math.tanh %62 : vector<16x128xf32>
    %cst_27 = arith.constant 1.000000e+00 : f32
    %64 = vector.broadcast %cst_27 : f32 to vector<16x128xf32>
    %65 = arith.addf %64, %63 : vector<16x128xf32>
    %cst_28 = arith.constant 5.000000e-01 : f32
    %66 = vector.broadcast %cst_28 : f32 to vector<16x128xf32>
    %67 = arith.mulf %66, %65 : vector<16x128xf32>
    %68 = vector.extract_strided_slice %51 {offsets = [0, 256], sizes = [16, 128], strides = [1, 1]} : vector<16x512xf32> to vector<16x128xf32>
    %69 = math.tanh %68 : vector<16x128xf32>
    %70 = vector.extract_strided_slice %51 {offsets = [0, 384], sizes = [16, 128], strides = [1, 1]} : vector<16x512xf32> to vector<16x128xf32>
    %cst_29 = arith.constant 5.000000e-01 : f32
    %71 = vector.broadcast %cst_29 : f32 to vector<16x128xf32>
    %72 = arith.mulf %71, %70 : vector<16x128xf32>
    %73 = math.tanh %72 : vector<16x128xf32>
    %cst_30 = arith.constant 1.000000e+00 : f32
    %74 = vector.broadcast %cst_30 : f32 to vector<16x128xf32>
    %75 = arith.addf %74, %73 : vector<16x128xf32>
    %cst_31 = arith.constant 5.000000e-01 : f32
    %76 = vector.broadcast %cst_31 : f32 to vector<16x128xf32>
    %77 = arith.mulf %76, %75 : vector<16x128xf32>
    %78 = arith.mulf %67, %41 : vector<16x128xf32>
    %79 = arith.mulf %59, %69 : vector<16x128xf32>
    %80 = arith.addf %78, %79 : vector<16x128xf32>
    %81 = math.tanh %80 : vector<16x128xf32>
    %82 = arith.mulf %77, %81 : vector<16x128xf32>
    %83 = arith.truncf %82 : vector<16x128xf32> to vector<16x128xbf16>
    %c2_i32 = arith.constant 2 : i32
    %84 = arith.index_cast %c2_i32 : i32 to index
    %c0_32 = arith.constant 0 : index
    %c0_33 = arith.constant 0 : index
    %85 = vector.load %arg2[%84, %c0_32, %c0_33] : memref<16x16x512xbf16, #tpu.memory_space<vmem>>, vector<1x16x512xbf16>
    %86 = vector.shape_cast %85 : vector<1x16x512xbf16> to vector<16x512xbf16>
    %87 = arith.extf %86 : vector<16x512xbf16> to vector<16x512xf32>
    %c0_34 = arith.constant 0 : index
    %c0_35 = arith.constant 0 : index
    %88 = vector.load %arg3[%c0_34, %c0_35] : memref<128x512xbf16, #tpu.memory_space<vmem>>, vector<128x512xbf16>
    %cst_36 = arith.constant dense<0.000000e+00> : vector<16x512xf32>
    %89 = tpu.matmul %83, %88, %cst_36 {dimension_numbers = #tpu.dot_dimension_numbers<[1], [0], [0], [1], [0, 0, 1, 1], [], []>} : vector<16x128xbf16>, vector<128x512xbf16>, vector<16x512xf32> -> vector<16x512xf32>
    %90 = arith.addf %87, %89 : vector<16x512xf32>
    %91 = vector.extract_strided_slice %90 {offsets = [0, 0], sizes = [16, 128], strides = [1, 1]} : vector<16x512xf32> to vector<16x128xf32>
    %cst_37 = arith.constant 5.000000e-01 : f32
    %92 = vector.broadcast %cst_37 : f32 to vector<16x128xf32>
    %93 = arith.mulf %92, %91 : vector<16x128xf32>
    %94 = math.tanh %93 : vector<16x128xf32>
    %cst_38 = arith.constant 1.000000e+00 : f32
    %95 = vector.broadcast %cst_38 : f32 to vector<16x128xf32>
    %96 = arith.addf %95, %94 : vector<16x128xf32>
    %cst_39 = arith.constant 5.000000e-01 : f32
    %97 = vector.broadcast %cst_39 : f32 to vector<16x128xf32>
    %98 = arith.mulf %97, %96 : vector<16x128xf32>
    %99 = vector.extract_strided_slice %90 {offsets = [0, 128], sizes = [16, 128], strides = [1, 1]} : vector<16x512xf32> to vector<16x128xf32>
    %cst_40 = arith.constant 5.000000e-01 : f32
    %100 = vector.broadcast %cst_40 : f32 to vector<16x128xf32>
    %101 = arith.mulf %100, %99 : vector<16x128xf32>
    %102 = math.tanh %101 : vector<16x128xf32>
    %cst_41 = arith.constant 1.000000e+00 : f32
    %103 = vector.broadcast %cst_41 : f32 to vector<16x128xf32>
    %104 = arith.addf %103, %102 : vector<16x128xf32>
    %cst_42 = arith.constant 5.000000e-01 : f32
    %105 = vector.broadcast %cst_42 : f32 to vector<16x128xf32>
    %106 = arith.mulf %105, %104 : vector<16x128xf32>
    %107 = vector.extract_strided_slice %90 {offsets = [0, 256], sizes = [16, 128], strides = [1, 1]} : vector<16x512xf32> to vector<16x128xf32>
    %108 = math.tanh %107 : vector<16x128xf32>
    %109 = vector.extract_strided_slice %90 {offsets = [0, 384], sizes = [16, 128], strides = [1, 1]} : vector<16x512xf32> to vector<16x128xf32>
    %cst_43 = arith.constant 5.000000e-01 : f32
    %110 = vector.broadcast %cst_43 : f32 to vector<16x128xf32>
    %111 = arith.mulf %110, %109 : vector<16x128xf32>
    %112 = math.tanh %111 : vector<16x128xf32>
    %cst_44 = arith.constant 1.000000e+00 : f32
    %113 = vector.broadcast %cst_44 : f32 to vector<16x128xf32>
    %114 = arith.addf %113, %112 : vector<16x128xf32>
    %cst_45 = arith.constant 5.000000e-01 : f32
    %115 = vector.broadcast %cst_45 : f32 to vector<16x128xf32>
    %116 = arith.mulf %115, %114 : vector<16x128xf32>
    %117 = arith.mulf %106, %80 : vector<16x128xf32>
    %118 = arith.mulf %98, %108 : vector<16x128xf32>
    %119 = arith.addf %117, %118 : vector<16x128xf32>
    %120 = math.tanh %119 : vector<16x128xf32>
    %121 = arith.mulf %116, %120 : vector<16x128xf32>
    %122 = arith.truncf %121 : vector<16x128xf32> to vector<16x128xbf16>
    %c3_i32 = arith.constant 3 : i32
    %123 = arith.index_cast %c3_i32 : i32 to index
    %c0_46 = arith.constant 0 : index
    %c0_47 = arith.constant 0 : index
    %124 = vector.load %arg2[%123, %c0_46, %c0_47] : memref<16x16x512xbf16, #tpu.memory_space<vmem>>, vector<1x16x512xbf16>
    %125 = vector.shape_cast %124 : vector<1x16x512xbf16> to vector<16x512xbf16>
    %126 = arith.extf %125 : vector<16x512xbf16> to vector<16x512xf32>
    %c0_48 = arith.constant 0 : index
    %c0_49 = arith.constant 0 : index
    %127 = vector.load %arg3[%c0_48, %c0_49] : memref<128x512xbf16, #tpu.memory_space<vmem>>, vector<128x512xbf16>
    %cst_50 = arith.constant dense<0.000000e+00> : vector<16x512xf32>
    %128 = tpu.matmul %122, %127, %cst_50 {dimension_numbers = #tpu.dot_dimension_numbers<[1], [0], [0], [1], [0, 0, 1, 1], [], []>} : vector<16x128xbf16>, vector<128x512xbf16>, vector<16x512xf32> -> vector<16x512xf32>
    %129 = arith.addf %126, %128 : vector<16x512xf32>
    %130 = vector.extract_strided_slice %129 {offsets = [0, 0], sizes = [16, 128], strides = [1, 1]} : vector<16x512xf32> to vector<16x128xf32>
    %cst_51 = arith.constant 5.000000e-01 : f32
    %131 = vector.broadcast %cst_51 : f32 to vector<16x128xf32>
    %132 = arith.mulf %131, %130 : vector<16x128xf32>
    %133 = math.tanh %132 : vector<16x128xf32>
    %cst_52 = arith.constant 1.000000e+00 : f32
    %134 = vector.broadcast %cst_52 : f32 to vector<16x128xf32>
    %135 = arith.addf %134, %133 : vector<16x128xf32>
    %cst_53 = arith.constant 5.000000e-01 : f32
    %136 = vector.broadcast %cst_53 : f32 to vector<16x128xf32>
    %137 = arith.mulf %136, %135 : vector<16x128xf32>
    %138 = vector.extract_strided_slice %129 {offsets = [0, 128], sizes = [16, 128], strides = [1, 1]} : vector<16x512xf32> to vector<16x128xf32>
    %cst_54 = arith.constant 5.000000e-01 : f32
    %139 = vector.broadcast %cst_54 : f32 to vector<16x128xf32>
    %140 = arith.mulf %139, %138 : vector<16x128xf32>
    %141 = math.tanh %140 : vector<16x128xf32>
    %cst_55 = arith.constant 1.000000e+00 : f32
    %142 = vector.broadcast %cst_55 : f32 to vector<16x128xf32>
    %143 = arith.addf %142, %141 : vector<16x128xf32>
    %cst_56 = arith.constant 5.000000e-01 : f32
    %144 = vector.broadcast %cst_56 : f32 to vector<16x128xf32>
    %145 = arith.mulf %144, %143 : vector<16x128xf32>
    %146 = vector.extract_strided_slice %129 {offsets = [0, 256], sizes = [16, 128], strides = [1, 1]} : vector<16x512xf32> to vector<16x128xf32>
    %147 = math.tanh %146 : vector<16x128xf32>
    %148 = vector.extract_strided_slice %129 {offsets = [0, 384], sizes = [16, 128], strides = [1, 1]} : vector<16x512xf32> to vector<16x128xf32>
    %cst_57 = arith.constant 5.000000e-01 : f32
    %149 = vector.broadcast %cst_57 : f32 to vector<16x128xf32>
    %150 = arith.mulf %149, %148 : vector<16x128xf32>
    %151 = math.tanh %150 : vector<16x128xf32>
    %cst_58 = arith.constant 1.000000e+00 : f32
    %152 = vector.broadcast %cst_58 : f32 to vector<16x128xf32>
    %153 = arith.addf %152, %151 : vector<16x128xf32>
    %cst_59 = arith.constant 5.000000e-01 : f32
    %154 = vector.broadcast %cst_59 : f32 to vector<16x128xf32>
    %155 = arith.mulf %154, %153 : vector<16x128xf32>
    %156 = arith.mulf %145, %119 : vector<16x128xf32>
    %157 = arith.mulf %137, %147 : vector<16x128xf32>
    %158 = arith.addf %156, %157 : vector<16x128xf32>
    %159 = math.tanh %158 : vector<16x128xf32>
    %160 = arith.mulf %155, %159 : vector<16x128xf32>
    %161 = arith.truncf %160 : vector<16x128xf32> to vector<16x128xbf16>
    %c4_i32 = arith.constant 4 : i32
    %162 = arith.index_cast %c4_i32 : i32 to index
    %c0_60 = arith.constant 0 : index
    %c0_61 = arith.constant 0 : index
    %163 = vector.load %arg2[%162, %c0_60, %c0_61] : memref<16x16x512xbf16, #tpu.memory_space<vmem>>, vector<1x16x512xbf16>
    %164 = vector.shape_cast %163 : vector<1x16x512xbf16> to vector<16x512xbf16>
    %165 = arith.extf %164 : vector<16x512xbf16> to vector<16x512xf32>
    %c0_62 = arith.constant 0 : index
    %c0_63 = arith.constant 0 : index
    %166 = vector.load %arg3[%c0_62, %c0_63] : memref<128x512xbf16, #tpu.memory_space<vmem>>, vector<128x512xbf16>
    %cst_64 = arith.constant dense<0.000000e+00> : vector<16x512xf32>
    %167 = tpu.matmul %161, %166, %cst_64 {dimension_numbers = #tpu.dot_dimension_numbers<[1], [0], [0], [1], [0, 0, 1, 1], [], []>} : vector<16x128xbf16>, vector<128x512xbf16>, vector<16x512xf32> -> vector<16x512xf32>
    %168 = arith.addf %165, %167 : vector<16x512xf32>
    %169 = vector.extract_strided_slice %168 {offsets = [0, 0], sizes = [16, 128], strides = [1, 1]} : vector<16x512xf32> to vector<16x128xf32>
    %cst_65 = arith.constant 5.000000e-01 : f32
    %170 = vector.broadcast %cst_65 : f32 to vector<16x128xf32>
    %171 = arith.mulf %170, %169 : vector<16x128xf32>
    %172 = math.tanh %171 : vector<16x128xf32>
    %cst_66 = arith.constant 1.000000e+00 : f32
    %173 = vector.broadcast %cst_66 : f32 to vector<16x128xf32>
    %174 = arith.addf %173, %172 : vector<16x128xf32>
    %cst_67 = arith.constant 5.000000e-01 : f32
    %175 = vector.broadcast %cst_67 : f32 to vector<16x128xf32>
    %176 = arith.mulf %175, %174 : vector<16x128xf32>
    %177 = vector.extract_strided_slice %168 {offsets = [0, 128], sizes = [16, 128], strides = [1, 1]} : vector<16x512xf32> to vector<16x128xf32>
    %cst_68 = arith.constant 5.000000e-01 : f32
    %178 = vector.broadcast %cst_68 : f32 to vector<16x128xf32>
    %179 = arith.mulf %178, %177 : vector<16x128xf32>
    %180 = math.tanh %179 : vector<16x128xf32>
    %cst_69 = arith.constant 1.000000e+00 : f32
    %181 = vector.broadcast %cst_69 : f32 to vector<16x128xf32>
    %182 = arith.addf %181, %180 : vector<16x128xf32>
    %cst_70 = arith.constant 5.000000e-01 : f32
    %183 = vector.broadcast %cst_70 : f32 to vector<16x128xf32>
    %184 = arith.mulf %183, %182 : vector<16x128xf32>
    %185 = vector.extract_strided_slice %168 {offsets = [0, 256], sizes = [16, 128], strides = [1, 1]} : vector<16x512xf32> to vector<16x128xf32>
    %186 = math.tanh %185 : vector<16x128xf32>
    %187 = vector.extract_strided_slice %168 {offsets = [0, 384], sizes = [16, 128], strides = [1, 1]} : vector<16x512xf32> to vector<16x128xf32>
    %cst_71 = arith.constant 5.000000e-01 : f32
    %188 = vector.broadcast %cst_71 : f32 to vector<16x128xf32>
    %189 = arith.mulf %188, %187 : vector<16x128xf32>
    %190 = math.tanh %189 : vector<16x128xf32>
    %cst_72 = arith.constant 1.000000e+00 : f32
    %191 = vector.broadcast %cst_72 : f32 to vector<16x128xf32>
    %192 = arith.addf %191, %190 : vector<16x128xf32>
    %cst_73 = arith.constant 5.000000e-01 : f32
    %193 = vector.broadcast %cst_73 : f32 to vector<16x128xf32>
    %194 = arith.mulf %193, %192 : vector<16x128xf32>
    %195 = arith.mulf %184, %158 : vector<16x128xf32>
    %196 = arith.mulf %176, %186 : vector<16x128xf32>
    %197 = arith.addf %195, %196 : vector<16x128xf32>
    %198 = math.tanh %197 : vector<16x128xf32>
    %199 = arith.mulf %194, %198 : vector<16x128xf32>
    %200 = arith.truncf %199 : vector<16x128xf32> to vector<16x128xbf16>
    %c5_i32 = arith.constant 5 : i32
    %201 = arith.index_cast %c5_i32 : i32 to index
    %c0_74 = arith.constant 0 : index
    %c0_75 = arith.constant 0 : index
    %202 = vector.load %arg2[%201, %c0_74, %c0_75] : memref<16x16x512xbf16, #tpu.memory_space<vmem>>, vector<1x16x512xbf16>
    %203 = vector.shape_cast %202 : vector<1x16x512xbf16> to vector<16x512xbf16>
    %204 = arith.extf %203 : vector<16x512xbf16> to vector<16x512xf32>
    %c0_76 = arith.constant 0 : index
    %c0_77 = arith.constant 0 : index
    %205 = vector.load %arg3[%c0_76, %c0_77] : memref<128x512xbf16, #tpu.memory_space<vmem>>, vector<128x512xbf16>
    %cst_78 = arith.constant dense<0.000000e+00> : vector<16x512xf32>
    %206 = tpu.matmul %200, %205, %cst_78 {dimension_numbers = #tpu.dot_dimension_numbers<[1], [0], [0], [1], [0, 0, 1, 1], [], []>} : vector<16x128xbf16>, vector<128x512xbf16>, vector<16x512xf32> -> vector<16x512xf32>
    %207 = arith.addf %204, %206 : vector<16x512xf32>
    %208 = vector.extract_strided_slice %207 {offsets = [0, 0], sizes = [16, 128], strides = [1, 1]} : vector<16x512xf32> to vector<16x128xf32>
    %cst_79 = arith.constant 5.000000e-01 : f32
    %209 = vector.broadcast %cst_79 : f32 to vector<16x128xf32>
    %210 = arith.mulf %209, %208 : vector<16x128xf32>
    %211 = math.tanh %210 : vector<16x128xf32>
    %cst_80 = arith.constant 1.000000e+00 : f32
    %212 = vector.broadcast %cst_80 : f32 to vector<16x128xf32>
    %213 = arith.addf %212, %211 : vector<16x128xf32>
    %cst_81 = arith.constant 5.000000e-01 : f32
    %214 = vector.broadcast %cst_81 : f32 to vector<16x128xf32>
    %215 = arith.mulf %214, %213 : vector<16x128xf32>
    %216 = vector.extract_strided_slice %207 {offsets = [0, 128], sizes = [16, 128], strides = [1, 1]} : vector<16x512xf32> to vector<16x128xf32>
    %cst_82 = arith.constant 5.000000e-01 : f32
    %217 = vector.broadcast %cst_82 : f32 to vector<16x128xf32>
    %218 = arith.mulf %217, %216 : vector<16x128xf32>
    %219 = math.tanh %218 : vector<16x128xf32>
    %cst_83 = arith.constant 1.000000e+00 : f32
    %220 = vector.broadcast %cst_83 : f32 to vector<16x128xf32>
    %221 = arith.addf %220, %219 : vector<16x128xf32>
    %cst_84 = arith.constant 5.000000e-01 : f32
    %222 = vector.broadcast %cst_84 : f32 to vector<16x128xf32>
    %223 = arith.mulf %222, %221 : vector<16x128xf32>
    %224 = vector.extract_strided_slice %207 {offsets = [0, 256], sizes = [16, 128], strides = [1, 1]} : vector<16x512xf32> to vector<16x128xf32>
    %225 = math.tanh %224 : vector<16x128xf32>
    %226 = vector.extract_strided_slice %207 {offsets = [0, 384], sizes = [16, 128], strides = [1, 1]} : vector<16x512xf32> to vector<16x128xf32>
    %cst_85 = arith.constant 5.000000e-01 : f32
    %227 = vector.broadcast %cst_85 : f32 to vector<16x128xf32>
    %228 = arith.mulf %227, %226 : vector<16x128xf32>
    %229 = math.tanh %228 : vector<16x128xf32>
    %cst_86 = arith.constant 1.000000e+00 : f32
    %230 = vector.broadcast %cst_86 : f32 to vector<16x128xf32>
    %231 = arith.addf %230, %229 : vector<16x128xf32>
    %cst_87 = arith.constant 5.000000e-01 : f32
    %232 = vector.broadcast %cst_87 : f32 to vector<16x128xf32>
    %233 = arith.mulf %232, %231 : vector<16x128xf32>
    %234 = arith.mulf %223, %197 : vector<16x128xf32>
    %235 = arith.mulf %215, %225 : vector<16x128xf32>
    %236 = arith.addf %234, %235 : vector<16x128xf32>
    %237 = math.tanh %236 : vector<16x128xf32>
    %238 = arith.mulf %233, %237 : vector<16x128xf32>
    %239 = arith.truncf %238 : vector<16x128xf32> to vector<16x128xbf16>
    %c6_i32 = arith.constant 6 : i32
    %240 = arith.index_cast %c6_i32 : i32 to index
    %c0_88 = arith.constant 0 : index
    %c0_89 = arith.constant 0 : index
    %241 = vector.load %arg2[%240, %c0_88, %c0_89] : memref<16x16x512xbf16, #tpu.memory_space<vmem>>, vector<1x16x512xbf16>
    %242 = vector.shape_cast %241 : vector<1x16x512xbf16> to vector<16x512xbf16>
    %243 = arith.extf %242 : vector<16x512xbf16> to vector<16x512xf32>
    %c0_90 = arith.constant 0 : index
    %c0_91 = arith.constant 0 : index
    %244 = vector.load %arg3[%c0_90, %c0_91] : memref<128x512xbf16, #tpu.memory_space<vmem>>, vector<128x512xbf16>
    %cst_92 = arith.constant dense<0.000000e+00> : vector<16x512xf32>
    %245 = tpu.matmul %239, %244, %cst_92 {dimension_numbers = #tpu.dot_dimension_numbers<[1], [0], [0], [1], [0, 0, 1, 1], [], []>} : vector<16x128xbf16>, vector<128x512xbf16>, vector<16x512xf32> -> vector<16x512xf32>
    %246 = arith.addf %243, %245 : vector<16x512xf32>
    %247 = vector.extract_strided_slice %246 {offsets = [0, 0], sizes = [16, 128], strides = [1, 1]} : vector<16x512xf32> to vector<16x128xf32>
    %cst_93 = arith.constant 5.000000e-01 : f32
    %248 = vector.broadcast %cst_93 : f32 to vector<16x128xf32>
    %249 = arith.mulf %248, %247 : vector<16x128xf32>
    %250 = math.tanh %249 : vector<16x128xf32>
    %cst_94 = arith.constant 1.000000e+00 : f32
    %251 = vector.broadcast %cst_94 : f32 to vector<16x128xf32>
    %252 = arith.addf %251, %250 : vector<16x128xf32>
    %cst_95 = arith.constant 5.000000e-01 : f32
    %253 = vector.broadcast %cst_95 : f32 to vector<16x128xf32>
    %254 = arith.mulf %253, %252 : vector<16x128xf32>
    %255 = vector.extract_strided_slice %246 {offsets = [0, 128], sizes = [16, 128], strides = [1, 1]} : vector<16x512xf32> to vector<16x128xf32>
    %cst_96 = arith.constant 5.000000e-01 : f32
    %256 = vector.broadcast %cst_96 : f32 to vector<16x128xf32>
    %257 = arith.mulf %256, %255 : vector<16x128xf32>
    %258 = math.tanh %257 : vector<16x128xf32>
    %cst_97 = arith.constant 1.000000e+00 : f32
    %259 = vector.broadcast %cst_97 : f32 to vector<16x128xf32>
    %260 = arith.addf %259, %258 : vector<16x128xf32>
    %cst_98 = arith.constant 5.000000e-01 : f32
    %261 = vector.broadcast %cst_98 : f32 to vector<16x128xf32>
    %262 = arith.mulf %261, %260 : vector<16x128xf32>
    %263 = vector.extract_strided_slice %246 {offsets = [0, 256], sizes = [16, 128], strides = [1, 1]} : vector<16x512xf32> to vector<16x128xf32>
    %264 = math.tanh %263 : vector<16x128xf32>
    %265 = vector.extract_strided_slice %246 {offsets = [0, 384], sizes = [16, 128], strides = [1, 1]} : vector<16x512xf32> to vector<16x128xf32>
    %cst_99 = arith.constant 5.000000e-01 : f32
    %266 = vector.broadcast %cst_99 : f32 to vector<16x128xf32>
    %267 = arith.mulf %266, %265 : vector<16x128xf32>
    %268 = math.tanh %267 : vector<16x128xf32>
    %cst_100 = arith.constant 1.000000e+00 : f32
    %269 = vector.broadcast %cst_100 : f32 to vector<16x128xf32>
    %270 = arith.addf %269, %268 : vector<16x128xf32>
    %cst_101 = arith.constant 5.000000e-01 : f32
    %271 = vector.broadcast %cst_101 : f32 to vector<16x128xf32>
    %272 = arith.mulf %271, %270 : vector<16x128xf32>
    %273 = arith.mulf %262, %236 : vector<16x128xf32>
    %274 = arith.mulf %254, %264 : vector<16x128xf32>
    %275 = arith.addf %273, %274 : vector<16x128xf32>
    %276 = math.tanh %275 : vector<16x128xf32>
    %277 = arith.mulf %272, %276 : vector<16x128xf32>
    %278 = arith.truncf %277 : vector<16x128xf32> to vector<16x128xbf16>
    %c7_i32 = arith.constant 7 : i32
    %279 = arith.index_cast %c7_i32 : i32 to index
    %c0_102 = arith.constant 0 : index
    %c0_103 = arith.constant 0 : index
    %280 = vector.load %arg2[%279, %c0_102, %c0_103] : memref<16x16x512xbf16, #tpu.memory_space<vmem>>, vector<1x16x512xbf16>
    %281 = vector.shape_cast %280 : vector<1x16x512xbf16> to vector<16x512xbf16>
    %282 = arith.extf %281 : vector<16x512xbf16> to vector<16x512xf32>
    %c0_104 = arith.constant 0 : index
    %c0_105 = arith.constant 0 : index
    %283 = vector.load %arg3[%c0_104, %c0_105] : memref<128x512xbf16, #tpu.memory_space<vmem>>, vector<128x512xbf16>
    %cst_106 = arith.constant dense<0.000000e+00> : vector<16x512xf32>
    %284 = tpu.matmul %278, %283, %cst_106 {dimension_numbers = #tpu.dot_dimension_numbers<[1], [0], [0], [1], [0, 0, 1, 1], [], []>} : vector<16x128xbf16>, vector<128x512xbf16>, vector<16x512xf32> -> vector<16x512xf32>
    %285 = arith.addf %282, %284 : vector<16x512xf32>
    %286 = vector.extract_strided_slice %285 {offsets = [0, 0], sizes = [16, 128], strides = [1, 1]} : vector<16x512xf32> to vector<16x128xf32>
    %cst_107 = arith.constant 5.000000e-01 : f32
    %287 = vector.broadcast %cst_107 : f32 to vector<16x128xf32>
    %288 = arith.mulf %287, %286 : vector<16x128xf32>
    %289 = math.tanh %288 : vector<16x128xf32>
    %cst_108 = arith.constant 1.000000e+00 : f32
    %290 = vector.broadcast %cst_108 : f32 to vector<16x128xf32>
    %291 = arith.addf %290, %289 : vector<16x128xf32>
    %cst_109 = arith.constant 5.000000e-01 : f32
    %292 = vector.broadcast %cst_109 : f32 to vector<16x128xf32>
    %293 = arith.mulf %292, %291 : vector<16x128xf32>
    %294 = vector.extract_strided_slice %285 {offsets = [0, 128], sizes = [16, 128], strides = [1, 1]} : vector<16x512xf32> to vector<16x128xf32>
    %cst_110 = arith.constant 5.000000e-01 : f32
    %295 = vector.broadcast %cst_110 : f32 to vector<16x128xf32>
    %296 = arith.mulf %295, %294 : vector<16x128xf32>
    %297 = math.tanh %296 : vector<16x128xf32>
    %cst_111 = arith.constant 1.000000e+00 : f32
    %298 = vector.broadcast %cst_111 : f32 to vector<16x128xf32>
    %299 = arith.addf %298, %297 : vector<16x128xf32>
    %cst_112 = arith.constant 5.000000e-01 : f32
    %300 = vector.broadcast %cst_112 : f32 to vector<16x128xf32>
    %301 = arith.mulf %300, %299 : vector<16x128xf32>
    %302 = vector.extract_strided_slice %285 {offsets = [0, 256], sizes = [16, 128], strides = [1, 1]} : vector<16x512xf32> to vector<16x128xf32>
    %303 = math.tanh %302 : vector<16x128xf32>
    %304 = vector.extract_strided_slice %285 {offsets = [0, 384], sizes = [16, 128], strides = [1, 1]} : vector<16x512xf32> to vector<16x128xf32>
    %cst_113 = arith.constant 5.000000e-01 : f32
    %305 = vector.broadcast %cst_113 : f32 to vector<16x128xf32>
    %306 = arith.mulf %305, %304 : vector<16x128xf32>
    %307 = math.tanh %306 : vector<16x128xf32>
    %cst_114 = arith.constant 1.000000e+00 : f32
    %308 = vector.broadcast %cst_114 : f32 to vector<16x128xf32>
    %309 = arith.addf %308, %307 : vector<16x128xf32>
    %cst_115 = arith.constant 5.000000e-01 : f32
    %310 = vector.broadcast %cst_115 : f32 to vector<16x128xf32>
    %311 = arith.mulf %310, %309 : vector<16x128xf32>
    %312 = arith.mulf %301, %275 : vector<16x128xf32>
    %313 = arith.mulf %293, %303 : vector<16x128xf32>
    %314 = arith.addf %312, %313 : vector<16x128xf32>
    %315 = math.tanh %314 : vector<16x128xf32>
    %316 = arith.mulf %311, %315 : vector<16x128xf32>
    %317 = arith.truncf %316 : vector<16x128xf32> to vector<16x128xbf16>
    %c8_i32 = arith.constant 8 : i32
    %318 = arith.index_cast %c8_i32 : i32 to index
    %c0_116 = arith.constant 0 : index
    %c0_117 = arith.constant 0 : index
    %319 = vector.load %arg2[%318, %c0_116, %c0_117] : memref<16x16x512xbf16, #tpu.memory_space<vmem>>, vector<1x16x512xbf16>
    %320 = vector.shape_cast %319 : vector<1x16x512xbf16> to vector<16x512xbf16>
    %321 = arith.extf %320 : vector<16x512xbf16> to vector<16x512xf32>
    %c0_118 = arith.constant 0 : index
    %c0_119 = arith.constant 0 : index
    %322 = vector.load %arg3[%c0_118, %c0_119] : memref<128x512xbf16, #tpu.memory_space<vmem>>, vector<128x512xbf16>
    %cst_120 = arith.constant dense<0.000000e+00> : vector<16x512xf32>
    %323 = tpu.matmul %317, %322, %cst_120 {dimension_numbers = #tpu.dot_dimension_numbers<[1], [0], [0], [1], [0, 0, 1, 1], [], []>} : vector<16x128xbf16>, vector<128x512xbf16>, vector<16x512xf32> -> vector<16x512xf32>
    %324 = arith.addf %321, %323 : vector<16x512xf32>
    %325 = vector.extract_strided_slice %324 {offsets = [0, 0], sizes = [16, 128], strides = [1, 1]} : vector<16x512xf32> to vector<16x128xf32>
    %cst_121 = arith.constant 5.000000e-01 : f32
    %326 = vector.broadcast %cst_121 : f32 to vector<16x128xf32>
    %327 = arith.mulf %326, %325 : vector<16x128xf32>
    %328 = math.tanh %327 : vector<16x128xf32>
    %cst_122 = arith.constant 1.000000e+00 : f32
    %329 = vector.broadcast %cst_122 : f32 to vector<16x128xf32>
    %330 = arith.addf %329, %328 : vector<16x128xf32>
    %cst_123 = arith.constant 5.000000e-01 : f32
    %331 = vector.broadcast %cst_123 : f32 to vector<16x128xf32>
    %332 = arith.mulf %331, %330 : vector<16x128xf32>
    %333 = vector.extract_strided_slice %324 {offsets = [0, 128], sizes = [16, 128], strides = [1, 1]} : vector<16x512xf32> to vector<16x128xf32>
    %cst_124 = arith.constant 5.000000e-01 : f32
    %334 = vector.broadcast %cst_124 : f32 to vector<16x128xf32>
    %335 = arith.mulf %334, %333 : vector<16x128xf32>
    %336 = math.tanh %335 : vector<16x128xf32>
    %cst_125 = arith.constant 1.000000e+00 : f32
    %337 = vector.broadcast %cst_125 : f32 to vector<16x128xf32>
    %338 = arith.addf %337, %336 : vector<16x128xf32>
    %cst_126 = arith.constant 5.000000e-01 : f32
    %339 = vector.broadcast %cst_126 : f32 to vector<16x128xf32>
    %340 = arith.mulf %339, %338 : vector<16x128xf32>
    %341 = vector.extract_strided_slice %324 {offsets = [0, 256], sizes = [16, 128], strides = [1, 1]} : vector<16x512xf32> to vector<16x128xf32>
    %342 = math.tanh %341 : vector<16x128xf32>
    %343 = vector.extract_strided_slice %324 {offsets = [0, 384], sizes = [16, 128], strides = [1, 1]} : vector<16x512xf32> to vector<16x128xf32>
    %cst_127 = arith.constant 5.000000e-01 : f32
    %344 = vector.broadcast %cst_127 : f32 to vector<16x128xf32>
    %345 = arith.mulf %344, %343 : vector<16x128xf32>
    %346 = math.tanh %345 : vector<16x128xf32>
    %cst_128 = arith.constant 1.000000e+00 : f32
    %347 = vector.broadcast %cst_128 : f32 to vector<16x128xf32>
    %348 = arith.addf %347, %346 : vector<16x128xf32>
    %cst_129 = arith.constant 5.000000e-01 : f32
    %349 = vector.broadcast %cst_129 : f32 to vector<16x128xf32>
    %350 = arith.mulf %349, %348 : vector<16x128xf32>
    %351 = arith.mulf %340, %314 : vector<16x128xf32>
    %352 = arith.mulf %332, %342 : vector<16x128xf32>
    %353 = arith.addf %351, %352 : vector<16x128xf32>
    %354 = math.tanh %353 : vector<16x128xf32>
    %355 = arith.mulf %350, %354 : vector<16x128xf32>
    %356 = arith.truncf %355 : vector<16x128xf32> to vector<16x128xbf16>
    %c9_i32 = arith.constant 9 : i32
    %357 = arith.index_cast %c9_i32 : i32 to index
    %c0_130 = arith.constant 0 : index
    %c0_131 = arith.constant 0 : index
    %358 = vector.load %arg2[%357, %c0_130, %c0_131] : memref<16x16x512xbf16, #tpu.memory_space<vmem>>, vector<1x16x512xbf16>
    %359 = vector.shape_cast %358 : vector<1x16x512xbf16> to vector<16x512xbf16>
    %360 = arith.extf %359 : vector<16x512xbf16> to vector<16x512xf32>
    %c0_132 = arith.constant 0 : index
    %c0_133 = arith.constant 0 : index
    %361 = vector.load %arg3[%c0_132, %c0_133] : memref<128x512xbf16, #tpu.memory_space<vmem>>, vector<128x512xbf16>
    %cst_134 = arith.constant dense<0.000000e+00> : vector<16x512xf32>
    %362 = tpu.matmul %356, %361, %cst_134 {dimension_numbers = #tpu.dot_dimension_numbers<[1], [0], [0], [1], [0, 0, 1, 1], [], []>} : vector<16x128xbf16>, vector<128x512xbf16>, vector<16x512xf32> -> vector<16x512xf32>
    %363 = arith.addf %360, %362 : vector<16x512xf32>
    %364 = vector.extract_strided_slice %363 {offsets = [0, 0], sizes = [16, 128], strides = [1, 1]} : vector<16x512xf32> to vector<16x128xf32>
    %cst_135 = arith.constant 5.000000e-01 : f32
    %365 = vector.broadcast %cst_135 : f32 to vector<16x128xf32>
    %366 = arith.mulf %365, %364 : vector<16x128xf32>
    %367 = math.tanh %366 : vector<16x128xf32>
    %cst_136 = arith.constant 1.000000e+00 : f32
    %368 = vector.broadcast %cst_136 : f32 to vector<16x128xf32>
    %369 = arith.addf %368, %367 : vector<16x128xf32>
    %cst_137 = arith.constant 5.000000e-01 : f32
    %370 = vector.broadcast %cst_137 : f32 to vector<16x128xf32>
    %371 = arith.mulf %370, %369 : vector<16x128xf32>
    %372 = vector.extract_strided_slice %363 {offsets = [0, 128], sizes = [16, 128], strides = [1, 1]} : vector<16x512xf32> to vector<16x128xf32>
    %cst_138 = arith.constant 5.000000e-01 : f32
    %373 = vector.broadcast %cst_138 : f32 to vector<16x128xf32>
    %374 = arith.mulf %373, %372 : vector<16x128xf32>
    %375 = math.tanh %374 : vector<16x128xf32>
    %cst_139 = arith.constant 1.000000e+00 : f32
    %376 = vector.broadcast %cst_139 : f32 to vector<16x128xf32>
    %377 = arith.addf %376, %375 : vector<16x128xf32>
    %cst_140 = arith.constant 5.000000e-01 : f32
    %378 = vector.broadcast %cst_140 : f32 to vector<16x128xf32>
    %379 = arith.mulf %378, %377 : vector<16x128xf32>
    %380 = vector.extract_strided_slice %363 {offsets = [0, 256], sizes = [16, 128], strides = [1, 1]} : vector<16x512xf32> to vector<16x128xf32>
    %381 = math.tanh %380 : vector<16x128xf32>
    %382 = vector.extract_strided_slice %363 {offsets = [0, 384], sizes = [16, 128], strides = [1, 1]} : vector<16x512xf32> to vector<16x128xf32>
    %cst_141 = arith.constant 5.000000e-01 : f32
    %383 = vector.broadcast %cst_141 : f32 to vector<16x128xf32>
    %384 = arith.mulf %383, %382 : vector<16x128xf32>
    %385 = math.tanh %384 : vector<16x128xf32>
    %cst_142 = arith.constant 1.000000e+00 : f32
    %386 = vector.broadcast %cst_142 : f32 to vector<16x128xf32>
    %387 = arith.addf %386, %385 : vector<16x128xf32>
    %cst_143 = arith.constant 5.000000e-01 : f32
    %388 = vector.broadcast %cst_143 : f32 to vector<16x128xf32>
    %389 = arith.mulf %388, %387 : vector<16x128xf32>
    %390 = arith.mulf %379, %353 : vector<16x128xf32>
    %391 = arith.mulf %371, %381 : vector<16x128xf32>
    %392 = arith.addf %390, %391 : vector<16x128xf32>
    %393 = math.tanh %392 : vector<16x128xf32>
    %394 = arith.mulf %389, %393 : vector<16x128xf32>
    %395 = arith.truncf %394 : vector<16x128xf32> to vector<16x128xbf16>
    %c10_i32 = arith.constant 10 : i32
    %396 = arith.index_cast %c10_i32 : i32 to index
    %c0_144 = arith.constant 0 : index
    %c0_145 = arith.constant 0 : index
    %397 = vector.load %arg2[%396, %c0_144, %c0_145] : memref<16x16x512xbf16, #tpu.memory_space<vmem>>, vector<1x16x512xbf16>
    %398 = vector.shape_cast %397 : vector<1x16x512xbf16> to vector<16x512xbf16>
    %399 = arith.extf %398 : vector<16x512xbf16> to vector<16x512xf32>
    %c0_146 = arith.constant 0 : index
    %c0_147 = arith.constant 0 : index
    %400 = vector.load %arg3[%c0_146, %c0_147] : memref<128x512xbf16, #tpu.memory_space<vmem>>, vector<128x512xbf16>
    %cst_148 = arith.constant dense<0.000000e+00> : vector<16x512xf32>
    %401 = tpu.matmul %395, %400, %cst_148 {dimension_numbers = #tpu.dot_dimension_numbers<[1], [0], [0], [1], [0, 0, 1, 1], [], []>} : vector<16x128xbf16>, vector<128x512xbf16>, vector<16x512xf32> -> vector<16x512xf32>
    %402 = arith.addf %399, %401 : vector<16x512xf32>
    %403 = vector.extract_strided_slice %402 {offsets = [0, 0], sizes = [16, 128], strides = [1, 1]} : vector<16x512xf32> to vector<16x128xf32>
    %cst_149 = arith.constant 5.000000e-01 : f32
    %404 = vector.broadcast %cst_149 : f32 to vector<16x128xf32>
    %405 = arith.mulf %404, %403 : vector<16x128xf32>
    %406 = math.tanh %405 : vector<16x128xf32>
    %cst_150 = arith.constant 1.000000e+00 : f32
    %407 = vector.broadcast %cst_150 : f32 to vector<16x128xf32>
    %408 = arith.addf %407, %406 : vector<16x128xf32>
    %cst_151 = arith.constant 5.000000e-01 : f32
    %409 = vector.broadcast %cst_151 : f32 to vector<16x128xf32>
    %410 = arith.mulf %409, %408 : vector<16x128xf32>
    %411 = vector.extract_strided_slice %402 {offsets = [0, 128], sizes = [16, 128], strides = [1, 1]} : vector<16x512xf32> to vector<16x128xf32>
    %cst_152 = arith.constant 5.000000e-01 : f32
    %412 = vector.broadcast %cst_152 : f32 to vector<16x128xf32>
    %413 = arith.mulf %412, %411 : vector<16x128xf32>
    %414 = math.tanh %413 : vector<16x128xf32>
    %cst_153 = arith.constant 1.000000e+00 : f32
    %415 = vector.broadcast %cst_153 : f32 to vector<16x128xf32>
    %416 = arith.addf %415, %414 : vector<16x128xf32>
    %cst_154 = arith.constant 5.000000e-01 : f32
    %417 = vector.broadcast %cst_154 : f32 to vector<16x128xf32>
    %418 = arith.mulf %417, %416 : vector<16x128xf32>
    %419 = vector.extract_strided_slice %402 {offsets = [0, 256], sizes = [16, 128], strides = [1, 1]} : vector<16x512xf32> to vector<16x128xf32>
    %420 = math.tanh %419 : vector<16x128xf32>
    %421 = vector.extract_strided_slice %402 {offsets = [0, 384], sizes = [16, 128], strides = [1, 1]} : vector<16x512xf32> to vector<16x128xf32>
    %cst_155 = arith.constant 5.000000e-01 : f32
    %422 = vector.broadcast %cst_155 : f32 to vector<16x128xf32>
    %423 = arith.mulf %422, %421 : vector<16x128xf32>
    %424 = math.tanh %423 : vector<16x128xf32>
    %cst_156 = arith.constant 1.000000e+00 : f32
    %425 = vector.broadcast %cst_156 : f32 to vector<16x128xf32>
    %426 = arith.addf %425, %424 : vector<16x128xf32>
    %cst_157 = arith.constant 5.000000e-01 : f32
    %427 = vector.broadcast %cst_157 : f32 to vector<16x128xf32>
    %428 = arith.mulf %427, %426 : vector<16x128xf32>
    %429 = arith.mulf %418, %392 : vector<16x128xf32>
    %430 = arith.mulf %410, %420 : vector<16x128xf32>
    %431 = arith.addf %429, %430 : vector<16x128xf32>
    %432 = math.tanh %431 : vector<16x128xf32>
    %433 = arith.mulf %428, %432 : vector<16x128xf32>
    %434 = arith.truncf %433 : vector<16x128xf32> to vector<16x128xbf16>
    %c11_i32 = arith.constant 11 : i32
    %435 = arith.index_cast %c11_i32 : i32 to index
    %c0_158 = arith.constant 0 : index
    %c0_159 = arith.constant 0 : index
    %436 = vector.load %arg2[%435, %c0_158, %c0_159] : memref<16x16x512xbf16, #tpu.memory_space<vmem>>, vector<1x16x512xbf16>
    %437 = vector.shape_cast %436 : vector<1x16x512xbf16> to vector<16x512xbf16>
    %438 = arith.extf %437 : vector<16x512xbf16> to vector<16x512xf32>
    %c0_160 = arith.constant 0 : index
    %c0_161 = arith.constant 0 : index
    %439 = vector.load %arg3[%c0_160, %c0_161] : memref<128x512xbf16, #tpu.memory_space<vmem>>, vector<128x512xbf16>
    %cst_162 = arith.constant dense<0.000000e+00> : vector<16x512xf32>
    %440 = tpu.matmul %434, %439, %cst_162 {dimension_numbers = #tpu.dot_dimension_numbers<[1], [0], [0], [1], [0, 0, 1, 1], [], []>} : vector<16x128xbf16>, vector<128x512xbf16>, vector<16x512xf32> -> vector<16x512xf32>
    %441 = arith.addf %438, %440 : vector<16x512xf32>
    %442 = vector.extract_strided_slice %441 {offsets = [0, 0], sizes = [16, 128], strides = [1, 1]} : vector<16x512xf32> to vector<16x128xf32>
    %cst_163 = arith.constant 5.000000e-01 : f32
    %443 = vector.broadcast %cst_163 : f32 to vector<16x128xf32>
    %444 = arith.mulf %443, %442 : vector<16x128xf32>
    %445 = math.tanh %444 : vector<16x128xf32>
    %cst_164 = arith.constant 1.000000e+00 : f32
    %446 = vector.broadcast %cst_164 : f32 to vector<16x128xf32>
    %447 = arith.addf %446, %445 : vector<16x128xf32>
    %cst_165 = arith.constant 5.000000e-01 : f32
    %448 = vector.broadcast %cst_165 : f32 to vector<16x128xf32>
    %449 = arith.mulf %448, %447 : vector<16x128xf32>
    %450 = vector.extract_strided_slice %441 {offsets = [0, 128], sizes = [16, 128], strides = [1, 1]} : vector<16x512xf32> to vector<16x128xf32>
    %cst_166 = arith.constant 5.000000e-01 : f32
    %451 = vector.broadcast %cst_166 : f32 to vector<16x128xf32>
    %452 = arith.mulf %451, %450 : vector<16x128xf32>
    %453 = math.tanh %452 : vector<16x128xf32>
    %cst_167 = arith.constant 1.000000e+00 : f32
    %454 = vector.broadcast %cst_167 : f32 to vector<16x128xf32>
    %455 = arith.addf %454, %453 : vector<16x128xf32>
    %cst_168 = arith.constant 5.000000e-01 : f32
    %456 = vector.broadcast %cst_168 : f32 to vector<16x128xf32>
    %457 = arith.mulf %456, %455 : vector<16x128xf32>
    %458 = vector.extract_strided_slice %441 {offsets = [0, 256], sizes = [16, 128], strides = [1, 1]} : vector<16x512xf32> to vector<16x128xf32>
    %459 = math.tanh %458 : vector<16x128xf32>
    %460 = vector.extract_strided_slice %441 {offsets = [0, 384], sizes = [16, 128], strides = [1, 1]} : vector<16x512xf32> to vector<16x128xf32>
    %cst_169 = arith.constant 5.000000e-01 : f32
    %461 = vector.broadcast %cst_169 : f32 to vector<16x128xf32>
    %462 = arith.mulf %461, %460 : vector<16x128xf32>
    %463 = math.tanh %462 : vector<16x128xf32>
    %cst_170 = arith.constant 1.000000e+00 : f32
    %464 = vector.broadcast %cst_170 : f32 to vector<16x128xf32>
    %465 = arith.addf %464, %463 : vector<16x128xf32>
    %cst_171 = arith.constant 5.000000e-01 : f32
    %466 = vector.broadcast %cst_171 : f32 to vector<16x128xf32>
    %467 = arith.mulf %466, %465 : vector<16x128xf32>
    %468 = arith.mulf %457, %431 : vector<16x128xf32>
    %469 = arith.mulf %449, %459 : vector<16x128xf32>
    %470 = arith.addf %468, %469 : vector<16x128xf32>
    %471 = math.tanh %470 : vector<16x128xf32>
    %472 = arith.mulf %467, %471 : vector<16x128xf32>
    %473 = arith.truncf %472 : vector<16x128xf32> to vector<16x128xbf16>
    %c12_i32 = arith.constant 12 : i32
    %474 = arith.index_cast %c12_i32 : i32 to index
    %c0_172 = arith.constant 0 : index
    %c0_173 = arith.constant 0 : index
    %475 = vector.load %arg2[%474, %c0_172, %c0_173] : memref<16x16x512xbf16, #tpu.memory_space<vmem>>, vector<1x16x512xbf16>
    %476 = vector.shape_cast %475 : vector<1x16x512xbf16> to vector<16x512xbf16>
    %477 = arith.extf %476 : vector<16x512xbf16> to vector<16x512xf32>
    %c0_174 = arith.constant 0 : index
    %c0_175 = arith.constant 0 : index
    %478 = vector.load %arg3[%c0_174, %c0_175] : memref<128x512xbf16, #tpu.memory_space<vmem>>, vector<128x512xbf16>
    %cst_176 = arith.constant dense<0.000000e+00> : vector<16x512xf32>
    %479 = tpu.matmul %473, %478, %cst_176 {dimension_numbers = #tpu.dot_dimension_numbers<[1], [0], [0], [1], [0, 0, 1, 1], [], []>} : vector<16x128xbf16>, vector<128x512xbf16>, vector<16x512xf32> -> vector<16x512xf32>
    %480 = arith.addf %477, %479 : vector<16x512xf32>
    %481 = vector.extract_strided_slice %480 {offsets = [0, 0], sizes = [16, 128], strides = [1, 1]} : vector<16x512xf32> to vector<16x128xf32>
    %cst_177 = arith.constant 5.000000e-01 : f32
    %482 = vector.broadcast %cst_177 : f32 to vector<16x128xf32>
    %483 = arith.mulf %482, %481 : vector<16x128xf32>
    %484 = math.tanh %483 : vector<16x128xf32>
    %cst_178 = arith.constant 1.000000e+00 : f32
    %485 = vector.broadcast %cst_178 : f32 to vector<16x128xf32>
    %486 = arith.addf %485, %484 : vector<16x128xf32>
    %cst_179 = arith.constant 5.000000e-01 : f32
    %487 = vector.broadcast %cst_179 : f32 to vector<16x128xf32>
    %488 = arith.mulf %487, %486 : vector<16x128xf32>
    %489 = vector.extract_strided_slice %480 {offsets = [0, 128], sizes = [16, 128], strides = [1, 1]} : vector<16x512xf32> to vector<16x128xf32>
    %cst_180 = arith.constant 5.000000e-01 : f32
    %490 = vector.broadcast %cst_180 : f32 to vector<16x128xf32>
    %491 = arith.mulf %490, %489 : vector<16x128xf32>
    %492 = math.tanh %491 : vector<16x128xf32>
    %cst_181 = arith.constant 1.000000e+00 : f32
    %493 = vector.broadcast %cst_181 : f32 to vector<16x128xf32>
    %494 = arith.addf %493, %492 : vector<16x128xf32>
    %cst_182 = arith.constant 5.000000e-01 : f32
    %495 = vector.broadcast %cst_182 : f32 to vector<16x128xf32>
    %496 = arith.mulf %495, %494 : vector<16x128xf32>
    %497 = vector.extract_strided_slice %480 {offsets = [0, 256], sizes = [16, 128], strides = [1, 1]} : vector<16x512xf32> to vector<16x128xf32>
    %498 = math.tanh %497 : vector<16x128xf32>
    %499 = vector.extract_strided_slice %480 {offsets = [0, 384], sizes = [16, 128], strides = [1, 1]} : vector<16x512xf32> to vector<16x128xf32>
    %cst_183 = arith.constant 5.000000e-01 : f32
    %500 = vector.broadcast %cst_183 : f32 to vector<16x128xf32>
    %501 = arith.mulf %500, %499 : vector<16x128xf32>
    %502 = math.tanh %501 : vector<16x128xf32>
    %cst_184 = arith.constant 1.000000e+00 : f32
    %503 = vector.broadcast %cst_184 : f32 to vector<16x128xf32>
    %504 = arith.addf %503, %502 : vector<16x128xf32>
    %cst_185 = arith.constant 5.000000e-01 : f32
    %505 = vector.broadcast %cst_185 : f32 to vector<16x128xf32>
    %506 = arith.mulf %505, %504 : vector<16x128xf32>
    %507 = arith.mulf %496, %470 : vector<16x128xf32>
    %508 = arith.mulf %488, %498 : vector<16x128xf32>
    %509 = arith.addf %507, %508 : vector<16x128xf32>
    %510 = math.tanh %509 : vector<16x128xf32>
    %511 = arith.mulf %506, %510 : vector<16x128xf32>
    %512 = arith.truncf %511 : vector<16x128xf32> to vector<16x128xbf16>
    %c13_i32 = arith.constant 13 : i32
    %513 = arith.index_cast %c13_i32 : i32 to index
    %c0_186 = arith.constant 0 : index
    %c0_187 = arith.constant 0 : index
    %514 = vector.load %arg2[%513, %c0_186, %c0_187] : memref<16x16x512xbf16, #tpu.memory_space<vmem>>, vector<1x16x512xbf16>
    %515 = vector.shape_cast %514 : vector<1x16x512xbf16> to vector<16x512xbf16>
    %516 = arith.extf %515 : vector<16x512xbf16> to vector<16x512xf32>
    %c0_188 = arith.constant 0 : index
    %c0_189 = arith.constant 0 : index
    %517 = vector.load %arg3[%c0_188, %c0_189] : memref<128x512xbf16, #tpu.memory_space<vmem>>, vector<128x512xbf16>
    %cst_190 = arith.constant dense<0.000000e+00> : vector<16x512xf32>
    %518 = tpu.matmul %512, %517, %cst_190 {dimension_numbers = #tpu.dot_dimension_numbers<[1], [0], [0], [1], [0, 0, 1, 1], [], []>} : vector<16x128xbf16>, vector<128x512xbf16>, vector<16x512xf32> -> vector<16x512xf32>
    %519 = arith.addf %516, %518 : vector<16x512xf32>
    %520 = vector.extract_strided_slice %519 {offsets = [0, 0], sizes = [16, 128], strides = [1, 1]} : vector<16x512xf32> to vector<16x128xf32>
    %cst_191 = arith.constant 5.000000e-01 : f32
    %521 = vector.broadcast %cst_191 : f32 to vector<16x128xf32>
    %522 = arith.mulf %521, %520 : vector<16x128xf32>
    %523 = math.tanh %522 : vector<16x128xf32>
    %cst_192 = arith.constant 1.000000e+00 : f32
    %524 = vector.broadcast %cst_192 : f32 to vector<16x128xf32>
    %525 = arith.addf %524, %523 : vector<16x128xf32>
    %cst_193 = arith.constant 5.000000e-01 : f32
    %526 = vector.broadcast %cst_193 : f32 to vector<16x128xf32>
    %527 = arith.mulf %526, %525 : vector<16x128xf32>
    %528 = vector.extract_strided_slice %519 {offsets = [0, 128], sizes = [16, 128], strides = [1, 1]} : vector<16x512xf32> to vector<16x128xf32>
    %cst_194 = arith.constant 5.000000e-01 : f32
    %529 = vector.broadcast %cst_194 : f32 to vector<16x128xf32>
    %530 = arith.mulf %529, %528 : vector<16x128xf32>
    %531 = math.tanh %530 : vector<16x128xf32>
    %cst_195 = arith.constant 1.000000e+00 : f32
    %532 = vector.broadcast %cst_195 : f32 to vector<16x128xf32>
    %533 = arith.addf %532, %531 : vector<16x128xf32>
    %cst_196 = arith.constant 5.000000e-01 : f32
    %534 = vector.broadcast %cst_196 : f32 to vector<16x128xf32>
    %535 = arith.mulf %534, %533 : vector<16x128xf32>
    %536 = vector.extract_strided_slice %519 {offsets = [0, 256], sizes = [16, 128], strides = [1, 1]} : vector<16x512xf32> to vector<16x128xf32>
    %537 = math.tanh %536 : vector<16x128xf32>
    %538 = vector.extract_strided_slice %519 {offsets = [0, 384], sizes = [16, 128], strides = [1, 1]} : vector<16x512xf32> to vector<16x128xf32>
    %cst_197 = arith.constant 5.000000e-01 : f32
    %539 = vector.broadcast %cst_197 : f32 to vector<16x128xf32>
    %540 = arith.mulf %539, %538 : vector<16x128xf32>
    %541 = math.tanh %540 : vector<16x128xf32>
    %cst_198 = arith.constant 1.000000e+00 : f32
    %542 = vector.broadcast %cst_198 : f32 to vector<16x128xf32>
    %543 = arith.addf %542, %541 : vector<16x128xf32>
    %cst_199 = arith.constant 5.000000e-01 : f32
    %544 = vector.broadcast %cst_199 : f32 to vector<16x128xf32>
    %545 = arith.mulf %544, %543 : vector<16x128xf32>
    %546 = arith.mulf %535, %509 : vector<16x128xf32>
    %547 = arith.mulf %527, %537 : vector<16x128xf32>
    %548 = arith.addf %546, %547 : vector<16x128xf32>
    %549 = math.tanh %548 : vector<16x128xf32>
    %550 = arith.mulf %545, %549 : vector<16x128xf32>
    %551 = arith.truncf %550 : vector<16x128xf32> to vector<16x128xbf16>
    %c14_i32 = arith.constant 14 : i32
    %552 = arith.index_cast %c14_i32 : i32 to index
    %c0_200 = arith.constant 0 : index
    %c0_201 = arith.constant 0 : index
    %553 = vector.load %arg2[%552, %c0_200, %c0_201] : memref<16x16x512xbf16, #tpu.memory_space<vmem>>, vector<1x16x512xbf16>
    %554 = vector.shape_cast %553 : vector<1x16x512xbf16> to vector<16x512xbf16>
    %555 = arith.extf %554 : vector<16x512xbf16> to vector<16x512xf32>
    %c0_202 = arith.constant 0 : index
    %c0_203 = arith.constant 0 : index
    %556 = vector.load %arg3[%c0_202, %c0_203] : memref<128x512xbf16, #tpu.memory_space<vmem>>, vector<128x512xbf16>
    %cst_204 = arith.constant dense<0.000000e+00> : vector<16x512xf32>
    %557 = tpu.matmul %551, %556, %cst_204 {dimension_numbers = #tpu.dot_dimension_numbers<[1], [0], [0], [1], [0, 0, 1, 1], [], []>} : vector<16x128xbf16>, vector<128x512xbf16>, vector<16x512xf32> -> vector<16x512xf32>
    %558 = arith.addf %555, %557 : vector<16x512xf32>
    %559 = vector.extract_strided_slice %558 {offsets = [0, 0], sizes = [16, 128], strides = [1, 1]} : vector<16x512xf32> to vector<16x128xf32>
    %cst_205 = arith.constant 5.000000e-01 : f32
    %560 = vector.broadcast %cst_205 : f32 to vector<16x128xf32>
    %561 = arith.mulf %560, %559 : vector<16x128xf32>
    %562 = math.tanh %561 : vector<16x128xf32>
    %cst_206 = arith.constant 1.000000e+00 : f32
    %563 = vector.broadcast %cst_206 : f32 to vector<16x128xf32>
    %564 = arith.addf %563, %562 : vector<16x128xf32>
    %cst_207 = arith.constant 5.000000e-01 : f32
    %565 = vector.broadcast %cst_207 : f32 to vector<16x128xf32>
    %566 = arith.mulf %565, %564 : vector<16x128xf32>
    %567 = vector.extract_strided_slice %558 {offsets = [0, 128], sizes = [16, 128], strides = [1, 1]} : vector<16x512xf32> to vector<16x128xf32>
    %cst_208 = arith.constant 5.000000e-01 : f32
    %568 = vector.broadcast %cst_208 : f32 to vector<16x128xf32>
    %569 = arith.mulf %568, %567 : vector<16x128xf32>
    %570 = math.tanh %569 : vector<16x128xf32>
    %cst_209 = arith.constant 1.000000e+00 : f32
    %571 = vector.broadcast %cst_209 : f32 to vector<16x128xf32>
    %572 = arith.addf %571, %570 : vector<16x128xf32>
    %cst_210 = arith.constant 5.000000e-01 : f32
    %573 = vector.broadcast %cst_210 : f32 to vector<16x128xf32>
    %574 = arith.mulf %573, %572 : vector<16x128xf32>
    %575 = vector.extract_strided_slice %558 {offsets = [0, 256], sizes = [16, 128], strides = [1, 1]} : vector<16x512xf32> to vector<16x128xf32>
    %576 = math.tanh %575 : vector<16x128xf32>
    %577 = vector.extract_strided_slice %558 {offsets = [0, 384], sizes = [16, 128], strides = [1, 1]} : vector<16x512xf32> to vector<16x128xf32>
    %cst_211 = arith.constant 5.000000e-01 : f32
    %578 = vector.broadcast %cst_211 : f32 to vector<16x128xf32>
    %579 = arith.mulf %578, %577 : vector<16x128xf32>
    %580 = math.tanh %579 : vector<16x128xf32>
    %cst_212 = arith.constant 1.000000e+00 : f32
    %581 = vector.broadcast %cst_212 : f32 to vector<16x128xf32>
    %582 = arith.addf %581, %580 : vector<16x128xf32>
    %cst_213 = arith.constant 5.000000e-01 : f32
    %583 = vector.broadcast %cst_213 : f32 to vector<16x128xf32>
    %584 = arith.mulf %583, %582 : vector<16x128xf32>
    %585 = arith.mulf %574, %548 : vector<16x128xf32>
    %586 = arith.mulf %566, %576 : vector<16x128xf32>
    %587 = arith.addf %585, %586 : vector<16x128xf32>
    %588 = math.tanh %587 : vector<16x128xf32>
    %589 = arith.mulf %584, %588 : vector<16x128xf32>
    %590 = arith.truncf %589 : vector<16x128xf32> to vector<16x128xbf16>
    %c15_i32 = arith.constant 15 : i32
    %591 = arith.index_cast %c15_i32 : i32 to index
    %c0_214 = arith.constant 0 : index
    %c0_215 = arith.constant 0 : index
    %592 = vector.load %arg2[%591, %c0_214, %c0_215] : memref<16x16x512xbf16, #tpu.memory_space<vmem>>, vector<1x16x512xbf16>
    %593 = vector.shape_cast %592 : vector<1x16x512xbf16> to vector<16x512xbf16>
    %594 = arith.extf %593 : vector<16x512xbf16> to vector<16x512xf32>
    %c0_216 = arith.constant 0 : index
    %c0_217 = arith.constant 0 : index
    %595 = vector.load %arg3[%c0_216, %c0_217] : memref<128x512xbf16, #tpu.memory_space<vmem>>, vector<128x512xbf16>
    %cst_218 = arith.constant dense<0.000000e+00> : vector<16x512xf32>
    %596 = tpu.matmul %590, %595, %cst_218 {dimension_numbers = #tpu.dot_dimension_numbers<[1], [0], [0], [1], [0, 0, 1, 1], [], []>} : vector<16x128xbf16>, vector<128x512xbf16>, vector<16x512xf32> -> vector<16x512xf32>
    %597 = arith.addf %594, %596 : vector<16x512xf32>
    %598 = vector.extract_strided_slice %597 {offsets = [0, 0], sizes = [16, 128], strides = [1, 1]} : vector<16x512xf32> to vector<16x128xf32>
    %cst_219 = arith.constant 5.000000e-01 : f32
    %599 = vector.broadcast %cst_219 : f32 to vector<16x128xf32>
    %600 = arith.mulf %599, %598 : vector<16x128xf32>
    %601 = math.tanh %600 : vector<16x128xf32>
    %cst_220 = arith.constant 1.000000e+00 : f32
    %602 = vector.broadcast %cst_220 : f32 to vector<16x128xf32>
    %603 = arith.addf %602, %601 : vector<16x128xf32>
    %cst_221 = arith.constant 5.000000e-01 : f32
    %604 = vector.broadcast %cst_221 : f32 to vector<16x128xf32>
    %605 = arith.mulf %604, %603 : vector<16x128xf32>
    %606 = vector.extract_strided_slice %597 {offsets = [0, 128], sizes = [16, 128], strides = [1, 1]} : vector<16x512xf32> to vector<16x128xf32>
    %cst_222 = arith.constant 5.000000e-01 : f32
    %607 = vector.broadcast %cst_222 : f32 to vector<16x128xf32>
    %608 = arith.mulf %607, %606 : vector<16x128xf32>
    %609 = math.tanh %608 : vector<16x128xf32>
    %cst_223 = arith.constant 1.000000e+00 : f32
    %610 = vector.broadcast %cst_223 : f32 to vector<16x128xf32>
    %611 = arith.addf %610, %609 : vector<16x128xf32>
    %cst_224 = arith.constant 5.000000e-01 : f32
    %612 = vector.broadcast %cst_224 : f32 to vector<16x128xf32>
    %613 = arith.mulf %612, %611 : vector<16x128xf32>
    %614 = vector.extract_strided_slice %597 {offsets = [0, 256], sizes = [16, 128], strides = [1, 1]} : vector<16x512xf32> to vector<16x128xf32>
    %615 = math.tanh %614 : vector<16x128xf32>
    %616 = vector.extract_strided_slice %597 {offsets = [0, 384], sizes = [16, 128], strides = [1, 1]} : vector<16x512xf32> to vector<16x128xf32>
    %cst_225 = arith.constant 5.000000e-01 : f32
    %617 = vector.broadcast %cst_225 : f32 to vector<16x128xf32>
    %618 = arith.mulf %617, %616 : vector<16x128xf32>
    %619 = math.tanh %618 : vector<16x128xf32>
    %cst_226 = arith.constant 1.000000e+00 : f32
    %620 = vector.broadcast %cst_226 : f32 to vector<16x128xf32>
    %621 = arith.addf %620, %619 : vector<16x128xf32>
    %cst_227 = arith.constant 5.000000e-01 : f32
    %622 = vector.broadcast %cst_227 : f32 to vector<16x128xf32>
    %623 = arith.mulf %622, %621 : vector<16x128xf32>
    %624 = arith.mulf %613, %587 : vector<16x128xf32>
    %625 = arith.mulf %605, %615 : vector<16x128xf32>
    %626 = arith.addf %624, %625 : vector<16x128xf32>
    %627 = math.tanh %626 : vector<16x128xf32>
    %628 = arith.mulf %623, %627 : vector<16x128xf32>
    %629 = arith.truncf %628 : vector<16x128xf32> to vector<16x128xbf16>
    %c16_i32 = arith.constant 16 : i32
    %c0_228 = arith.constant 0 : index
    %c0_229 = arith.constant 0 : index
    %630 = vector.load %arg5[%c0_228, %c0_229] : memref<16x128xf32, #tpu.memory_space<vmem>>, vector<16x128xf32>
    tpu.vector_store %arg5[%c0_228, %c0_229], %628 {strides = array<i32>} : memref<16x128xf32, #tpu.memory_space<vmem>>, vector<16x128xf32>,
    %c0_230 = arith.constant 0 : index
    %c0_231 = arith.constant 0 : index
    %631 = vector.load %arg6[%c0_230, %c0_231] : memref<16x128xf32, #tpu.memory_space<vmem>>, vector<16x128xf32>
    tpu.vector_store %arg6[%c0_230, %c0_231], %626 {strides = array<i32>} : memref<16x128xf32, #tpu.memory_space<vmem>>, vector<16x128xf32>,
    %c0_i32_232 = arith.constant 0 : i32
    %632 = arith.cmpi eq, %arg1, %c0_i32_232 : i32
    %633 = arith.extui %632 : i1 to i32
    %c0_i32_233 = arith.constant 0 : i32
    %634 = arith.cmpi ne, %633, %c0_i32_233 : i32
    scf.if %634 {
      %c0_234 = arith.constant 0 : index
      %c0_235 = arith.constant 0 : index
      %635 = vector.load %arg4[%c0_234, %c0_235] : memref<16x128xf32, #tpu.memory_space<vmem>>, vector<16x128xf32>
      tpu.vector_store %arg4[%c0_234, %c0_235], %628 {strides = array<i32>} : memref<16x128xf32, #tpu.memory_space<vmem>>, vector<16x128xf32>,
    } else {
    }
    return
  }
  func.func @transform_0(%arg0: i32, %arg1: i32) -> (i32, i32, i32) {
    %c0_i32 = arith.constant 0 : i32
    %c0_i32_0 = arith.constant 0 : i32
    return %arg1, %arg0, %c0_i32 : i32, i32, i32
  }
  func.func @transform_1(%arg0: i32, %arg1: i32) -> (i32, i32) {
    %c0_i32 = arith.constant 0 : i32
    %c0_i32_0 = arith.constant 0 : i32
    %c0_i32_1 = arith.constant 0 : i32
    return %c0_i32, %c0_i32_0 : i32, i32
  }
  func.func @transform_2(%arg0: i32, %arg1: i32) -> (i32, i32) {
    %c0_i32 = arith.constant 0 : i32
    %c0_i32_0 = arith.constant 0 : i32
    return %arg0, %c0_i32 : i32, i32
  }
}

module attributes {stable_mosaic.version = 11 : i64} {
  func.func @_lstm_chunk_kernel(%arg0: i32, %arg1: i32, %arg2: memref<16x16x512xbf16, #tpu.memory_space<vmem>>, %arg3: memref<128x512xbf16, #tpu.memory_space<vmem>>, %arg4: memref<16x128xf32, #tpu.memory_space<vmem>>, %arg5: memref<16x128xf32, #tpu.memory_space<vmem>>, %arg6: memref<16x128xf32, #tpu.memory_space<vmem>>) attributes {dimension_semantics = [#tpu.dimension_semantics<parallel>, #tpu.dimension_semantics<arbitrary>], iteration_bounds = array<i64: 1, 1>, scalar_prefetch = 0 : i64, scratch_operands = 2 : i64, tpu.core_type = #tpu.core_type<tc>, window_params = [{transform_indices = @transform_0, window_bounds = array<i64: 16, 16, 512>}, {pipeline_mode = #tpu.pipeline_mode<synchronous>, transform_indices = @transform_1, window_bounds = array<i64: 128, 512>}, {transform_indices = @transform_2, window_bounds = array<i64: 16, 128>}]} {
    %c0_i32 = arith.constant 0 : i32
    %0 = arith.cmpi eq, %arg1, %c0_i32 : i32
    %1 = arith.extui %0 : i1 to i32
    %c0_i32_0 = arith.constant 0 : i32
    %2 = arith.cmpi ne, %1, %c0_i32_0 : i32
    scf.if %2 {
      %cst_234 = arith.constant 0.000000e+00 : f32
      %635 = vector.broadcast %cst_234 : f32 to vector<16x128xf32>
      %c0_235 = arith.constant 0 : index
      %c0_236 = arith.constant 0 : index
      %636 = vector.load %arg5[%c0_235, %c0_236] : memref<16x128xf32, #tpu.memory_space<vmem>>, vector<16x128xf32>
      tpu.vector_store %arg5[%c0_235, %c0_236], %635 {strides = array<i32>} : memref<16x128xf32, #tpu.memory_space<vmem>>, vector<16x128xf32>,
      %cst_237 = arith.constant 0.000000e+00 : f32
      %637 = vector.broadcast %cst_237 : f32 to vector<16x128xf32>
      %c0_238 = arith.constant 0 : index
      %c0_239 = arith.constant 0 : index
      %638 = vector.load %arg6[%c0_238, %c0_239] : memref<16x128xf32, #tpu.memory_space<vmem>>, vector<16x128xf32>
      tpu.vector_store %arg6[%c0_238, %c0_239], %637 {strides = array<i32>} : memref<16x128xf32, #tpu.memory_space<vmem>>, vector<16x128xf32>,
    } else {
    }
    %c0 = arith.constant 0 : index
    %c0_1 = arith.constant 0 : index
    %3 = vector.load %arg5[%c0, %c0_1] : memref<16x128xf32, #tpu.memory_space<vmem>>, vector<16x128xf32>
    %c0_2 = arith.constant 0 : index
    %c0_3 = arith.constant 0 : index
    %4 = vector.load %arg6[%c0_2, %c0_3] : memref<16x128xf32, #tpu.memory_space<vmem>>, vector<16x128xf32>
    %5 = arith.truncf %3 : vector<16x128xf32> to vector<16x128xbf16>
    %c0_i32_4 = arith.constant 0 : i32
    %6 = arith.index_cast %c0_i32_4 : i32 to index
    %c0_5 = arith.constant 0 : index
    %c0_6 = arith.constant 0 : index
    %7 = vector.load %arg2[%6, %c0_5, %c0_6] : memref<16x16x512xbf16, #tpu.memory_space<vmem>>, vector<1x16x512xbf16>
    %8 = vector.shape_cast %7 : vector<1x16x512xbf16> to vector<16x512xbf16>
    %9 = arith.extf %8 : vector<16x512xbf16> to vector<16x512xf32>
    %c0_7 = arith.constant 0 : index
    %c0_8 = arith.constant 0 : index
    %10 = vector.load %arg3[%c0_7, %c0_8] : memref<128x512xbf16, #tpu.memory_space<vmem>>, vector<128x512xbf16>
    %cst = arith.constant dense<0.000000e+00> : vector<16x512xf32>
    %11 = tpu.matmul %5, %10, %cst {dimension_numbers = #tpu.dot_dimension_numbers<[1], [0], [0], [1], [0, 0, 1, 1], [], []>} : vector<16x128xbf16>, vector<128x512xbf16>, vector<16x512xf32> -> vector<16x512xf32>
    %12 = arith.addf %9, %11 : vector<16x512xf32>
    %13 = vector.extract_strided_slice %12 {offsets = [0, 0], sizes = [16, 128], strides = [1, 1]} : vector<16x512xf32> to vector<16x128xf32>
    %cst_9 = arith.constant 5.000000e-01 : f32
    %14 = vector.broadcast %cst_9 : f32 to vector<16x128xf32>
    %15 = arith.mulf %14, %13 : vector<16x128xf32>
    %16 = math.tanh %15 : vector<16x128xf32>
    %cst_10 = arith.constant 1.000000e+00 : f32
    %17 = vector.broadcast %cst_10 : f32 to vector<16x128xf32>
    %18 = arith.addf %17, %16 : vector<16x128xf32>
    %cst_11 = arith.constant 5.000000e-01 : f32
    %19 = vector.broadcast %cst_11 : f32 to vector<16x128xf32>
    %20 = arith.mulf %19, %18 : vector<16x128xf32>
    %21 = vector.extract_strided_slice %12 {offsets = [0, 128], sizes = [16, 128], strides = [1, 1]} : vector<16x512xf32> to vector<16x128xf32>
    %cst_12 = arith.constant 5.000000e-01 : f32
    %22 = vector.broadcast %cst_12 : f32 to vector<16x128xf32>
    %23 = arith.mulf %22, %21 : vector<16x128xf32>
    %24 = math.tanh %23 : vector<16x128xf32>
    %cst_13 = arith.constant 1.000000e+00 : f32
    %25 = vector.broadcast %cst_13 : f32 to vector<16x128xf32>
    %26 = arith.addf %25, %24 : vector<16x128xf32>
    %cst_14 = arith.constant 5.000000e-01 : f32
    %27 = vector.broadcast %cst_14 : f32 to vector<16x128xf32>
    %28 = arith.mulf %27, %26 : vector<16x128xf32>
    %29 = vector.extract_strided_slice %12 {offsets = [0, 256], sizes = [16, 128], strides = [1, 1]} : vector<16x512xf32> to vector<16x128xf32>
    %30 = math.tanh %29 : vector<16x128xf32>
    %31 = vector.extract_strided_slice %12 {offsets = [0, 384], sizes = [16, 128], strides = [1, 1]} : vector<16x512xf32> to vector<16x128xf32>
    %cst_15 = arith.constant 5.000000e-01 : f32
    %32 = vector.broadcast %cst_15 : f32 to vector<16x128xf32>
    %33 = arith.mulf %32, %31 : vector<16x128xf32>
    %34 = math.tanh %33 : vector<16x128xf32>
    %cst_16 = arith.constant 1.000000e+00 : f32
    %35 = vector.broadcast %cst_16 : f32 to vector<16x128xf32>
    %36 = arith.addf %35, %34 : vector<16x128xf32>
    %cst_17 = arith.constant 5.000000e-01 : f32
    %37 = vector.broadcast %cst_17 : f32 to vector<16x128xf32>
    %38 = arith.mulf %37, %36 : vector<16x128xf32>
    %39 = arith.mulf %28, %4 : vector<16x128xf32>
    %40 = arith.mulf %20, %30 : vector<16x128xf32>
    %41 = arith.addf %39, %40 : vector<16x128xf32>
    %42 = math.tanh %41 : vector<16x128xf32>
    %43 = arith.mulf %38, %42 : vector<16x128xf32>
    %44 = arith.truncf %43 : vector<16x128xf32> to vector<16x128xbf16>
    %c1_i32 = arith.constant 1 : i32
    %45 = arith.index_cast %c1_i32 : i32 to index
    %c0_18 = arith.constant 0 : index
    %c0_19 = arith.constant 0 : index
    %46 = vector.load %arg2[%45, %c0_18, %c0_19] : memref<16x16x512xbf16, #tpu.memory_space<vmem>>, vector<1x16x512xbf16>
    %47 = vector.shape_cast %46 : vector<1x16x512xbf16> to vector<16x512xbf16>
    %48 = arith.extf %47 : vector<16x512xbf16> to vector<16x512xf32>
    %c0_20 = arith.constant 0 : index
    %c0_21 = arith.constant 0 : index
    %49 = vector.load %arg3[%c0_20, %c0_21] : memref<128x512xbf16, #tpu.memory_space<vmem>>, vector<128x512xbf16>
    %cst_22 = arith.constant dense<0.000000e+00> : vector<16x512xf32>
    %50 = tpu.matmul %44, %49, %cst_22 {dimension_numbers = #tpu.dot_dimension_numbers<[1], [0], [0], [1], [0, 0, 1, 1], [], []>} : vector<16x128xbf16>, vector<128x512xbf16>, vector<16x512xf32> -> vector<16x512xf32>
    %51 = arith.addf %48, %50 : vector<16x512xf32>
    %52 = vector.extract_strided_slice %51 {offsets = [0, 0], sizes = [16, 128], strides = [1, 1]} : vector<16x512xf32> to vector<16x128xf32>
    %cst_23 = arith.constant 5.000000e-01 : f32
    %53 = vector.broadcast %cst_23 : f32 to vector<16x128xf32>
    %54 = arith.mulf %53, %52 : vector<16x128xf32>
    %55 = math.tanh %54 : vector<16x128xf32>
    %cst_24 = arith.constant 1.000000e+00 : f32
    %56 = vector.broadcast %cst_24 : f32 to vector<16x128xf32>
    %57 = arith.addf %56, %55 : vector<16x128xf32>
    %cst_25 = arith.constant 5.000000e-01 : f32
    %58 = vector.broadcast %cst_25 : f32 to vector<16x128xf32>
    %59 = arith.mulf %58, %57 : vector<16x128xf32>
    %60 = vector.extract_strided_slice %51 {offsets = [0, 128], sizes = [16, 128], strides = [1, 1]} : vector<16x512xf32> to vector<16x128xf32>
    %cst_26 = arith.constant 5.000000e-01 : f32
    %61 = vector.broadcast %cst_26 : f32 to vector<16x128xf32>
    %62 = arith.mulf %61, %60 : vector<16x128xf32>
    %63 = math.tanh %62 : vector<16x128xf32>
    %cst_27 = arith.constant 1.000000e+00 : f32
    %64 = vector.broadcast %cst_27 : f32 to vector<16x128xf32>
    %65 = arith.addf %64, %63 : vector<16x128xf32>
    %cst_28 = arith.constant 5.000000e-01 : f32
    %66 = vector.broadcast %cst_28 : f32 to vector<16x128xf32>
    %67 = arith.mulf %66, %65 : vector<16x128xf32>
    %68 = vector.extract_strided_slice %51 {offsets = [0, 256], sizes = [16, 128], strides = [1, 1]} : vector<16x512xf32> to vector<16x128xf32>
    %69 = math.tanh %68 : vector<16x128xf32>
    %70 = vector.extract_strided_slice %51 {offsets = [0, 384], sizes = [16, 128], strides = [1, 1]} : vector<16x512xf32> to vector<16x128xf32>
    %cst_29 = arith.constant 5.000000e-01 : f32
    %71 = vector.broadcast %cst_29 : f32 to vector<16x128xf32>
    %72 = arith.mulf %71, %70 : vector<16x128xf32>
    %73 = math.tanh %72 : vector<16x128xf32>
    %cst_30 = arith.constant 1.000000e+00 : f32
    %74 = vector.broadcast %cst_30 : f32 to vector<16x128xf32>
    %75 = arith.addf %74, %73 : vector<16x128xf32>
    %cst_31 = arith.constant 5.000000e-01 : f32
    %76 = vector.broadcast %cst_31 : f32 to vector<16x128xf32>
    %77 = arith.mulf %76, %75 : vector<16x128xf32>
    %78 = arith.mulf %67, %41 : vector<16x128xf32>
    %79 = arith.mulf %59, %69 : vector<16x128xf32>
    %80 = arith.addf %78, %79 : vector<16x128xf32>
    %81 = math.tanh %80 : vector<16x128xf32>
    %82 = arith.mulf %77, %81 : vector<16x128xf32>
    %83 = arith.truncf %82 : vector<16x128xf32> to vector<16x128xbf16>
    %c2_i32 = arith.constant 2 : i32
    %84 = arith.index_cast %c2_i32 : i32 to index
    %c0_32 = arith.constant 0 : index
    %c0_33 = arith.constant 0 : index
    %85 = vector.load %arg2[%84, %c0_32, %c0_33] : memref<16x16x512xbf16, #tpu.memory_space<vmem>>, vector<1x16x512xbf16>
    %86 = vector.shape_cast %85 : vector<1x16x512xbf16> to vector<16x512xbf16>
    %87 = arith.extf %86 : vector<16x512xbf16> to vector<16x512xf32>
    %c0_34 = arith.constant 0 : index
    %c0_35 = arith.constant 0 : index
    %88 = vector.load %arg3[%c0_34, %c0_35] : memref<128x512xbf16, #tpu.memory_space<vmem>>, vector<128x512xbf16>
    %cst_36 = arith.constant dense<0.000000e+00> : vector<16x512xf32>
    %89 = tpu.matmul %83, %88, %cst_36 {dimension_numbers = #tpu.dot_dimension_numbers<[1], [0], [0], [1], [0, 0, 1, 1], [], []>} : vector<16x128xbf16>, vector<128x512xbf16>, vector<16x512xf32> -> vector<16x512xf32>
    %90 = arith.addf %87, %89 : vector<16x512xf32>
    %91 = vector.extract_strided_slice %90 {offsets = [0, 0], sizes = [16, 128], strides = [1, 1]} : vector<16x512xf32> to vector<16x128xf32>
    %cst_37 = arith.constant 5.000000e-01 : f32
    %92 = vector.broadcast %cst_37 : f32 to vector<16x128xf32>
    %93 = arith.mulf %92, %91 : vector<16x128xf32>
    %94 = math.tanh %93 : vector<16x128xf32>
    %cst_38 = arith.constant 1.000000e+00 : f32
    %95 = vector.broadcast %cst_38 : f32 to vector<16x128xf32>
    %96 = arith.addf %95, %94 : vector<16x128xf32>
    %cst_39 = arith.constant 5.000000e-01 : f32
    %97 = vector.broadcast %cst_39 : f32 to vector<16x128xf32>
    %98 = arith.mulf %97, %96 : vector<16x128xf32>
    %99 = vector.extract_strided_slice %90 {offsets = [0, 128], sizes = [16, 128], strides = [1, 1]} : vector<16x512xf32> to vector<16x128xf32>
    %cst_40 = arith.constant 5.000000e-01 : f32
    %100 = vector.broadcast %cst_40 : f32 to vector<16x128xf32>
    %101 = arith.mulf %100, %99 : vector<16x128xf32>
    %102 = math.tanh %101 : vector<16x128xf32>
    %cst_41 = arith.constant 1.000000e+00 : f32
    %103 = vector.broadcast %cst_41 : f32 to vector<16x128xf32>
    %104 = arith.addf %103, %102 : vector<16x128xf32>
    %cst_42 = arith.constant 5.000000e-01 : f32
    %105 = vector.broadcast %cst_42 : f32 to vector<16x128xf32>
    %106 = arith.mulf %105, %104 : vector<16x128xf32>
    %107 = vector.extract_strided_slice %90 {offsets = [0, 256], sizes = [16, 128], strides = [1, 1]} : vector<16x512xf32> to vector<16x128xf32>
    %108 = math.tanh %107 : vector<16x128xf32>
    %109 = vector.extract_strided_slice %90 {offsets = [0, 384], sizes = [16, 128], strides = [1, 1]} : vector<16x512xf32> to vector<16x128xf32>
    %cst_43 = arith.constant 5.000000e-01 : f32
    %110 = vector.broadcast %cst_43 : f32 to vector<16x128xf32>
    %111 = arith.mulf %110, %109 : vector<16x128xf32>
    %112 = math.tanh %111 : vector<16x128xf32>
    %cst_44 = arith.constant 1.000000e+00 : f32
    %113 = vector.broadcast %cst_44 : f32 to vector<16x128xf32>
    %114 = arith.addf %113, %112 : vector<16x128xf32>
    %cst_45 = arith.constant 5.000000e-01 : f32
    %115 = vector.broadcast %cst_45 : f32 to vector<16x128xf32>
    %116 = arith.mulf %115, %114 : vector<16x128xf32>
    %117 = arith.mulf %106, %80 : vector<16x128xf32>
    %118 = arith.mulf %98, %108 : vector<16x128xf32>
    %119 = arith.addf %117, %118 : vector<16x128xf32>
    %120 = math.tanh %119 : vector<16x128xf32>
    %121 = arith.mulf %116, %120 : vector<16x128xf32>
    %122 = arith.truncf %121 : vector<16x128xf32> to vector<16x128xbf16>
    %c3_i32 = arith.constant 3 : i32
    %123 = arith.index_cast %c3_i32 : i32 to index
    %c0_46 = arith.constant 0 : index
    %c0_47 = arith.constant 0 : index
    %124 = vector.load %arg2[%123, %c0_46, %c0_47] : memref<16x16x512xbf16, #tpu.memory_space<vmem>>, vector<1x16x512xbf16>
    %125 = vector.shape_cast %124 : vector<1x16x512xbf16> to vector<16x512xbf16>
    %126 = arith.extf %125 : vector<16x512xbf16> to vector<16x512xf32>
    %c0_48 = arith.constant 0 : index
    %c0_49 = arith.constant 0 : index
    %127 = vector.load %arg3[%c0_48, %c0_49] : memref<128x512xbf16, #tpu.memory_space<vmem>>, vector<128x512xbf16>
    %cst_50 = arith.constant dense<0.000000e+00> : vector<16x512xf32>
    %128 = tpu.matmul %122, %127, %cst_50 {dimension_numbers = #tpu.dot_dimension_numbers<[1], [0], [0], [1], [0, 0, 1, 1], [], []>} : vector<16x128xbf16>, vector<128x512xbf16>, vector<16x512xf32> -> vector<16x512xf32>
    %129 = arith.addf %126, %128 : vector<16x512xf32>
    %130 = vector.extract_strided_slice %129 {offsets = [0, 0], sizes = [16, 128], strides = [1, 1]} : vector<16x512xf32> to vector<16x128xf32>
    %cst_51 = arith.constant 5.000000e-01 : f32
    %131 = vector.broadcast %cst_51 : f32 to vector<16x128xf32>
    %132 = arith.mulf %131, %130 : vector<16x128xf32>
    %133 = math.tanh %132 : vector<16x128xf32>
    %cst_52 = arith.constant 1.000000e+00 : f32
    %134 = vector.broadcast %cst_52 : f32 to vector<16x128xf32>
    %135 = arith.addf %134, %133 : vector<16x128xf32>
    %cst_53 = arith.constant 5.000000e-01 : f32
    %136 = vector.broadcast %cst_53 : f32 to vector<16x128xf32>
    %137 = arith.mulf %136, %135 : vector<16x128xf32>
    %138 = vector.extract_strided_slice %129 {offsets = [0, 128], sizes = [16, 128], strides = [1, 1]} : vector<16x512xf32> to vector<16x128xf32>
    %cst_54 = arith.constant 5.000000e-01 : f32
    %139 = vector.broadcast %cst_54 : f32 to vector<16x128xf32>
    %140 = arith.mulf %139, %138 : vector<16x128xf32>
    %141 = math.tanh %140 : vector<16x128xf32>
    %cst_55 = arith.constant 1.000000e+00 : f32
    %142 = vector.broadcast %cst_55 : f32 to vector<16x128xf32>
    %143 = arith.addf %142, %141 : vector<16x128xf32>
    %cst_56 = arith.constant 5.000000e-01 : f32
    %144 = vector.broadcast %cst_56 : f32 to vector<16x128xf32>
    %145 = arith.mulf %144, %143 : vector<16x128xf32>
    %146 = vector.extract_strided_slice %129 {offsets = [0, 256], sizes = [16, 128], strides = [1, 1]} : vector<16x512xf32> to vector<16x128xf32>
    %147 = math.tanh %146 : vector<16x128xf32>
    %148 = vector.extract_strided_slice %129 {offsets = [0, 384], sizes = [16, 128], strides = [1, 1]} : vector<16x512xf32> to vector<16x128xf32>
    %cst_57 = arith.constant 5.000000e-01 : f32
    %149 = vector.broadcast %cst_57 : f32 to vector<16x128xf32>
    %150 = arith.mulf %149, %148 : vector<16x128xf32>
    %151 = math.tanh %150 : vector<16x128xf32>
    %cst_58 = arith.constant 1.000000e+00 : f32
    %152 = vector.broadcast %cst_58 : f32 to vector<16x128xf32>
    %153 = arith.addf %152, %151 : vector<16x128xf32>
    %cst_59 = arith.constant 5.000000e-01 : f32
    %154 = vector.broadcast %cst_59 : f32 to vector<16x128xf32>
    %155 = arith.mulf %154, %153 : vector<16x128xf32>
    %156 = arith.mulf %145, %119 : vector<16x128xf32>
    %157 = arith.mulf %137, %147 : vector<16x128xf32>
    %158 = arith.addf %156, %157 : vector<16x128xf32>
    %159 = math.tanh %158 : vector<16x128xf32>
    %160 = arith.mulf %155, %159 : vector<16x128xf32>
    %161 = arith.truncf %160 : vector<16x128xf32> to vector<16x128xbf16>
    %c4_i32 = arith.constant 4 : i32
    %162 = arith.index_cast %c4_i32 : i32 to index
    %c0_60 = arith.constant 0 : index
    %c0_61 = arith.constant 0 : index
    %163 = vector.load %arg2[%162, %c0_60, %c0_61] : memref<16x16x512xbf16, #tpu.memory_space<vmem>>, vector<1x16x512xbf16>
    %164 = vector.shape_cast %163 : vector<1x16x512xbf16> to vector<16x512xbf16>
    %165 = arith.extf %164 : vector<16x512xbf16> to vector<16x512xf32>
    %c0_62 = arith.constant 0 : index
    %c0_63 = arith.constant 0 : index
    %166 = vector.load %arg3[%c0_62, %c0_63] : memref<128x512xbf16, #tpu.memory_space<vmem>>, vector<128x512xbf16>
    %cst_64 = arith.constant dense<0.000000e+00> : vector<16x512xf32>
    %167 = tpu.matmul %161, %166, %cst_64 {dimension_numbers = #tpu.dot_dimension_numbers<[1], [0], [0], [1], [0, 0, 1, 1], [], []>} : vector<16x128xbf16>, vector<128x512xbf16>, vector<16x512xf32> -> vector<16x512xf32>
    %168 = arith.addf %165, %167 : vector<16x512xf32>
    %169 = vector.extract_strided_slice %168 {offsets = [0, 0], sizes = [16, 128], strides = [1, 1]} : vector<16x512xf32> to vector<16x128xf32>
    %cst_65 = arith.constant 5.000000e-01 : f32
    %170 = vector.broadcast %cst_65 : f32 to vector<16x128xf32>
    %171 = arith.mulf %170, %169 : vector<16x128xf32>
    %172 = math.tanh %171 : vector<16x128xf32>
    %cst_66 = arith.constant 1.000000e+00 : f32
    %173 = vector.broadcast %cst_66 : f32 to vector<16x128xf32>
    %174 = arith.addf %173, %172 : vector<16x128xf32>
    %cst_67 = arith.constant 5.000000e-01 : f32
    %175 = vector.broadcast %cst_67 : f32 to vector<16x128xf32>
    %176 = arith.mulf %175, %174 : vector<16x128xf32>
    %177 = vector.extract_strided_slice %168 {offsets = [0, 128], sizes = [16, 128], strides = [1, 1]} : vector<16x512xf32> to vector<16x128xf32>
    %cst_68 = arith.constant 5.000000e-01 : f32
    %178 = vector.broadcast %cst_68 : f32 to vector<16x128xf32>
    %179 = arith.mulf %178, %177 : vector<16x128xf32>
    %180 = math.tanh %179 : vector<16x128xf32>
    %cst_69 = arith.constant 1.000000e+00 : f32
    %181 = vector.broadcast %cst_69 : f32 to vector<16x128xf32>
    %182 = arith.addf %181, %180 : vector<16x128xf32>
    %cst_70 = arith.constant 5.000000e-01 : f32
    %183 = vector.broadcast %cst_70 : f32 to vector<16x128xf32>
    %184 = arith.mulf %183, %182 : vector<16x128xf32>
    %185 = vector.extract_strided_slice %168 {offsets = [0, 256], sizes = [16, 128], strides = [1, 1]} : vector<16x512xf32> to vector<16x128xf32>
    %186 = math.tanh %185 : vector<16x128xf32>
    %187 = vector.extract_strided_slice %168 {offsets = [0, 384], sizes = [16, 128], strides = [1, 1]} : vector<16x512xf32> to vector<16x128xf32>
    %cst_71 = arith.constant 5.000000e-01 : f32
    %188 = vector.broadcast %cst_71 : f32 to vector<16x128xf32>
    %189 = arith.mulf %188, %187 : vector<16x128xf32>
    %190 = math.tanh %189 : vector<16x128xf32>
    %cst_72 = arith.constant 1.000000e+00 : f32
    %191 = vector.broadcast %cst_72 : f32 to vector<16x128xf32>
    %192 = arith.addf %191, %190 : vector<16x128xf32>
    %cst_73 = arith.constant 5.000000e-01 : f32
    %193 = vector.broadcast %cst_73 : f32 to vector<16x128xf32>
    %194 = arith.mulf %193, %192 : vector<16x128xf32>
    %195 = arith.mulf %184, %158 : vector<16x128xf32>
    %196 = arith.mulf %176, %186 : vector<16x128xf32>
    %197 = arith.addf %195, %196 : vector<16x128xf32>
    %198 = math.tanh %197 : vector<16x128xf32>
    %199 = arith.mulf %194, %198 : vector<16x128xf32>
    %200 = arith.truncf %199 : vector<16x128xf32> to vector<16x128xbf16>
    %c5_i32 = arith.constant 5 : i32
    %201 = arith.index_cast %c5_i32 : i32 to index
    %c0_74 = arith.constant 0 : index
    %c0_75 = arith.constant 0 : index
    %202 = vector.load %arg2[%201, %c0_74, %c0_75] : memref<16x16x512xbf16, #tpu.memory_space<vmem>>, vector<1x16x512xbf16>
    %203 = vector.shape_cast %202 : vector<1x16x512xbf16> to vector<16x512xbf16>
    %204 = arith.extf %203 : vector<16x512xbf16> to vector<16x512xf32>
    %c0_76 = arith.constant 0 : index
    %c0_77 = arith.constant 0 : index
    %205 = vector.load %arg3[%c0_76, %c0_77] : memref<128x512xbf16, #tpu.memory_space<vmem>>, vector<128x512xbf16>
    %cst_78 = arith.constant dense<0.000000e+00> : vector<16x512xf32>
    %206 = tpu.matmul %200, %205, %cst_78 {dimension_numbers = #tpu.dot_dimension_numbers<[1], [0], [0], [1], [0, 0, 1, 1], [], []>} : vector<16x128xbf16>, vector<128x512xbf16>, vector<16x512xf32> -> vector<16x512xf32>
    %207 = arith.addf %204, %206 : vector<16x512xf32>
    %208 = vector.extract_strided_slice %207 {offsets = [0, 0], sizes = [16, 128], strides = [1, 1]} : vector<16x512xf32> to vector<16x128xf32>
    %cst_79 = arith.constant 5.000000e-01 : f32
    %209 = vector.broadcast %cst_79 : f32 to vector<16x128xf32>
    %210 = arith.mulf %209, %208 : vector<16x128xf32>
    %211 = math.tanh %210 : vector<16x128xf32>
    %cst_80 = arith.constant 1.000000e+00 : f32
    %212 = vector.broadcast %cst_80 : f32 to vector<16x128xf32>
    %213 = arith.addf %212, %211 : vector<16x128xf32>
    %cst_81 = arith.constant 5.000000e-01 : f32
    %214 = vector.broadcast %cst_81 : f32 to vector<16x128xf32>
    %215 = arith.mulf %214, %213 : vector<16x128xf32>
    %216 = vector.extract_strided_slice %207 {offsets = [0, 128], sizes = [16, 128], strides = [1, 1]} : vector<16x512xf32> to vector<16x128xf32>
    %cst_82 = arith.constant 5.000000e-01 : f32
    %217 = vector.broadcast %cst_82 : f32 to vector<16x128xf32>
    %218 = arith.mulf %217, %216 : vector<16x128xf32>
    %219 = math.tanh %218 : vector<16x128xf32>
    %cst_83 = arith.constant 1.000000e+00 : f32
    %220 = vector.broadcast %cst_83 : f32 to vector<16x128xf32>
    %221 = arith.addf %220, %219 : vector<16x128xf32>
    %cst_84 = arith.constant 5.000000e-01 : f32
    %222 = vector.broadcast %cst_84 : f32 to vector<16x128xf32>
    %223 = arith.mulf %222, %221 : vector<16x128xf32>
    %224 = vector.extract_strided_slice %207 {offsets = [0, 256], sizes = [16, 128], strides = [1, 1]} : vector<16x512xf32> to vector<16x128xf32>
    %225 = math.tanh %224 : vector<16x128xf32>
    %226 = vector.extract_strided_slice %207 {offsets = [0, 384], sizes = [16, 128], strides = [1, 1]} : vector<16x512xf32> to vector<16x128xf32>
    %cst_85 = arith.constant 5.000000e-01 : f32
    %227 = vector.broadcast %cst_85 : f32 to vector<16x128xf32>
    %228 = arith.mulf %227, %226 : vector<16x128xf32>
    %229 = math.tanh %228 : vector<16x128xf32>
    %cst_86 = arith.constant 1.000000e+00 : f32
    %230 = vector.broadcast %cst_86 : f32 to vector<16x128xf32>
    %231 = arith.addf %230, %229 : vector<16x128xf32>
    %cst_87 = arith.constant 5.000000e-01 : f32
    %232 = vector.broadcast %cst_87 : f32 to vector<16x128xf32>
    %233 = arith.mulf %232, %231 : vector<16x128xf32>
    %234 = arith.mulf %223, %197 : vector<16x128xf32>
    %235 = arith.mulf %215, %225 : vector<16x128xf32>
    %236 = arith.addf %234, %235 : vector<16x128xf32>
    %237 = math.tanh %236 : vector<16x128xf32>
    %238 = arith.mulf %233, %237 : vector<16x128xf32>
    %239 = arith.truncf %238 : vector<16x128xf32> to vector<16x128xbf16>
    %c6_i32 = arith.constant 6 : i32
    %240 = arith.index_cast %c6_i32 : i32 to index
    %c0_88 = arith.constant 0 : index
    %c0_89 = arith.constant 0 : index
    %241 = vector.load %arg2[%240, %c0_88, %c0_89] : memref<16x16x512xbf16, #tpu.memory_space<vmem>>, vector<1x16x512xbf16>
    %242 = vector.shape_cast %241 : vector<1x16x512xbf16> to vector<16x512xbf16>
    %243 = arith.extf %242 : vector<16x512xbf16> to vector<16x512xf32>
    %c0_90 = arith.constant 0 : index
    %c0_91 = arith.constant 0 : index
    %244 = vector.load %arg3[%c0_90, %c0_91] : memref<128x512xbf16, #tpu.memory_space<vmem>>, vector<128x512xbf16>
    %cst_92 = arith.constant dense<0.000000e+00> : vector<16x512xf32>
    %245 = tpu.matmul %239, %244, %cst_92 {dimension_numbers = #tpu.dot_dimension_numbers<[1], [0], [0], [1], [0, 0, 1, 1], [], []>} : vector<16x128xbf16>, vector<128x512xbf16>, vector<16x512xf32> -> vector<16x512xf32>
    %246 = arith.addf %243, %245 : vector<16x512xf32>
    %247 = vector.extract_strided_slice %246 {offsets = [0, 0], sizes = [16, 128], strides = [1, 1]} : vector<16x512xf32> to vector<16x128xf32>
    %cst_93 = arith.constant 5.000000e-01 : f32
    %248 = vector.broadcast %cst_93 : f32 to vector<16x128xf32>
    %249 = arith.mulf %248, %247 : vector<16x128xf32>
    %250 = math.tanh %249 : vector<16x128xf32>
    %cst_94 = arith.constant 1.000000e+00 : f32
    %251 = vector.broadcast %cst_94 : f32 to vector<16x128xf32>
    %252 = arith.addf %251, %250 : vector<16x128xf32>
    %cst_95 = arith.constant 5.000000e-01 : f32
    %253 = vector.broadcast %cst_95 : f32 to vector<16x128xf32>
    %254 = arith.mulf %253, %252 : vector<16x128xf32>
    %255 = vector.extract_strided_slice %246 {offsets = [0, 128], sizes = [16, 128], strides = [1, 1]} : vector<16x512xf32> to vector<16x128xf32>
    %cst_96 = arith.constant 5.000000e-01 : f32
    %256 = vector.broadcast %cst_96 : f32 to vector<16x128xf32>
    %257 = arith.mulf %256, %255 : vector<16x128xf32>
    %258 = math.tanh %257 : vector<16x128xf32>
    %cst_97 = arith.constant 1.000000e+00 : f32
    %259 = vector.broadcast %cst_97 : f32 to vector<16x128xf32>
    %260 = arith.addf %259, %258 : vector<16x128xf32>
    %cst_98 = arith.constant 5.000000e-01 : f32
    %261 = vector.broadcast %cst_98 : f32 to vector<16x128xf32>
    %262 = arith.mulf %261, %260 : vector<16x128xf32>
    %263 = vector.extract_strided_slice %246 {offsets = [0, 256], sizes = [16, 128], strides = [1, 1]} : vector<16x512xf32> to vector<16x128xf32>
    %264 = math.tanh %263 : vector<16x128xf32>
    %265 = vector.extract_strided_slice %246 {offsets = [0, 384], sizes = [16, 128], strides = [1, 1]} : vector<16x512xf32> to vector<16x128xf32>
    %cst_99 = arith.constant 5.000000e-01 : f32
    %266 = vector.broadcast %cst_99 : f32 to vector<16x128xf32>
    %267 = arith.mulf %266, %265 : vector<16x128xf32>
    %268 = math.tanh %267 : vector<16x128xf32>
    %cst_100 = arith.constant 1.000000e+00 : f32
    %269 = vector.broadcast %cst_100 : f32 to vector<16x128xf32>
    %270 = arith.addf %269, %268 : vector<16x128xf32>
    %cst_101 = arith.constant 5.000000e-01 : f32
    %271 = vector.broadcast %cst_101 : f32 to vector<16x128xf32>
    %272 = arith.mulf %271, %270 : vector<16x128xf32>
    %273 = arith.mulf %262, %236 : vector<16x128xf32>
    %274 = arith.mulf %254, %264 : vector<16x128xf32>
    %275 = arith.addf %273, %274 : vector<16x128xf32>
    %276 = math.tanh %275 : vector<16x128xf32>
    %277 = arith.mulf %272, %276 : vector<16x128xf32>
    %278 = arith.truncf %277 : vector<16x128xf32> to vector<16x128xbf16>
    %c7_i32 = arith.constant 7 : i32
    %279 = arith.index_cast %c7_i32 : i32 to index
    %c0_102 = arith.constant 0 : index
    %c0_103 = arith.constant 0 : index
    %280 = vector.load %arg2[%279, %c0_102, %c0_103] : memref<16x16x512xbf16, #tpu.memory_space<vmem>>, vector<1x16x512xbf16>
    %281 = vector.shape_cast %280 : vector<1x16x512xbf16> to vector<16x512xbf16>
    %282 = arith.extf %281 : vector<16x512xbf16> to vector<16x512xf32>
    %c0_104 = arith.constant 0 : index
    %c0_105 = arith.constant 0 : index
    %283 = vector.load %arg3[%c0_104, %c0_105] : memref<128x512xbf16, #tpu.memory_space<vmem>>, vector<128x512xbf16>
    %cst_106 = arith.constant dense<0.000000e+00> : vector<16x512xf32>
    %284 = tpu.matmul %278, %283, %cst_106 {dimension_numbers = #tpu.dot_dimension_numbers<[1], [0], [0], [1], [0, 0, 1, 1], [], []>} : vector<16x128xbf16>, vector<128x512xbf16>, vector<16x512xf32> -> vector<16x512xf32>
    %285 = arith.addf %282, %284 : vector<16x512xf32>
    %286 = vector.extract_strided_slice %285 {offsets = [0, 0], sizes = [16, 128], strides = [1, 1]} : vector<16x512xf32> to vector<16x128xf32>
    %cst_107 = arith.constant 5.000000e-01 : f32
    %287 = vector.broadcast %cst_107 : f32 to vector<16x128xf32>
    %288 = arith.mulf %287, %286 : vector<16x128xf32>
    %289 = math.tanh %288 : vector<16x128xf32>
    %cst_108 = arith.constant 1.000000e+00 : f32
    %290 = vector.broadcast %cst_108 : f32 to vector<16x128xf32>
    %291 = arith.addf %290, %289 : vector<16x128xf32>
    %cst_109 = arith.constant 5.000000e-01 : f32
    %292 = vector.broadcast %cst_109 : f32 to vector<16x128xf32>
    %293 = arith.mulf %292, %291 : vector<16x128xf32>
    %294 = vector.extract_strided_slice %285 {offsets = [0, 128], sizes = [16, 128], strides = [1, 1]} : vector<16x512xf32> to vector<16x128xf32>
    %cst_110 = arith.constant 5.000000e-01 : f32
    %295 = vector.broadcast %cst_110 : f32 to vector<16x128xf32>
    %296 = arith.mulf %295, %294 : vector<16x128xf32>
    %297 = math.tanh %296 : vector<16x128xf32>
    %cst_111 = arith.constant 1.000000e+00 : f32
    %298 = vector.broadcast %cst_111 : f32 to vector<16x128xf32>
    %299 = arith.addf %298, %297 : vector<16x128xf32>
    %cst_112 = arith.constant 5.000000e-01 : f32
    %300 = vector.broadcast %cst_112 : f32 to vector<16x128xf32>
    %301 = arith.mulf %300, %299 : vector<16x128xf32>
    %302 = vector.extract_strided_slice %285 {offsets = [0, 256], sizes = [16, 128], strides = [1, 1]} : vector<16x512xf32> to vector<16x128xf32>
    %303 = math.tanh %302 : vector<16x128xf32>
    %304 = vector.extract_strided_slice %285 {offsets = [0, 384], sizes = [16, 128], strides = [1, 1]} : vector<16x512xf32> to vector<16x128xf32>
    %cst_113 = arith.constant 5.000000e-01 : f32
    %305 = vector.broadcast %cst_113 : f32 to vector<16x128xf32>
    %306 = arith.mulf %305, %304 : vector<16x128xf32>
    %307 = math.tanh %306 : vector<16x128xf32>
    %cst_114 = arith.constant 1.000000e+00 : f32
    %308 = vector.broadcast %cst_114 : f32 to vector<16x128xf32>
    %309 = arith.addf %308, %307 : vector<16x128xf32>
    %cst_115 = arith.constant 5.000000e-01 : f32
    %310 = vector.broadcast %cst_115 : f32 to vector<16x128xf32>
    %311 = arith.mulf %310, %309 : vector<16x128xf32>
    %312 = arith.mulf %301, %275 : vector<16x128xf32>
    %313 = arith.mulf %293, %303 : vector<16x128xf32>
    %314 = arith.addf %312, %313 : vector<16x128xf32>
    %315 = math.tanh %314 : vector<16x128xf32>
    %316 = arith.mulf %311, %315 : vector<16x128xf32>
    %317 = arith.truncf %316 : vector<16x128xf32> to vector<16x128xbf16>
    %c8_i32 = arith.constant 8 : i32
    %318 = arith.index_cast %c8_i32 : i32 to index
    %c0_116 = arith.constant 0 : index
    %c0_117 = arith.constant 0 : index
    %319 = vector.load %arg2[%318, %c0_116, %c0_117] : memref<16x16x512xbf16, #tpu.memory_space<vmem>>, vector<1x16x512xbf16>
    %320 = vector.shape_cast %319 : vector<1x16x512xbf16> to vector<16x512xbf16>
    %321 = arith.extf %320 : vector<16x512xbf16> to vector<16x512xf32>
    %c0_118 = arith.constant 0 : index
    %c0_119 = arith.constant 0 : index
    %322 = vector.load %arg3[%c0_118, %c0_119] : memref<128x512xbf16, #tpu.memory_space<vmem>>, vector<128x512xbf16>
    %cst_120 = arith.constant dense<0.000000e+00> : vector<16x512xf32>
    %323 = tpu.matmul %317, %322, %cst_120 {dimension_numbers = #tpu.dot_dimension_numbers<[1], [0], [0], [1], [0, 0, 1, 1], [], []>} : vector<16x128xbf16>, vector<128x512xbf16>, vector<16x512xf32> -> vector<16x512xf32>
    %324 = arith.addf %321, %323 : vector<16x512xf32>
    %325 = vector.extract_strided_slice %324 {offsets = [0, 0], sizes = [16, 128], strides = [1, 1]} : vector<16x512xf32> to vector<16x128xf32>
    %cst_121 = arith.constant 5.000000e-01 : f32
    %326 = vector.broadcast %cst_121 : f32 to vector<16x128xf32>
    %327 = arith.mulf %326, %325 : vector<16x128xf32>
    %328 = math.tanh %327 : vector<16x128xf32>
    %cst_122 = arith.constant 1.000000e+00 : f32
    %329 = vector.broadcast %cst_122 : f32 to vector<16x128xf32>
    %330 = arith.addf %329, %328 : vector<16x128xf32>
    %cst_123 = arith.constant 5.000000e-01 : f32
    %331 = vector.broadcast %cst_123 : f32 to vector<16x128xf32>
    %332 = arith.mulf %331, %330 : vector<16x128xf32>
    %333 = vector.extract_strided_slice %324 {offsets = [0, 128], sizes = [16, 128], strides = [1, 1]} : vector<16x512xf32> to vector<16x128xf32>
    %cst_124 = arith.constant 5.000000e-01 : f32
    %334 = vector.broadcast %cst_124 : f32 to vector<16x128xf32>
    %335 = arith.mulf %334, %333 : vector<16x128xf32>
    %336 = math.tanh %335 : vector<16x128xf32>
    %cst_125 = arith.constant 1.000000e+00 : f32
    %337 = vector.broadcast %cst_125 : f32 to vector<16x128xf32>
    %338 = arith.addf %337, %336 : vector<16x128xf32>
    %cst_126 = arith.constant 5.000000e-01 : f32
    %339 = vector.broadcast %cst_126 : f32 to vector<16x128xf32>
    %340 = arith.mulf %339, %338 : vector<16x128xf32>
    %341 = vector.extract_strided_slice %324 {offsets = [0, 256], sizes = [16, 128], strides = [1, 1]} : vector<16x512xf32> to vector<16x128xf32>
    %342 = math.tanh %341 : vector<16x128xf32>
    %343 = vector.extract_strided_slice %324 {offsets = [0, 384], sizes = [16, 128], strides = [1, 1]} : vector<16x512xf32> to vector<16x128xf32>
    %cst_127 = arith.constant 5.000000e-01 : f32
    %344 = vector.broadcast %cst_127 : f32 to vector<16x128xf32>
    %345 = arith.mulf %344, %343 : vector<16x128xf32>
    %346 = math.tanh %345 : vector<16x128xf32>
    %cst_128 = arith.constant 1.000000e+00 : f32
    %347 = vector.broadcast %cst_128 : f32 to vector<16x128xf32>
    %348 = arith.addf %347, %346 : vector<16x128xf32>
    %cst_129 = arith.constant 5.000000e-01 : f32
    %349 = vector.broadcast %cst_129 : f32 to vector<16x128xf32>
    %350 = arith.mulf %349, %348 : vector<16x128xf32>
    %351 = arith.mulf %340, %314 : vector<16x128xf32>
    %352 = arith.mulf %332, %342 : vector<16x128xf32>
    %353 = arith.addf %351, %352 : vector<16x128xf32>
    %354 = math.tanh %353 : vector<16x128xf32>
    %355 = arith.mulf %350, %354 : vector<16x128xf32>
    %356 = arith.truncf %355 : vector<16x128xf32> to vector<16x128xbf16>
    %c9_i32 = arith.constant 9 : i32
    %357 = arith.index_cast %c9_i32 : i32 to index
    %c0_130 = arith.constant 0 : index
    %c0_131 = arith.constant 0 : index
    %358 = vector.load %arg2[%357, %c0_130, %c0_131] : memref<16x16x512xbf16, #tpu.memory_space<vmem>>, vector<1x16x512xbf16>
    %359 = vector.shape_cast %358 : vector<1x16x512xbf16> to vector<16x512xbf16>
    %360 = arith.extf %359 : vector<16x512xbf16> to vector<16x512xf32>
    %c0_132 = arith.constant 0 : index
    %c0_133 = arith.constant 0 : index
    %361 = vector.load %arg3[%c0_132, %c0_133] : memref<128x512xbf16, #tpu.memory_space<vmem>>, vector<128x512xbf16>
    %cst_134 = arith.constant dense<0.000000e+00> : vector<16x512xf32>
    %362 = tpu.matmul %356, %361, %cst_134 {dimension_numbers = #tpu.dot_dimension_numbers<[1], [0], [0], [1], [0, 0, 1, 1], [], []>} : vector<16x128xbf16>, vector<128x512xbf16>, vector<16x512xf32> -> vector<16x512xf32>
    %363 = arith.addf %360, %362 : vector<16x512xf32>
    %364 = vector.extract_strided_slice %363 {offsets = [0, 0], sizes = [16, 128], strides = [1, 1]} : vector<16x512xf32> to vector<16x128xf32>
    %cst_135 = arith.constant 5.000000e-01 : f32
    %365 = vector.broadcast %cst_135 : f32 to vector<16x128xf32>
    %366 = arith.mulf %365, %364 : vector<16x128xf32>
    %367 = math.tanh %366 : vector<16x128xf32>
    %cst_136 = arith.constant 1.000000e+00 : f32
    %368 = vector.broadcast %cst_136 : f32 to vector<16x128xf32>
    %369 = arith.addf %368, %367 : vector<16x128xf32>
    %cst_137 = arith.constant 5.000000e-01 : f32
    %370 = vector.broadcast %cst_137 : f32 to vector<16x128xf32>
    %371 = arith.mulf %370, %369 : vector<16x128xf32>
    %372 = vector.extract_strided_slice %363 {offsets = [0, 128], sizes = [16, 128], strides = [1, 1]} : vector<16x512xf32> to vector<16x128xf32>
    %cst_138 = arith.constant 5.000000e-01 : f32
    %373 = vector.broadcast %cst_138 : f32 to vector<16x128xf32>
    %374 = arith.mulf %373, %372 : vector<16x128xf32>
    %375 = math.tanh %374 : vector<16x128xf32>
    %cst_139 = arith.constant 1.000000e+00 : f32
    %376 = vector.broadcast %cst_139 : f32 to vector<16x128xf32>
    %377 = arith.addf %376, %375 : vector<16x128xf32>
    %cst_140 = arith.constant 5.000000e-01 : f32
    %378 = vector.broadcast %cst_140 : f32 to vector<16x128xf32>
    %379 = arith.mulf %378, %377 : vector<16x128xf32>
    %380 = vector.extract_strided_slice %363 {offsets = [0, 256], sizes = [16, 128], strides = [1, 1]} : vector<16x512xf32> to vector<16x128xf32>
    %381 = math.tanh %380 : vector<16x128xf32>
    %382 = vector.extract_strided_slice %363 {offsets = [0, 384], sizes = [16, 128], strides = [1, 1]} : vector<16x512xf32> to vector<16x128xf32>
    %cst_141 = arith.constant 5.000000e-01 : f32
    %383 = vector.broadcast %cst_141 : f32 to vector<16x128xf32>
    %384 = arith.mulf %383, %382 : vector<16x128xf32>
    %385 = math.tanh %384 : vector<16x128xf32>
    %cst_142 = arith.constant 1.000000e+00 : f32
    %386 = vector.broadcast %cst_142 : f32 to vector<16x128xf32>
    %387 = arith.addf %386, %385 : vector<16x128xf32>
    %cst_143 = arith.constant 5.000000e-01 : f32
    %388 = vector.broadcast %cst_143 : f32 to vector<16x128xf32>
    %389 = arith.mulf %388, %387 : vector<16x128xf32>
    %390 = arith.mulf %379, %353 : vector<16x128xf32>
    %391 = arith.mulf %371, %381 : vector<16x128xf32>
    %392 = arith.addf %390, %391 : vector<16x128xf32>
    %393 = math.tanh %392 : vector<16x128xf32>
    %394 = arith.mulf %389, %393 : vector<16x128xf32>
    %395 = arith.truncf %394 : vector<16x128xf32> to vector<16x128xbf16>
    %c10_i32 = arith.constant 10 : i32
    %396 = arith.index_cast %c10_i32 : i32 to index
    %c0_144 = arith.constant 0 : index
    %c0_145 = arith.constant 0 : index
    %397 = vector.load %arg2[%396, %c0_144, %c0_145] : memref<16x16x512xbf16, #tpu.memory_space<vmem>>, vector<1x16x512xbf16>
    %398 = vector.shape_cast %397 : vector<1x16x512xbf16> to vector<16x512xbf16>
    %399 = arith.extf %398 : vector<16x512xbf16> to vector<16x512xf32>
    %c0_146 = arith.constant 0 : index
    %c0_147 = arith.constant 0 : index
    %400 = vector.load %arg3[%c0_146, %c0_147] : memref<128x512xbf16, #tpu.memory_space<vmem>>, vector<128x512xbf16>
    %cst_148 = arith.constant dense<0.000000e+00> : vector<16x512xf32>
    %401 = tpu.matmul %395, %400, %cst_148 {dimension_numbers = #tpu.dot_dimension_numbers<[1], [0], [0], [1], [0, 0, 1, 1], [], []>} : vector<16x128xbf16>, vector<128x512xbf16>, vector<16x512xf32> -> vector<16x512xf32>
    %402 = arith.addf %399, %401 : vector<16x512xf32>
    %403 = vector.extract_strided_slice %402 {offsets = [0, 0], sizes = [16, 128], strides = [1, 1]} : vector<16x512xf32> to vector<16x128xf32>
    %cst_149 = arith.constant 5.000000e-01 : f32
    %404 = vector.broadcast %cst_149 : f32 to vector<16x128xf32>
    %405 = arith.mulf %404, %403 : vector<16x128xf32>
    %406 = math.tanh %405 : vector<16x128xf32>
    %cst_150 = arith.constant 1.000000e+00 : f32
    %407 = vector.broadcast %cst_150 : f32 to vector<16x128xf32>
    %408 = arith.addf %407, %406 : vector<16x128xf32>
    %cst_151 = arith.constant 5.000000e-01 : f32
    %409 = vector.broadcast %cst_151 : f32 to vector<16x128xf32>
    %410 = arith.mulf %409, %408 : vector<16x128xf32>
    %411 = vector.extract_strided_slice %402 {offsets = [0, 128], sizes = [16, 128], strides = [1, 1]} : vector<16x512xf32> to vector<16x128xf32>
    %cst_152 = arith.constant 5.000000e-01 : f32
    %412 = vector.broadcast %cst_152 : f32 to vector<16x128xf32>
    %413 = arith.mulf %412, %411 : vector<16x128xf32>
    %414 = math.tanh %413 : vector<16x128xf32>
    %cst_153 = arith.constant 1.000000e+00 : f32
    %415 = vector.broadcast %cst_153 : f32 to vector<16x128xf32>
    %416 = arith.addf %415, %414 : vector<16x128xf32>
    %cst_154 = arith.constant 5.000000e-01 : f32
    %417 = vector.broadcast %cst_154 : f32 to vector<16x128xf32>
    %418 = arith.mulf %417, %416 : vector<16x128xf32>
    %419 = vector.extract_strided_slice %402 {offsets = [0, 256], sizes = [16, 128], strides = [1, 1]} : vector<16x512xf32> to vector<16x128xf32>
    %420 = math.tanh %419 : vector<16x128xf32>
    %421 = vector.extract_strided_slice %402 {offsets = [0, 384], sizes = [16, 128], strides = [1, 1]} : vector<16x512xf32> to vector<16x128xf32>
    %cst_155 = arith.constant 5.000000e-01 : f32
    %422 = vector.broadcast %cst_155 : f32 to vector<16x128xf32>
    %423 = arith.mulf %422, %421 : vector<16x128xf32>
    %424 = math.tanh %423 : vector<16x128xf32>
    %cst_156 = arith.constant 1.000000e+00 : f32
    %425 = vector.broadcast %cst_156 : f32 to vector<16x128xf32>
    %426 = arith.addf %425, %424 : vector<16x128xf32>
    %cst_157 = arith.constant 5.000000e-01 : f32
    %427 = vector.broadcast %cst_157 : f32 to vector<16x128xf32>
    %428 = arith.mulf %427, %426 : vector<16x128xf32>
    %429 = arith.mulf %418, %392 : vector<16x128xf32>
    %430 = arith.mulf %410, %420 : vector<16x128xf32>
    %431 = arith.addf %429, %430 : vector<16x128xf32>
    %432 = math.tanh %431 : vector<16x128xf32>
    %433 = arith.mulf %428, %432 : vector<16x128xf32>
    %434 = arith.truncf %433 : vector<16x128xf32> to vector<16x128xbf16>
    %c11_i32 = arith.constant 11 : i32
    %435 = arith.index_cast %c11_i32 : i32 to index
    %c0_158 = arith.constant 0 : index
    %c0_159 = arith.constant 0 : index
    %436 = vector.load %arg2[%435, %c0_158, %c0_159] : memref<16x16x512xbf16, #tpu.memory_space<vmem>>, vector<1x16x512xbf16>
    %437 = vector.shape_cast %436 : vector<1x16x512xbf16> to vector<16x512xbf16>
    %438 = arith.extf %437 : vector<16x512xbf16> to vector<16x512xf32>
    %c0_160 = arith.constant 0 : index
    %c0_161 = arith.constant 0 : index
    %439 = vector.load %arg3[%c0_160, %c0_161] : memref<128x512xbf16, #tpu.memory_space<vmem>>, vector<128x512xbf16>
    %cst_162 = arith.constant dense<0.000000e+00> : vector<16x512xf32>
    %440 = tpu.matmul %434, %439, %cst_162 {dimension_numbers = #tpu.dot_dimension_numbers<[1], [0], [0], [1], [0, 0, 1, 1], [], []>} : vector<16x128xbf16>, vector<128x512xbf16>, vector<16x512xf32> -> vector<16x512xf32>
    %441 = arith.addf %438, %440 : vector<16x512xf32>
    %442 = vector.extract_strided_slice %441 {offsets = [0, 0], sizes = [16, 128], strides = [1, 1]} : vector<16x512xf32> to vector<16x128xf32>
    %cst_163 = arith.constant 5.000000e-01 : f32
    %443 = vector.broadcast %cst_163 : f32 to vector<16x128xf32>
    %444 = arith.mulf %443, %442 : vector<16x128xf32>
    %445 = math.tanh %444 : vector<16x128xf32>
    %cst_164 = arith.constant 1.000000e+00 : f32
    %446 = vector.broadcast %cst_164 : f32 to vector<16x128xf32>
    %447 = arith.addf %446, %445 : vector<16x128xf32>
    %cst_165 = arith.constant 5.000000e-01 : f32
    %448 = vector.broadcast %cst_165 : f32 to vector<16x128xf32>
    %449 = arith.mulf %448, %447 : vector<16x128xf32>
    %450 = vector.extract_strided_slice %441 {offsets = [0, 128], sizes = [16, 128], strides = [1, 1]} : vector<16x512xf32> to vector<16x128xf32>
    %cst_166 = arith.constant 5.000000e-01 : f32
    %451 = vector.broadcast %cst_166 : f32 to vector<16x128xf32>
    %452 = arith.mulf %451, %450 : vector<16x128xf32>
    %453 = math.tanh %452 : vector<16x128xf32>
    %cst_167 = arith.constant 1.000000e+00 : f32
    %454 = vector.broadcast %cst_167 : f32 to vector<16x128xf32>
    %455 = arith.addf %454, %453 : vector<16x128xf32>
    %cst_168 = arith.constant 5.000000e-01 : f32
    %456 = vector.broadcast %cst_168 : f32 to vector<16x128xf32>
    %457 = arith.mulf %456, %455 : vector<16x128xf32>
    %458 = vector.extract_strided_slice %441 {offsets = [0, 256], sizes = [16, 128], strides = [1, 1]} : vector<16x512xf32> to vector<16x128xf32>
    %459 = math.tanh %458 : vector<16x128xf32>
    %460 = vector.extract_strided_slice %441 {offsets = [0, 384], sizes = [16, 128], strides = [1, 1]} : vector<16x512xf32> to vector<16x128xf32>
    %cst_169 = arith.constant 5.000000e-01 : f32
    %461 = vector.broadcast %cst_169 : f32 to vector<16x128xf32>
    %462 = arith.mulf %461, %460 : vector<16x128xf32>
    %463 = math.tanh %462 : vector<16x128xf32>
    %cst_170 = arith.constant 1.000000e+00 : f32
    %464 = vector.broadcast %cst_170 : f32 to vector<16x128xf32>
    %465 = arith.addf %464, %463 : vector<16x128xf32>
    %cst_171 = arith.constant 5.000000e-01 : f32
    %466 = vector.broadcast %cst_171 : f32 to vector<16x128xf32>
    %467 = arith.mulf %466, %465 : vector<16x128xf32>
    %468 = arith.mulf %457, %431 : vector<16x128xf32>
    %469 = arith.mulf %449, %459 : vector<16x128xf32>
    %470 = arith.addf %468, %469 : vector<16x128xf32>
    %471 = math.tanh %470 : vector<16x128xf32>
    %472 = arith.mulf %467, %471 : vector<16x128xf32>
    %473 = arith.truncf %472 : vector<16x128xf32> to vector<16x128xbf16>
    %c12_i32 = arith.constant 12 : i32
    %474 = arith.index_cast %c12_i32 : i32 to index
    %c0_172 = arith.constant 0 : index
    %c0_173 = arith.constant 0 : index
    %475 = vector.load %arg2[%474, %c0_172, %c0_173] : memref<16x16x512xbf16, #tpu.memory_space<vmem>>, vector<1x16x512xbf16>
    %476 = vector.shape_cast %475 : vector<1x16x512xbf16> to vector<16x512xbf16>
    %477 = arith.extf %476 : vector<16x512xbf16> to vector<16x512xf32>
    %c0_174 = arith.constant 0 : index
    %c0_175 = arith.constant 0 : index
    %478 = vector.load %arg3[%c0_174, %c0_175] : memref<128x512xbf16, #tpu.memory_space<vmem>>, vector<128x512xbf16>
    %cst_176 = arith.constant dense<0.000000e+00> : vector<16x512xf32>
    %479 = tpu.matmul %473, %478, %cst_176 {dimension_numbers = #tpu.dot_dimension_numbers<[1], [0], [0], [1], [0, 0, 1, 1], [], []>} : vector<16x128xbf16>, vector<128x512xbf16>, vector<16x512xf32> -> vector<16x512xf32>
    %480 = arith.addf %477, %479 : vector<16x512xf32>
    %481 = vector.extract_strided_slice %480 {offsets = [0, 0], sizes = [16, 128], strides = [1, 1]} : vector<16x512xf32> to vector<16x128xf32>
    %cst_177 = arith.constant 5.000000e-01 : f32
    %482 = vector.broadcast %cst_177 : f32 to vector<16x128xf32>
    %483 = arith.mulf %482, %481 : vector<16x128xf32>
    %484 = math.tanh %483 : vector<16x128xf32>
    %cst_178 = arith.constant 1.000000e+00 : f32
    %485 = vector.broadcast %cst_178 : f32 to vector<16x128xf32>
    %486 = arith.addf %485, %484 : vector<16x128xf32>
    %cst_179 = arith.constant 5.000000e-01 : f32
    %487 = vector.broadcast %cst_179 : f32 to vector<16x128xf32>
    %488 = arith.mulf %487, %486 : vector<16x128xf32>
    %489 = vector.extract_strided_slice %480 {offsets = [0, 128], sizes = [16, 128], strides = [1, 1]} : vector<16x512xf32> to vector<16x128xf32>
    %cst_180 = arith.constant 5.000000e-01 : f32
    %490 = vector.broadcast %cst_180 : f32 to vector<16x128xf32>
    %491 = arith.mulf %490, %489 : vector<16x128xf32>
    %492 = math.tanh %491 : vector<16x128xf32>
    %cst_181 = arith.constant 1.000000e+00 : f32
    %493 = vector.broadcast %cst_181 : f32 to vector<16x128xf32>
    %494 = arith.addf %493, %492 : vector<16x128xf32>
    %cst_182 = arith.constant 5.000000e-01 : f32
    %495 = vector.broadcast %cst_182 : f32 to vector<16x128xf32>
    %496 = arith.mulf %495, %494 : vector<16x128xf32>
    %497 = vector.extract_strided_slice %480 {offsets = [0, 256], sizes = [16, 128], strides = [1, 1]} : vector<16x512xf32> to vector<16x128xf32>
    %498 = math.tanh %497 : vector<16x128xf32>
    %499 = vector.extract_strided_slice %480 {offsets = [0, 384], sizes = [16, 128], strides = [1, 1]} : vector<16x512xf32> to vector<16x128xf32>
    %cst_183 = arith.constant 5.000000e-01 : f32
    %500 = vector.broadcast %cst_183 : f32 to vector<16x128xf32>
    %501 = arith.mulf %500, %499 : vector<16x128xf32>
    %502 = math.tanh %501 : vector<16x128xf32>
    %cst_184 = arith.constant 1.000000e+00 : f32
    %503 = vector.broadcast %cst_184 : f32 to vector<16x128xf32>
    %504 = arith.addf %503, %502 : vector<16x128xf32>
    %cst_185 = arith.constant 5.000000e-01 : f32
    %505 = vector.broadcast %cst_185 : f32 to vector<16x128xf32>
    %506 = arith.mulf %505, %504 : vector<16x128xf32>
    %507 = arith.mulf %496, %470 : vector<16x128xf32>
    %508 = arith.mulf %488, %498 : vector<16x128xf32>
    %509 = arith.addf %507, %508 : vector<16x128xf32>
    %510 = math.tanh %509 : vector<16x128xf32>
    %511 = arith.mulf %506, %510 : vector<16x128xf32>
    %512 = arith.truncf %511 : vector<16x128xf32> to vector<16x128xbf16>
    %c13_i32 = arith.constant 13 : i32
    %513 = arith.index_cast %c13_i32 : i32 to index
    %c0_186 = arith.constant 0 : index
    %c0_187 = arith.constant 0 : index
    %514 = vector.load %arg2[%513, %c0_186, %c0_187] : memref<16x16x512xbf16, #tpu.memory_space<vmem>>, vector<1x16x512xbf16>
    %515 = vector.shape_cast %514 : vector<1x16x512xbf16> to vector<16x512xbf16>
    %516 = arith.extf %515 : vector<16x512xbf16> to vector<16x512xf32>
    %c0_188 = arith.constant 0 : index
    %c0_189 = arith.constant 0 : index
    %517 = vector.load %arg3[%c0_188, %c0_189] : memref<128x512xbf16, #tpu.memory_space<vmem>>, vector<128x512xbf16>
    %cst_190 = arith.constant dense<0.000000e+00> : vector<16x512xf32>
    %518 = tpu.matmul %512, %517, %cst_190 {dimension_numbers = #tpu.dot_dimension_numbers<[1], [0], [0], [1], [0, 0, 1, 1], [], []>} : vector<16x128xbf16>, vector<128x512xbf16>, vector<16x512xf32> -> vector<16x512xf32>
    %519 = arith.addf %516, %518 : vector<16x512xf32>
    %520 = vector.extract_strided_slice %519 {offsets = [0, 0], sizes = [16, 128], strides = [1, 1]} : vector<16x512xf32> to vector<16x128xf32>
    %cst_191 = arith.constant 5.000000e-01 : f32
    %521 = vector.broadcast %cst_191 : f32 to vector<16x128xf32>
    %522 = arith.mulf %521, %520 : vector<16x128xf32>
    %523 = math.tanh %522 : vector<16x128xf32>
    %cst_192 = arith.constant 1.000000e+00 : f32
    %524 = vector.broadcast %cst_192 : f32 to vector<16x128xf32>
    %525 = arith.addf %524, %523 : vector<16x128xf32>
    %cst_193 = arith.constant 5.000000e-01 : f32
    %526 = vector.broadcast %cst_193 : f32 to vector<16x128xf32>
    %527 = arith.mulf %526, %525 : vector<16x128xf32>
    %528 = vector.extract_strided_slice %519 {offsets = [0, 128], sizes = [16, 128], strides = [1, 1]} : vector<16x512xf32> to vector<16x128xf32>
    %cst_194 = arith.constant 5.000000e-01 : f32
    %529 = vector.broadcast %cst_194 : f32 to vector<16x128xf32>
    %530 = arith.mulf %529, %528 : vector<16x128xf32>
    %531 = math.tanh %530 : vector<16x128xf32>
    %cst_195 = arith.constant 1.000000e+00 : f32
    %532 = vector.broadcast %cst_195 : f32 to vector<16x128xf32>
    %533 = arith.addf %532, %531 : vector<16x128xf32>
    %cst_196 = arith.constant 5.000000e-01 : f32
    %534 = vector.broadcast %cst_196 : f32 to vector<16x128xf32>
    %535 = arith.mulf %534, %533 : vector<16x128xf32>
    %536 = vector.extract_strided_slice %519 {offsets = [0, 256], sizes = [16, 128], strides = [1, 1]} : vector<16x512xf32> to vector<16x128xf32>
    %537 = math.tanh %536 : vector<16x128xf32>
    %538 = vector.extract_strided_slice %519 {offsets = [0, 384], sizes = [16, 128], strides = [1, 1]} : vector<16x512xf32> to vector<16x128xf32>
    %cst_197 = arith.constant 5.000000e-01 : f32
    %539 = vector.broadcast %cst_197 : f32 to vector<16x128xf32>
    %540 = arith.mulf %539, %538 : vector<16x128xf32>
    %541 = math.tanh %540 : vector<16x128xf32>
    %cst_198 = arith.constant 1.000000e+00 : f32
    %542 = vector.broadcast %cst_198 : f32 to vector<16x128xf32>
    %543 = arith.addf %542, %541 : vector<16x128xf32>
    %cst_199 = arith.constant 5.000000e-01 : f32
    %544 = vector.broadcast %cst_199 : f32 to vector<16x128xf32>
    %545 = arith.mulf %544, %543 : vector<16x128xf32>
    %546 = arith.mulf %535, %509 : vector<16x128xf32>
    %547 = arith.mulf %527, %537 : vector<16x128xf32>
    %548 = arith.addf %546, %547 : vector<16x128xf32>
    %549 = math.tanh %548 : vector<16x128xf32>
    %550 = arith.mulf %545, %549 : vector<16x128xf32>
    %551 = arith.truncf %550 : vector<16x128xf32> to vector<16x128xbf16>
    %c14_i32 = arith.constant 14 : i32
    %552 = arith.index_cast %c14_i32 : i32 to index
    %c0_200 = arith.constant 0 : index
    %c0_201 = arith.constant 0 : index
    %553 = vector.load %arg2[%552, %c0_200, %c0_201] : memref<16x16x512xbf16, #tpu.memory_space<vmem>>, vector<1x16x512xbf16>
    %554 = vector.shape_cast %553 : vector<1x16x512xbf16> to vector<16x512xbf16>
    %555 = arith.extf %554 : vector<16x512xbf16> to vector<16x512xf32>
    %c0_202 = arith.constant 0 : index
    %c0_203 = arith.constant 0 : index
    %556 = vector.load %arg3[%c0_202, %c0_203] : memref<128x512xbf16, #tpu.memory_space<vmem>>, vector<128x512xbf16>
    %cst_204 = arith.constant dense<0.000000e+00> : vector<16x512xf32>
    %557 = tpu.matmul %551, %556, %cst_204 {dimension_numbers = #tpu.dot_dimension_numbers<[1], [0], [0], [1], [0, 0, 1, 1], [], []>} : vector<16x128xbf16>, vector<128x512xbf16>, vector<16x512xf32> -> vector<16x512xf32>
    %558 = arith.addf %555, %557 : vector<16x512xf32>
    %559 = vector.extract_strided_slice %558 {offsets = [0, 0], sizes = [16, 128], strides = [1, 1]} : vector<16x512xf32> to vector<16x128xf32>
    %cst_205 = arith.constant 5.000000e-01 : f32
    %560 = vector.broadcast %cst_205 : f32 to vector<16x128xf32>
    %561 = arith.mulf %560, %559 : vector<16x128xf32>
    %562 = math.tanh %561 : vector<16x128xf32>
    %cst_206 = arith.constant 1.000000e+00 : f32
    %563 = vector.broadcast %cst_206 : f32 to vector<16x128xf32>
    %564 = arith.addf %563, %562 : vector<16x128xf32>
    %cst_207 = arith.constant 5.000000e-01 : f32
    %565 = vector.broadcast %cst_207 : f32 to vector<16x128xf32>
    %566 = arith.mulf %565, %564 : vector<16x128xf32>
    %567 = vector.extract_strided_slice %558 {offsets = [0, 128], sizes = [16, 128], strides = [1, 1]} : vector<16x512xf32> to vector<16x128xf32>
    %cst_208 = arith.constant 5.000000e-01 : f32
    %568 = vector.broadcast %cst_208 : f32 to vector<16x128xf32>
    %569 = arith.mulf %568, %567 : vector<16x128xf32>
    %570 = math.tanh %569 : vector<16x128xf32>
    %cst_209 = arith.constant 1.000000e+00 : f32
    %571 = vector.broadcast %cst_209 : f32 to vector<16x128xf32>
    %572 = arith.addf %571, %570 : vector<16x128xf32>
    %cst_210 = arith.constant 5.000000e-01 : f32
    %573 = vector.broadcast %cst_210 : f32 to vector<16x128xf32>
    %574 = arith.mulf %573, %572 : vector<16x128xf32>
    %575 = vector.extract_strided_slice %558 {offsets = [0, 256], sizes = [16, 128], strides = [1, 1]} : vector<16x512xf32> to vector<16x128xf32>
    %576 = math.tanh %575 : vector<16x128xf32>
    %577 = vector.extract_strided_slice %558 {offsets = [0, 384], sizes = [16, 128], strides = [1, 1]} : vector<16x512xf32> to vector<16x128xf32>
    %cst_211 = arith.constant 5.000000e-01 : f32
    %578 = vector.broadcast %cst_211 : f32 to vector<16x128xf32>
    %579 = arith.mulf %578, %577 : vector<16x128xf32>
    %580 = math.tanh %579 : vector<16x128xf32>
    %cst_212 = arith.constant 1.000000e+00 : f32
    %581 = vector.broadcast %cst_212 : f32 to vector<16x128xf32>
    %582 = arith.addf %581, %580 : vector<16x128xf32>
    %cst_213 = arith.constant 5.000000e-01 : f32
    %583 = vector.broadcast %cst_213 : f32 to vector<16x128xf32>
    %584 = arith.mulf %583, %582 : vector<16x128xf32>
    %585 = arith.mulf %574, %548 : vector<16x128xf32>
    %586 = arith.mulf %566, %576 : vector<16x128xf32>
    %587 = arith.addf %585, %586 : vector<16x128xf32>
    %588 = math.tanh %587 : vector<16x128xf32>
    %589 = arith.mulf %584, %588 : vector<16x128xf32>
    %590 = arith.truncf %589 : vector<16x128xf32> to vector<16x128xbf16>
    %c15_i32 = arith.constant 15 : i32
    %591 = arith.index_cast %c15_i32 : i32 to index
    %c0_214 = arith.constant 0 : index
    %c0_215 = arith.constant 0 : index
    %592 = vector.load %arg2[%591, %c0_214, %c0_215] : memref<16x16x512xbf16, #tpu.memory_space<vmem>>, vector<1x16x512xbf16>
    %593 = vector.shape_cast %592 : vector<1x16x512xbf16> to vector<16x512xbf16>
    %594 = arith.extf %593 : vector<16x512xbf16> to vector<16x512xf32>
    %c0_216 = arith.constant 0 : index
    %c0_217 = arith.constant 0 : index
    %595 = vector.load %arg3[%c0_216, %c0_217] : memref<128x512xbf16, #tpu.memory_space<vmem>>, vector<128x512xbf16>
    %cst_218 = arith.constant dense<0.000000e+00> : vector<16x512xf32>
    %596 = tpu.matmul %590, %595, %cst_218 {dimension_numbers = #tpu.dot_dimension_numbers<[1], [0], [0], [1], [0, 0, 1, 1], [], []>} : vector<16x128xbf16>, vector<128x512xbf16>, vector<16x512xf32> -> vector<16x512xf32>
    %597 = arith.addf %594, %596 : vector<16x512xf32>
    %598 = vector.extract_strided_slice %597 {offsets = [0, 0], sizes = [16, 128], strides = [1, 1]} : vector<16x512xf32> to vector<16x128xf32>
    %cst_219 = arith.constant 5.000000e-01 : f32
    %599 = vector.broadcast %cst_219 : f32 to vector<16x128xf32>
    %600 = arith.mulf %599, %598 : vector<16x128xf32>
    %601 = math.tanh %600 : vector<16x128xf32>
    %cst_220 = arith.constant 1.000000e+00 : f32
    %602 = vector.broadcast %cst_220 : f32 to vector<16x128xf32>
    %603 = arith.addf %602, %601 : vector<16x128xf32>
    %cst_221 = arith.constant 5.000000e-01 : f32
    %604 = vector.broadcast %cst_221 : f32 to vector<16x128xf32>
    %605 = arith.mulf %604, %603 : vector<16x128xf32>
    %606 = vector.extract_strided_slice %597 {offsets = [0, 128], sizes = [16, 128], strides = [1, 1]} : vector<16x512xf32> to vector<16x128xf32>
    %cst_222 = arith.constant 5.000000e-01 : f32
    %607 = vector.broadcast %cst_222 : f32 to vector<16x128xf32>
    %608 = arith.mulf %607, %606 : vector<16x128xf32>
    %609 = math.tanh %608 : vector<16x128xf32>
    %cst_223 = arith.constant 1.000000e+00 : f32
    %610 = vector.broadcast %cst_223 : f32 to vector<16x128xf32>
    %611 = arith.addf %610, %609 : vector<16x128xf32>
    %cst_224 = arith.constant 5.000000e-01 : f32
    %612 = vector.broadcast %cst_224 : f32 to vector<16x128xf32>
    %613 = arith.mulf %612, %611 : vector<16x128xf32>
    %614 = vector.extract_strided_slice %597 {offsets = [0, 256], sizes = [16, 128], strides = [1, 1]} : vector<16x512xf32> to vector<16x128xf32>
    %615 = math.tanh %614 : vector<16x128xf32>
    %616 = vector.extract_strided_slice %597 {offsets = [0, 384], sizes = [16, 128], strides = [1, 1]} : vector<16x512xf32> to vector<16x128xf32>
    %cst_225 = arith.constant 5.000000e-01 : f32
    %617 = vector.broadcast %cst_225 : f32 to vector<16x128xf32>
    %618 = arith.mulf %617, %616 : vector<16x128xf32>
    %619 = math.tanh %618 : vector<16x128xf32>
    %cst_226 = arith.constant 1.000000e+00 : f32
    %620 = vector.broadcast %cst_226 : f32 to vector<16x128xf32>
    %621 = arith.addf %620, %619 : vector<16x128xf32>
    %cst_227 = arith.constant 5.000000e-01 : f32
    %622 = vector.broadcast %cst_227 : f32 to vector<16x128xf32>
    %623 = arith.mulf %622, %621 : vector<16x128xf32>
    %624 = arith.mulf %613, %587 : vector<16x128xf32>
    %625 = arith.mulf %605, %615 : vector<16x128xf32>
    %626 = arith.addf %624, %625 : vector<16x128xf32>
    %627 = math.tanh %626 : vector<16x128xf32>
    %628 = arith.mulf %623, %627 : vector<16x128xf32>
    %629 = arith.truncf %628 : vector<16x128xf32> to vector<16x128xbf16>
    %c16_i32 = arith.constant 16 : i32
    %c0_228 = arith.constant 0 : index
    %c0_229 = arith.constant 0 : index
    %630 = vector.load %arg5[%c0_228, %c0_229] : memref<16x128xf32, #tpu.memory_space<vmem>>, vector<16x128xf32>
    tpu.vector_store %arg5[%c0_228, %c0_229], %628 {strides = array<i32>} : memref<16x128xf32, #tpu.memory_space<vmem>>, vector<16x128xf32>,
    %c0_230 = arith.constant 0 : index
    %c0_231 = arith.constant 0 : index
    %631 = vector.load %arg6[%c0_230, %c0_231] : memref<16x128xf32, #tpu.memory_space<vmem>>, vector<16x128xf32>
    tpu.vector_store %arg6[%c0_230, %c0_231], %626 {strides = array<i32>} : memref<16x128xf32, #tpu.memory_space<vmem>>, vector<16x128xf32>,
    %c0_i32_232 = arith.constant 0 : i32
    %632 = arith.cmpi eq, %arg1, %c0_i32_232 : i32
    %633 = arith.extui %632 : i1 to i32
    %c0_i32_233 = arith.constant 0 : i32
    %634 = arith.cmpi ne, %633, %c0_i32_233 : i32
    scf.if %634 {
      %c0_234 = arith.constant 0 : index
      %c0_235 = arith.constant 0 : index
      %635 = vector.load %arg4[%c0_234, %c0_235] : memref<16x128xf32, #tpu.memory_space<vmem>>, vector<16x128xf32>
      tpu.vector_store %arg4[%c0_234, %c0_235], %628 {strides = array<i32>} : memref<16x128xf32, #tpu.memory_space<vmem>>, vector<16x128xf32>,
    } else {
    }
    return
  }
  func.func @transform_0(%arg0: i32, %arg1: i32) -> (i32, i32, i32) {
    %c0_i32 = arith.constant 0 : i32
    %c0_i32_0 = arith.constant 0 : i32
    return %arg1, %arg0, %c0_i32 : i32, i32, i32
  }
  func.func @transform_1(%arg0: i32, %arg1: i32) -> (i32, i32) {
    %c0_i32 = arith.constant 0 : i32
    %c0_i32_0 = arith.constant 0 : i32
    %c0_i32_1 = arith.constant 0 : i32
    return %c0_i32, %c0_i32_0 : i32, i32
  }
  func.func @transform_2(%arg0: i32, %arg1: i32) -> (i32, i32) {
    %c0_i32 = arith.constant 0 : i32
    %c0_i32_0 = arith.constant 0 : i32
    return %arg0, %c0_i32 : i32, i32
  }
}

</mosaic_0001>

<bundles_post_ra>
// kernel: tpu_custom_call.1
= control target key start
LH: loop header
LB: loop body
LE: loop exit
PB: predicated region body
PF: predicated region fallthrough
CT: control target
= control target key end

     0   :  { %7 = vsyncpa [#allocation5], 0  ;;  %s4036_s0 = inlined_call_operand.hbm [shape: bf16[16,16,512], index: 0, kind: input, shape index: {}]   ;;  %s4037_s1 = inlined_call_operand.hbm [shape: bf16[128,512], index: 1, kind: input, shape index: {}]   ;;  %s4038_s2 = inlined_call_operand.hbm [shape: f32[16,128], index: 2, kind: output, shape index: {}]  }
   0x1   :  { %8 = vsyncpa [#allocation8], 0 }
   0x2   :  { %9 = vsyncpa [#allocation6], 0  ;;  %s3135_s9 = smov [#allocation4]   ;;  %s3063_s13 = scalar_lea.hbm %s4036_s0, 8192 }
   0x3   :  { %s15_s10 = sshll.u32 %s3135_s9, 4  ;;  %p3064_p0 = scmp.ne.s32.totalorder %s4036_s0, %s3063_s13  ;;  %s16_s10 = int_to_ptr.vmem [resolvable:$true] %s15_s10 }
   0x4   :  { %p3067_p1 = scmp.lt.u32.totalorder %s3063_s13, %s4036_s0 }
   0x6   :  { %p3069_p2 = pnand %p3067_p1, %p3064_p0 }
   0x8   :  { %3072 = shalt.err (!%p3069_p2)
}
   0x9   :  { %s3073_s18 = scalar_lea.vmem %s16_s10, 8192  ;;  %p3078_p4 = scmp.lt.s32.totalorder %s16_s10, %s16_s10 }
   0xa   :  { %p3074_p3 = scmp.ne.s32.totalorder %s16_s10, %s3073_s18  ;;  %p3079_p5 = scmp.lt.s32.totalorder %s3073_s18, %s3073_s18 }
   0xc   :  { %p3080_p6 = por %p3079_p5, %p3078_p4 }
   0xe   :  { %p3081_p7 = pnand %p3080_p6, %p3074_p3 }
  0x10   :  { %3084 = shalt.err (!%p3081_p7)
}
  0x11   :  { %s3136_s19 = smov 256   ;;  %s3137_s20 = smov 16  }
  0x12   :  { %21 = dma.hbm_to_vmem [thread:$0]  %s4036_s0, 8192, %s16_s10, [#allocation5], %s3136_s19, %s3136_s19, %s3137_s20  }
  0x13   :  { %s3138_s23 = smov [#allocation7]   ;;  %s3085_s27 = scalar_lea.hbm %s4037_s1, 4096 }
  0x14   :  { %s27_s24 = sshll.u32 %s3138_s23, 4  ;;  %p3086_p8 = scmp.ne.s32.totalorder %s4037_s1, %s3085_s27  ;;  %s28_s24 = int_to_ptr.vmem [resolvable:$true] %s27_s24 }
  0x15   :  { %p3089_p9 = scmp.lt.u32.totalorder %s3085_s27, %s4037_s1 }
  0x17   :  { %p3091_p10 = pnand %p3089_p9, %p3086_p8 }
  0x19   :  { %3094 = shalt.err (!%p3091_p10)
}
  0x1a   :  { %s3095_s4 = scalar_lea.vmem %s28_s24, 4096  ;;  %p3100_p12 = scmp.lt.s32.totalorder %s28_s24, %s28_s24 }
  0x1b   :  { %p3096_p11 = scmp.ne.s32.totalorder %s28_s24, %s3095_s4  ;;  %p3101_p13 = scmp.lt.s32.totalorder %s3095_s4, %s3095_s4 }
  0x1d   :  { %p3102_p0 = por %p3101_p13, %p3100_p12 }
  0x1f   :  { %p3103_p1 = pnand %p3102_p0, %p3096_p11 }
  0x21   :  { %3106 = shalt.err (!%p3103_p1)
}
  0x22   :  { %33 = dma.hbm_to_vmem [thread:$0]  %s4037_s1, 4096, %s28_s24, [#allocation8], %s3136_s19, %s3136_s19, %s3137_s20  }
  0x23   :  { %3129 = dma.done.wait [#allocation5], 8192  }
  0x24   :  { %3130 = vsyncadd [#allocation5], 4294959104 }
  0x25   :  { %3131 = dma.done.wait [#allocation8], 4096  }
  0x26   :  { %3132 = vsyncadd [#allocation8], 4294963200  ;;  %v3139_v0 = vmov 0   ;;  %v3185_v1 = vld [vmem:[#allocation7 + $0x4] ss:$16 sps:$4 sm:$0xff]   ;;  %v3140_v33 = vmov 0.0|0.0  }
  0x27   :  { %290 = vmatprep.mubr.bf16.mxu0 %v3139_v0  ;;  %333 = vmatprep.mubr.bf16.mxu1 %v3139_v0  ;;  %v3187_v2 = vld [vmem:[#allocation7] ss:$16 sps:$4 sm:$0xff]   ;;  %v3190_v3 = vld [vmem:[#allocation7 + $0x24] ss:$16 sps:$4 sm:$0xff]   ;;  %v3193_v4 = vld [vmem:[#allocation7 + $0xc] ss:$16 sps:$4 sm:$0xff]  }
  0x28   :  { %258 = vmatprep.subr.bf16.mxu0 %v3185_v1  ;;  %v3195_v5 = vld [vmem:[#allocation7 + $0x20] ss:$16 sps:$4 sm:$0xff]   ;;  %v3197_v6 = vld [vmem:[#allocation7 + $0x8] ss:$16 sps:$4 sm:$0xff]   ;;  %v3200_v7 = vld [vmem:[#allocation7 + $0x44] ss:$16 sps:$4 sm:$0xff]   ;;  %301 = vmatprep.subr.bf16.mxu1 %v3193_v4 }
  0x29   :  { %259 = vmatpush1.bf16.msra.mxu0 %v3187_v2  ;;  %v3203_v8 = vld [vmem:[#allocation7 + $0x2c] ss:$16 sps:$4 sm:$0xff]   ;;  %302 = vmatpush1.bf16.msra.mxu1 %v3197_v6  ;;  %v3206_v9 = vld [vmem:[#allocation7 + $0x28] ss:$16 sps:$4 sm:$0xff]   ;;  %v3210_v10 = vld [vmem:[#allocation7 + $0x40] ss:$16 sps:$4 sm:$0xff]  }
  0x2a   :  { %260 = vmatprep.subr.bf16.mxu0 %v3190_v3  ;;  %303 = vmatprep.subr.bf16.mxu1 %v3203_v8  ;;  %v3213_v11 = vld [vmem:[#allocation7 + $0x64] ss:$16 sps:$4 sm:$0xff]   ;;  %v3215_v12 = vld [vmem:[#allocation7 + $0x4c] ss:$16 sps:$4 sm:$0xff]   ;;  %v3218_v13 = vld [vmem:[#allocation7 + $0x48] ss:$16 sps:$4 sm:$0xff]  }
  0x2b   :  { %v3222_v14 = vld [vmem:[#allocation7 + $0x60] ss:$16 sps:$4 sm:$0xff]   ;;  %v3224_v15 = vld [vmem:[#allocation7 + $0x6c] ss:$16 sps:$4 sm:$0xff]   ;;  %v3227_v16 = vld [vmem:[#allocation7 + $0x84] ss:$16 sps:$4 sm:$0xff]  }
  0x2c   :  { %v3230_v17 = vld [vmem:[#allocation7 + $0x80] ss:$16 sps:$4 sm:$0xff]   ;;  %v3232_v18 = vld [vmem:[#allocation7 + $0x68] ss:$16 sps:$4 sm:$0xff]   ;;  %v3236_v19 = vld [vmem:[#allocation7 + $0x8c] ss:$16 sps:$4 sm:$0xff]  }
  0x2d   :  { %261 = vmatpush1.bf16.msra.mxu0 %v3195_v5  ;;  %304 = vmatpush1.bf16.msra.mxu1 %v3206_v9  ;;  %v3239_v20 = vld [vmem:[#allocation7 + $0xa4] ss:$16 sps:$4 sm:$0xff]   ;;  %v3242_v21 = vld [vmem:[#allocation7 + $0x88] ss:$16 sps:$4 sm:$0xff]   ;;  %v3246_v22 = vld [vmem:[#allocation7 + $0xa0] ss:$16 sps:$4 sm:$0xff]  }
  0x2e   :  { %262 = vmatprep.subr.bf16.mxu0 %v3200_v7  ;;  %305 = vmatprep.subr.bf16.mxu1 %v3215_v12  ;;  %v3248_v23 = vld [vmem:[#allocation7 + $0xac] ss:$16 sps:$4 sm:$0xff]   ;;  %v3251_v24 = vld [vmem:[#allocation7 + $0xc4] ss:$16 sps:$4 sm:$0xff]   ;;  %v3254_v25 = vld [vmem:[#allocation7 + $0xa8] ss:$16 sps:$4 sm:$0xff]  }
  0x2f   :  { %v3258_v26 = vld [vmem:[#allocation7 + $0xc0] ss:$16 sps:$4 sm:$0xff]   ;;  %v3260_v27 = vld [vmem:[#allocation7 + $0xcc] ss:$16 sps:$4 sm:$0xff]   ;;  %v3263_v28 = vld [vmem:[#allocation7 + $0xe4] ss:$16 sps:$4 sm:$0xff]  }
  0x30   :  { %v3266_v29 = vld [vmem:[#allocation7 + $0xc8] ss:$16 sps:$4 sm:$0xff]   ;;  %v3270_v30 = vld [vmem:[#allocation7 + $0xe0] ss:$16 sps:$4 sm:$0xff]   ;;  %v3272_v31 = vld [vmem:[#allocation7 + $0xec] ss:$16 sps:$4 sm:$0xff]  }
  0x31   :  { %263 = vmatpush1.bf16.msra.mxu0 %v3210_v10  ;;  %306 = vmatpush1.bf16.msra.mxu1 %v3218_v13  ;;  %v3276_v32 = vld [vmem:[#allocation7 + $0xe8] ss:$16 sps:$4 sm:$0xff]   ;;  %v54_v34 = vld [vmem:[#allocation4] sm:$0xff]  ;;  %v56_v35 = vld [vmem:[#allocation4 + $0x10] sm:$0xff]  ;;  %s3141_s1 = smov [#allocation9]  }
  0x32   :  { %264 = vmatprep.subr.bf16.mxu0 %v3213_v11  ;;  %307 = vmatprep.subr.bf16.mxu1 %v3224_v15  ;;  %v58_v36 = vunpack.c.l.bf16 %v54_v34  ;;  %v59_v37 = vunpack.c.h.bf16 %v54_v34  ;;  %v55_v38 = vld [vmem:[#allocation4 + $0x8] sm:$0xff]  ;;  %v62_v39 = vunpack.c.l.bf16 %v56_v35  ;;  %v63_v41 = vunpack.c.h.bf16 %v56_v35  ;;  %v57_v42 = vld [vmem:[#allocation4 + $0x18] sm:$0xff]  ;;  %s2562_s6 = sshll.u32 %s3141_s1, 4  ;;  %s2563_s6 = int_to_ptr.vmem [resolvable:$true] %s2562_s6 }
  0x33   :  { %v60_v45 = vunpack.c.l.bf16 %v55_v38  ;;  %v64_v52 = vunpack.c.l.bf16 %v57_v42  ;;  %v61_v60 = vunpack.c.h.bf16 %v55_v38  ;;  %v65_v63 = vunpack.c.h.bf16 %v57_v42  ;;  %s3107_s7 = scalar_lea.vmem %s2563_s6, 256  ;;  %p3112_p3 = scmp.lt.s32.totalorder %s2563_s6, %s2563_s6 }
  0x34   :  { %p3108_p2 = scmp.ne.s32.totalorder %s2563_s6, %s3107_s7  ;;  %p3113_p4 = scmp.lt.s32.totalorder %s3107_s7, %s3107_s7 }
  0x35   :  { %265 = vmatpush1.bf16.msra.mxu0 %v3222_v14  ;;  %308 = vmatpush1.bf16.msra.mxu1 %v3232_v18 }
  0x36   :  { %266 = vmatprep.subr.bf16.mxu0 %v3227_v16  ;;  %309 = vmatprep.subr.bf16.mxu1 %v3236_v19  ;;  %p3114_p5 = por %p3113_p4, %p3112_p3 }
  0x38   :  { %p3115_p6 = pnand %p3114_p5, %p3108_p2 }
  0x39   :  { %267 = vmatpush1.bf16.msra.mxu0 %v3230_v17  ;;  %310 = vmatpush1.bf16.msra.mxu1 %v3242_v21 }
  0x3a   :  { %268 = vmatprep.subr.bf16.mxu0 %v3239_v20  ;;  %311 = vmatprep.subr.bf16.mxu1 %v3248_v23 }
  0x3d   :  { %269 = vmatpush1.bf16.msra.mxu0 %v3246_v22  ;;  %312 = vmatpush1.bf16.msra.mxu1 %v3254_v25 }
  0x3e   :  { %270 = vmatprep.subr.bf16.mxu0 %v3251_v24  ;;  %313 = vmatprep.subr.bf16.mxu1 %v3260_v27 }
  0x41   :  { %271 = vmatpush1.bf16.msra.mxu0 %v3258_v26  ;;  %314 = vmatpush1.bf16.msra.mxu1 %v3266_v29 }
  0x42   :  { %272 = vmatprep.subr.bf16.mxu0 %v3263_v28  ;;  %315 = vmatprep.subr.bf16.mxu1 %v3272_v31 }
  0x45   :  { %273 = vmatpush1.bf16.msra.mxu0 %v3270_v30  ;;  %316 = vmatpush1.bf16.msra.mxu1 %v3276_v32 }
  0x46   :  { %402 = vmatprep.subr.bf16.mxu0 %v3185_v1  ;;  %445 = vmatprep.subr.bf16.mxu1 %v3193_v4 }
  0x48   :  { %291 = vmatmul.mubr.bf16.vlgmr.msra.gmra.mrb[0].mxu0 %v3140_v33  ;;  %334 = vmatmul.mubr.bf16.vlgmr.msra.gmra.mrb[0].mxu1 %v3140_v33 }
  0x49   :  { %403 = vmatpush1.bf16.msra.mxu0 %v3187_v2  ;;  %434 = vmatprep.mubr.bf16.mxu0 %v3139_v0 }
  0x4a   :  { %404 = vmatprep.subr.bf16.mxu0 %v3190_v3  ;;  %446 = vmatpush1.bf16.msra.mxu1 %v3197_v6 }
  0x4b   :  { %477 = vmatprep.mubr.bf16.mxu1 %v3139_v0  ;;  %447 = vmatprep.subr.bf16.mxu1 %v3203_v8 }
  0x4d   :  { %405 = vmatpush1.bf16.msra.mxu0 %v3195_v5 }
  0x4e   :  { %406 = vmatprep.subr.bf16.mxu0 %v3200_v7  ;;  %448 = vmatpush1.bf16.msra.mxu1 %v3206_v9 }
  0x4f   :  { %449 = vmatprep.subr.bf16.mxu1 %v3215_v12 }
  0x51   :  { %407 = vmatpush1.bf16.msra.mxu0 %v3210_v10 }
  0x52   :  { %408 = vmatprep.subr.bf16.mxu0 %v3213_v11  ;;  %450 = vmatpush1.bf16.msra.mxu1 %v3218_v13 }
  0x53   :  { %451 = vmatprep.subr.bf16.mxu1 %v3224_v15 }
  0x55   :  { %409 = vmatpush1.bf16.msra.mxu0 %v3222_v14 }
  0x56   :  { %410 = vmatprep.subr.bf16.mxu0 %v3227_v16  ;;  %452 = vmatpush1.bf16.msra.mxu1 %v3232_v18 }
  0x57   :  { %453 = vmatprep.subr.bf16.mxu1 %v3236_v19 }
  0x59   :  { %411 = vmatpush1.bf16.msra.mxu0 %v3230_v17 }
  0x5a   :  { %412 = vmatprep.subr.bf16.mxu0 %v3239_v20  ;;  %454 = vmatpush1.bf16.msra.mxu1 %v3242_v21 }
  0x5b   :  { %455 = vmatprep.subr.bf16.mxu1 %v3248_v23 }
  0x5d   :  { %413 = vmatpush1.bf16.msra.mxu0 %v3246_v22 }
  0x5e   :  { %414 = vmatprep.subr.bf16.mxu0 %v3251_v24  ;;  %456 = vmatpush1.bf16.msra.mxu1 %v3254_v25 }
  0x5f   :  { %457 = vmatprep.subr.bf16.mxu1 %v3260_v27 }
  0x61   :  { %415 = vmatpush1.bf16.msra.mxu0 %v3258_v26 }
  0x62   :  { %416 = vmatprep.subr.bf16.mxu0 %v3263_v28  ;;  %458 = vmatpush1.bf16.msra.mxu1 %v3266_v29 }
  0x63   :  { %459 = vmatprep.subr.bf16.mxu1 %v3272_v31 }
  0x65   :  { %417 = vmatpush1.bf16.msra.mxu0 %v3270_v30 }
  0x66   :  { %546 = vmatprep.subr.bf16.mxu0 %v3185_v1  ;;  %460 = vmatpush1.bf16.msra.mxu1 %v3276_v32 }
  0x67   :  { %589 = vmatprep.subr.bf16.mxu1 %v3193_v4 }
 0x11b   :  { %v292_v40 = vpop.f32.mrb[0].mxu0  ;;  %v335_v51 = vpop.f32.mrb[0].mxu1 }
 0x11c   :  { %v344_v43 = vadd.f32 %v292_v40, %v58_v36  ;;  %v294_v44 = vpop.f32.mrb[1].mxu0  ;;  %v337_v55 = vpop.f32.mrb[1].mxu1  ;;  %v346_v57 = vadd.f32 %v335_v51, %v60_v45 }
 0x11d   :  { %v345_v46 = vadd.f32 %v294_v44, %v59_v37  ;;  %v296_v47 = vpop.f32.mrb[2].mxu0  ;;  %v339_v58 = vpop.f32.mrb[2].mxu1  ;;  %v347_v33 = vadd.f32 %v337_v55, %v61_v60 }
 0x11e   :  { %v352_v48 = vmul.f32 0.5, %v344_v43  ;;  %v348_v49 = vadd.f32 %v296_v47, %v62_v39  ;;  %v298_v50 = vpop.f32.mrb[3].mxu0  ;;  %v341_v61 = vpop.f32.mrb[3].mxu1  ;;  %v350_v62 = vadd.f32 %v339_v58, %v64_v52 }
 0x11f   :  { %v360_v53 = vmul.f32 0.5, %v345_v46  ;;  %v349_v54 = vadd.f32 %v298_v50, %v63_v41  ;;  %v351_v34 = vadd.f32 %v341_v61, %v65_v63  ;;  %v370_v35 = vmul.f32 0.5, %v347_v33 }
 0x120   :  { %2664 = vtanh.f32 %v352_v48  ;;  %v353_v56 = vmul.f32 0.5, %v348_v49 }
 0x121   :  { %2666 = vtanh.f32 %v360_v53  ;;  %v361_v59 = vmul.f32 0.5, %v349_v54  ;;  %v371_v37 = vmul.f32 0.5, %v351_v34 }
 0x122   :  { %2668 = vtanh.f32 %v353_v56 }
 0x123   :  { %2670 = vtanh.f32 %v361_v59 }
 0x124   :  { %2672 = vtanh.f32 %v346_v57 }
 0x125   :  { %2674 = vtanh.f32 %v350_v62 }
 0x126   :  { %2676 = vtanh.f32 %v370_v35 }
 0x127   :  { %2678 = vtanh.f32 %v371_v37  ;;  %v390_v37 = vld [vmem:[#allocation4 + $0x20] sm:$0xff] }
 0x12a   :  { %v2665_v36 = vpop.eup %2664 }
 0x12b   :  { %v2667_v39 = vpop.eup %2666  ;;  %v356_v40 = vadd.f32 1.0, %v2665_v36 }
 0x12c   :  { %v2669_v41 = vpop.eup %2668  ;;  %v364_v43 = vadd.f32 1.0, %v2667_v39  ;;  %v392_v39 = vld [vmem:[#allocation4 + $0x30] sm:$0xff] }
 0x12d   :  { %v2671_v44 = vpop.eup %2670  ;;  %v358_v45 = vmul.f32 0.5, %v356_v40  ;;  %v357_v46 = vadd.f32 1.0, %v2669_v41  ;;  %v394_v40 = vunpack.c.l.bf16 %v390_v37  ;;  %v391_v41 = vld [vmem:[#allocation4 + $0x28] sm:$0xff] }
 0x12e   :  { %v2673_v38 = vpop.eup %2672  ;;  %v366_v47 = vmul.f32 0.5, %v364_v43  ;;  %v365_v48 = vadd.f32 1.0, %v2671_v44  ;;  %v395_v43 = vunpack.c.h.bf16 %v390_v37  ;;  %v398_v44 = vunpack.c.l.bf16 %v392_v39 }
 0x12f   :  { %v359_v42 = vmul.f32 0.5, %v357_v46  ;;  %v380_v49 = vmul.f32 %v2673_v38, %v358_v45  ;;  %v2675_v50 = vpop.eup %2674  ;;  %v399_v38 = vunpack.c.h.bf16 %v392_v39 }
 0x130   :  { %v378_v51 = vmul.f32 0.0, %v366_v47  ;;  %v367_v52 = vmul.f32 0.5, %v365_v48  ;;  %v2677_v57 = vpop.eup %2676  ;;  %v396_v48 = vunpack.c.l.bf16 %v391_v41 }
 0x131   :  { %v381_v53 = vmul.f32 %v2675_v50, %v359_v42  ;;  %v2679_v58 = vpop.eup %2678  ;;  %v374_v59 = vadd.f32 1.0, %v2677_v57  ;;  %v393_v50 = vld [vmem:[#allocation4 + $0x38] sm:$0xff] }
 0x132   :  { %v379_v54 = vmul.f32 0.0, %v367_v52  ;;  %v3317_v55 = vadd.f32 %v380_v49, %v378_v51  ;;  %v375_v60 = vadd.f32 1.0, %v2679_v58  ;;  %v401_v37 = vunpack.c.h.bf16 %v393_v50 }
 0x133   :  { %v376_v62 = vmul.f32 0.5, %v374_v59 }
 0x134   :  { %2680 = vtanh.f32 %v3317_v55  ;;  %v3320_v56 = vadd.f32 %v381_v53, %v379_v54  ;;  %v377_v63 = vmul.f32 0.5, %v375_v60 }
 0x136   :  { %2682 = vtanh.f32 %v3320_v56 }
 0x13e   :  { %v2681_v61 = vpop.eup %2680 }
 0x13f   :  { %v386_v34 = vmul.f32 %v2681_v61, %v376_v62  ;;  %v400_v61 = vunpack.c.l.bf16 %v393_v50 }
 0x140   :  { %v2683_v33 = vpop.eup %2682 }
 0x141   :  { %v387_v35 = vmul.f32 %v2683_v33, %v377_v63 }
 0x143   :  { %v388_v36 = vpack.c.bf16 %v387_v35, %v386_v34  ;;  %v397_v35 = vunpack.c.h.bf16 %v391_v41 }
 0x145   :  { %435 = vmatmul.mubr.bf16.vlgmr.msra.gmra.mrb[4].mxu0 %v388_v36  ;;  %478 = vmatmul.mubr.bf16.vlgmr.msra.gmra.mrb[4].mxu1 %v388_v36 }
 0x146   :  { %547 = vmatpush1.bf16.msra.mxu0 %v3187_v2  ;;  %590 = vmatpush1.bf16.msra.mxu1 %v3197_v6 }
 0x147   :  { %548 = vmatprep.subr.bf16.mxu0 %v3190_v3  ;;  %591 = vmatprep.subr.bf16.mxu1 %v3203_v8 }
 0x148   :  { %578 = vmatprep.mubr.bf16.mxu0 %v3139_v0  ;;  %621 = vmatprep.mubr.bf16.mxu1 %v3139_v0 }
 0x14a   :  { %549 = vmatpush1.bf16.msra.mxu0 %v3195_v5  ;;  %592 = vmatpush1.bf16.msra.mxu1 %v3206_v9 }
 0x14b   :  { %550 = vmatprep.subr.bf16.mxu0 %v3200_v7  ;;  %593 = vmatprep.subr.bf16.mxu1 %v3215_v12 }
 0x14e   :  { %551 = vmatpush1.bf16.msra.mxu0 %v3210_v10  ;;  %594 = vmatpush1.bf16.msra.mxu1 %v3218_v13 }
 0x14f   :  { %552 = vmatprep.subr.bf16.mxu0 %v3213_v11  ;;  %595 = vmatprep.subr.bf16.mxu1 %v3224_v15 }
 0x152   :  { %553 = vmatpush1.bf16.msra.mxu0 %v3222_v14  ;;  %596 = vmatpush1.bf16.msra.mxu1 %v3232_v18 }
 0x153   :  { %554 = vmatprep.subr.bf16.mxu0 %v3227_v16  ;;  %597 = vmatprep.subr.bf16.mxu1 %v3236_v19 }
 0x156   :  { %555 = vmatpush1.bf16.msra.mxu0 %v3230_v17  ;;  %598 = vmatpush1.bf16.msra.mxu1 %v3242_v21 }
 0x157   :  { %556 = vmatprep.subr.bf16.mxu0 %v3239_v20  ;;  %599 = vmatprep.subr.bf16.mxu1 %v3248_v23 }
 0x15a   :  { %557 = vmatpush1.bf16.msra.mxu0 %v3246_v22  ;;  %600 = vmatpush1.bf16.msra.mxu1 %v3254_v25 }
 0x15b   :  { %558 = vmatprep.subr.bf16.mxu0 %v3251_v24  ;;  %601 = vmatprep.subr.bf16.mxu1 %v3260_v27 }
 0x15e   :  { %559 = vmatpush1.bf16.msra.mxu0 %v3258_v26  ;;  %602 = vmatpush1.bf16.msra.mxu1 %v3266_v29 }
 0x15f   :  { %560 = vmatprep.subr.bf16.mxu0 %v3263_v28  ;;  %603 = vmatprep.subr.bf16.mxu1 %v3272_v31 }
 0x162   :  { %561 = vmatpush1.bf16.msra.mxu0 %v3270_v30  ;;  %604 = vmatpush1.bf16.msra.mxu1 %v3276_v32 }
 0x163   :  { %690 = vmatprep.subr.bf16.mxu0 %v3185_v1  ;;  %733 = vmatprep.subr.bf16.mxu1 %v3193_v4 }
 0x218   :  { %v436_v45 = vpop.f32.mrb[4].mxu0  ;;  %v479_v46 = vpop.f32.mrb[4].mxu1 }
 0x219   :  { %v488_v47 = vadd.f32 %v436_v45, %v394_v40  ;;  %v438_v42 = vpop.f32.mrb[5].mxu0  ;;  %v481_v49 = vpop.f32.mrb[5].mxu1  ;;  %v490_v63 = vadd.f32 %v479_v46, %v396_v48 }
 0x21a   :  { %v489_v51 = vadd.f32 %v438_v42, %v395_v43  ;;  %v440_v52 = vpop.f32.mrb[6].mxu0  ;;  %v483_v53 = vpop.f32.mrb[6].mxu1  ;;  %v491_v39 = vadd.f32 %v481_v49, %v397_v35 }
 0x21b   :  { %v496_v54 = vmul.f32 0.5, %v488_v47  ;;  %v492_v57 = vadd.f32 %v440_v52, %v398_v44  ;;  %v442_v58 = vpop.f32.mrb[7].mxu0  ;;  %v485_v59 = vpop.f32.mrb[7].mxu1  ;;  %v494_v36 = vadd.f32 %v483_v53, %v400_v61 }
 0x21c   :  { %v504_v60 = vmul.f32 0.5, %v489_v51  ;;  %v493_v62 = vadd.f32 %v442_v58, %v399_v38  ;;  %v495_v40 = vadd.f32 %v485_v59, %v401_v37  ;;  %v514_v47 = vmul.f32 0.5, %v491_v39 }
 0x21d   :  { %2684 = vtanh.f32 %v496_v54  ;;  %v497_v33 = vmul.f32 0.5, %v492_v57 }
 0x21e   :  { %2686 = vtanh.f32 %v504_v60  ;;  %v505_v34 = vmul.f32 0.5, %v493_v62  ;;  %v515_v38 = vmul.f32 0.5, %v495_v40 }
 0x21f   :  { %2688 = vtanh.f32 %v497_v33 }
 0x220   :  { %2690 = vtanh.f32 %v490_v63 }
 0x221   :  { %2692 = vtanh.f32 %v505_v34 }
 0x222   :  { %2694 = vtanh.f32 %v494_v36 }
 0x223   :  { %2696 = vtanh.f32 %v514_v47  ;;  %v536_v47 = vld [vmem:[#allocation4 + $0x50] sm:$0xff] }
 0x224   :  { %2698 = vtanh.f32 %v515_v38  ;;  %v535_v38 = vld [vmem:[#allocation4 + $0x48] sm:$0xff] }
 0x227   :  { %v2685_v43 = vpop.eup %2684 }
 0x228   :  { %v2687_v44 = vpop.eup %2686  ;;  %v500_v45 = vadd.f32 1.0, %v2685_v43 }
 0x229   :  { %v508_v42 = vadd.f32 1.0, %v2687_v44  ;;  %v2689_v51 = vpop.eup %2688 }
 0x22a   :  { %v502_v46 = vmul.f32 0.5, %v500_v45  ;;  %v2691_v48 = vpop.eup %2690  ;;  %v501_v54 = vadd.f32 1.0, %v2689_v51 }
 0x22b   :  { %v510_v52 = vmul.f32 0.5, %v508_v42  ;;  %v2693_v41 = vpop.eup %2692 }
 0x22c   :  { %v524_v57 = vmul.f32 %v2691_v48, %v502_v46  ;;  %v503_v53 = vmul.f32 0.5, %v501_v54  ;;  %v509_v49 = vadd.f32 1.0, %v2693_v41  ;;  %v2695_v58 = vpop.eup %2694  ;;  %v542_v46 = vunpack.c.l.bf16 %v536_v47 }
 0x22d   :  { %v522_v50 = vmul.f32 %v510_v52, %v3317_v55  ;;  %v2697_v33 = vpop.eup %2696  ;;  %v543_v54 = vunpack.c.h.bf16 %v536_v47 }
 0x22e   :  { %v511_v60 = vmul.f32 0.5, %v509_v49  ;;  %v525_v61 = vmul.f32 %v2695_v58, %v503_v53  ;;  %v2699_v34 = vpop.eup %2698  ;;  %v518_v35 = vadd.f32 1.0, %v2697_v33  ;;  %v537_v49 = vld [vmem:[#allocation4 + $0x58] sm:$0xff] }
 0x22f   :  { %v3358_v59 = vadd.f32 %v524_v57, %v522_v50  ;;  %v519_v55 = vadd.f32 1.0, %v2699_v34  ;;  %v540_v57 = vunpack.c.l.bf16 %v535_v38 }
 0x230   :  { %v523_v62 = vmul.f32 %v511_v60, %v3320_v56  ;;  %v520_v37 = vmul.f32 0.5, %v518_v35  ;;  %v534_v56 = vld [vmem:[#allocation4 + $0x40] sm:$0xff] }
 0x231   :  { %2700 = vtanh.f32 %v3358_v59  ;;  %v521_v39 = vmul.f32 0.5, %v519_v55  ;;  %v538_v42 = vunpack.c.l.bf16 %v534_v56  ;;  %v539_v51 = vunpack.c.h.bf16 %v534_v56 }
 0x232   :  { %v3362_v63 = vadd.f32 %v525_v61, %v523_v62  ;;  %v545_v56 = vunpack.c.h.bf16 %v537_v49 }
 0x234   :  { %2702 = vtanh.f32 %v3362_v63 }
 0x23b   :  { %v2701_v36 = vpop.eup %2700 }
 0x23c   :  { %v530_v43 = vmul.f32 %v2701_v36, %v520_v37  ;;  %v544_v36 = vunpack.c.l.bf16 %v537_v49 }
 0x23e   :  { %v2703_v40 = vpop.eup %2702 }
 0x23f   :  { %v531_v44 = vmul.f32 %v2703_v40, %v521_v39 }
 0x241   :  { %v532_v45 = vpack.c.bf16 %v531_v44, %v530_v43  ;;  %v541_v44 = vunpack.c.h.bf16 %v535_v38 }
 0x243   :  { %579 = vmatmul.mubr.bf16.vlgmr.msra.gmra.mrb[8].mxu0 %v532_v45  ;;  %622 = vmatmul.mubr.bf16.vlgmr.msra.gmra.mrb[8].mxu1 %v532_v45 }
 0x244   :  { %691 = vmatpush1.bf16.msra.mxu0 %v3187_v2  ;;  %734 = vmatpush1.bf16.msra.mxu1 %v3197_v6 }
 0x245   :  { %692 = vmatprep.subr.bf16.mxu0 %v3190_v3  ;;  %735 = vmatprep.subr.bf16.mxu1 %v3203_v8 }
 0x246   :  { %722 = vmatprep.mubr.bf16.mxu0 %v3139_v0  ;;  %765 = vmatprep.mubr.bf16.mxu1 %v3139_v0 }
 0x248   :  { %693 = vmatpush1.bf16.msra.mxu0 %v3195_v5  ;;  %736 = vmatpush1.bf16.msra.mxu1 %v3206_v9 }
 0x249   :  { %694 = vmatprep.subr.bf16.mxu0 %v3200_v7  ;;  %737 = vmatprep.subr.bf16.mxu1 %v3215_v12 }
 0x24c   :  { %695 = vmatpush1.bf16.msra.mxu0 %v3210_v10  ;;  %738 = vmatpush1.bf16.msra.mxu1 %v3218_v13 }
 0x24d   :  { %696 = vmatprep.subr.bf16.mxu0 %v3213_v11  ;;  %739 = vmatprep.subr.bf16.mxu1 %v3224_v15 }
 0x250   :  { %697 = vmatpush1.bf16.msra.mxu0 %v3222_v14  ;;  %740 = vmatpush1.bf16.msra.mxu1 %v3232_v18 }
 0x251   :  { %698 = vmatprep.subr.bf16.mxu0 %v3227_v16  ;;  %741 = vmatprep.subr.bf16.mxu1 %v3236_v19 }
 0x254   :  { %699 = vmatpush1.bf16.msra.mxu0 %v3230_v17  ;;  %742 = vmatpush1.bf16.msra.mxu1 %v3242_v21 }
 0x255   :  { %700 = vmatprep.subr.bf16.mxu0 %v3239_v20  ;;  %743 = vmatprep.subr.bf16.mxu1 %v3248_v23 }
 0x258   :  { %701 = vmatpush1.bf16.msra.mxu0 %v3246_v22  ;;  %744 = vmatpush1.bf16.msra.mxu1 %v3254_v25 }
 0x259   :  { %702 = vmatprep.subr.bf16.mxu0 %v3251_v24  ;;  %745 = vmatprep.subr.bf16.mxu1 %v3260_v27 }
 0x25c   :  { %703 = vmatpush1.bf16.msra.mxu0 %v3258_v26  ;;  %746 = vmatpush1.bf16.msra.mxu1 %v3266_v29 }
 0x25d   :  { %704 = vmatprep.subr.bf16.mxu0 %v3263_v28  ;;  %747 = vmatprep.subr.bf16.mxu1 %v3272_v31 }
 0x260   :  { %705 = vmatpush1.bf16.msra.mxu0 %v3270_v30  ;;  %748 = vmatpush1.bf16.msra.mxu1 %v3276_v32 }
 0x261   :  { %834 = vmatprep.subr.bf16.mxu0 %v3185_v1  ;;  %877 = vmatprep.subr.bf16.mxu1 %v3193_v4 }
 0x316   :  { %v580_v48 = vpop.f32.mrb[8].mxu0  ;;  %v623_v52 = vpop.f32.mrb[8].mxu1 }
 0x317   :  { %v632_v41 = vadd.f32 %v580_v48, %v538_v42  ;;  %v582_v50 = vpop.f32.mrb[9].mxu0  ;;  %v625_v53 = vpop.f32.mrb[9].mxu1  ;;  %v634_v39 = vadd.f32 %v623_v52, %v540_v57 }
 0x318   :  { %v633_v58 = vadd.f32 %v582_v50, %v539_v51  ;;  %v584_v60 = vpop.f32.mrb[10].mxu0  ;;  %v627_v61 = vpop.f32.mrb[10].mxu1  ;;  %v635_v47 = vadd.f32 %v625_v53, %v541_v44 }
 0x319   :  { %v640_v62 = vmul.f32 0.5, %v632_v41  ;;  %v636_v33 = vadd.f32 %v584_v60, %v542_v46  ;;  %v586_v34 = vpop.f32.mrb[11].mxu0  ;;  %v629_v35 = vpop.f32.mrb[11].mxu1  ;;  %v638_v45 = vadd.f32 %v627_v61, %v544_v36 }
 0x31a   :  { %v648_v55 = vmul.f32 0.5, %v633_v58  ;;  %v637_v37 = vadd.f32 %v586_v34, %v543_v54  ;;  %v639_v42 = vadd.f32 %v629_v35, %v545_v56  ;;  %v658_v41 = vmul.f32 0.5, %v635_v47 }
 0x31b   :  { %2704 = vtanh.f32 %v640_v62  ;;  %v641_v40 = vmul.f32 0.5, %v636_v33 }
 0x31c   :  { %2706 = vtanh.f32 %v648_v55  ;;  %v649_v43 = vmul.f32 0.5, %v637_v37  ;;  %v659_v54 = vmul.f32 0.5, %v639_v42 }
 0x31d   :  { %2708 = vtanh.f32 %v641_v40 }
 0x31e   :  { %2710 = vtanh.f32 %v634_v39 }
 0x31f   :  { %2712 = vtanh.f32 %v649_v43 }
 0x320   :  { %2714 = vtanh.f32 %v638_v45 }
 0x321   :  { %2716 = vtanh.f32 %v658_v41 }
 0x322   :  { %2718 = vtanh.f32 %v659_v54 }
 0x325   :  { %v2705_v51 = vpop.eup %2704 }
 0x326   :  { %v2707_v46 = vpop.eup %2706  ;;  %v644_v48 = vadd.f32 1.0, %v2705_v51 }
 0x327   :  { %v652_v50 = vadd.f32 1.0, %v2707_v46  ;;  %v2709_v58 = vpop.eup %2708 }
 0x328   :  { %v646_v52 = vmul.f32 0.5, %v644_v48  ;;  %v2711_v57 = vpop.eup %2710  ;;  %v645_v62 = vadd.f32 1.0, %v2709_v58 }
 0x329   :  { %v654_v60 = vmul.f32 0.5, %v652_v50  ;;  %v2713_v38 = vpop.eup %2712 }
 0x32a   :  { %v668_v33 = vmul.f32 %v2711_v57, %v646_v52  ;;  %v647_v61 = vmul.f32 0.5, %v645_v62  ;;  %v653_v53 = vadd.f32 1.0, %v2713_v38  ;;  %v2715_v34 = vpop.eup %2714 }
 0x32b   :  { %v666_v49 = vmul.f32 %v654_v60, %v3358_v59  ;;  %v2717_v40 = vpop.eup %2716 }
 0x32c   :  { %v655_v55 = vmul.f32 0.5, %v653_v53  ;;  %v669_v36 = vmul.f32 %v2715_v34, %v647_v61  ;;  %v2719_v43 = vpop.eup %2718  ;;  %v662_v44 = vadd.f32 1.0, %v2717_v40 }
 0x32d   :  { %v3400_v35 = vadd.f32 %v668_v33, %v666_v49  ;;  %v663_v59 = vadd.f32 1.0, %v2719_v43 }
 0x32e   :  { %v667_v37 = vmul.f32 %v655_v55, %v3362_v63  ;;  %v664_v56 = vmul.f32 0.5, %v662_v44 }
 0x32f   :  { %2720 = vtanh.f32 %v3400_v35  ;;  %v665_v47 = vmul.f32 0.5, %v663_v59 }
 0x330   :  { %v3404_v39 = vadd.f32 %v669_v36, %v667_v37 }
 0x332   :  { %2722 = vtanh.f32 %v3404_v39 }
 0x339   :  { %v2721_v45 = vpop.eup %2720 }
 0x33a   :  { %v674_v51 = vmul.f32 %v2721_v45, %v664_v56 }
 0x33c   :  { %v2723_v42 = vpop.eup %2722 }
 0x33d   :  { %v675_v46 = vmul.f32 %v2723_v42, %v665_v47 }
 0x33f   :  { %v676_v48 = vpack.c.bf16 %v675_v46, %v674_v51 }
 0x341   :  { %723 = vmatmul.mubr.bf16.vlgmr.msra.gmra.mrb[12].mxu0 %v676_v48  ;;  %766 = vmatmul.mubr.bf16.vlgmr.msra.gmra.mrb[12].mxu1 %v676_v48 }
 0x342   :  { %835 = vmatpush1.bf16.msra.mxu0 %v3187_v2  ;;  %878 = vmatpush1.bf16.msra.mxu1 %v3197_v6  ;;  %v678_v2 = vld [vmem:[#allocation4 + $0x60] sm:$0xff]  ;;  %v679_v6 = vld [vmem:[#allocation4 + $0x68] sm:$0xff] }
 0x343   :  { %836 = vmatprep.subr.bf16.mxu0 %v3190_v3  ;;  %879 = vmatprep.subr.bf16.mxu1 %v3203_v8  ;;  %v680_v3 = vld [vmem:[#allocation4 + $0x70] sm:$0xff]  ;;  %v685_v33 = vunpack.c.h.bf16 %v679_v6 }
 0x344   :  { %866 = vmatprep.mubr.bf16.mxu0 %v3139_v0  ;;  %909 = vmatprep.mubr.bf16.mxu1 %v3139_v0  ;;  %v686_v8 = vunpack.c.l.bf16 %v680_v3 }
 0x346   :  { %837 = vmatpush1.bf16.msra.mxu0 %v3195_v5  ;;  %880 = vmatpush1.bf16.msra.mxu1 %v3206_v9  ;;  %v682_v5 = vunpack.c.l.bf16 %v678_v2 }
 0x347   :  { %838 = vmatprep.subr.bf16.mxu0 %v3200_v7  ;;  %881 = vmatprep.subr.bf16.mxu1 %v3215_v12  ;;  %v683_v7 = vunpack.c.h.bf16 %v678_v2 }
 0x34a   :  { %839 = vmatpush1.bf16.msra.mxu0 %v3210_v10  ;;  %882 = vmatpush1.bf16.msra.mxu1 %v3218_v13  ;;  %v684_v13 = vunpack.c.l.bf16 %v679_v6 }
 0x34b   :  { %840 = vmatprep.subr.bf16.mxu0 %v3213_v11  ;;  %883 = vmatprep.subr.bf16.mxu1 %v3224_v15  ;;  %v687_v11 = vunpack.c.h.bf16 %v680_v3 }
 0x34e   :  { %841 = vmatpush1.bf16.msra.mxu0 %v3222_v14  ;;  %884 = vmatpush1.bf16.msra.mxu1 %v3232_v18 }
 0x34f   :  { %842 = vmatprep.subr.bf16.mxu0 %v3227_v16  ;;  %885 = vmatprep.subr.bf16.mxu1 %v3236_v19  ;;  %v681_v16 = vld [vmem:[#allocation4 + $0x78] sm:$0xff] }
 0x350   :  { %v688_v52 = vunpack.c.l.bf16 %v681_v16  ;;  %v689_v61 = vunpack.c.h.bf16 %v681_v16 }
 0x352   :  { %843 = vmatpush1.bf16.msra.mxu0 %v3230_v17  ;;  %886 = vmatpush1.bf16.msra.mxu1 %v3242_v21 }
 0x353   :  { %844 = vmatprep.subr.bf16.mxu0 %v3239_v20  ;;  %887 = vmatprep.subr.bf16.mxu1 %v3248_v23 }
 0x356   :  { %845 = vmatpush1.bf16.msra.mxu0 %v3246_v22  ;;  %888 = vmatpush1.bf16.msra.mxu1 %v3254_v25 }
 0x357   :  { %846 = vmatprep.subr.bf16.mxu0 %v3251_v24  ;;  %889 = vmatprep.subr.bf16.mxu1 %v3260_v27 }
 0x35a   :  { %847 = vmatpush1.bf16.msra.mxu0 %v3258_v26  ;;  %890 = vmatpush1.bf16.msra.mxu1 %v3266_v29 }
 0x35b   :  { %848 = vmatprep.subr.bf16.mxu0 %v3263_v28  ;;  %891 = vmatprep.subr.bf16.mxu1 %v3272_v31 }
 0x35e   :  { %849 = vmatpush1.bf16.msra.mxu0 %v3270_v30  ;;  %892 = vmatpush1.bf16.msra.mxu1 %v3276_v32 }
 0x35f   :  { %978 = vmatprep.subr.bf16.mxu0 %v3185_v1  ;;  %1021 = vmatprep.subr.bf16.mxu1 %v3193_v4 }
 0x414   :  { %v724_v9 = vpop.f32.mrb[12].mxu0  ;;  %v767_v10 = vpop.f32.mrb[12].mxu1 }
 0x415   :  { %v776_v12 = vadd.f32 %v724_v9, %v682_v5  ;;  %v726_v14 = vpop.f32.mrb[13].mxu0  ;;  %v769_v15 = vpop.f32.mrb[13].mxu1  ;;  %v778_v60 = vadd.f32 %v767_v10, %v684_v13 }
 0x416   :  { %v777_v17 = vadd.f32 %v726_v14, %v683_v7  ;;  %v728_v63 = vpop.f32.mrb[14].mxu0  ;;  %v771_v41 = vpop.f32.mrb[14].mxu1  ;;  %v779_v53 = vadd.f32 %v769_v15, %v685_v33  ;;  %v3481_v33 = vld [vmem:[#allocation7 + $0x64] ss:$16 sps:$4 sm:$0xff]  }
 0x417   :  { %v784_v1 = vmul.f32 0.5, %v776_v12  ;;  %v780_v50 = vadd.f32 %v728_v63, %v686_v8  ;;  %v730_v4 = vpop.f32.mrb[15].mxu0  ;;  %v773_v54 = vpop.f32.mrb[15].mxu1  ;;  %v782_v49 = vadd.f32 %v771_v41, %v688_v52  ;;  %v3466_v52 = vld [vmem:[#allocation7 + $0x28] ss:$16 sps:$4 sm:$0xff]  }
 0x418   :  { %v792_v58 = vmul.f32 0.5, %v777_v17  ;;  %v781_v57 = vadd.f32 %v730_v4, %v687_v11  ;;  %v783_v34 = vadd.f32 %v773_v54, %v689_v61  ;;  %v802_v40 = vmul.f32 0.5, %v779_v53  ;;  %v3455_v4 = vld [vmem:[#allocation7 + $0x24] ss:$16 sps:$4 sm:$0xff]   ;;  %v3458_v54 = vld [vmem:[#allocation7 + $0x2c] ss:$16 sps:$4 sm:$0xff]  }
 0x419   :  { %2724 = vtanh.f32 %v784_v1  ;;  %v785_v62 = vmul.f32 0.5, %v780_v50  ;;  %v3452_v50 = vld [vmem:[#allocation7 + $0x8] ss:$16 sps:$4 sm:$0xff]   ;;  %v3487_v61 = vld [vmem:[#allocation7 + $0x60] ss:$16 sps:$4 sm:$0xff]  }
 0x41a   :  { %2726 = vtanh.f32 %v792_v58  ;;  %v793_v38 = vmul.f32 0.5, %v781_v57  ;;  %v803_v44 = vmul.f32 0.5, %v783_v34  ;;  %v3463_v58 = vld [vmem:[#allocation7 + $0x20] ss:$16 sps:$4 sm:$0xff]   ;;  %v3469_v57 = vld [vmem:[#allocation7 + $0x44] ss:$16 sps:$4 sm:$0xff]  }
 0x41b   :  { %2728 = vtanh.f32 %v785_v62  ;;  %v3475_v62 = vld [vmem:[#allocation7 + $0x40] ss:$16 sps:$4 sm:$0xff]   ;;  %v3491_v53 = vld [vmem:[#allocation7 + $0x84] ss:$16 sps:$4 sm:$0xff]  }
 0x41c   :  { %2730 = vtanh.f32 %v778_v60  ;;  %v3472_v60 = vld [vmem:[#allocation7 + $0x4c] ss:$16 sps:$4 sm:$0xff]   ;;  %v3495_v34 = vld [vmem:[#allocation7 + $0x80] ss:$16 sps:$4 sm:$0xff]  }
 0x41d   :  { %2732 = vtanh.f32 %v793_v38  ;;  %v3478_v38 = vld [vmem:[#allocation7 + $0x48] ss:$16 sps:$4 sm:$0xff]  }
 0x41e   :  { %2734 = vtanh.f32 %v782_v49  ;;  %v3484_v49 = vld [vmem:[#allocation7 + $0x6c] ss:$16 sps:$4 sm:$0xff]  }
 0x41f   :  { %2736 = vtanh.f32 %v802_v40 }
 0x420   :  { %2738 = vtanh.f32 %v803_v44 }
 0x423   :  { %v2725_v55 = vpop.eup %2724 }
 0x424   :  { %v2727_v36 = vpop.eup %2726  ;;  %v788_v37 = vadd.f32 1.0, %v2725_v55  ;;  %v825_v55 = vld [vmem:[#allocation4 + $0x98] sm:$0xff] }
 0x425   :  { %v796_v43 = vadd.f32 1.0, %v2727_v36  ;;  %v2729_v59 = vpop.eup %2728 }
 0x426   :  { %v790_v45 = vmul.f32 0.5, %v788_v37  ;;  %v2731_v56 = vpop.eup %2730  ;;  %v789_v42 = vadd.f32 1.0, %v2729_v59 }
 0x427   :  { %v798_v47 = vmul.f32 0.5, %v796_v43  ;;  %v2733_v51 = vpop.eup %2732 }
 0x428   :  { %v812_v46 = vmul.f32 %v2731_v56, %v790_v45  ;;  %v791_v2 = vmul.f32 0.5, %v789_v42  ;;  %v797_v3 = vadd.f32 1.0, %v2733_v51  ;;  %v2735_v5 = vpop.eup %2734 }
 0x429   :  { %v810_v48 = vmul.f32 %v798_v47, %v3400_v35  ;;  %v2737_v11 = vpop.eup %2736  ;;  %v832_v47 = vunpack.c.l.bf16 %v825_v55 }
 0x42a   :  { %v799_v7 = vmul.f32 0.5, %v797_v3  ;;  %v813_v8 = vmul.f32 %v2735_v5, %v791_v2  ;;  %v2739_v12 = vpop.eup %2738  ;;  %v806_v13 = vadd.f32 1.0, %v2737_v11  ;;  %v833_v5 = vunpack.c.h.bf16 %v825_v55 }
 0x42b   :  { %v3442_v6 = vadd.f32 %v812_v46, %v810_v48  ;;  %v807_v35 = vadd.f32 1.0, %v2739_v12 }
 0x42c   :  { %v811_v9 = vmul.f32 %v799_v7, %v3404_v39  ;;  %v808_v15 = vmul.f32 0.5, %v806_v13  ;;  %v3449_v39 = vld [vmem:[#allocation7] ss:$16 sps:$4 sm:$0xff]  }
 0x42d   :  { %2740 = vtanh.f32 %v3442_v6  ;;  %v809_v16 = vmul.f32 0.5, %v807_v35 }
 0x42e   :  { %v3446_v10 = vadd.f32 %v813_v8, %v811_v9 }
 0x430   :  { %2742 = vtanh.f32 %v3446_v10 }
 0x437   :  { %v2741_v14 = vpop.eup %2740 }
 0x438   :  { %v818_v63 = vmul.f32 %v2741_v14, %v808_v15 }
 0x43a   :  { %v2743_v17 = vpop.eup %2742 }
 0x43b   :  { %v819_v41 = vmul.f32 %v2743_v17, %v809_v16 }
 0x43d   :  { %v820_v1 = vpack.c.bf16 %v819_v41, %v818_v63 }
 0x43f   :  { %867 = vmatmul.mubr.bf16.vlgmr.msra.gmra.mrb[16].mxu0 %v820_v1  ;;  %910 = vmatmul.mubr.bf16.vlgmr.msra.gmra.mrb[16].mxu1 %v820_v1 }
 0x440   :  { %979 = vmatpush1.bf16.msra.mxu0 %v3449_v39  ;;  %1022 = vmatpush1.bf16.msra.mxu1 %v3452_v50 }
 0x441   :  { %980 = vmatprep.subr.bf16.mxu0 %v3455_v4  ;;  %1023 = vmatprep.subr.bf16.mxu1 %v3458_v54 }
 0x442   :  { %1010 = vmatprep.mubr.bf16.mxu0 %v3139_v0  ;;  %1053 = vmatprep.mubr.bf16.mxu1 %v3139_v0 }
 0x444   :  { %981 = vmatpush1.bf16.msra.mxu0 %v3463_v58  ;;  %1024 = vmatpush1.bf16.msra.mxu1 %v3466_v52 }
 0x445   :  { %982 = vmatprep.subr.bf16.mxu0 %v3469_v57  ;;  %1025 = vmatprep.subr.bf16.mxu1 %v3472_v60 }
 0x448   :  { %983 = vmatpush1.bf16.msra.mxu0 %v3475_v62  ;;  %1026 = vmatpush1.bf16.msra.mxu1 %v3478_v38 }
 0x449   :  { %984 = vmatprep.subr.bf16.mxu0 %v3481_v33  ;;  %1027 = vmatprep.subr.bf16.mxu1 %v3484_v49 }
 0x44c   :  { %985 = vmatpush1.bf16.msra.mxu0 %v3487_v61  ;;  %1028 = vmatpush1.bf16.msra.mxu1 %v3232_v18  ;;  %v3511_v18 = vld [vmem:[#allocation7 + $0x4] ss:$16 sps:$4 sm:$0xff]  }
 0x44d   :  { %986 = vmatprep.subr.bf16.mxu0 %v3491_v53  ;;  %1029 = vmatprep.subr.bf16.mxu1 %v3236_v19  ;;  %v3514_v19 = vld [vmem:[#allocation7 + $0xc] ss:$16 sps:$4 sm:$0xff]  }
 0x450   :  { %987 = vmatpush1.bf16.msra.mxu0 %v3495_v34  ;;  %1030 = vmatpush1.bf16.msra.mxu1 %v3242_v21  ;;  %v824_v21 = vld [vmem:[#allocation4 + $0x90] sm:$0xff] }
 0x451   :  { %988 = vmatprep.subr.bf16.mxu0 %v3239_v20  ;;  %1031 = vmatprep.subr.bf16.mxu1 %v3248_v23  ;;  %v822_v20 = vld [vmem:[#allocation4 + $0x80] sm:$0xff]  ;;  %v823_v23 = vld [vmem:[#allocation4 + $0x88] sm:$0xff] }
 0x452   :  { %v829_v2 = vunpack.c.h.bf16 %v823_v23 }
 0x454   :  { %989 = vmatpush1.bf16.msra.mxu0 %v3246_v22  ;;  %1032 = vmatpush1.bf16.msra.mxu1 %v3254_v25  ;;  %v826_v22 = vunpack.c.l.bf16 %v822_v20  ;;  %v830_v25 = vunpack.c.l.bf16 %v824_v21 }
 0x455   :  { %990 = vmatprep.subr.bf16.mxu0 %v3251_v24  ;;  %1033 = vmatprep.subr.bf16.mxu1 %v3260_v27  ;;  %v827_v24 = vunpack.c.h.bf16 %v822_v20 }
 0x458   :  { %991 = vmatpush1.bf16.msra.mxu0 %v3258_v26  ;;  %1034 = vmatpush1.bf16.msra.mxu1 %v3266_v29 }
 0x459   :  { %992 = vmatprep.subr.bf16.mxu0 %v3263_v28  ;;  %1035 = vmatprep.subr.bf16.mxu1 %v3272_v31  ;;  %v831_v28 = vunpack.c.h.bf16 %v824_v21 }
 0x45c   :  { %993 = vmatpush1.bf16.msra.mxu0 %v3270_v30  ;;  %1036 = vmatpush1.bf16.msra.mxu1 %v3276_v32  ;;  %v828_v30 = vunpack.c.l.bf16 %v823_v23 }
 0x45d   :  { %1122 = vmatprep.subr.bf16.mxu0 %v3511_v18  ;;  %1165 = vmatprep.subr.bf16.mxu1 %v3514_v19 }
 0x512   :  { %v868_v26 = vpop.f32.mrb[16].mxu0  ;;  %v911_v27 = vpop.f32.mrb[16].mxu1 }
 0x513   :  { %v920_v29 = vadd.f32 %v868_v26, %v826_v22  ;;  %v870_v31 = vpop.f32.mrb[17].mxu0  ;;  %v913_v32 = vpop.f32.mrb[17].mxu1  ;;  %v922_v51 = vadd.f32 %v911_v27, %v828_v30 }
 0x514   :  { %v921_v36 = vadd.f32 %v870_v31, %v827_v24  ;;  %v872_v37 = vpop.f32.mrb[18].mxu0  ;;  %v915_v40 = vpop.f32.mrb[18].mxu1  ;;  %v923_v7 = vadd.f32 %v913_v32, %v829_v2  ;;  %v3566_v2 = vld [vmem:[#allocation7 + $0xcc] ss:$16 sps:$4 sm:$0xff]  }
 0x515   :  { %v928_v43 = vmul.f32 0.5, %v920_v29  ;;  %v924_v44 = vadd.f32 %v872_v37, %v830_v25  ;;  %v874_v59 = vpop.f32.mrb[19].mxu0  ;;  %v917_v45 = vpop.f32.mrb[19].mxu1  ;;  %v926_v3 = vadd.f32 %v915_v40, %v832_v47  ;;  %v3551_v47 = vld [vmem:[#allocation7 + $0xa4] ss:$16 sps:$4 sm:$0xff]  }
 0x516   :  { %v936_v56 = vmul.f32 0.5, %v921_v36  ;;  %v925_v42 = vadd.f32 %v874_v59, %v831_v28  ;;  %v927_v8 = vadd.f32 %v917_v45, %v833_v5  ;;  %v946_v13 = vmul.f32 0.5, %v923_v7  ;;  %v3544_v45 = vld [vmem:[#allocation7 + $0x8c] ss:$16 sps:$4 sm:$0xff]   ;;  %v3572_v5 = vld [vmem:[#allocation7 + $0xc8] ss:$16 sps:$4 sm:$0xff]  }
 0x517   :  { %2744 = vtanh.f32 %v928_v43  ;;  %v929_v46 = vmul.f32 0.5, %v924_v44  ;;  %v3575_v7 = vld [vmem:[#allocation7 + $0xe4] ss:$16 sps:$4 sm:$0xff]  }
 0x518   :  { %2746 = vtanh.f32 %v936_v56  ;;  %v937_v48 = vmul.f32 0.5, %v925_v42  ;;  %v947_v14 = vmul.f32 0.5, %v927_v8  ;;  %v3548_v56 = vld [vmem:[#allocation7 + $0x88] ss:$16 sps:$4 sm:$0xff]   ;;  %v3554_v42 = vld [vmem:[#allocation7 + $0xac] ss:$16 sps:$4 sm:$0xff]  }
 0x519   :  { %2748 = vtanh.f32 %v929_v46  ;;  %v3560_v46 = vld [vmem:[#allocation7 + $0xa8] ss:$16 sps:$4 sm:$0xff]   ;;  %v3578_v8 = vld [vmem:[#allocation7 + $0xec] ss:$16 sps:$4 sm:$0xff]  }
 0x51a   :  { %2750 = vtanh.f32 %v922_v51  ;;  %v3557_v51 = vld [vmem:[#allocation7 + $0xa0] ss:$16 sps:$4 sm:$0xff]  }
 0x51b   :  { %2752 = vtanh.f32 %v937_v48  ;;  %v3563_v48 = vld [vmem:[#allocation7 + $0xc4] ss:$16 sps:$4 sm:$0xff]  }
 0x51c   :  { %2754 = vtanh.f32 %v926_v3  ;;  %v3569_v3 = vld [vmem:[#allocation7 + $0xc0] ss:$16 sps:$4 sm:$0xff]  }
 0x51d   :  { %2756 = vtanh.f32 %v946_v13  ;;  %v968_v13 = vld [vmem:[#allocation4 + $0xb0] sm:$0xff] }
 0x51e   :  { %2758 = vtanh.f32 %v947_v14  ;;  %v967_v14 = vld [vmem:[#allocation4 + $0xa8] sm:$0xff] }
 0x521   :  { %v2745_v9 = vpop.eup %2744 }
 0x522   :  { %v2747_v11 = vpop.eup %2746  ;;  %v932_v12 = vadd.f32 1.0, %v2745_v9  ;;  %v3581_v9 = vld [vmem:[#allocation7 + $0xe0] ss:$16 sps:$4 sm:$0xff]  }
 0x523   :  { %v940_v35 = vadd.f32 1.0, %v2747_v11  ;;  %v2749_v15 = vpop.eup %2748  ;;  %v3584_v11 = vld [vmem:[#allocation7 + $0xe8] ss:$16 sps:$4 sm:$0xff]  }
 0x524   :  { %v934_v16 = vmul.f32 0.5, %v932_v12  ;;  %v2751_v17 = vpop.eup %2750  ;;  %v933_v41 = vadd.f32 1.0, %v2749_v15  ;;  %v966_v12 = vld [vmem:[#allocation4 + $0xa0] sm:$0xff] }
 0x525   :  { %v942_v63 = vmul.f32 0.5, %v940_v35  ;;  %v2753_v1 = vpop.eup %2752  ;;  %v970_v35 = vunpack.c.l.bf16 %v966_v12  ;;  %v971_v15 = vunpack.c.h.bf16 %v966_v12 }
 0x526   :  { %v956_v20 = vmul.f32 %v2751_v17, %v934_v16  ;;  %v935_v22 = vmul.f32 0.5, %v933_v41  ;;  %v941_v23 = vadd.f32 1.0, %v2753_v1  ;;  %v2755_v24 = vpop.eup %2754  ;;  %v974_v16 = vunpack.c.l.bf16 %v968_v13 }
 0x527   :  { %v954_v21 = vmul.f32 %v942_v63, %v3442_v6  ;;  %v2757_v30 = vpop.eup %2756  ;;  %v975_v41 = vunpack.c.h.bf16 %v968_v13 }
 0x528   :  { %v943_v26 = vmul.f32 0.5, %v941_v23  ;;  %v957_v27 = vmul.f32 %v2755_v24, %v935_v22  ;;  %v2759_v31 = vpop.eup %2758  ;;  %v950_v32 = vadd.f32 1.0, %v2757_v30  ;;  %v969_v23 = vld [vmem:[#allocation4 + $0xb8] sm:$0xff] }
 0x529   :  { %v3518_v25 = vadd.f32 %v956_v20, %v954_v21  ;;  %v951_v6 = vadd.f32 1.0, %v2759_v31  ;;  %v972_v20 = vunpack.c.l.bf16 %v967_v14  ;;  %v977_v12 = vunpack.c.h.bf16 %v969_v23 }
 0x52a   :  { %v955_v28 = vmul.f32 %v943_v26, %v3446_v10  ;;  %v952_v36 = vmul.f32 0.5, %v950_v32  ;;  %v3540_v10 = vld [vmem:[#allocation7 + $0x68] ss:$16 sps:$4 sm:$0xff]  }
 0x52b   :  { %2760 = vtanh.f32 %v3518_v25  ;;  %v953_v37 = vmul.f32 0.5, %v951_v6 }
 0x52c   :  { %v3522_v29 = vadd.f32 %v957_v27, %v955_v28 }
 0x52e   :  { %2762 = vtanh.f32 %v3522_v29 }
 0x535   :  { %v2761_v55 = vpop.eup %2760 }
 0x536   :  { %v962_v43 = vmul.f32 %v2761_v55, %v952_v36  ;;  %v976_v55 = vunpack.c.l.bf16 %v969_v23 }
 0x538   :  { %v2763_v40 = vpop.eup %2762 }
 0x539   :  { %v963_v44 = vmul.f32 %v2763_v40, %v953_v37 }
 0x53b   :  { %v964_v59 = vpack.c.bf16 %v963_v44, %v962_v43  ;;  %v973_v44 = vunpack.c.h.bf16 %v967_v14 }
 0x53d   :  { %1011 = vmatmul.mubr.bf16.vlgmr.msra.gmra.mrb[20].mxu0 %v964_v59  ;;  %1054 = vmatmul.mubr.bf16.vlgmr.msra.gmra.mrb[20].mxu1 %v964_v59 }
 0x53e   :  { %1123 = vmatpush1.bf16.msra.mxu0 %v3449_v39  ;;  %1166 = vmatpush1.bf16.msra.mxu1 %v3452_v50 }
 0x53f   :  { %1124 = vmatprep.subr.bf16.mxu0 %v3455_v4  ;;  %1167 = vmatprep.subr.bf16.mxu1 %v3458_v54 }
 0x540   :  { %1154 = vmatprep.mubr.bf16.mxu0 %v3139_v0  ;;  %1197 = vmatprep.mubr.bf16.mxu1 %v3139_v0 }
 0x542   :  { %1125 = vmatpush1.bf16.msra.mxu0 %v3463_v58  ;;  %1168 = vmatpush1.bf16.msra.mxu1 %v3466_v52 }
 0x543   :  { %1126 = vmatprep.subr.bf16.mxu0 %v3469_v57  ;;  %1169 = vmatprep.subr.bf16.mxu1 %v3472_v60 }
 0x546   :  { %1127 = vmatpush1.bf16.msra.mxu0 %v3475_v62  ;;  %1170 = vmatpush1.bf16.msra.mxu1 %v3478_v38 }
 0x547   :  { %1128 = vmatprep.subr.bf16.mxu0 %v3481_v33  ;;  %1171 = vmatprep.subr.bf16.mxu1 %v3484_v49 }
 0x54a   :  { %1129 = vmatpush1.bf16.msra.mxu0 %v3487_v61  ;;  %1172 = vmatpush1.bf16.msra.mxu1 %v3540_v10 }
 0x54b   :  { %1130 = vmatprep.subr.bf16.mxu0 %v3491_v53  ;;  %1173 = vmatprep.subr.bf16.mxu1 %v3544_v45 }
 0x54e   :  { %1131 = vmatpush1.bf16.msra.mxu0 %v3495_v34  ;;  %1174 = vmatpush1.bf16.msra.mxu1 %v3548_v56 }
 0x54f   :  { %1132 = vmatprep.subr.bf16.mxu0 %v3551_v47  ;;  %1175 = vmatprep.subr.bf16.mxu1 %v3554_v42 }
 0x552   :  { %1133 = vmatpush1.bf16.msra.mxu0 %v3557_v51  ;;  %1176 = vmatpush1.bf16.msra.mxu1 %v3560_v46 }
 0x553   :  { %1134 = vmatprep.subr.bf16.mxu0 %v3563_v48  ;;  %1177 = vmatprep.subr.bf16.mxu1 %v3566_v2 }
 0x556   :  { %1135 = vmatpush1.bf16.msra.mxu0 %v3569_v3  ;;  %1178 = vmatpush1.bf16.msra.mxu1 %v3572_v5 }
 0x557   :  { %1136 = vmatprep.subr.bf16.mxu0 %v3575_v7  ;;  %1179 = vmatprep.subr.bf16.mxu1 %v3578_v8 }
 0x55a   :  { %1137 = vmatpush1.bf16.msra.mxu0 %v3581_v9  ;;  %1180 = vmatpush1.bf16.msra.mxu1 %v3584_v11 }
 0x55b   :  { %1266 = vmatprep.subr.bf16.mxu0 %v3511_v18  ;;  %1309 = vmatprep.subr.bf16.mxu1 %v3514_v19 }
 0x610   :  { %v1012_v17 = vpop.f32.mrb[20].mxu0  ;;  %v1055_v63 = vpop.f32.mrb[20].mxu1 }
 0x611   :  { %v1064_v1 = vadd.f32 %v1012_v17, %v970_v35  ;;  %v1014_v21 = vpop.f32.mrb[21].mxu0  ;;  %v1057_v22 = vpop.f32.mrb[21].mxu1  ;;  %v1066_v37 = vadd.f32 %v1055_v63, %v972_v20 }
 0x612   :  { %v1065_v24 = vadd.f32 %v1014_v21, %v971_v15  ;;  %v1016_v26 = vpop.f32.mrb[22].mxu0  ;;  %v1059_v27 = vpop.f32.mrb[22].mxu1  ;;  %v1067_v13 = vadd.f32 %v1057_v22, %v973_v44 }
 0x613   :  { %v1072_v28 = vmul.f32 0.5, %v1064_v1  ;;  %v1068_v30 = vadd.f32 %v1016_v26, %v974_v16  ;;  %v1018_v31 = vpop.f32.mrb[23].mxu0  ;;  %v1061_v32 = vpop.f32.mrb[23].mxu1  ;;  %v1070_v59 = vadd.f32 %v1059_v27, %v976_v55 }
 0x614   :  { %v1080_v6 = vmul.f32 0.5, %v1065_v24  ;;  %v1069_v36 = vadd.f32 %v1018_v31, %v975_v41  ;;  %v1071_v35 = vadd.f32 %v1061_v32, %v977_v12  ;;  %v1090_v1 = vmul.f32 0.5, %v1067_v13 }
 0x615   :  { %2764 = vtanh.f32 %v1072_v28  ;;  %v1073_v40 = vmul.f32 0.5, %v1068_v30 }
 0x616   :  { %2766 = vtanh.f32 %v1080_v6  ;;  %v1081_v43 = vmul.f32 0.5, %v1069_v36  ;;  %v1091_v41 = vmul.f32 0.5, %v1071_v35 }
 0x617   :  { %2768 = vtanh.f32 %v1073_v40 }
 0x618   :  { %2770 = vtanh.f32 %v1066_v37 }
 0x619   :  { %2772 = vtanh.f32 %v1081_v43 }
 0x61a   :  { %2774 = vtanh.f32 %v1070_v59 }
 0x61b   :  { %2776 = vtanh.f32 %v1090_v1  ;;  %v1112_v1 = vld [vmem:[#allocation4 + $0xd0] sm:$0xff] }
 0x61c   :  { %2778 = vtanh.f32 %v1091_v41  ;;  %v1111_v41 = vld [vmem:[#allocation4 + $0xc8] sm:$0xff] }
 0x61f   :  { %v2765_v15 = vpop.eup %2764 }
 0x620   :  { %v2767_v16 = vpop.eup %2766  ;;  %v1076_v17 = vadd.f32 1.0, %v2765_v15 }
 0x621   :  { %v1084_v21 = vadd.f32 1.0, %v2767_v16  ;;  %v2769_v24 = vpop.eup %2768 }
 0x622   :  { %v1078_v63 = vmul.f32 0.5, %v1076_v17  ;;  %v2771_v20 = vpop.eup %2770  ;;  %v1077_v28 = vadd.f32 1.0, %v2769_v24 }
 0x623   :  { %v1086_v26 = vmul.f32 0.5, %v1084_v21  ;;  %v2773_v14 = vpop.eup %2772 }
 0x624   :  { %v1100_v30 = vmul.f32 %v2771_v20, %v1078_v63  ;;  %v1079_v27 = vmul.f32 0.5, %v1077_v28  ;;  %v1085_v22 = vadd.f32 1.0, %v2773_v14  ;;  %v2775_v31 = vpop.eup %2774  ;;  %v1118_v63 = vunpack.c.l.bf16 %v1112_v1 }
 0x625   :  { %v1098_v23 = vmul.f32 %v1086_v26, %v3518_v25  ;;  %v2777_v40 = vpop.eup %2776  ;;  %v1119_v28 = vunpack.c.h.bf16 %v1112_v1 }
 0x626   :  { %v1087_v6 = vmul.f32 0.5, %v1085_v22  ;;  %v1101_v55 = vmul.f32 %v2775_v31, %v1079_v27  ;;  %v2779_v43 = vpop.eup %2778  ;;  %v1094_v44 = vadd.f32 1.0, %v2777_v40  ;;  %v1113_v22 = vld [vmem:[#allocation4 + $0xd8] sm:$0xff] }
 0x627   :  { %v3590_v32 = vadd.f32 %v1100_v30, %v1098_v23  ;;  %v1095_v25 = vadd.f32 1.0, %v2779_v43  ;;  %v1116_v30 = vunpack.c.l.bf16 %v1111_v41 }
 0x628   :  { %v1099_v36 = vmul.f32 %v1087_v6, %v3522_v29  ;;  %v1096_v12 = vmul.f32 0.5, %v1094_v44  ;;  %v1110_v29 = vld [vmem:[#allocation4 + $0xc0] sm:$0xff] }
 0x629   :  { %2780 = vtanh.f32 %v3590_v32  ;;  %v1097_v13 = vmul.f32 0.5, %v1095_v25  ;;  %v1114_v21 = vunpack.c.l.bf16 %v1110_v29  ;;  %v1115_v24 = vunpack.c.h.bf16 %v1110_v29 }
 0x62a   :  { %v3594_v37 = vadd.f32 %v1101_v55, %v1099_v36  ;;  %v1121_v29 = vunpack.c.h.bf16 %v1113_v22 }
 0x62c   :  { %2782 = vtanh.f32 %v3594_v37 }
 0x633   :  { %v2781_v59 = vpop.eup %2780 }
 0x634   :  { %v1106_v15 = vmul.f32 %v2781_v59, %v1096_v12  ;;  %v1120_v59 = vunpack.c.l.bf16 %v1113_v22 }
 0x636   :  { %v2783_v35 = vpop.eup %2782 }
 0x637   :  { %v1107_v16 = vmul.f32 %v2783_v35, %v1097_v13 }
 0x639   :  { %v1108_v17 = vpack.c.bf16 %v1107_v16, %v1106_v15  ;;  %v1117_v16 = vunpack.c.h.bf16 %v1111_v41 }
 0x63b   :  { %1155 = vmatmul.mubr.bf16.vlgmr.msra.gmra.mrb[24].mxu0 %v1108_v17  ;;  %1198 = vmatmul.mubr.bf16.vlgmr.msra.gmra.mrb[24].mxu1 %v1108_v17 }
 0x63c   :  { %1267 = vmatpush1.bf16.msra.mxu0 %v3449_v39  ;;  %1310 = vmatpush1.bf16.msra.mxu1 %v3452_v50 }
 0x63d   :  { %1268 = vmatprep.subr.bf16.mxu0 %v3455_v4  ;;  %1311 = vmatprep.subr.bf16.mxu1 %v3458_v54 }
 0x63e   :  { %1298 = vmatprep.mubr.bf16.mxu0 %v3139_v0  ;;  %1341 = vmatprep.mubr.bf16.mxu1 %v3139_v0 }
 0x640   :  { %1269 = vmatpush1.bf16.msra.mxu0 %v3463_v58  ;;  %1312 = vmatpush1.bf16.msra.mxu1 %v3466_v52 }
 0x641   :  { %1270 = vmatprep.subr.bf16.mxu0 %v3469_v57  ;;  %1313 = vmatprep.subr.bf16.mxu1 %v3472_v60 }
 0x644   :  { %1271 = vmatpush1.bf16.msra.mxu0 %v3475_v62  ;;  %1314 = vmatpush1.bf16.msra.mxu1 %v3478_v38 }
 0x645   :  { %1272 = vmatprep.subr.bf16.mxu0 %v3481_v33  ;;  %1315 = vmatprep.subr.bf16.mxu1 %v3484_v49 }
 0x648   :  { %1273 = vmatpush1.bf16.msra.mxu0 %v3487_v61  ;;  %1316 = vmatpush1.bf16.msra.mxu1 %v3540_v10 }
 0x649   :  { %1274 = vmatprep.subr.bf16.mxu0 %v3491_v53  ;;  %1317 = vmatprep.subr.bf16.mxu1 %v3544_v45 }
 0x64c   :  { %1275 = vmatpush1.bf16.msra.mxu0 %v3495_v34  ;;  %1318 = vmatpush1.bf16.msra.mxu1 %v3548_v56 }
 0x64d   :  { %1276 = vmatprep.subr.bf16.mxu0 %v3551_v47  ;;  %1319 = vmatprep.subr.bf16.mxu1 %v3554_v42 }
 0x650   :  { %1277 = vmatpush1.bf16.msra.mxu0 %v3557_v51  ;;  %1320 = vmatpush1.bf16.msra.mxu1 %v3560_v46 }
 0x651   :  { %1278 = vmatprep.subr.bf16.mxu0 %v3563_v48  ;;  %1321 = vmatprep.subr.bf16.mxu1 %v3566_v2 }
 0x654   :  { %1279 = vmatpush1.bf16.msra.mxu0 %v3569_v3  ;;  %1322 = vmatpush1.bf16.msra.mxu1 %v3572_v5 }
 0x655   :  { %1280 = vmatprep.subr.bf16.mxu0 %v3575_v7  ;;  %1323 = vmatprep.subr.bf16.mxu1 %v3578_v8 }
 0x658   :  { %1281 = vmatpush1.bf16.msra.mxu0 %v3581_v9  ;;  %1324 = vmatpush1.bf16.msra.mxu1 %v3584_v11 }
 0x659   :  { %1410 = vmatprep.subr.bf16.mxu0 %v3511_v18  ;;  %1453 = vmatprep.subr.bf16.mxu1 %v3514_v19 }
 0x70e   :  { %v1156_v20 = vpop.f32.mrb[24].mxu0  ;;  %v1199_v26 = vpop.f32.mrb[24].mxu1 }
 0x70f   :  { %v1208_v14 = vadd.f32 %v1156_v20, %v1114_v21  ;;  %v1158_v23 = vpop.f32.mrb[25].mxu0  ;;  %v1201_v27 = vpop.f32.mrb[25].mxu1  ;;  %v1210_v13 = vadd.f32 %v1199_v26, %v1116_v30 }
 0x710   :  { %v1209_v31 = vadd.f32 %v1158_v23, %v1115_v24  ;;  %v1160_v6 = vpop.f32.mrb[26].mxu0  ;;  %v1203_v55 = vpop.f32.mrb[26].mxu1  ;;  %v1211_v1 = vadd.f32 %v1201_v27, %v1117_v16 }
 0x711   :  { %v1216_v36 = vmul.f32 0.5, %v1208_v14  ;;  %v1212_v40 = vadd.f32 %v1160_v6, %v1118_v63  ;;  %v1162_v43 = vpop.f32.mrb[27].mxu0  ;;  %v1205_v44 = vpop.f32.mrb[27].mxu1  ;;  %v1214_v17 = vadd.f32 %v1203_v55, %v1120_v59 }
 0x712   :  { %v1224_v25 = vmul.f32 0.5, %v1209_v31  ;;  %v1213_v12 = vadd.f32 %v1162_v43, %v1119_v28  ;;  %v1215_v21 = vadd.f32 %v1205_v44, %v1121_v29  ;;  %v1234_v14 = vmul.f32 0.5, %v1211_v1 }
 0x713   :  { %2784 = vtanh.f32 %v1216_v36  ;;  %v1217_v35 = vmul.f32 0.5, %v1212_v40 }
 0x714   :  { %2786 = vtanh.f32 %v1224_v25  ;;  %v1225_v15 = vmul.f32 0.5, %v1213_v12  ;;  %v1235_v28 = vmul.f32 0.5, %v1215_v21 }
 0x715   :  { %2788 = vtanh.f32 %v1217_v35 }
 0x716   :  { %2790 = vtanh.f32 %v1210_v13 }
 0x717   :  { %2792 = vtanh.f32 %v1225_v15 }
 0x718   :  { %2794 = vtanh.f32 %v1214_v17 }
 0x719   :  { %2796 = vtanh.f32 %v1234_v14  ;;  %v1256_v14 = vld [vmem:[#allocation4 + $0xf0] sm:$0xff] }
 0x71a   :  { %2798 = vtanh.f32 %v1235_v28  ;;  %v1255_v28 = vld [vmem:[#allocation4 + $0xe8] sm:$0xff] }
 0x71d   :  { %v2785_v24 = vpop.eup %2784 }
 0x71e   :  { %v2787_v63 = vpop.eup %2786  ;;  %v1220_v20 = vadd.f32 1.0, %v2785_v24 }
 0x71f   :  { %v1228_v23 = vadd.f32 1.0, %v2787_v63  ;;  %v2789_v31 = vpop.eup %2788 }
 0x720   :  { %v1222_v26 = vmul.f32 0.5, %v1220_v20  ;;  %v2791_v30 = vpop.eup %2790  ;;  %v1221_v36 = vadd.f32 1.0, %v2789_v31 }
 0x721   :  { %v1230_v6 = vmul.f32 0.5, %v1228_v23  ;;  %v2793_v41 = vpop.eup %2792 }
 0x722   :  { %v1244_v40 = vmul.f32 %v2791_v30, %v1222_v26  ;;  %v1223_v55 = vmul.f32 0.5, %v1221_v36  ;;  %v1229_v27 = vadd.f32 1.0, %v2793_v41  ;;  %v2795_v43 = vpop.eup %2794  ;;  %v1262_v26 = vunpack.c.l.bf16 %v1256_v14 }
 0x723   :  { %v1242_v22 = vmul.f32 %v1230_v6, %v3590_v32  ;;  %v2797_v35 = vpop.eup %2796  ;;  %v1263_v36 = vunpack.c.h.bf16 %v1256_v14 }
 0x724   :  { %v1231_v25 = vmul.f32 0.5, %v1229_v27  ;;  %v1245_v59 = vmul.f32 %v2795_v43, %v1223_v55  ;;  %v2799_v15 = vpop.eup %2798  ;;  %v1238_v16 = vadd.f32 1.0, %v2797_v35  ;;  %v1257_v27 = vld [vmem:[#allocation4 + $0xf8] sm:$0xff] }
 0x725   :  { %v3632_v44 = vadd.f32 %v1244_v40, %v1242_v22  ;;  %v1239_v32 = vadd.f32 1.0, %v2799_v15  ;;  %v1260_v40 = vunpack.c.l.bf16 %v1255_v28 }
 0x726   :  { %v1243_v12 = vmul.f32 %v1231_v25, %v3594_v37  ;;  %v1240_v29 = vmul.f32 0.5, %v1238_v16  ;;  %v1254_v37 = vld [vmem:[#allocation4 + $0xe0] sm:$0xff] }
 0x727   :  { %2800 = vtanh.f32 %v3632_v44  ;;  %v1241_v1 = vmul.f32 0.5, %v1239_v32  ;;  %v1258_v23 = vunpack.c.l.bf16 %v1254_v37  ;;  %v1259_v31 = vunpack.c.h.bf16 %v1254_v37 }
 0x728   :  { %v3636_v13 = vadd.f32 %v1245_v59, %v1243_v12  ;;  %v1265_v37 = vunpack.c.h.bf16 %v1257_v27 }
 0x72a   :  { %2802 = vtanh.f32 %v3636_v13 }
 0x731   :  { %v2801_v17 = vpop.eup %2800 }
 0x732   :  { %v1250_v24 = vmul.f32 %v2801_v17, %v1240_v29  ;;  %v1264_v17 = vunpack.c.l.bf16 %v1257_v27 }
 0x734   :  { %v2803_v21 = vpop.eup %2802 }
 0x735   :  { %v1251_v63 = vmul.f32 %v2803_v21, %v1241_v1 }
 0x737   :  { %v1252_v20 = vpack.c.bf16 %v1251_v63, %v1250_v24  ;;  %v1261_v63 = vunpack.c.h.bf16 %v1255_v28 }
 0x739   :  { %1299 = vmatmul.mubr.bf16.vlgmr.msra.gmra.mrb[28].mxu0 %v1252_v20  ;;  %1342 = vmatmul.mubr.bf16.vlgmr.msra.gmra.mrb[28].mxu1 %v1252_v20 }
 0x73a   :  { %1411 = vmatpush1.bf16.msra.mxu0 %v3449_v39  ;;  %1454 = vmatpush1.bf16.msra.mxu1 %v3452_v50 }
 0x73b   :  { %1412 = vmatprep.subr.bf16.mxu0 %v3455_v4  ;;  %1455 = vmatprep.subr.bf16.mxu1 %v3458_v54 }
 0x73c   :  { %1442 = vmatprep.mubr.bf16.mxu0 %v3139_v0  ;;  %1485 = vmatprep.mubr.bf16.mxu1 %v3139_v0 }
 0x73e   :  { %1413 = vmatpush1.bf16.msra.mxu0 %v3463_v58  ;;  %1456 = vmatpush1.bf16.msra.mxu1 %v3466_v52 }
 0x73f   :  { %1414 = vmatprep.subr.bf16.mxu0 %v3469_v57  ;;  %1457 = vmatprep.subr.bf16.mxu1 %v3472_v60 }
 0x742   :  { %1415 = vmatpush1.bf16.msra.mxu0 %v3475_v62  ;;  %1458 = vmatpush1.bf16.msra.mxu1 %v3478_v38 }
 0x743   :  { %1416 = vmatprep.subr.bf16.mxu0 %v3481_v33  ;;  %1459 = vmatprep.subr.bf16.mxu1 %v3484_v49 }
 0x746   :  { %1417 = vmatpush1.bf16.msra.mxu0 %v3487_v61  ;;  %1460 = vmatpush1.bf16.msra.mxu1 %v3540_v10 }
 0x747   :  { %1418 = vmatprep.subr.bf16.mxu0 %v3491_v53  ;;  %1461 = vmatprep.subr.bf16.mxu1 %v3544_v45 }
 0x74a   :  { %1419 = vmatpush1.bf16.msra.mxu0 %v3495_v34  ;;  %1462 = vmatpush1.bf16.msra.mxu1 %v3548_v56 }
 0x74b   :  { %1420 = vmatprep.subr.bf16.mxu0 %v3551_v47  ;;  %1463 = vmatprep.subr.bf16.mxu1 %v3554_v42 }
 0x74e   :  { %1421 = vmatpush1.bf16.msra.mxu0 %v3557_v51  ;;  %1464 = vmatpush1.bf16.msra.mxu1 %v3560_v46 }
 0x74f   :  { %1422 = vmatprep.subr.bf16.mxu0 %v3563_v48  ;;  %1465 = vmatprep.subr.bf16.mxu1 %v3566_v2 }
 0x752   :  { %1423 = vmatpush1.bf16.msra.mxu0 %v3569_v3  ;;  %1466 = vmatpush1.bf16.msra.mxu1 %v3572_v5 }
 0x753   :  { %1424 = vmatprep.subr.bf16.mxu0 %v3575_v7  ;;  %1467 = vmatprep.subr.bf16.mxu1 %v3578_v8 }
 0x756   :  { %1425 = vmatpush1.bf16.msra.mxu0 %v3581_v9  ;;  %1468 = vmatpush1.bf16.msra.mxu1 %v3584_v11 }
 0x757   :  { %1554 = vmatprep.subr.bf16.mxu0 %v3511_v18  ;;  %1597 = vmatprep.subr.bf16.mxu1 %v3514_v19 }
 0x80c   :  { %v1300_v30 = vpop.f32.mrb[28].mxu0  ;;  %v1343_v6 = vpop.f32.mrb[28].mxu1 }
 0x80d   :  { %v1352_v41 = vadd.f32 %v1300_v30, %v1258_v23  ;;  %v1302_v22 = vpop.f32.mrb[29].mxu0  ;;  %v1345_v55 = vpop.f32.mrb[29].mxu1  ;;  %v1354_v1 = vadd.f32 %v1343_v6, %v1260_v40 }
 0x80e   :  { %v1353_v43 = vadd.f32 %v1302_v22, %v1259_v31  ;;  %v1304_v25 = vpop.f32.mrb[30].mxu0  ;;  %v1347_v59 = vpop.f32.mrb[30].mxu1  ;;  %v1355_v14 = vadd.f32 %v1345_v55, %v1261_v63 }
 0x80f   :  { %v1360_v12 = vmul.f32 0.5, %v1352_v41  ;;  %v1356_v35 = vadd.f32 %v1304_v25, %v1262_v26  ;;  %v1306_v15 = vpop.f32.mrb[31].mxu0  ;;  %v1349_v16 = vpop.f32.mrb[31].mxu1  ;;  %v1358_v20 = vadd.f32 %v1347_v59, %v1264_v17 }
 0x810   :  { %v1368_v32 = vmul.f32 0.5, %v1353_v43  ;;  %v1357_v29 = vadd.f32 %v1306_v15, %v1263_v36  ;;  %v1359_v23 = vadd.f32 %v1349_v16, %v1265_v37  ;;  %v1378_v41 = vmul.f32 0.5, %v1355_v14 }
 0x811   :  { %2804 = vtanh.f32 %v1360_v12  ;;  %v1361_v21 = vmul.f32 0.5, %v1356_v35 }
 0x812   :  { %2806 = vtanh.f32 %v1368_v32  ;;  %v1369_v24 = vmul.f32 0.5, %v1357_v29  ;;  %v1379_v36 = vmul.f32 0.5, %v1359_v23 }
 0x813   :  { %2808 = vtanh.f32 %v1361_v21 }
 0x814   :  { %2810 = vtanh.f32 %v1354_v1 }
 0x815   :  { %2812 = vtanh.f32 %v1369_v24 }
 0x816   :  { %2814 = vtanh.f32 %v1358_v20 }
 0x817   :  { %2816 = vtanh.f32 %v1378_v41 }
 0x818   :  { %2818 = vtanh.f32 %v1379_v36 }
 0x81b   :  { %v2805_v31 = vpop.eup %2804 }
 0x81c   :  { %v2807_v26 = vpop.eup %2806  ;;  %v1364_v30 = vadd.f32 1.0, %v2805_v31 }
 0x81d   :  { %v1372_v22 = vadd.f32 1.0, %v2807_v26  ;;  %v2809_v43 = vpop.eup %2808 }
 0x81e   :  { %v1366_v6 = vmul.f32 0.5, %v1364_v30  ;;  %v2811_v40 = vpop.eup %2810  ;;  %v1365_v12 = vadd.f32 1.0, %v2809_v43 }
 0x81f   :  { %v1374_v25 = vmul.f32 0.5, %v1372_v22  ;;  %v2813_v28 = vpop.eup %2812 }
 0x820   :  { %v1388_v35 = vmul.f32 %v2811_v40, %v1366_v6  ;;  %v1367_v59 = vmul.f32 0.5, %v1365_v12  ;;  %v1373_v55 = vadd.f32 1.0, %v2813_v28  ;;  %v2815_v15 = vpop.eup %2814 }
 0x821   :  { %v1386_v27 = vmul.f32 %v1374_v25, %v3632_v44  ;;  %v2817_v21 = vpop.eup %2816 }
 0x822   :  { %v1375_v32 = vmul.f32 0.5, %v1373_v55  ;;  %v1389_v17 = vmul.f32 %v2815_v15, %v1367_v59  ;;  %v2819_v24 = vpop.eup %2818  ;;  %v1382_v63 = vadd.f32 1.0, %v2817_v21 }
 0x823   :  { %v3674_v16 = vadd.f32 %v1388_v35, %v1386_v27  ;;  %v1383_v44 = vadd.f32 1.0, %v2819_v24 }
 0x824   :  { %v1387_v29 = vmul.f32 %v1375_v32, %v3636_v13  ;;  %v1384_v37 = vmul.f32 0.5, %v1382_v63 }
 0x825   :  { %2820 = vtanh.f32 %v3674_v16  ;;  %v1385_v14 = vmul.f32 0.5, %v1383_v44 }
 0x826   :  { %v3678_v1 = vadd.f32 %v1389_v17, %v1387_v29 }
 0x828   :  { %2822 = vtanh.f32 %v3678_v1 }
 0x82f   :  { %v2821_v20 = vpop.eup %2820 }
 0x830   :  { %v1394_v31 = vmul.f32 %v2821_v20, %v1384_v37 }
 0x832   :  { %v2823_v23 = vpop.eup %2822 }
 0x833   :  { %v1395_v26 = vmul.f32 %v2823_v23, %v1385_v14 }
 0x835   :  { %v1396_v30 = vpack.c.bf16 %v1395_v26, %v1394_v31 }
 0x837   :  { %1443 = vmatmul.mubr.bf16.vlgmr.msra.gmra.mrb[32].mxu0 %v1396_v30  ;;  %1486 = vmatmul.mubr.bf16.vlgmr.msra.gmra.mrb[32].mxu1 %v1396_v30 }
 0x838   :  { %1555 = vmatpush1.bf16.msra.mxu0 %v3449_v39  ;;  %1598 = vmatpush1.bf16.msra.mxu1 %v3452_v50  ;;  %v1398_v39 = vld [vmem:[#allocation4 + $0x100] sm:$0xff]  ;;  %v1400_v50 = vld [vmem:[#allocation4 + $0x110] sm:$0xff] }
 0x839   :  { %1556 = vmatprep.subr.bf16.mxu0 %v3455_v4  ;;  %1599 = vmatprep.subr.bf16.mxu1 %v3458_v54  ;;  %v1402_v4 = vunpack.c.l.bf16 %v1398_v39  ;;  %v1399_v54 = vld [vmem:[#allocation4 + $0x108] sm:$0xff] }
 0x83a   :  { %1586 = vmatprep.mubr.bf16.mxu0 %v3139_v0  ;;  %1629 = vmatprep.mubr.bf16.mxu1 %v3139_v0  ;;  %v1405_v35 = vunpack.c.h.bf16 %v1399_v54 }
 0x83c   :  { %1557 = vmatpush1.bf16.msra.mxu0 %v3463_v58  ;;  %1600 = vmatpush1.bf16.msra.mxu1 %v3466_v52  ;;  %v1403_v58 = vunpack.c.h.bf16 %v1398_v39  ;;  %v1406_v52 = vunpack.c.l.bf16 %v1400_v50 }
 0x83d   :  { %1558 = vmatprep.subr.bf16.mxu0 %v3469_v57  ;;  %1601 = vmatprep.subr.bf16.mxu1 %v3472_v60 }
 0x840   :  { %1559 = vmatpush1.bf16.msra.mxu0 %v3475_v62  ;;  %1602 = vmatpush1.bf16.msra.mxu1 %v3478_v38  ;;  %v1407_v62 = vunpack.c.h.bf16 %v1400_v50 }
 0x841   :  { %1560 = vmatprep.subr.bf16.mxu0 %v3481_v33  ;;  %1603 = vmatprep.subr.bf16.mxu1 %v3484_v49  ;;  %v1404_v33 = vunpack.c.l.bf16 %v1399_v54 }
 0x844   :  { %1561 = vmatpush1.bf16.msra.mxu0 %v3487_v61  ;;  %1604 = vmatpush1.bf16.msra.mxu1 %v3540_v10 }
 0x845   :  { %1562 = vmatprep.subr.bf16.mxu0 %v3491_v53  ;;  %1605 = vmatprep.subr.bf16.mxu1 %v3544_v45  ;;  %v1401_v53 = vld [vmem:[#allocation4 + $0x118] sm:$0xff] }
 0x846   :  { %v1408_v6 = vunpack.c.l.bf16 %v1401_v53  ;;  %v1409_v59 = vunpack.c.h.bf16 %v1401_v53 }
 0x848   :  { %1563 = vmatpush1.bf16.msra.mxu0 %v3495_v34  ;;  %1606 = vmatpush1.bf16.msra.mxu1 %v3548_v56 }
 0x849   :  { %1564 = vmatprep.subr.bf16.mxu0 %v3551_v47  ;;  %1607 = vmatprep.subr.bf16.mxu1 %v3554_v42 }
 0x84c   :  { %1565 = vmatpush1.bf16.msra.mxu0 %v3557_v51  ;;  %1608 = vmatpush1.bf16.msra.mxu1 %v3560_v46 }
 0x84d   :  { %1566 = vmatprep.subr.bf16.mxu0 %v3563_v48  ;;  %1609 = vmatprep.subr.bf16.mxu1 %v3566_v2 }
 0x850   :  { %1567 = vmatpush1.bf16.msra.mxu0 %v3569_v3  ;;  %1610 = vmatpush1.bf16.msra.mxu1 %v3572_v5 }
 0x851   :  { %1568 = vmatprep.subr.bf16.mxu0 %v3575_v7  ;;  %1611 = vmatprep.subr.bf16.mxu1 %v3578_v8 }
 0x854   :  { %1569 = vmatpush1.bf16.msra.mxu0 %v3581_v9  ;;  %1612 = vmatpush1.bf16.msra.mxu1 %v3584_v11 }
 0x855   :  { %1698 = vmatprep.subr.bf16.mxu0 %v3511_v18  ;;  %1741 = vmatprep.subr.bf16.mxu1 %v3514_v19 }
 0x90a   :  { %v1444_v57 = vpop.f32.mrb[32].mxu0  ;;  %v1487_v60 = vpop.f32.mrb[32].mxu1 }
 0x90b   :  { %v1496_v38 = vadd.f32 %v1444_v57, %v1402_v4  ;;  %v1446_v49 = vpop.f32.mrb[33].mxu0  ;;  %v1489_v61 = vpop.f32.mrb[33].mxu1  ;;  %v1498_v25 = vadd.f32 %v1487_v60, %v1404_v33 }
 0x90c   :  { %v1497_v34 = vadd.f32 %v1446_v49, %v1403_v58  ;;  %v1448_v13 = vpop.f32.mrb[34].mxu0  ;;  %v1491_v41 = vpop.f32.mrb[34].mxu1  ;;  %v1499_v55 = vadd.f32 %v1489_v61, %v1405_v35  ;;  %v3755_v35 = vld [vmem:[#allocation7 + $0x64] ss:$16 sps:$4 sm:$0xff]  }
 0x90d   :  { %v1504_v18 = vmul.f32 0.5, %v1496_v38  ;;  %v1500_v22 = vadd.f32 %v1448_v13, %v1406_v52  ;;  %v1450_v19 = vpop.f32.mrb[35].mxu0  ;;  %v1493_v36 = vpop.f32.mrb[35].mxu1  ;;  %v1502_v27 = vadd.f32 %v1491_v41, %v1408_v6  ;;  %v3740_v6 = vld [vmem:[#allocation7 + $0x28] ss:$16 sps:$4 sm:$0xff]  }
 0x90e   :  { %v1512_v43 = vmul.f32 0.5, %v1497_v34  ;;  %v1501_v40 = vadd.f32 %v1450_v19, %v1407_v62  ;;  %v1503_v15 = vadd.f32 %v1493_v36, %v1409_v59  ;;  %v1522_v21 = vmul.f32 0.5, %v1499_v55  ;;  %v3729_v19 = vld [vmem:[#allocation7 + $0x24] ss:$16 sps:$4 sm:$0xff]   ;;  %v3732_v36 = vld [vmem:[#allocation7 + $0x2c] ss:$16 sps:$4 sm:$0xff]  }
 0x90f   :  { %2824 = vtanh.f32 %v1504_v18  ;;  %v1505_v12 = vmul.f32 0.5, %v1500_v22  ;;  %v3726_v22 = vld [vmem:[#allocation7 + $0x8] ss:$16 sps:$4 sm:$0xff]   ;;  %v3761_v59 = vld [vmem:[#allocation7 + $0x60] ss:$16 sps:$4 sm:$0xff]  }
 0x910   :  { %2826 = vtanh.f32 %v1512_v43  ;;  %v1513_v28 = vmul.f32 0.5, %v1501_v40  ;;  %v1523_v63 = vmul.f32 0.5, %v1503_v15  ;;  %v3737_v43 = vld [vmem:[#allocation7 + $0x20] ss:$16 sps:$4 sm:$0xff]   ;;  %v3743_v40 = vld [vmem:[#allocation7 + $0x44] ss:$16 sps:$4 sm:$0xff]  }
 0x911   :  { %2828 = vtanh.f32 %v1505_v12  ;;  %v3749_v12 = vld [vmem:[#allocation7 + $0x40] ss:$16 sps:$4 sm:$0xff]   ;;  %v3765_v55 = vld [vmem:[#allocation7 + $0x84] ss:$16 sps:$4 sm:$0xff]  }
 0x912   :  { %2830 = vtanh.f32 %v1498_v25  ;;  %v3746_v25 = vld [vmem:[#allocation7 + $0x4c] ss:$16 sps:$4 sm:$0xff]   ;;  %v3769_v15 = vld [vmem:[#allocation7 + $0x80] ss:$16 sps:$4 sm:$0xff]  }
 0x913   :  { %2832 = vtanh.f32 %v1513_v28  ;;  %v3752_v28 = vld [vmem:[#allocation7 + $0x48] ss:$16 sps:$4 sm:$0xff]  }
 0x914   :  { %2834 = vtanh.f32 %v1502_v27  ;;  %v3758_v27 = vld [vmem:[#allocation7 + $0x6c] ss:$16 sps:$4 sm:$0xff]  }
 0x915   :  { %2836 = vtanh.f32 %v1522_v21 }
 0x916   :  { %2838 = vtanh.f32 %v1523_v63 }
 0x919   :  { %v2825_v32 = vpop.eup %2824 }
 0x91a   :  { %v2827_v17 = vpop.eup %2826  ;;  %v1508_v29 = vadd.f32 1.0, %v2825_v32  ;;  %v1545_v32 = vld [vmem:[#allocation4 + $0x138] sm:$0xff] }
 0x91b   :  { %v1516_v24 = vadd.f32 1.0, %v2827_v17  ;;  %v2829_v44 = vpop.eup %2828 }
 0x91c   :  { %v1510_v20 = vmul.f32 0.5, %v1508_v29  ;;  %v2831_v37 = vpop.eup %2830  ;;  %v1509_v23 = vadd.f32 1.0, %v2829_v44 }
 0x91d   :  { %v1518_v14 = vmul.f32 0.5, %v1516_v24  ;;  %v2833_v31 = vpop.eup %2832 }
 0x91e   :  { %v1532_v26 = vmul.f32 %v2831_v37, %v1510_v20  ;;  %v1511_v39 = vmul.f32 0.5, %v1509_v23  ;;  %v1517_v50 = vadd.f32 1.0, %v2833_v31  ;;  %v2835_v4 = vpop.eup %2834 }
 0x91f   :  { %v1530_v30 = vmul.f32 %v1518_v14, %v3674_v16  ;;  %v2837_v62 = vpop.eup %2836  ;;  %v1552_v14 = vunpack.c.l.bf16 %v1545_v32 }
 0x920   :  { %v1519_v58 = vmul.f32 0.5, %v1517_v50  ;;  %v1533_v52 = vmul.f32 %v2835_v4, %v1511_v39  ;;  %v2839_v38 = vpop.eup %2838  ;;  %v1526_v33 = vadd.f32 1.0, %v2837_v62  ;;  %v1553_v4 = vunpack.c.h.bf16 %v1545_v32 }
 0x921   :  { %v3716_v54 = vadd.f32 %v1532_v26, %v1530_v30  ;;  %v1527_v16 = vadd.f32 1.0, %v2839_v38 }
 0x922   :  { %v1531_v57 = vmul.f32 %v1519_v58, %v3678_v1  ;;  %v1528_v61 = vmul.f32 0.5, %v1526_v33  ;;  %v3723_v1 = vld [vmem:[#allocation7] ss:$16 sps:$4 sm:$0xff]  }
 0x923   :  { %2840 = vtanh.f32 %v3716_v54  ;;  %v1529_v53 = vmul.f32 0.5, %v1527_v16 }
 0x924   :  { %v3720_v60 = vadd.f32 %v1533_v52, %v1531_v57 }
 0x926   :  { %2842 = vtanh.f32 %v3720_v60 }
 0x92d   :  { %v2841_v49 = vpop.eup %2840 }
 0x92e   :  { %v1538_v13 = vmul.f32 %v2841_v49, %v1528_v61 }
 0x930   :  { %v2843_v34 = vpop.eup %2842 }
 0x931   :  { %v1539_v41 = vmul.f32 %v2843_v34, %v1529_v53 }
 0x933   :  { %v1540_v18 = vpack.c.bf16 %v1539_v41, %v1538_v13 }
 0x935   :  { %1587 = vmatmul.mubr.bf16.vlgmr.msra.gmra.mrb[36].mxu0 %v1540_v18  ;;  %1630 = vmatmul.mubr.bf16.vlgmr.msra.gmra.mrb[36].mxu1 %v1540_v18 }
 0x936   :  { %1699 = vmatpush1.bf16.msra.mxu0 %v3723_v1  ;;  %1742 = vmatpush1.bf16.msra.mxu1 %v3726_v22 }
 0x937   :  { %1700 = vmatprep.subr.bf16.mxu0 %v3729_v19  ;;  %1743 = vmatprep.subr.bf16.mxu1 %v3732_v36 }
 0x938   :  { %1730 = vmatprep.mubr.bf16.mxu0 %v3139_v0  ;;  %1773 = vmatprep.mubr.bf16.mxu1 %v3139_v0 }
 0x93a   :  { %1701 = vmatpush1.bf16.msra.mxu0 %v3737_v43  ;;  %1744 = vmatpush1.bf16.msra.mxu1 %v3740_v6 }
 0x93b   :  { %1702 = vmatprep.subr.bf16.mxu0 %v3743_v40  ;;  %1745 = vmatprep.subr.bf16.mxu1 %v3746_v25 }
 0x93e   :  { %1703 = vmatpush1.bf16.msra.mxu0 %v3749_v12  ;;  %1746 = vmatpush1.bf16.msra.mxu1 %v3752_v28 }
 0x93f   :  { %1704 = vmatprep.subr.bf16.mxu0 %v3755_v35  ;;  %1747 = vmatprep.subr.bf16.mxu1 %v3758_v27 }
 0x942   :  { %1705 = vmatpush1.bf16.msra.mxu0 %v3761_v59  ;;  %1748 = vmatpush1.bf16.msra.mxu1 %v3540_v10  ;;  %v3785_v10 = vld [vmem:[#allocation7 + $0x4] ss:$16 sps:$4 sm:$0xff]  }
 0x943   :  { %1706 = vmatprep.subr.bf16.mxu0 %v3765_v55  ;;  %1749 = vmatprep.subr.bf16.mxu1 %v3544_v45  ;;  %v3788_v45 = vld [vmem:[#allocation7 + $0xc] ss:$16 sps:$4 sm:$0xff]  }
 0x946   :  { %1707 = vmatpush1.bf16.msra.mxu0 %v3769_v15  ;;  %1750 = vmatpush1.bf16.msra.mxu1 %v3548_v56  ;;  %v1542_v56 = vld [vmem:[#allocation4 + $0x120] sm:$0xff] }
 0x947   :  { %1708 = vmatprep.subr.bf16.mxu0 %v3551_v47  ;;  %1751 = vmatprep.subr.bf16.mxu1 %v3554_v42  ;;  %v1544_v47 = vld [vmem:[#allocation4 + $0x130] sm:$0xff]  ;;  %v1546_v42 = vunpack.c.l.bf16 %v1542_v56 }
 0x94a   :  { %1709 = vmatpush1.bf16.msra.mxu0 %v3557_v51  ;;  %1752 = vmatpush1.bf16.msra.mxu1 %v3560_v46  ;;  %v1543_v51 = vld [vmem:[#allocation4 + $0x128] sm:$0xff]  ;;  %v1547_v46 = vunpack.c.h.bf16 %v1542_v56 }
 0x94b   :  { %1710 = vmatprep.subr.bf16.mxu0 %v3563_v48  ;;  %1753 = vmatprep.subr.bf16.mxu1 %v3566_v2  ;;  %v1550_v48 = vunpack.c.l.bf16 %v1544_v47  ;;  %v1549_v39 = vunpack.c.h.bf16 %v1543_v51 }
 0x94e   :  { %1711 = vmatpush1.bf16.msra.mxu0 %v3569_v3  ;;  %1754 = vmatpush1.bf16.msra.mxu1 %v3572_v5  ;;  %v1551_v5 = vunpack.c.h.bf16 %v1544_v47 }
 0x94f   :  { %1712 = vmatprep.subr.bf16.mxu0 %v3575_v7  ;;  %1755 = vmatprep.subr.bf16.mxu1 %v3578_v8  ;;  %v1548_v8 = vunpack.c.l.bf16 %v1543_v51 }
 0x952   :  { %1713 = vmatpush1.bf16.msra.mxu0 %v3581_v9  ;;  %1756 = vmatpush1.bf16.msra.mxu1 %v3584_v11 }
 0x953   :  { %1842 = vmatprep.subr.bf16.mxu0 %v3785_v10  ;;  %1885 = vmatprep.subr.bf16.mxu1 %v3788_v45 }
 0xa08   :  { %v1588_v2 = vpop.f32.mrb[36].mxu0  ;;  %v1631_v3 = vpop.f32.mrb[36].mxu1 }
 0xa09   :  { %v1640_v7 = vadd.f32 %v1588_v2, %v1546_v42  ;;  %v1590_v9 = vpop.f32.mrb[37].mxu0  ;;  %v1633_v11 = vpop.f32.mrb[37].mxu1  ;;  %v1642_v31 = vadd.f32 %v1631_v3, %v1548_v8 }
 0xa0a   :  { %v1641_v17 = vadd.f32 %v1590_v9, %v1547_v46  ;;  %v1592_v29 = vpop.f32.mrb[38].mxu0  ;;  %v1635_v21 = vpop.f32.mrb[38].mxu1  ;;  %v1643_v58 = vadd.f32 %v1633_v11, %v1549_v39  ;;  %v3840_v39 = vld [vmem:[#allocation7 + $0xcc] ss:$16 sps:$4 sm:$0xff]  }
 0xa0b   :  { %v1648_v24 = vmul.f32 0.5, %v1640_v7  ;;  %v1644_v63 = vadd.f32 %v1592_v29, %v1550_v48  ;;  %v1594_v44 = vpop.f32.mrb[39].mxu0  ;;  %v1637_v20 = vpop.f32.mrb[39].mxu1  ;;  %v1646_v50 = vadd.f32 %v1635_v21, %v1552_v14  ;;  %v3825_v14 = vld [vmem:[#allocation7 + $0xa4] ss:$16 sps:$4 sm:$0xff]  }
 0xa0c   :  { %v1656_v37 = vmul.f32 0.5, %v1641_v17  ;;  %v1645_v23 = vadd.f32 %v1594_v44, %v1551_v5  ;;  %v1647_v52 = vadd.f32 %v1637_v20, %v1553_v4  ;;  %v1666_v33 = vmul.f32 0.5, %v1643_v58  ;;  %v3818_v20 = vld [vmem:[#allocation7 + $0x8c] ss:$16 sps:$4 sm:$0xff]   ;;  %v3846_v4 = vld [vmem:[#allocation7 + $0xc8] ss:$16 sps:$4 sm:$0xff]  }
 0xa0d   :  { %2844 = vtanh.f32 %v1648_v24  ;;  %v1649_v26 = vmul.f32 0.5, %v1644_v63  ;;  %v3849_v58 = vld [vmem:[#allocation7 + $0xe4] ss:$16 sps:$4 sm:$0xff]  }
 0xa0e   :  { %2846 = vtanh.f32 %v1656_v37  ;;  %v1657_v30 = vmul.f32 0.5, %v1645_v23  ;;  %v1667_v49 = vmul.f32 0.5, %v1647_v52  ;;  %v3822_v37 = vld [vmem:[#allocation7 + $0x88] ss:$16 sps:$4 sm:$0xff]   ;;  %v3828_v23 = vld [vmem:[#allocation7 + $0xac] ss:$16 sps:$4 sm:$0xff]  }
 0xa0f   :  { %2848 = vtanh.f32 %v1649_v26  ;;  %v3834_v26 = vld [vmem:[#allocation7 + $0xa8] ss:$16 sps:$4 sm:$0xff]   ;;  %v3852_v52 = vld [vmem:[#allocation7 + $0xec] ss:$16 sps:$4 sm:$0xff]  }
 0xa10   :  { %2850 = vtanh.f32 %v1642_v31  ;;  %v3831_v31 = vld [vmem:[#allocation7 + $0xa0] ss:$16 sps:$4 sm:$0xff]  }
 0xa11   :  { %2852 = vtanh.f32 %v1657_v30  ;;  %v3837_v30 = vld [vmem:[#allocation7 + $0xc4] ss:$16 sps:$4 sm:$0xff]  }
 0xa12   :  { %2854 = vtanh.f32 %v1646_v50  ;;  %v3843_v50 = vld [vmem:[#allocation7 + $0xc0] ss:$16 sps:$4 sm:$0xff]  }
 0xa13   :  { %2856 = vtanh.f32 %v1666_v33  ;;  %v1688_v33 = vld [vmem:[#allocation4 + $0x150] sm:$0xff] }
 0xa14   :  { %2858 = vtanh.f32 %v1667_v49  ;;  %v1687_v49 = vld [vmem:[#allocation4 + $0x148] sm:$0xff] }
 0xa17   :  { %v2845_v57 = vpop.eup %2844 }
 0xa18   :  { %v2847_v62 = vpop.eup %2846  ;;  %v1652_v38 = vadd.f32 1.0, %v2845_v57  ;;  %v3855_v57 = vld [vmem:[#allocation7 + $0xe0] ss:$16 sps:$4 sm:$0xff]  }
 0xa19   :  { %v1660_v16 = vadd.f32 1.0, %v2847_v62  ;;  %v2849_v61 = vpop.eup %2848  ;;  %v3858_v62 = vld [vmem:[#allocation7 + $0xe8] ss:$16 sps:$4 sm:$0xff]  }
 0xa1a   :  { %v1654_v53 = vmul.f32 0.5, %v1652_v38  ;;  %v2851_v34 = vpop.eup %2850  ;;  %v1653_v41 = vadd.f32 1.0, %v2849_v61  ;;  %v1686_v38 = vld [vmem:[#allocation4 + $0x140] sm:$0xff] }
 0xa1b   :  { %v1662_v13 = vmul.f32 0.5, %v1660_v16  ;;  %v2853_v18 = vpop.eup %2852  ;;  %v1690_v16 = vunpack.c.l.bf16 %v1686_v38  ;;  %v1691_v61 = vunpack.c.h.bf16 %v1686_v38 }
 0xa1c   :  { %v1676_v56 = vmul.f32 %v2851_v34, %v1654_v53  ;;  %v1655_v42 = vmul.f32 0.5, %v1653_v41  ;;  %v1661_v51 = vadd.f32 1.0, %v2853_v18  ;;  %v2855_v46 = vpop.eup %2854  ;;  %v1694_v53 = vunpack.c.l.bf16 %v1688_v33 }
 0xa1d   :  { %v1674_v47 = vmul.f32 %v1662_v13, %v3716_v54  ;;  %v2857_v8 = vpop.eup %2856  ;;  %v1695_v41 = vunpack.c.h.bf16 %v1688_v33 }
 0xa1e   :  { %v1663_v2 = vmul.f32 0.5, %v1661_v51  ;;  %v1677_v3 = vmul.f32 %v2855_v46, %v1655_v42  ;;  %v2859_v9 = vpop.eup %2858  ;;  %v1670_v11 = vadd.f32 1.0, %v2857_v8  ;;  %v1689_v51 = vld [vmem:[#allocation4 + $0x158] sm:$0xff] }
 0xa1f   :  { %v3792_v48 = vadd.f32 %v1676_v56, %v1674_v47  ;;  %v1671_v54 = vadd.f32 1.0, %v2859_v9  ;;  %v1692_v56 = vunpack.c.l.bf16 %v1687_v49  ;;  %v1697_v38 = vunpack.c.h.bf16 %v1689_v51 }
 0xa20   :  { %v1675_v5 = vmul.f32 %v1663_v2, %v3720_v60  ;;  %v1672_v17 = vmul.f32 0.5, %v1670_v11  ;;  %v3814_v60 = vld [vmem:[#allocation7 + $0x68] ss:$16 sps:$4 sm:$0xff]  }
 0xa21   :  { %2860 = vtanh.f32 %v3792_v48  ;;  %v1673_v29 = vmul.f32 0.5, %v1671_v54 }
 0xa22   :  { %v3796_v7 = vadd.f32 %v1677_v3, %v1675_v5 }
 0xa24   :  { %2862 = vtanh.f32 %v3796_v7 }
 0xa2b   :  { %v2861_v32 = vpop.eup %2860 }
 0xa2c   :  { %v1682_v24 = vmul.f32 %v2861_v32, %v1672_v17  ;;  %v1696_v32 = vunpack.c.l.bf16 %v1689_v51 }
 0xa2e   :  { %v2863_v21 = vpop.eup %2862 }
 0xa2f   :  { %v1683_v63 = vmul.f32 %v2863_v21, %v1673_v29 }
 0xa31   :  { %v1684_v44 = vpack.c.bf16 %v1683_v63, %v1682_v24  ;;  %v1693_v63 = vunpack.c.h.bf16 %v1687_v49 }
 0xa33   :  { %1731 = vmatmul.mubr.bf16.vlgmr.msra.gmra.mrb[40].mxu0 %v1684_v44  ;;  %1774 = vmatmul.mubr.bf16.vlgmr.msra.gmra.mrb[40].mxu1 %v1684_v44 }
 0xa34   :  { %1843 = vmatpush1.bf16.msra.mxu0 %v3723_v1  ;;  %1886 = vmatpush1.bf16.msra.mxu1 %v3726_v22 }
 0xa35   :  { %1844 = vmatprep.subr.bf16.mxu0 %v3729_v19  ;;  %1887 = vmatprep.subr.bf16.mxu1 %v3732_v36 }
 0xa36   :  { %1874 = vmatprep.mubr.bf16.mxu0 %v3139_v0  ;;  %1917 = vmatprep.mubr.bf16.mxu1 %v3139_v0 }
 0xa38   :  { %1845 = vmatpush1.bf16.msra.mxu0 %v3737_v43  ;;  %1888 = vmatpush1.bf16.msra.mxu1 %v3740_v6 }
 0xa39   :  { %1846 = vmatprep.subr.bf16.mxu0 %v3743_v40  ;;  %1889 = vmatprep.subr.bf16.mxu1 %v3746_v25 }
 0xa3c   :  { %1847 = vmatpush1.bf16.msra.mxu0 %v3749_v12  ;;  %1890 = vmatpush1.bf16.msra.mxu1 %v3752_v28 }
 0xa3d   :  { %1848 = vmatprep.subr.bf16.mxu0 %v3755_v35  ;;  %1891 = vmatprep.subr.bf16.mxu1 %v3758_v27 }
 0xa40   :  { %1849 = vmatpush1.bf16.msra.mxu0 %v3761_v59  ;;  %1892 = vmatpush1.bf16.msra.mxu1 %v3814_v60 }
 0xa41   :  { %1850 = vmatprep.subr.bf16.mxu0 %v3765_v55  ;;  %1893 = vmatprep.subr.bf16.mxu1 %v3818_v20 }
 0xa44   :  { %1851 = vmatpush1.bf16.msra.mxu0 %v3769_v15  ;;  %1894 = vmatpush1.bf16.msra.mxu1 %v3822_v37 }
 0xa45   :  { %1852 = vmatprep.subr.bf16.mxu0 %v3825_v14  ;;  %1895 = vmatprep.subr.bf16.mxu1 %v3828_v23 }
 0xa48   :  { %1853 = vmatpush1.bf16.msra.mxu0 %v3831_v31  ;;  %1896 = vmatpush1.bf16.msra.mxu1 %v3834_v26 }
 0xa49   :  { %1854 = vmatprep.subr.bf16.mxu0 %v3837_v30  ;;  %1897 = vmatprep.subr.bf16.mxu1 %v3840_v39 }
 0xa4c   :  { %1855 = vmatpush1.bf16.msra.mxu0 %v3843_v50  ;;  %1898 = vmatpush1.bf16.msra.mxu1 %v3846_v4 }
 0xa4d   :  { %1856 = vmatprep.subr.bf16.mxu0 %v3849_v58  ;;  %1899 = vmatprep.subr.bf16.mxu1 %v3852_v52 }
 0xa50   :  { %1857 = vmatpush1.bf16.msra.mxu0 %v3855_v57  ;;  %1900 = vmatpush1.bf16.msra.mxu1 %v3858_v62 }
 0xa51   :  { %1986 = vmatprep.subr.bf16.mxu0 %v3785_v10  ;;  %2029 = vmatprep.subr.bf16.mxu1 %v3788_v45 }
 0xb06   :  { %v1732_v34 = vpop.f32.mrb[40].mxu0  ;;  %v1775_v13 = vpop.f32.mrb[40].mxu1 }
 0xb07   :  { %v1784_v18 = vadd.f32 %v1732_v34, %v1690_v16  ;;  %v1734_v47 = vpop.f32.mrb[41].mxu0  ;;  %v1777_v42 = vpop.f32.mrb[41].mxu1  ;;  %v1786_v29 = vadd.f32 %v1775_v13, %v1692_v56 }
 0xb08   :  { %v1785_v46 = vadd.f32 %v1734_v47, %v1691_v61  ;;  %v1736_v2 = vpop.f32.mrb[42].mxu0  ;;  %v1779_v3 = vpop.f32.mrb[42].mxu1  ;;  %v1787_v33 = vadd.f32 %v1777_v42, %v1693_v63 }
 0xb09   :  { %v1792_v5 = vmul.f32 0.5, %v1784_v18  ;;  %v1788_v8 = vadd.f32 %v1736_v2, %v1694_v53  ;;  %v1738_v9 = vpop.f32.mrb[43].mxu0  ;;  %v1781_v11 = vpop.f32.mrb[43].mxu1  ;;  %v1790_v44 = vadd.f32 %v1779_v3, %v1696_v32 }
 0xb0a   :  { %v1800_v54 = vmul.f32 0.5, %v1785_v46  ;;  %v1789_v17 = vadd.f32 %v1738_v9, %v1695_v41  ;;  %v1791_v16 = vadd.f32 %v1781_v11, %v1697_v38  ;;  %v1810_v18 = vmul.f32 0.5, %v1787_v33 }
 0xb0b   :  { %2864 = vtanh.f32 %v1792_v5  ;;  %v1793_v21 = vmul.f32 0.5, %v1788_v8 }
 0xb0c   :  { %2866 = vtanh.f32 %v1800_v54  ;;  %v1801_v24 = vmul.f32 0.5, %v1789_v17  ;;  %v1811_v41 = vmul.f32 0.5, %v1791_v16 }
 0xb0d   :  { %2868 = vtanh.f32 %v1793_v21 }
 0xb0e   :  { %2870 = vtanh.f32 %v1786_v29 }
 0xb0f   :  { %2872 = vtanh.f32 %v1801_v24 }
 0xb10   :  { %2874 = vtanh.f32 %v1790_v44 }
 0xb11   :  { %2876 = vtanh.f32 %v1810_v18  ;;  %v1832_v18 = vld [vmem:[#allocation4 + $0x170] sm:$0xff] }
 0xb12   :  { %2878 = vtanh.f32 %v1811_v41  ;;  %v1831_v41 = vld [vmem:[#allocation4 + $0x168] sm:$0xff] }
 0xb15   :  { %v2865_v61 = vpop.eup %2864 }
 0xb16   :  { %v2867_v53 = vpop.eup %2866  ;;  %v1796_v34 = vadd.f32 1.0, %v2865_v61 }
 0xb17   :  { %v1804_v47 = vadd.f32 1.0, %v2867_v53  ;;  %v2869_v46 = vpop.eup %2868 }
 0xb18   :  { %v1798_v13 = vmul.f32 0.5, %v1796_v34  ;;  %v2871_v56 = vpop.eup %2870  ;;  %v1797_v5 = vadd.f32 1.0, %v2869_v46 }
 0xb19   :  { %v1806_v2 = vmul.f32 0.5, %v1804_v47  ;;  %v2873_v49 = vpop.eup %2872 }
 0xb1a   :  { %v1820_v8 = vmul.f32 %v2871_v56, %v1798_v13  ;;  %v1799_v3 = vmul.f32 0.5, %v1797_v5  ;;  %v1805_v42 = vadd.f32 1.0, %v2873_v49  ;;  %v2875_v9 = vpop.eup %2874  ;;  %v1838_v13 = vunpack.c.l.bf16 %v1832_v18 }
 0xb1b   :  { %v1818_v51 = vmul.f32 %v1806_v2, %v3792_v48  ;;  %v2877_v21 = vpop.eup %2876  ;;  %v1839_v5 = vunpack.c.h.bf16 %v1832_v18 }
 0xb1c   :  { %v1807_v54 = vmul.f32 0.5, %v1805_v42  ;;  %v1821_v32 = vmul.f32 %v2875_v9, %v1799_v3  ;;  %v2879_v24 = vpop.eup %2878  ;;  %v1814_v63 = vadd.f32 1.0, %v2877_v21  ;;  %v1833_v42 = vld [vmem:[#allocation4 + $0x178] sm:$0xff] }
 0xb1d   :  { %v3864_v11 = vadd.f32 %v1820_v8, %v1818_v51  ;;  %v1815_v48 = vadd.f32 1.0, %v2879_v24  ;;  %v1836_v8 = vunpack.c.l.bf16 %v1831_v41 }
 0xb1e   :  { %v1819_v17 = vmul.f32 %v1807_v54, %v3796_v7  ;;  %v1816_v38 = vmul.f32 0.5, %v1814_v63  ;;  %v1830_v7 = vld [vmem:[#allocation4 + $0x160] sm:$0xff] }
 0xb1f   :  { %2880 = vtanh.f32 %v3864_v11  ;;  %v1817_v33 = vmul.f32 0.5, %v1815_v48  ;;  %v1834_v47 = vunpack.c.l.bf16 %v1830_v7  ;;  %v1835_v46 = vunpack.c.h.bf16 %v1830_v7 }
 0xb20   :  { %v3868_v29 = vadd.f32 %v1821_v32, %v1819_v17  ;;  %v1841_v7 = vunpack.c.h.bf16 %v1833_v42 }
 0xb22   :  { %2882 = vtanh.f32 %v3868_v29 }
 0xb29   :  { %v2881_v44 = vpop.eup %2880 }
 0xb2a   :  { %v1826_v61 = vmul.f32 %v2881_v44, %v1816_v38  ;;  %v1840_v44 = vunpack.c.l.bf16 %v1833_v42 }
 0xb2c   :  { %v2883_v16 = vpop.eup %2882 }
 0xb2d   :  { %v1827_v53 = vmul.f32 %v2883_v16, %v1817_v33 }
 0xb2f   :  { %v1828_v34 = vpack.c.bf16 %v1827_v53, %v1826_v61  ;;  %v1837_v53 = vunpack.c.h.bf16 %v1831_v41 }
 0xb31   :  { %1875 = vmatmul.mubr.bf16.vlgmr.msra.gmra.mrb[44].mxu0 %v1828_v34  ;;  %1918 = vmatmul.mubr.bf16.vlgmr.msra.gmra.mrb[44].mxu1 %v1828_v34 }
 0xb32   :  { %1987 = vmatpush1.bf16.msra.mxu0 %v3723_v1  ;;  %2030 = vmatpush1.bf16.msra.mxu1 %v3726_v22 }
 0xb33   :  { %1988 = vmatprep.subr.bf16.mxu0 %v3729_v19  ;;  %2031 = vmatprep.subr.bf16.mxu1 %v3732_v36 }
 0xb34   :  { %2018 = vmatprep.mubr.bf16.mxu0 %v3139_v0  ;;  %2061 = vmatprep.mubr.bf16.mxu1 %v3139_v0 }
 0xb36   :  { %1989 = vmatpush1.bf16.msra.mxu0 %v3737_v43  ;;  %2032 = vmatpush1.bf16.msra.mxu1 %v3740_v6 }
 0xb37   :  { %1990 = vmatprep.subr.bf16.mxu0 %v3743_v40  ;;  %2033 = vmatprep.subr.bf16.mxu1 %v3746_v25 }
 0xb3a   :  { %1991 = vmatpush1.bf16.msra.mxu0 %v3749_v12  ;;  %2034 = vmatpush1.bf16.msra.mxu1 %v3752_v28 }
 0xb3b   :  { %1992 = vmatprep.subr.bf16.mxu0 %v3755_v35  ;;  %2035 = vmatprep.subr.bf16.mxu1 %v3758_v27 }
 0xb3e   :  { %1993 = vmatpush1.bf16.msra.mxu0 %v3761_v59  ;;  %2036 = vmatpush1.bf16.msra.mxu1 %v3814_v60 }
 0xb3f   :  { %1994 = vmatprep.subr.bf16.mxu0 %v3765_v55  ;;  %2037 = vmatprep.subr.bf16.mxu1 %v3818_v20 }
 0xb42   :  { %1995 = vmatpush1.bf16.msra.mxu0 %v3769_v15  ;;  %2038 = vmatpush1.bf16.msra.mxu1 %v3822_v37 }
 0xb43   :  { %1996 = vmatprep.subr.bf16.mxu0 %v3825_v14  ;;  %2039 = vmatprep.subr.bf16.mxu1 %v3828_v23 }
 0xb46   :  { %1997 = vmatpush1.bf16.msra.mxu0 %v3831_v31  ;;  %2040 = vmatpush1.bf16.msra.mxu1 %v3834_v26 }
 0xb47   :  { %1998 = vmatprep.subr.bf16.mxu0 %v3837_v30  ;;  %2041 = vmatprep.subr.bf16.mxu1 %v3840_v39 }
 0xb4a   :  { %1999 = vmatpush1.bf16.msra.mxu0 %v3843_v50  ;;  %2042 = vmatpush1.bf16.msra.mxu1 %v3846_v4 }
 0xb4b   :  { %2000 = vmatprep.subr.bf16.mxu0 %v3849_v58  ;;  %2043 = vmatprep.subr.bf16.mxu1 %v3852_v52 }
 0xb4e   :  { %2001 = vmatpush1.bf16.msra.mxu0 %v3855_v57  ;;  %2044 = vmatpush1.bf16.msra.mxu1 %v3858_v62 }
 0xb4f   :  { %2130 = vmatprep.subr.bf16.mxu0 %v3785_v10  ;;  %2173 = vmatprep.subr.bf16.mxu1 %v3788_v45 }
 0xc04   :  { %v1876_v56 = vpop.f32.mrb[44].mxu0  ;;  %v1919_v2 = vpop.f32.mrb[44].mxu1 }
 0xc05   :  { %v1928_v49 = vadd.f32 %v1876_v56, %v1834_v47  ;;  %v1878_v51 = vpop.f32.mrb[45].mxu0  ;;  %v1921_v3 = vpop.f32.mrb[45].mxu1  ;;  %v1930_v33 = vadd.f32 %v1919_v2, %v1836_v8 }
 0xc06   :  { %v1929_v9 = vadd.f32 %v1878_v51, %v1835_v46  ;;  %v1880_v54 = vpop.f32.mrb[46].mxu0  ;;  %v1923_v32 = vpop.f32.mrb[46].mxu1  ;;  %v1931_v18 = vadd.f32 %v1921_v3, %v1837_v53 }
 0xc07   :  { %v1936_v17 = vmul.f32 0.5, %v1928_v49  ;;  %v1932_v21 = vadd.f32 %v1880_v54, %v1838_v13  ;;  %v1882_v24 = vpop.f32.mrb[47].mxu0  ;;  %v1925_v63 = vpop.f32.mrb[47].mxu1  ;;  %v1934_v34 = vadd.f32 %v1923_v32, %v1840_v44 }
 0xc08   :  { %v1944_v48 = vmul.f32 0.5, %v1929_v9  ;;  %v1933_v38 = vadd.f32 %v1882_v24, %v1839_v5  ;;  %v1935_v47 = vadd.f32 %v1925_v63, %v1841_v7  ;;  %v1954_v49 = vmul.f32 0.5, %v1931_v18 }
 0xc09   :  { %2884 = vtanh.f32 %v1936_v17  ;;  %v1937_v16 = vmul.f32 0.5, %v1932_v21 }
 0xc0a   :  { %2886 = vtanh.f32 %v1944_v48  ;;  %v1945_v61 = vmul.f32 0.5, %v1933_v38  ;;  %v1955_v5 = vmul.f32 0.5, %v1935_v47 }
 0xc0b   :  { %2888 = vtanh.f32 %v1937_v16 }
 0xc0c   :  { %2890 = vtanh.f32 %v1930_v33 }
 0xc0d   :  { %2892 = vtanh.f32 %v1945_v61 }
 0xc0e   :  { %2894 = vtanh.f32 %v1934_v34 }
 0xc0f   :  { %2896 = vtanh.f32 %v1954_v49  ;;  %v1976_v49 = vld [vmem:[#allocation4 + $0x190] sm:$0xff] }
 0xc10   :  { %2898 = vtanh.f32 %v1955_v5  ;;  %v1975_v5 = vld [vmem:[#allocation4 + $0x188] sm:$0xff] }
 0xc13   :  { %v2885_v46 = vpop.eup %2884 }
 0xc14   :  { %v2887_v13 = vpop.eup %2886  ;;  %v1940_v56 = vadd.f32 1.0, %v2885_v46 }
 0xc15   :  { %v1948_v51 = vadd.f32 1.0, %v2887_v13  ;;  %v2889_v9 = vpop.eup %2888 }
 0xc16   :  { %v1942_v2 = vmul.f32 0.5, %v1940_v56  ;;  %v2891_v8 = vpop.eup %2890  ;;  %v1941_v17 = vadd.f32 1.0, %v2889_v9 }
 0xc17   :  { %v1950_v54 = vmul.f32 0.5, %v1948_v51  ;;  %v2893_v41 = vpop.eup %2892 }
 0xc18   :  { %v1964_v21 = vmul.f32 %v2891_v8, %v1942_v2  ;;  %v1943_v32 = vmul.f32 0.5, %v1941_v17  ;;  %v1949_v3 = vadd.f32 1.0, %v2893_v41  ;;  %v2895_v24 = vpop.eup %2894  ;;  %v1982_v2 = vunpack.c.l.bf16 %v1976_v49 }
 0xc19   :  { %v1962_v42 = vmul.f32 %v1950_v54, %v3864_v11  ;;  %v2897_v16 = vpop.eup %2896  ;;  %v1983_v17 = vunpack.c.h.bf16 %v1976_v49 }
 0xc1a   :  { %v1951_v48 = vmul.f32 0.5, %v1949_v3  ;;  %v1965_v44 = vmul.f32 %v2895_v24, %v1943_v32  ;;  %v2899_v61 = vpop.eup %2898  ;;  %v1958_v53 = vadd.f32 1.0, %v2897_v16  ;;  %v1977_v3 = vld [vmem:[#allocation4 + $0x198] sm:$0xff] }
 0xc1b   :  { %v3906_v63 = vadd.f32 %v1964_v21, %v1962_v42  ;;  %v1959_v11 = vadd.f32 1.0, %v2899_v61  ;;  %v1980_v21 = vunpack.c.l.bf16 %v1975_v5 }
 0xc1c   :  { %v1963_v38 = vmul.f32 %v1951_v48, %v3868_v29  ;;  %v1960_v7 = vmul.f32 0.5, %v1958_v53  ;;  %v1974_v29 = vld [vmem:[#allocation4 + $0x180] sm:$0xff] }
 0xc1d   :  { %2900 = vtanh.f32 %v3906_v63  ;;  %v1961_v18 = vmul.f32 0.5, %v1959_v11  ;;  %v1978_v51 = vunpack.c.l.bf16 %v1974_v29  ;;  %v1979_v9 = vunpack.c.h.bf16 %v1974_v29 }
 0xc1e   :  { %v3910_v33 = vadd.f32 %v1965_v44, %v1963_v38  ;;  %v1985_v29 = vunpack.c.h.bf16 %v1977_v3 }
 0xc20   :  { %2902 = vtanh.f32 %v3910_v33 }
 0xc27   :  { %v2901_v34 = vpop.eup %2900 }
 0xc28   :  { %v1970_v46 = vmul.f32 %v2901_v34, %v1960_v7  ;;  %v1984_v34 = vunpack.c.l.bf16 %v1977_v3 }
 0xc2a   :  { %v2903_v47 = vpop.eup %2902 }
 0xc2b   :  { %v1971_v13 = vmul.f32 %v2903_v47, %v1961_v18 }
 0xc2d   :  { %v1972_v56 = vpack.c.bf16 %v1971_v13, %v1970_v46  ;;  %v1981_v13 = vunpack.c.h.bf16 %v1975_v5 }
 0xc2f   :  { %2019 = vmatmul.mubr.bf16.vlgmr.msra.gmra.mrb[48].mxu0 %v1972_v56  ;;  %2062 = vmatmul.mubr.bf16.vlgmr.msra.gmra.mrb[48].mxu1 %v1972_v56 }
 0xc30   :  { %2131 = vmatpush1.bf16.msra.mxu0 %v3723_v1  ;;  %2174 = vmatpush1.bf16.msra.mxu1 %v3726_v22 }
 0xc31   :  { %2132 = vmatprep.subr.bf16.mxu0 %v3729_v19  ;;  %2175 = vmatprep.subr.bf16.mxu1 %v3732_v36 }
 0xc32   :  { %2162 = vmatprep.mubr.bf16.mxu0 %v3139_v0  ;;  %2205 = vmatprep.mubr.bf16.mxu1 %v3139_v0 }
 0xc34   :  { %2133 = vmatpush1.bf16.msra.mxu0 %v3737_v43  ;;  %2176 = vmatpush1.bf16.msra.mxu1 %v3740_v6 }
 0xc35   :  { %2134 = vmatprep.subr.bf16.mxu0 %v3743_v40  ;;  %2177 = vmatprep.subr.bf16.mxu1 %v3746_v25 }
 0xc38   :  { %2135 = vmatpush1.bf16.msra.mxu0 %v3749_v12  ;;  %2178 = vmatpush1.bf16.msra.mxu1 %v3752_v28 }
 0xc39   :  { %2136 = vmatprep.subr.bf16.mxu0 %v3755_v35  ;;  %2179 = vmatprep.subr.bf16.mxu1 %v3758_v27 }
 0xc3c   :  { %2137 = vmatpush1.bf16.msra.mxu0 %v3761_v59  ;;  %2180 = vmatpush1.bf16.msra.mxu1 %v3814_v60 }
 0xc3d   :  { %2138 = vmatprep.subr.bf16.mxu0 %v3765_v55  ;;  %2181 = vmatprep.subr.bf16.mxu1 %v3818_v20 }
 0xc40   :  { %2139 = vmatpush1.bf16.msra.mxu0 %v3769_v15  ;;  %2182 = vmatpush1.bf16.msra.mxu1 %v3822_v37 }
 0xc41   :  { %2140 = vmatprep.subr.bf16.mxu0 %v3825_v14  ;;  %2183 = vmatprep.subr.bf16.mxu1 %v3828_v23 }
 0xc44   :  { %2141 = vmatpush1.bf16.msra.mxu0 %v3831_v31  ;;  %2184 = vmatpush1.bf16.msra.mxu1 %v3834_v26 }
 0xc45   :  { %2142 = vmatprep.subr.bf16.mxu0 %v3837_v30  ;;  %2185 = vmatprep.subr.bf16.mxu1 %v3840_v39 }
 0xc48   :  { %2143 = vmatpush1.bf16.msra.mxu0 %v3843_v50  ;;  %2186 = vmatpush1.bf16.msra.mxu1 %v3846_v4 }
 0xc49   :  { %2144 = vmatprep.subr.bf16.mxu0 %v3849_v58  ;;  %2187 = vmatprep.subr.bf16.mxu1 %v3852_v52 }
 0xc4c   :  { %2145 = vmatpush1.bf16.msra.mxu0 %v3855_v57  ;;  %2188 = vmatpush1.bf16.msra.mxu1 %v3858_v62 }
 0xc4d   :  { %2274 = vmatprep.subr.bf16.mxu0 %v3785_v10  ;;  %2317 = vmatprep.subr.bf16.mxu1 %v3788_v45 }
 0xd02   :  { %v2020_v8 = vpop.f32.mrb[48].mxu0  ;;  %v2063_v54 = vpop.f32.mrb[48].mxu1 }
 0xd03   :  { %v2072_v41 = vadd.f32 %v2020_v8, %v1978_v51  ;;  %v2022_v42 = vpop.f32.mrb[49].mxu0  ;;  %v2065_v32 = vpop.f32.mrb[49].mxu1  ;;  %v2074_v18 = vadd.f32 %v2063_v54, %v1980_v21 }
 0xd04   :  { %v2073_v24 = vadd.f32 %v2022_v42, %v1979_v9  ;;  %v2024_v48 = vpop.f32.mrb[50].mxu0  ;;  %v2067_v44 = vpop.f32.mrb[50].mxu1  ;;  %v2075_v49 = vadd.f32 %v2065_v32, %v1981_v13 }
 0xd05   :  { %v2080_v38 = vmul.f32 0.5, %v2072_v41  ;;  %v2076_v16 = vadd.f32 %v2024_v48, %v1982_v2  ;;  %v2026_v61 = vpop.f32.mrb[51].mxu0  ;;  %v2069_v53 = vpop.f32.mrb[51].mxu1  ;;  %v2078_v56 = vadd.f32 %v2067_v44, %v1984_v34 }
 0xd06   :  { %v2088_v11 = vmul.f32 0.5, %v2073_v24  ;;  %v2077_v7 = vadd.f32 %v2026_v61, %v1983_v17  ;;  %v2079_v51 = vadd.f32 %v2069_v53, %v1985_v29  ;;  %v2098_v41 = vmul.f32 0.5, %v2075_v49 }
 0xd07   :  { %2904 = vtanh.f32 %v2080_v38  ;;  %v2081_v47 = vmul.f32 0.5, %v2076_v16 }
 0xd08   :  { %2906 = vtanh.f32 %v2088_v11  ;;  %v2089_v46 = vmul.f32 0.5, %v2077_v7  ;;  %v2099_v17 = vmul.f32 0.5, %v2079_v51 }
 0xd09   :  { %2908 = vtanh.f32 %v2081_v47 }
 0xd0a   :  { %2910 = vtanh.f32 %v2074_v18 }
 0xd0b   :  { %2912 = vtanh.f32 %v2089_v46 }
 0xd0c   :  { %2914 = vtanh.f32 %v2078_v56 }
 0xd0d   :  { %2916 = vtanh.f32 %v2098_v41 }
 0xd0e   :  { %2918 = vtanh.f32 %v2099_v17 }
 0xd11   :  { %v2905_v9 = vpop.eup %2904 }
 0xd12   :  { %v2907_v2 = vpop.eup %2906  ;;  %v2084_v8 = vadd.f32 1.0, %v2905_v9 }
 0xd13   :  { %v2092_v42 = vadd.f32 1.0, %v2907_v2  ;;  %v2909_v24 = vpop.eup %2908 }
 0xd14   :  { %v2086_v54 = vmul.f32 0.5, %v2084_v8  ;;  %v2911_v21 = vpop.eup %2910  ;;  %v2085_v38 = vadd.f32 1.0, %v2909_v24 }
 0xd15   :  { %v2094_v48 = vmul.f32 0.5, %v2092_v42  ;;  %v2913_v5 = vpop.eup %2912 }
 0xd16   :  { %v2108_v16 = vmul.f32 %v2911_v21, %v2086_v54  ;;  %v2087_v44 = vmul.f32 0.5, %v2085_v38  ;;  %v2093_v32 = vadd.f32 1.0, %v2913_v5  ;;  %v2915_v61 = vpop.eup %2914 }
 0xd17   :  { %v2106_v3 = vmul.f32 %v2094_v48, %v3906_v63  ;;  %v2917_v47 = vpop.eup %2916 }
 0xd18   :  { %v2095_v11 = vmul.f32 0.5, %v2093_v32  ;;  %v2109_v34 = vmul.f32 %v2915_v61, %v2087_v44  ;;  %v2919_v46 = vpop.eup %2918  ;;  %v2102_v13 = vadd.f32 1.0, %v2917_v47 }
 0xd19   :  { %v3948_v53 = vadd.f32 %v2108_v16, %v2106_v3  ;;  %v2103_v63 = vadd.f32 1.0, %v2919_v46 }
 0xd1a   :  { %v2107_v7 = vmul.f32 %v2095_v11, %v3910_v33  ;;  %v2104_v29 = vmul.f32 0.5, %v2102_v13 }
 0xd1b   :  { %2920 = vtanh.f32 %v3948_v53  ;;  %v2105_v49 = vmul.f32 0.5, %v2103_v63 }
 0xd1c   :  { %v3952_v18 = vadd.f32 %v2109_v34, %v2107_v7 }
 0xd1e   :  { %2922 = vtanh.f32 %v3952_v18 }
 0xd25   :  { %v2921_v56 = vpop.eup %2920 }
 0xd26   :  { %v2114_v9 = vmul.f32 %v2921_v56, %v2104_v29 }
 0xd28   :  { %v2923_v51 = vpop.eup %2922 }
 0xd29   :  { %v2115_v2 = vmul.f32 %v2923_v51, %v2105_v49 }
 0xd2b   :  { %v2116_v8 = vpack.c.bf16 %v2115_v2, %v2114_v9 }
 0xd2d   :  { %2163 = vmatmul.mubr.bf16.vlgmr.msra.gmra.mrb[52].mxu0 %v2116_v8  ;;  %2206 = vmatmul.mubr.bf16.vlgmr.msra.gmra.mrb[52].mxu1 %v2116_v8 }
 0xd2e   :  { %2275 = vmatpush1.bf16.msra.mxu0 %v3723_v1  ;;  %2318 = vmatpush1.bf16.msra.mxu1 %v3726_v22  ;;  %v2118_v1 = vld [vmem:[#allocation4 + $0x1a0] sm:$0xff]  ;;  %v2120_v22 = vld [vmem:[#allocation4 + $0x1b0] sm:$0xff] }
 0xd2f   :  { %2276 = vmatprep.subr.bf16.mxu0 %v3729_v19  ;;  %2319 = vmatprep.subr.bf16.mxu1 %v3732_v36  ;;  %v2122_v19 = vunpack.c.l.bf16 %v2118_v1  ;;  %v2119_v36 = vld [vmem:[#allocation4 + $0x1a8] sm:$0xff] }
 0xd30   :  { %2306 = vmatprep.mubr.bf16.mxu0 %v3139_v0  ;;  %2349 = vmatprep.mubr.bf16.mxu1 %v3139_v0  ;;  %v2125_v16 = vunpack.c.h.bf16 %v2119_v36 }
 0xd32   :  { %2277 = vmatpush1.bf16.msra.mxu0 %v3737_v43  ;;  %2320 = vmatpush1.bf16.msra.mxu1 %v3740_v6  ;;  %v2123_v43 = vunpack.c.h.bf16 %v2118_v1  ;;  %v2126_v6 = vunpack.c.l.bf16 %v2120_v22 }
 0xd33   :  { %2278 = vmatprep.subr.bf16.mxu0 %v3743_v40  ;;  %2321 = vmatprep.subr.bf16.mxu1 %v3746_v25 }
 0xd36   :  { %2279 = vmatpush1.bf16.msra.mxu0 %v3749_v12  ;;  %2322 = vmatpush1.bf16.msra.mxu1 %v3752_v28  ;;  %v2127_v12 = vunpack.c.h.bf16 %v2120_v22 }
 0xd37   :  { %2280 = vmatprep.subr.bf16.mxu0 %v3755_v35  ;;  %2323 = vmatprep.subr.bf16.mxu1 %v3758_v27  ;;  %v2124_v35 = vunpack.c.l.bf16 %v2119_v36 }
 0xd3a   :  { %2281 = vmatpush1.bf16.msra.mxu0 %v3761_v59  ;;  %2324 = vmatpush1.bf16.msra.mxu1 %v3814_v60 }
 0xd3b   :  { %2282 = vmatprep.subr.bf16.mxu0 %v3765_v55  ;;  %2325 = vmatprep.subr.bf16.mxu1 %v3818_v20  ;;  %v2121_v55 = vld [vmem:[#allocation4 + $0x1b8] sm:$0xff] }
 0xd3c   :  { %v2128_v54 = vunpack.c.l.bf16 %v2121_v55  ;;  %v2129_v44 = vunpack.c.h.bf16 %v2121_v55 }
 0xd3e   :  { %2283 = vmatpush1.bf16.msra.mxu0 %v3769_v15  ;;  %2326 = vmatpush1.bf16.msra.mxu1 %v3822_v37 }
 0xd3f   :  { %2284 = vmatprep.subr.bf16.mxu0 %v3825_v14  ;;  %2327 = vmatprep.subr.bf16.mxu1 %v3828_v23 }
 0xd42   :  { %2285 = vmatpush1.bf16.msra.mxu0 %v3831_v31  ;;  %2328 = vmatpush1.bf16.msra.mxu1 %v3834_v26 }
 0xd43   :  { %2286 = vmatprep.subr.bf16.mxu0 %v3837_v30  ;;  %2329 = vmatprep.subr.bf16.mxu1 %v3840_v39 }
 0xd46   :  { %2287 = vmatpush1.bf16.msra.mxu0 %v3843_v50  ;;  %2330 = vmatpush1.bf16.msra.mxu1 %v3846_v4 }
 0xd47   :  { %2288 = vmatprep.subr.bf16.mxu0 %v3849_v58  ;;  %2331 = vmatprep.subr.bf16.mxu1 %v3852_v52 }
 0xd4a   :  { %2289 = vmatpush1.bf16.msra.mxu0 %v3855_v57  ;;  %2332 = vmatpush1.bf16.msra.mxu1 %v3858_v62 }
 0xd4b   :  { %2418 = vmatprep.subr.bf16.mxu0 %v3785_v10  ;;  %2461 = vmatprep.subr.bf16.mxu1 %v3788_v45 }
 0xe00   :  { %v2164_v40 = vpop.f32.mrb[52].mxu0  ;;  %v2207_v25 = vpop.f32.mrb[52].mxu1 }
 0xe01   :  { %v2216_v28 = vadd.f32 %v2164_v40, %v2122_v19  ;;  %v2166_v27 = vpop.f32.mrb[53].mxu0  ;;  %v2209_v59 = vpop.f32.mrb[53].mxu1  ;;  %v2218_v48 = vadd.f32 %v2207_v25, %v2124_v35 }
 0xe02   :  { %v2217_v15 = vadd.f32 %v2166_v27, %v2123_v43  ;;  %v2168_v33 = vpop.f32.mrb[54].mxu0  ;;  %v2211_v41 = vpop.f32.mrb[54].mxu1  ;;  %v2219_v32 = vadd.f32 %v2209_v59, %v2125_v16  ;;  %v3058_v16 = vld [vmem:[#allocation7 + $0x64] ss:$16 sps:$4 sm:$0xff]  }
 0xe03   :  { %v2224_v10 = vmul.f32 0.5, %v2216_v28  ;;  %v2220_v42 = vadd.f32 %v2168_v33, %v2126_v6  ;;  %v2170_v45 = vpop.f32.mrb[55].mxu0  ;;  %v2213_v17 = vpop.f32.mrb[55].mxu1  ;;  %v2222_v3 = vadd.f32 %v2211_v41, %v2128_v54  ;;  %v3053_v54 = vld [vmem:[#allocation7 + $0x28] ss:$16 sps:$4 sm:$0xff]  }
 0xe04   :  { %v2232_v24 = vmul.f32 0.5, %v2217_v15  ;;  %v2221_v21 = vadd.f32 %v2170_v45, %v2127_v12  ;;  %v2223_v61 = vadd.f32 %v2213_v17, %v2129_v44  ;;  %v2242_v47 = vmul.f32 0.5, %v2219_v32  ;;  %v3050_v45 = vld [vmem:[#allocation7 + $0x24] ss:$16 sps:$4 sm:$0xff]   ;;  %v3051_v17 = vld [vmem:[#allocation7 + $0x2c] ss:$16 sps:$4 sm:$0xff]  }
 0xe05   :  { %2924 = vtanh.f32 %v2224_v10  ;;  %v2225_v38 = vmul.f32 0.5, %v2220_v42  ;;  %v3049_v42 = vld [vmem:[#allocation7 + $0x8] ss:$16 sps:$4 sm:$0xff]   ;;  %v3060_v44 = vld [vmem:[#allocation7 + $0x60] ss:$16 sps:$4 sm:$0xff]  }
 0xe06   :  { %2926 = vtanh.f32 %v2232_v24  ;;  %v2233_v5 = vmul.f32 0.5, %v2221_v21  ;;  %v2243_v13 = vmul.f32 0.5, %v2223_v61  ;;  %v3052_v24 = vld [vmem:[#allocation7 + $0x20] ss:$16 sps:$4 sm:$0xff]   ;;  %v3054_v21 = vld [vmem:[#allocation7 + $0x44] ss:$16 sps:$4 sm:$0xff]  }
 0xe07   :  { %2928 = vtanh.f32 %v2225_v38  ;;  %v3056_v38 = vld [vmem:[#allocation7 + $0x40] ss:$16 sps:$4 sm:$0xff]  }
 0xe08   :  { %2930 = vtanh.f32 %v2218_v48  ;;  %v3055_v48 = vld [vmem:[#allocation7 + $0x4c] ss:$16 sps:$4 sm:$0xff]   ;;  %v3062_v32 = vld [vmem:[#allocation7 + $0x80] ss:$16 sps:$4 sm:$0xff]  }
 0xe09   :  { %2932 = vtanh.f32 %v2233_v5  ;;  %v3057_v5 = vld [vmem:[#allocation7 + $0x48] ss:$16 sps:$4 sm:$0xff]  }
 0xe0a   :  { %2934 = vtanh.f32 %v2222_v3  ;;  %v3059_v3 = vld [vmem:[#allocation7 + $0x6c] ss:$16 sps:$4 sm:$0xff]  }
 0xe0b   :  { %2936 = vtanh.f32 %v2242_v47 }
 0xe0c   :  { %2938 = vtanh.f32 %v2243_v13 }
 0xe0f   :  { %v2925_v11 = vpop.eup %2924 }
 0xe10   :  { %v2927_v34 = vpop.eup %2926  ;;  %v2228_v7 = vadd.f32 1.0, %v2925_v11 }
 0xe11   :  { %v2236_v46 = vadd.f32 1.0, %v2927_v34  ;;  %v2929_v63 = vpop.eup %2928 }
 0xe12   :  { %v2230_v56 = vmul.f32 0.5, %v2228_v7  ;;  %v2931_v29 = vpop.eup %2930  ;;  %v2229_v51 = vadd.f32 1.0, %v2929_v63 }
 0xe13   :  { %v2238_v49 = vmul.f32 0.5, %v2236_v46  ;;  %v2933_v9 = vpop.eup %2932 }
 0xe14   :  { %v2252_v2 = vmul.f32 %v2931_v29, %v2230_v56  ;;  %v2231_v1 = vmul.f32 0.5, %v2229_v51  ;;  %v2237_v22 = vadd.f32 1.0, %v2933_v9  ;;  %v2935_v19 = vpop.eup %2934 }
 0xe15   :  { %v2250_v8 = vmul.f32 %v2238_v49, %v3948_v53  ;;  %v2937_v12 = vpop.eup %2936 }
 0xe16   :  { %v2239_v43 = vmul.f32 0.5, %v2237_v22  ;;  %v2253_v6 = vmul.f32 %v2935_v19, %v2231_v1  ;;  %v2939_v28 = vpop.eup %2938  ;;  %v2246_v35 = vadd.f32 1.0, %v2937_v12 }
 0xe17   :  { %v3990_v36 = vadd.f32 %v2252_v2, %v2250_v8  ;;  %v2247_v53 = vadd.f32 1.0, %v2939_v28 }
 0xe18   :  { %v2251_v40 = vmul.f32 %v2239_v43, %v3952_v18  ;;  %v2248_v59 = vmul.f32 0.5, %v2246_v35  ;;  %v3048_v18 = vld [vmem:[#allocation7] ss:$16 sps:$4 sm:$0xff]  }
 0xe19   :  { %2940 = vtanh.f32 %v3990_v36  ;;  %v2249_v55 = vmul.f32 0.5, %v2247_v53 }
 0xe1a   :  { %v3994_v25 = vadd.f32 %v2253_v6, %v2251_v40 }
 0xe1c   :  { %2942 = vtanh.f32 %v3994_v25 }
 0xe23   :  { %v2941_v27 = vpop.eup %2940 }
 0xe24   :  { %v2258_v33 = vmul.f32 %v2941_v27, %v2248_v59 }
 0xe26   :  { %v2943_v15 = vpop.eup %2942 }
 0xe27   :  { %v2259_v41 = vmul.f32 %v2943_v15, %v2249_v55 }
 0xe29   :  { %v2260_v10 = vpack.c.bf16 %v2259_v41, %v2258_v33 }
 0xe2b   :  { %2307 = vmatmul.mubr.bf16.vlgmr.msra.gmra.mrb[56].mxu0 %v2260_v10  ;;  %2350 = vmatmul.mubr.bf16.vlgmr.msra.gmra.mrb[56].mxu1 %v2260_v10 }
 0xe2c   :  { %2419 = vmatpush1.bf16.msra.mxu0 %v3048_v18  ;;  %2462 = vmatpush1.bf16.msra.mxu1 %v3049_v42 }
 0xe2d   :  { %2420 = vmatprep.subr.bf16.mxu0 %v3050_v45  ;;  %2463 = vmatprep.subr.bf16.mxu1 %v3051_v17 }
 0xe2e   :  { %2450 = vmatprep.mubr.bf16.mxu0 %v3139_v0  ;;  %2493 = vmatprep.mubr.bf16.mxu1 %v3139_v0  ;;  %v3061_v0 = vld [vmem:[#allocation7 + $0x84] ss:$16 sps:$4 sm:$0xff]  }
 0xe30   :  { %2421 = vmatpush1.bf16.msra.mxu0 %v3052_v24  ;;  %2464 = vmatpush1.bf16.msra.mxu1 %v3053_v54 }
 0xe31   :  { %2422 = vmatprep.subr.bf16.mxu0 %v3054_v21  ;;  %2465 = vmatprep.subr.bf16.mxu1 %v3055_v48 }
 0xe34   :  { %2423 = vmatpush1.bf16.msra.mxu0 %v3056_v38  ;;  %2466 = vmatpush1.bf16.msra.mxu1 %v3057_v5 }
 0xe35   :  { %2424 = vmatprep.subr.bf16.mxu0 %v3058_v16  ;;  %2467 = vmatprep.subr.bf16.mxu1 %v3059_v3 }
 0xe38   :  { %2425 = vmatpush1.bf16.msra.mxu0 %v3060_v44  ;;  %2468 = vmatpush1.bf16.msra.mxu1 %v3814_v60  ;;  %v2262_v60 = vld [vmem:[#allocation4 + $0x1c0] sm:$0xff] }
 0xe39   :  { %2426 = vmatprep.subr.bf16.mxu0 %v3061_v0  ;;  %2469 = vmatprep.subr.bf16.mxu1 %v3818_v20  ;;  %v2264_v20 = vld [vmem:[#allocation4 + $0x1d0] sm:$0xff] }
 0xe3c   :  { %2427 = vmatpush1.bf16.msra.mxu0 %v3062_v32  ;;  %2470 = vmatpush1.bf16.msra.mxu1 %v3822_v37  ;;  %v2266_v37 = vunpack.c.l.bf16 %v2262_v60 }
 0xe3d   :  { %2428 = vmatprep.subr.bf16.mxu0 %v3825_v14  ;;  %2471 = vmatprep.subr.bf16.mxu1 %v3828_v23  ;;  %v2263_v14 = vld [vmem:[#allocation4 + $0x1c8] sm:$0xff]  ;;  %v2267_v23 = vunpack.c.h.bf16 %v2262_v60 }
 0xe3e   :  { %v2268_v61 = vunpack.c.l.bf16 %v2263_v14  ;;  %v2269_v9 = vunpack.c.h.bf16 %v2263_v14 }
 0xe40   :  { %2429 = vmatpush1.bf16.msra.mxu0 %v3831_v31  ;;  %2472 = vmatpush1.bf16.msra.mxu1 %v3834_v26  ;;  %v2270_v31 = vunpack.c.l.bf16 %v2264_v20 }
 0xe41   :  { %2430 = vmatprep.subr.bf16.mxu0 %v3837_v30  ;;  %2473 = vmatprep.subr.bf16.mxu1 %v3840_v39  ;;  %v2271_v39 = vunpack.c.h.bf16 %v2264_v20 }
 0xe44   :  { %2431 = vmatpush1.bf16.msra.mxu0 %v3843_v50  ;;  %2474 = vmatpush1.bf16.msra.mxu1 %v3846_v4 }
 0xe45   :  { %2432 = vmatprep.subr.bf16.mxu0 %v3849_v58  ;;  %2475 = vmatprep.subr.bf16.mxu1 %v3852_v52  ;;  %v2265_v58 = vld [vmem:[#allocation4 + $0x1d8] sm:$0xff] }
 0xe46   :  { %v2272_v63 = vunpack.c.l.bf16 %v2265_v58  ;;  %v2273_v8 = vunpack.c.h.bf16 %v2265_v58 }
 0xe48   :  { %2433 = vmatpush1.bf16.msra.mxu0 %v3855_v57  ;;  %2476 = vmatpush1.bf16.msra.mxu1 %v3858_v62 }
 0xefe   :  { %v2308_v26 = vpop.f32.mrb[56].mxu0  ;;  %v2351_v30 = vpop.f32.mrb[56].mxu1 }
 0xeff   :  { %v2360_v50 = vadd.f32 %v2308_v26, %v2266_v37  ;;  %v2310_v4 = vpop.f32.mrb[57].mxu0  ;;  %v2353_v11 = vpop.f32.mrb[57].mxu1  ;;  %v2362_v29 = vadd.f32 %v2351_v30, %v2268_v61  ;;  %v2408_v37 = vld [vmem:[#allocation4 + $0x1f0] sm:$0xff] }
 0xf00   :  { %v2361_v34 = vadd.f32 %v2310_v4, %v2267_v23  ;;  %v2312_v52 = vpop.f32.mrb[58].mxu0  ;;  %v2355_v7 = vpop.f32.mrb[58].mxu1  ;;  %v2363_v1 = vadd.f32 %v2353_v11, %v2269_v9  ;;  %v2407_v23 = vld [vmem:[#allocation4 + $0x1e8] sm:$0xff]  ;;  %v2414_v26 = vunpack.c.l.bf16 %v2408_v37 }
 0xf01   :  { %v2368_v57 = vmul.f32 0.5, %v2360_v50  ;;  %v2364_v47 = vadd.f32 %v2312_v52, %v2270_v31  ;;  %v2314_v62 = vpop.f32.mrb[59].mxu0  ;;  %v2357_v46 = vpop.f32.mrb[59].mxu1  ;;  %v2366_v2 = vadd.f32 %v2355_v7, %v2272_v63  ;;  %v2415_v50 = vunpack.c.h.bf16 %v2408_v37 }
 0xf02   :  { %v2376_v13 = vmul.f32 0.5, %v2361_v34  ;;  %v2365_v56 = vadd.f32 %v2314_v62, %v2271_v39  ;;  %v2367_v22 = vadd.f32 %v2357_v46, %v2273_v8  ;;  %v2386_v40 = vmul.f32 0.5, %v2363_v1  ;;  %v2409_v34 = vld [vmem:[#allocation4 + $0x1f8] sm:$0xff] }
 0xf03   :  { %2944 = vtanh.f32 %v2368_v57  ;;  %v2369_v49 = vmul.f32 0.5, %v2364_v47  ;;  %v2412_v4 = vunpack.c.l.bf16 %v2407_v23 }
 0xf04   :  { %2946 = vtanh.f32 %v2376_v13  ;;  %v2377_v51 = vmul.f32 0.5, %v2365_v56  ;;  %v2387_v28 = vmul.f32 0.5, %v2367_v22  ;;  %v2416_v56 = vunpack.c.l.bf16 %v2409_v34 }
 0xf05   :  { %2948 = vtanh.f32 %v2369_v49  ;;  %v2417_v22 = vunpack.c.h.bf16 %v2409_v34 }
 0xf06   :  { %2950 = vtanh.f32 %v2362_v29 }
 0xf07   :  { %2952 = vtanh.f32 %v2377_v51  ;;  %v2413_v51 = vunpack.c.h.bf16 %v2407_v23 }
 0xf08   :  { %2954 = vtanh.f32 %v2366_v2 }
 0xf09   :  { %2956 = vtanh.f32 %v2386_v40 }
 0xf0a   :  { %2958 = vtanh.f32 %v2387_v28 }
 0xf0d   :  { %v2945_v19 = vpop.eup %2944 }
 0xf0e   :  { %v2947_v43 = vpop.eup %2946  ;;  %v2372_v6 = vadd.f32 1.0, %v2945_v19 }
 0xf0f   :  { %v2380_v12 = vadd.f32 1.0, %v2947_v43  ;;  %v2949_v35 = vpop.eup %2948 }
 0xf10   :  { %v2374_v53 = vmul.f32 0.5, %v2372_v6  ;;  %v2951_v27 = vpop.eup %2950  ;;  %v2373_v55 = vadd.f32 1.0, %v2949_v35 }
 0xf11   :  { %v2382_v59 = vmul.f32 0.5, %v2380_v12  ;;  %v2953_v15 = vpop.eup %2952 }
 0xf12   :  { %v2396_v33 = vmul.f32 %v2951_v27, %v2374_v53  ;;  %v2375_v10 = vmul.f32 0.5, %v2373_v55  ;;  %v2381_v18 = vadd.f32 1.0, %v2953_v15  ;;  %v2955_v42 = vpop.eup %2954 }
 0xf13   :  { %v2394_v41 = vmul.f32 %v2382_v59, %v3990_v36  ;;  %v2957_v48 = vpop.eup %2956 }
 0xf14   :  { %v2383_v17 = vmul.f32 0.5, %v2381_v18  ;;  %v2397_v24 = vmul.f32 %v2955_v42, %v2375_v10  ;;  %v2959_v38 = vpop.eup %2958  ;;  %v2390_v5 = vadd.f32 1.0, %v2957_v48 }
 0xf15   :  { %v4015_v45 = vadd.f32 %v2396_v33, %v2394_v41  ;;  %v2391_v36 = vadd.f32 1.0, %v2959_v38 }
 0xf16   :  { %v2395_v54 = vmul.f32 %v2383_v17, %v3994_v25  ;;  %v2392_v3 = vmul.f32 0.5, %v2390_v5  ;;  %v2406_v25 = vld [vmem:[#allocation4 + $0x1e0] sm:$0xff] }
 0xf17   :  { %2960 = vtanh.f32 %v4015_v45  ;;  %v2393_v44 = vmul.f32 0.5, %v2391_v36  ;;  %v2410_v14 = vunpack.c.l.bf16 %v2406_v25  ;;  %v2411_v31 = vunpack.c.h.bf16 %v2406_v25 }
 0xf18   :  { %v4019_v21 = vadd.f32 %v2397_v24, %v2395_v54 }
 0xf1a   :  { %2962 = vtanh.f32 %v4019_v21 }
 0xf21   :  { %v2961_v16 = vpop.eup %2960 }
 0xf22   :  { %v2402_v32 = vmul.f32 %v2961_v16, %v2392_v3 }
 0xf24   :  { %v2963_v0 = vpop.eup %2962 }
 0xf25   :  { %v2403_v60 = vmul.f32 %v2963_v0, %v2393_v44 }
 0xf27   :  { %v2404_v20 = vpack.c.bf16 %v2403_v60, %v2402_v32 }
 0xf29   :  { %2451 = vmatmul.mubr.bf16.vlgmr.msra.gmra.mrb[60].mxu0 %v2404_v20  ;;  %2494 = vmatmul.mubr.bf16.vlgmr.msra.gmra.mrb[60].mxu1 %v2404_v20 }
 0xffc   :  { %v2452_v30 = vpop.f32.mrb[60].mxu0  ;;  %v2495_v39 = vpop.f32.mrb[60].mxu1 }
 0xffd   :  { %v2504_v61 = vadd.f32 %v2452_v30, %v2410_v14  ;;  %v2454_v11 = vpop.f32.mrb[61].mxu0  ;;  %v2497_v58 = vpop.f32.mrb[61].mxu1  ;;  %v2506_v49 = vadd.f32 %v2495_v39, %v2412_v4 }
 0xffe   :  { %v2505_v52 = vadd.f32 %v2454_v11, %v2411_v31  ;;  %v2456_v7 = vpop.f32.mrb[62].mxu0  ;;  %v2499_v57 = vpop.f32.mrb[62].mxu1  ;;  %v2507_v1 = vadd.f32 %v2497_v58, %v2413_v51 }
 0xfff   :  { %v2512_v47 = vmul.f32 0.5, %v2504_v61  ;;  %v2508_v62 = vadd.f32 %v2456_v7, %v2414_v26  ;;  %v2458_v46 = vpop.f32.mrb[63].mxu0  ;;  %v2501_v13 = vpop.f32.mrb[63].mxu1  ;;  %v2510_v8 = vadd.f32 %v2499_v57, %v2416_v56 }
0x1000   :  { %v2520_v63 = vmul.f32 0.5, %v2505_v52  ;;  %v2509_v29 = vadd.f32 %v2458_v46, %v2415_v50  ;;  %v2530_v19 = vmul.f32 0.5, %v2507_v1  ;;  %v2511_v43 = vadd.f32 %v2501_v13, %v2417_v22 }
0x1001   :  { %2964 = vtanh.f32 %v2512_v47  ;;  %v2513_v9 = vmul.f32 0.5, %v2508_v62 }
0x1002   :  { %2966 = vtanh.f32 %v2520_v63  ;;  %v2521_v2 = vmul.f32 0.5, %v2509_v29  ;;  %v2531_v35 = vmul.f32 0.5, %v2511_v43 }
0x1003   :  { %2968 = vtanh.f32 %v2513_v9 }
0x1004   :  { %2970 = vtanh.f32 %v2506_v49 }
0x1005   :  { %2972 = vtanh.f32 %v2521_v2 }
0x1006   :  { %2974 = vtanh.f32 %v2510_v8 }
0x1007   :  { %2976 = vtanh.f32 %v2530_v19 }
0x1008   :  { %2978 = vtanh.f32 %v2531_v35 }
0x100b   :  { %v2965_v6 = vpop.eup %2964 }
0x100c   :  { %v2967_v40 = vpop.eup %2966  ;;  %v2516_v12 = vadd.f32 1.0, %v2965_v6 }
0x100d   :  { %v2524_v28 = vadd.f32 1.0, %v2967_v40  ;;  %v2969_v53 = vpop.eup %2968 }
0x100e   :  { %v2518_v27 = vmul.f32 0.5, %v2516_v12  ;;  %v2971_v59 = vpop.eup %2970  ;;  %v2517_v15 = vadd.f32 1.0, %v2969_v53 }
0x100f   :  { %v2526_v55 = vmul.f32 0.5, %v2524_v28  ;;  %v2973_v33 = vpop.eup %2972 }
0x1010   :  { %v2540_v41 = vmul.f32 %v2971_v59, %v2518_v27  ;;  %v2519_v18 = vmul.f32 0.5, %v2517_v15  ;;  %v2525_v42 = vadd.f32 1.0, %v2973_v33  ;;  %v2975_v17 = vpop.eup %2974 }
0x1011   :  { %v2538_v10 = vmul.f32 %v2526_v55, %v4015_v45  ;;  %v2977_v5 = vpop.eup %2976 }
0x1012   :  { %v2527_v54 = vmul.f32 0.5, %v2525_v42  ;;  %v2541_v48 = vmul.f32 %v2975_v17, %v2519_v18  ;;  %v2534_v16 = vadd.f32 1.0, %v2977_v5  ;;  %v2979_v3 = vpop.eup %2978 }
0x1013   :  { %v2542_v24 = vadd.f32 %v2540_v41, %v2538_v10  ;;  %v2535_v0 = vadd.f32 1.0, %v2979_v3 }
0x1014   :  { %v2539_v38 = vmul.f32 %v2527_v54, %v4019_v21  ;;  %v2536_v44 = vmul.f32 0.5, %v2534_v16 }
0x1015   :  { %2980 = vtanh.f32 %v2542_v24  ;;  %v2537_v45 = vmul.f32 0.5, %v2535_v0 }
0x1016   :  { %v2543_v36 = vadd.f32 %v2541_v48, %v2539_v38 }
0x1018   :  { %2982 = vtanh.f32 %v2543_v36 }
0x101f   :  { %v2981_v32 = vpop.eup %2980 }
0x1020   :  { %v2546_v60 = vmul.f32 %v2981_v32, %v2536_v44 }
0x1022   :  { %2555 = vst [vmem:[#allocation9] sm:$0xff] %v2546_v60  ;;  %v2983_v20 = vpop.eup %2982 }
0x1023   :  { %v2547_v25 = vmul.f32 %v2983_v20, %v2537_v45 }
0x1025   :  { %2556 = vst [vmem:[#allocation9 + $0x8] sm:$0xff] %v2547_v25 }
0x1026   :  { %3118 = shalt.err (!%p3115_p6)
}
0x1027   :  { %s3119_s10 = scalar_lea.hbm %s4038_s2, 256 }
0x1028   :  { %p3120_p7 = scmp.ne.s32.totalorder %s4038_s2, %s3119_s10  ;;  %p3123_p8 = scmp.lt.u32.totalorder %s3119_s10, %s4038_s2 }
0x102a   :  { %p3125_p9 = pnand %p3123_p8, %p3120_p7 }
0x102c   :  { %3128 = shalt.err (!%p3125_p9)
}
0x102d   :  { %s3142_s15 = smov 128   ;;  %s3143_s16 = smov 8  }
0x102e   :  { %2568 = dma.vmem_to_hbm [thread:$0]  %s2563_s6, 256, %s4038_s2, [#allocation6], %s3142_s15, %s3142_s15, %s3143_s16  }
0x102f   :  { %3133 = dma.done.wait [#allocation6], 256  }
0x1030   :  { %3134 = vsyncadd [#allocation6], 4294967040 }
0x1031   :  { %2572 = vsyncpa [#allocation5], 1 }
0x1032   :  { %2573 = vsyncpa [#allocation8], 1 }
0x1033   :  { %2574 = vsyncpa [#allocation6], 1 }

// kernel: tpu_custom_call.1
= control target key start
LH: loop header
LB: loop body
LE: loop exit
PB: predicated region body
PF: predicated region fallthrough
CT: control target
= control target key end

     0   :  { %7 = vsyncpa [#allocation5], 0  ;;  %s4036_s0 = inlined_call_operand.hbm [shape: bf16[16,16,512], index: 0, kind: input, shape index: {}]   ;;  %s4037_s1 = inlined_call_operand.hbm [shape: bf16[128,512], index: 1, kind: input, shape index: {}]   ;;  %s4038_s2 = inlined_call_operand.hbm [shape: f32[16,128], index: 2, kind: output, shape index: {}]  }
   0x1   :  { %8 = vsyncpa [#allocation8], 0 }
   0x2   :  { %9 = vsyncpa [#allocation6], 0  ;;  %s3135_s9 = smov [#allocation4]   ;;  %s3063_s13 = scalar_lea.hbm %s4036_s0, 8192 }
   0x3   :  { %s15_s10 = sshll.u32 %s3135_s9, 4  ;;  %p3064_p0 = scmp.ne.s32.totalorder %s4036_s0, %s3063_s13  ;;  %s16_s10 = int_to_ptr.vmem [resolvable:$true] %s15_s10 }
   0x4   :  { %p3067_p1 = scmp.lt.u32.totalorder %s3063_s13, %s4036_s0 }
   0x6   :  { %p3069_p2 = pnand %p3067_p1, %p3064_p0 }
   0x8   :  { %3072 = shalt.err (!%p3069_p2)
}
   0x9   :  { %s3073_s18 = scalar_lea.vmem %s16_s10, 8192  ;;  %p3078_p4 = scmp.lt.s32.totalorder %s16_s10, %s16_s10 }
   0xa   :  { %p3074_p3 = scmp.ne.s32.totalorder %s16_s10, %s3073_s18  ;;  %p3079_p5 = scmp.lt.s32.totalorder %s3073_s18, %s3073_s18 }
   0xc   :  { %p3080_p6 = por %p3079_p5, %p3078_p4 }
   0xe   :  { %p3081_p7 = pnand %p3080_p6, %p3074_p3 }
  0x10   :  { %3084 = shalt.err (!%p3081_p7)
}
  0x11   :  { %s3136_s19 = smov 256   ;;  %s3137_s20 = smov 16  }
  0x12   :  { %21 = dma.hbm_to_vmem [thread:$0]  %s4036_s0, 8192, %s16_s10, [#allocation5], %s3136_s19, %s3136_s19, %s3137_s20  }
  0x13   :  { %s3138_s23 = smov [#allocation7]   ;;  %s3085_s27 = scalar_lea.hbm %s4037_s1, 4096 }
  0x14   :  { %s27_s24 = sshll.u32 %s3138_s23, 4  ;;  %p3086_p8 = scmp.ne.s32.totalorder %s4037_s1, %s3085_s27  ;;  %s28_s24 = int_to_ptr.vmem [resolvable:$true] %s27_s24 }
  0x15   :  { %p3089_p9 = scmp.lt.u32.totalorder %s3085_s27, %s4037_s1 }
  0x17   :  { %p3091_p10 = pnand %p3089_p9, %p3086_p8 }
  0x19   :  { %3094 = shalt.err (!%p3091_p10)
}
  0x1a   :  { %s3095_s4 = scalar_lea.vmem %s28_s24, 4096  ;;  %p3100_p12 = scmp.lt.s32.totalorder %s28_s24, %s28_s24 }
  0x1b   :  { %p3096_p11 = scmp.ne.s32.totalorder %s28_s24, %s3095_s4  ;;  %p3101_p13 = scmp.lt.s32.totalorder %s3095_s4, %s3095_s4 }
  0x1d   :  { %p3102_p0 = por %p3101_p13, %p3100_p12 }
  0x1f   :  { %p3103_p1 = pnand %p3102_p0, %p3096_p11 }
  0x21   :  { %3106 = shalt.err (!%p3103_p1)
}
  0x22   :  { %33 = dma.hbm_to_vmem [thread:$0]  %s4037_s1, 4096, %s28_s24, [#allocation8], %s3136_s19, %s3136_s19, %s3137_s20  }
  0x23   :  { %3129 = dma.done.wait [#allocation5], 8192  }
  0x24   :  { %3130 = vsyncadd [#allocation5], 4294959104 }
  0x25   :  { %3131 = dma.done.wait [#allocation8], 4096  }
  0x26   :  { %3132 = vsyncadd [#allocation8], 4294963200  ;;  %v3139_v0 = vmov 0   ;;  %v3185_v1 = vld [vmem:[#allocation7 + $0x4] ss:$16 sps:$4 sm:$0xff]   ;;  %v3140_v33 = vmov 0.0|0.0  }
  0x27   :  { %290 = vmatprep.mubr.bf16.mxu0 %v3139_v0  ;;  %333 = vmatprep.mubr.bf16.mxu1 %v3139_v0  ;;  %v3187_v2 = vld [vmem:[#allocation7] ss:$16 sps:$4 sm:$0xff]   ;;  %v3190_v3 = vld [vmem:[#allocation7 + $0x24] ss:$16 sps:$4 sm:$0xff]   ;;  %v3193_v4 = vld [vmem:[#allocation7 + $0xc] ss:$16 sps:$4 sm:$0xff]  }
  0x28   :  { %258 = vmatprep.subr.bf16.mxu0 %v3185_v1  ;;  %v3195_v5 = vld [vmem:[#allocation7 + $0x20] ss:$16 sps:$4 sm:$0xff]   ;;  %v3197_v6 = vld [vmem:[#allocation7 + $0x8] ss:$16 sps:$4 sm:$0xff]   ;;  %v3200_v7 = vld [vmem:[#allocation7 + $0x44] ss:$16 sps:$4 sm:$0xff]   ;;  %301 = vmatprep.subr.bf16.mxu1 %v3193_v4 }
  0x29   :  { %259 = vmatpush1.bf16.msra.mxu0 %v3187_v2  ;;  %v3203_v8 = vld [vmem:[#allocation7 + $0x2c] ss:$16 sps:$4 sm:$0xff]   ;;  %302 = vmatpush1.bf16.msra.mxu1 %v3197_v6  ;;  %v3206_v9 = vld [vmem:[#allocation7 + $0x28] ss:$16 sps:$4 sm:$0xff]   ;;  %v3210_v10 = vld [vmem:[#allocation7 + $0x40] ss:$16 sps:$4 sm:$0xff]  }
  0x2a   :  { %260 = vmatprep.subr.bf16.mxu0 %v3190_v3  ;;  %303 = vmatprep.subr.bf16.mxu1 %v3203_v8  ;;  %v3213_v11 = vld [vmem:[#allocation7 + $0x64] ss:$16 sps:$4 sm:$0xff]   ;;  %v3215_v12 = vld [vmem:[#allocation7 + $0x4c] ss:$16 sps:$4 sm:$0xff]   ;;  %v3218_v13 = vld [vmem:[#allocation7 + $0x48] ss:$16 sps:$4 sm:$0xff]  }
  0x2b   :  { %v3222_v14 = vld [vmem:[#allocation7 + $0x60] ss:$16 sps:$4 sm:$0xff]   ;;  %v3224_v15 = vld [vmem:[#allocation7 + $0x6c] ss:$16 sps:$4 sm:$0xff]   ;;  %v3227_v16 = vld [vmem:[#allocation7 + $0x84] ss:$16 sps:$4 sm:$0xff]  }
  0x2c   :  { %v3230_v17 = vld [vmem:[#allocation7 + $0x80] ss:$16 sps:$4 sm:$0xff]   ;;  %v3232_v18 = vld [vmem:[#allocation7 + $0x68] ss:$16 sps:$4 sm:$0xff]   ;;  %v3236_v19 = vld [vmem:[#allocation7 + $0x8c] ss:$16 sps:$4 sm:$0xff]  }
  0x2d   :  { %261 = vmatpush1.bf16.msra.mxu0 %v3195_v5  ;;  %304 = vmatpush1.bf16.msra.mxu1 %v3206_v9  ;;  %v3239_v20 = vld [vmem:[#allocation7 + $0xa4] ss:$16 sps:$4 sm:$0xff]   ;;  %v3242_v21 = vld [vmem:[#allocation7 + $0x88] ss:$16 sps:$4 sm:$0xff]   ;;  %v3246_v22 = vld [vmem:[#allocation7 + $0xa0] ss:$16 sps:$4 sm:$0xff]  }
  0x2e   :  { %262 = vmatprep.subr.bf16.mxu0 %v3200_v7  ;;  %305 = vmatprep.subr.bf16.mxu1 %v3215_v12  ;;  %v3248_v23 = vld [vmem:[#allocation7 + $0xac] ss:$16 sps:$4 sm:$0xff]   ;;  %v3251_v24 = vld [vmem:[#allocation7 + $0xc4] ss:$16 sps:$4 sm:$0xff]   ;;  %v3254_v25 = vld [vmem:[#allocation7 + $0xa8] ss:$16 sps:$4 sm:$0xff]  }
  0x2f   :  { %v3258_v26 = vld [vmem:[#allocation7 + $0xc0] ss:$16 sps:$4 sm:$0xff]   ;;  %v3260_v27 = vld [vmem:[#allocation7 + $0xcc] ss:$16 sps:$4 sm:$0xff]   ;;  %v3263_v28 = vld [vmem:[#allocation7 + $0xe4] ss:$16 sps:$4 sm:$0xff]  }
  0x30   :  { %v3266_v29 = vld [vmem:[#allocation7 + $0xc8] ss:$16 sps:$4 sm:$0xff]   ;;  %v3270_v30 = vld [vmem:[#allocation7 + $0xe0] ss:$16 sps:$4 sm:$0xff]   ;;  %v3272_v31 = vld [vmem:[#allocation7 + $0xec] ss:$16 sps:$4 sm:$0xff]  }
  0x31   :  { %263 = vmatpush1.bf16.msra.mxu0 %v3210_v10  ;;  %306 = vmatpush1.bf16.msra.mxu1 %v3218_v13  ;;  %v3276_v32 = vld [vmem:[#allocation7 + $0xe8] ss:$16 sps:$4 sm:$0xff]   ;;  %v54_v34 = vld [vmem:[#allocation4] sm:$0xff]  ;;  %v56_v35 = vld [vmem:[#allocation4 + $0x10] sm:$0xff]  ;;  %s3141_s1 = smov [#allocation9]  }
  0x32   :  { %264 = vmatprep.subr.bf16.mxu0 %v3213_v11  ;;  %307 = vmatprep.subr.bf16.mxu1 %v3224_v15  ;;  %v58_v36 = vunpack.c.l.bf16 %v54_v34  ;;  %v59_v37 = vunpack.c.h.bf16 %v54_v34  ;;  %v55_v38 = vld [vmem:[#allocation4 + $0x8] sm:$0xff]  ;;  %v62_v39 = vunpack.c.l.bf16 %v56_v35  ;;  %v63_v41 = vunpack.c.h.bf16 %v56_v35  ;;  %v57_v42 = vld [vmem:[#allocation4 + $0x18] sm:$0xff]  ;;  %s2562_s6 = sshll.u32 %s3141_s1, 4  ;;  %s2563_s6 = int_to_ptr.vmem [resolvable:$true] %s2562_s6 }
  0x33   :  { %v60_v45 = vunpack.c.l.bf16 %v55_v38  ;;  %v64_v52 = vunpack.c.l.bf16 %v57_v42  ;;  %v61_v60 = vunpack.c.h.bf16 %v55_v38  ;;  %v65_v63 = vunpack.c.h.bf16 %v57_v42  ;;  %s3107_s7 = scalar_lea.vmem %s2563_s6, 256  ;;  %p3112_p3 = scmp.lt.s32.totalorder %s2563_s6, %s2563_s6 }
  0x34   :  { %p3108_p2 = scmp.ne.s32.totalorder %s2563_s6, %s3107_s7  ;;  %p3113_p4 = scmp.lt.s32.totalorder %s3107_s7, %s3107_s7 }
  0x35   :  { %265 = vmatpush1.bf16.msra.mxu0 %v3222_v14  ;;  %308 = vmatpush1.bf16.msra.mxu1 %v3232_v18 }
  0x36   :  { %266 = vmatprep.subr.bf16.mxu0 %v3227_v16  ;;  %309 = vmatprep.subr.bf16.mxu1 %v3236_v19  ;;  %p3114_p5 = por %p3113_p4, %p3112_p3 }
  0x38   :  { %p3115_p6 = pnand %p3114_p5, %p3108_p2 }
  0x39   :  { %267 = vmatpush1.bf16.msra.mxu0 %v3230_v17  ;;  %310 = vmatpush1.bf16.msra.mxu1 %v3242_v21 }
  0x3a   :  { %268 = vmatprep.subr.bf16.mxu0 %v3239_v20  ;;  %311 = vmatprep.subr.bf16.mxu1 %v3248_v23 }
  0x3d   :  { %269 = vmatpush1.bf16.msra.mxu0 %v3246_v22  ;;  %312 = vmatpush1.bf16.msra.mxu1 %v3254_v25 }
  0x3e   :  { %270 = vmatprep.subr.bf16.mxu0 %v3251_v24  ;;  %313 = vmatprep.subr.bf16.mxu1 %v3260_v27 }
  0x41   :  { %271 = vmatpush1.bf16.msra.mxu0 %v3258_v26  ;;  %314 = vmatpush1.bf16.msra.mxu1 %v3266_v29 }
  0x42   :  { %272 = vmatprep.subr.bf16.mxu0 %v3263_v28  ;;  %315 = vmatprep.subr.bf16.mxu1 %v3272_v31 }
  0x45   :  { %273 = vmatpush1.bf16.msra.mxu0 %v3270_v30  ;;  %316 = vmatpush1.bf16.msra.mxu1 %v3276_v32 }
  0x46   :  { %402 = vmatprep.subr.bf16.mxu0 %v3185_v1  ;;  %445 = vmatprep.subr.bf16.mxu1 %v3193_v4 }
  0x48   :  { %291 = vmatmul.mubr.bf16.vlgmr.msra.gmra.mrb[0].mxu0 %v3140_v33  ;;  %334 = vmatmul.mubr.bf16.vlgmr.msra.gmra.mrb[0].mxu1 %v3140_v33 }
  0x49   :  { %403 = vmatpush1.bf16.msra.mxu0 %v3187_v2  ;;  %434 = vmatprep.mubr.bf16.mxu0 %v3139_v0 }
  0x4a   :  { %404 = vmatprep.subr.bf16.mxu0 %v3190_v3  ;;  %446 = vmatpush1.bf16.msra.mxu1 %v3197_v6 }
  0x4b   :  { %477 = vmatprep.mubr.bf16.mxu1 %v3139_v0  ;;  %447 = vmatprep.subr.bf16.mxu1 %v3203_v8 }
  0x4d   :  { %405 = vmatpush1.bf16.msra.mxu0 %v3195_v5 }
  0x4e   :  { %406 = vmatprep.subr.bf16.mxu0 %v3200_v7  ;;  %448 = vmatpush1.bf16.msra.mxu1 %v3206_v9 }
  0x4f   :  { %449 = vmatprep.subr.bf16.mxu1 %v3215_v12 }
  0x51   :  { %407 = vmatpush1.bf16.msra.mxu0 %v3210_v10 }
  0x52   :  { %408 = vmatprep.subr.bf16.mxu0 %v3213_v11  ;;  %450 = vmatpush1.bf16.msra.mxu1 %v3218_v13 }
  0x53   :  { %451 = vmatprep.subr.bf16.mxu1 %v3224_v15 }
  0x55   :  { %409 = vmatpush1.bf16.msra.mxu0 %v3222_v14 }
  0x56   :  { %410 = vmatprep.subr.bf16.mxu0 %v3227_v16  ;;  %452 = vmatpush1.bf16.msra.mxu1 %v3232_v18 }
  0x57   :  { %453 = vmatprep.subr.bf16.mxu1 %v3236_v19 }
  0x59   :  { %411 = vmatpush1.bf16.msra.mxu0 %v3230_v17 }
  0x5a   :  { %412 = vmatprep.subr.bf16.mxu0 %v3239_v20  ;;  %454 = vmatpush1.bf16.msra.mxu1 %v3242_v21 }
  0x5b   :  { %455 = vmatprep.subr.bf16.mxu1 %v3248_v23 }
  0x5d   :  { %413 = vmatpush1.bf16.msra.mxu0 %v3246_v22 }
  0x5e   :  { %414 = vmatprep.subr.bf16.mxu0 %v3251_v24  ;;  %456 = vmatpush1.bf16.msra.mxu1 %v3254_v25 }
  0x5f   :  { %457 = vmatprep.subr.bf16.mxu1 %v3260_v27 }
  0x61   :  { %415 = vmatpush1.bf16.msra.mxu0 %v3258_v26 }
  0x62   :  { %416 = vmatprep.subr.bf16.mxu0 %v3263_v28  ;;  %458 = vmatpush1.bf16.msra.mxu1 %v3266_v29 }
  0x63   :  { %459 = vmatprep.subr.bf16.mxu1 %v3272_v31 }
  0x65   :  { %417 = vmatpush1.bf16.msra.mxu0 %v3270_v30 }
  0x66   :  { %546 = vmatprep.subr.bf16.mxu0 %v3185_v1  ;;  %460 = vmatpush1.bf16.msra.mxu1 %v3276_v32 }
  0x67   :  { %589 = vmatprep.subr.bf16.mxu1 %v3193_v4 }
 0x11b   :  { %v292_v40 = vpop.f32.mrb[0].mxu0  ;;  %v335_v51 = vpop.f32.mrb[0].mxu1 }
 0x11c   :  { %v344_v43 = vadd.f32 %v292_v40, %v58_v36  ;;  %v294_v44 = vpop.f32.mrb[1].mxu0  ;;  %v337_v55 = vpop.f32.mrb[1].mxu1  ;;  %v346_v57 = vadd.f32 %v335_v51, %v60_v45 }
 0x11d   :  { %v345_v46 = vadd.f32 %v294_v44, %v59_v37  ;;  %v296_v47 = vpop.f32.mrb[2].mxu0  ;;  %v339_v58 = vpop.f32.mrb[2].mxu1  ;;  %v347_v33 = vadd.f32 %v337_v55, %v61_v60 }
 0x11e   :  { %v352_v48 = vmul.f32 0.5, %v344_v43  ;;  %v348_v49 = vadd.f32 %v296_v47, %v62_v39  ;;  %v298_v50 = vpop.f32.mrb[3].mxu0  ;;  %v341_v61 = vpop.f32.mrb[3].mxu1  ;;  %v350_v62 = vadd.f32 %v339_v58, %v64_v52 }
 0x11f   :  { %v360_v53 = vmul.f32 0.5, %v345_v46  ;;  %v349_v54 = vadd.f32 %v298_v50, %v63_v41  ;;  %v351_v34 = vadd.f32 %v341_v61, %v65_v63  ;;  %v370_v35 = vmul.f32 0.5, %v347_v33 }
 0x120   :  { %2664 = vtanh.f32 %v352_v48  ;;  %v353_v56 = vmul.f32 0.5, %v348_v49 }
 0x121   :  { %2666 = vtanh.f32 %v360_v53  ;;  %v361_v59 = vmul.f32 0.5, %v349_v54  ;;  %v371_v37 = vmul.f32 0.5, %v351_v34 }
 0x122   :  { %2668 = vtanh.f32 %v353_v56 }
 0x123   :  { %2670 = vtanh.f32 %v361_v59 }
 0x124   :  { %2672 = vtanh.f32 %v346_v57 }
 0x125   :  { %2674 = vtanh.f32 %v350_v62 }
 0x126   :  { %2676 = vtanh.f32 %v370_v35 }
 0x127   :  { %2678 = vtanh.f32 %v371_v37  ;;  %v390_v37 = vld [vmem:[#allocation4 + $0x20] sm:$0xff] }
 0x12a   :  { %v2665_v36 = vpop.eup %2664 }
 0x12b   :  { %v2667_v39 = vpop.eup %2666  ;;  %v356_v40 = vadd.f32 1.0, %v2665_v36 }
 0x12c   :  { %v2669_v41 = vpop.eup %2668  ;;  %v364_v43 = vadd.f32 1.0, %v2667_v39  ;;  %v392_v39 = vld [vmem:[#allocation4 + $0x30] sm:$0xff] }
 0x12d   :  { %v2671_v44 = vpop.eup %2670  ;;  %v358_v45 = vmul.f32 0.5, %v356_v40  ;;  %v357_v46 = vadd.f32 1.0, %v2669_v41  ;;  %v394_v40 = vunpack.c.l.bf16 %v390_v37  ;;  %v391_v41 = vld [vmem:[#allocation4 + $0x28] sm:$0xff] }
 0x12e   :  { %v2673_v38 = vpop.eup %2672  ;;  %v366_v47 = vmul.f32 0.5, %v364_v43  ;;  %v365_v48 = vadd.f32 1.0, %v2671_v44  ;;  %v395_v43 = vunpack.c.h.bf16 %v390_v37  ;;  %v398_v44 = vunpack.c.l.bf16 %v392_v39 }
 0x12f   :  { %v359_v42 = vmul.f32 0.5, %v357_v46  ;;  %v380_v49 = vmul.f32 %v2673_v38, %v358_v45  ;;  %v2675_v50 = vpop.eup %2674  ;;  %v399_v38 = vunpack.c.h.bf16 %v392_v39 }
 0x130   :  { %v378_v51 = vmul.f32 0.0, %v366_v47  ;;  %v367_v52 = vmul.f32 0.5, %v365_v48  ;;  %v2677_v57 = vpop.eup %2676  ;;  %v396_v48 = vunpack.c.l.bf16 %v391_v41 }
 0x131   :  { %v381_v53 = vmul.f32 %v2675_v50, %v359_v42  ;;  %v2679_v58 = vpop.eup %2678  ;;  %v374_v59 = vadd.f32 1.0, %v2677_v57  ;;  %v393_v50 = vld [vmem:[#allocation4 + $0x38] sm:$0xff] }
 0x132   :  { %v379_v54 = vmul.f32 0.0, %v367_v52  ;;  %v3317_v55 = vadd.f32 %v380_v49, %v378_v51  ;;  %v375_v60 = vadd.f32 1.0, %v2679_v58  ;;  %v401_v37 = vunpack.c.h.bf16 %v393_v50 }
 0x133   :  { %v376_v62 = vmul.f32 0.5, %v374_v59 }
 0x134   :  { %2680 = vtanh.f32 %v3317_v55  ;;  %v3320_v56 = vadd.f32 %v381_v53, %v379_v54  ;;  %v377_v63 = vmul.f32 0.5, %v375_v60 }
 0x136   :  { %2682 = vtanh.f32 %v3320_v56 }
 0x13e   :  { %v2681_v61 = vpop.eup %2680 }
 0x13f   :  { %v386_v34 = vmul.f32 %v2681_v61, %v376_v62  ;;  %v400_v61 = vunpack.c.l.bf16 %v393_v50 }
 0x140   :  { %v2683_v33 = vpop.eup %2682 }
 0x141   :  { %v387_v35 = vmul.f32 %v2683_v33, %v377_v63 }
 0x143   :  { %v388_v36 = vpack.c.bf16 %v387_v35, %v386_v34  ;;  %v397_v35 = vunpack.c.h.bf16 %v391_v41 }
 0x145   :  { %435 = vmatmul.mubr.bf16.vlgmr.msra.gmra.mrb[4].mxu0 %v388_v36  ;;  %478 = vmatmul.mubr.bf16.vlgmr.msra.gmra.mrb[4].mxu1 %v388_v36 }
 0x146   :  { %547 = vmatpush1.bf16.msra.mxu0 %v3187_v2  ;;  %590 = vmatpush1.bf16.msra.mxu1 %v3197_v6 }
 0x147   :  { %548 = vmatprep.subr.bf16.mxu0 %v3190_v3  ;;  %591 = vmatprep.subr.bf16.mxu1 %v3203_v8 }
 0x148   :  { %578 = vmatprep.mubr.bf16.mxu0 %v3139_v0  ;;  %621 = vmatprep.mubr.bf16.mxu1 %v3139_v0 }
 0x14a   :  { %549 = vmatpush1.bf16.msra.mxu0 %v3195_v5  ;;  %592 = vmatpush1.bf16.msra.mxu1 %v3206_v9 }
 0x14b   :  { %550 = vmatprep.subr.bf16.mxu0 %v3200_v7  ;;  %593 = vmatprep.subr.bf16.mxu1 %v3215_v12 }
 0x14e   :  { %551 = vmatpush1.bf16.msra.mxu0 %v3210_v10  ;;  %594 = vmatpush1.bf16.msra.mxu1 %v3218_v13 }
 0x14f   :  { %552 = vmatprep.subr.bf16.mxu0 %v3213_v11  ;;  %595 = vmatprep.subr.bf16.mxu1 %v3224_v15 }
 0x152   :  { %553 = vmatpush1.bf16.msra.mxu0 %v3222_v14  ;;  %596 = vmatpush1.bf16.msra.mxu1 %v3232_v18 }
 0x153   :  { %554 = vmatprep.subr.bf16.mxu0 %v3227_v16  ;;  %597 = vmatprep.subr.bf16.mxu1 %v3236_v19 }
 0x156   :  { %555 = vmatpush1.bf16.msra.mxu0 %v3230_v17  ;;  %598 = vmatpush1.bf16.msra.mxu1 %v3242_v21 }
 0x157   :  { %556 = vmatprep.subr.bf16.mxu0 %v3239_v20  ;;  %599 = vmatprep.subr.bf16.mxu1 %v3248_v23 }
 0x15a   :  { %557 = vmatpush1.bf16.msra.mxu0 %v3246_v22  ;;  %600 = vmatpush1.bf16.msra.mxu1 %v3254_v25 }
 0x15b   :  { %558 = vmatprep.subr.bf16.mxu0 %v3251_v24  ;;  %601 = vmatprep.subr.bf16.mxu1 %v3260_v27 }
 0x15e   :  { %559 = vmatpush1.bf16.msra.mxu0 %v3258_v26  ;;  %602 = vmatpush1.bf16.msra.mxu1 %v3266_v29 }
 0x15f   :  { %560 = vmatprep.subr.bf16.mxu0 %v3263_v28  ;;  %603 = vmatprep.subr.bf16.mxu1 %v3272_v31 }
 0x162   :  { %561 = vmatpush1.bf16.msra.mxu0 %v3270_v30  ;;  %604 = vmatpush1.bf16.msra.mxu1 %v3276_v32 }
 0x163   :  { %690 = vmatprep.subr.bf16.mxu0 %v3185_v1  ;;  %733 = vmatprep.subr.bf16.mxu1 %v3193_v4 }
 0x218   :  { %v436_v45 = vpop.f32.mrb[4].mxu0  ;;  %v479_v46 = vpop.f32.mrb[4].mxu1 }
 0x219   :  { %v488_v47 = vadd.f32 %v436_v45, %v394_v40  ;;  %v438_v42 = vpop.f32.mrb[5].mxu0  ;;  %v481_v49 = vpop.f32.mrb[5].mxu1  ;;  %v490_v63 = vadd.f32 %v479_v46, %v396_v48 }
 0x21a   :  { %v489_v51 = vadd.f32 %v438_v42, %v395_v43  ;;  %v440_v52 = vpop.f32.mrb[6].mxu0  ;;  %v483_v53 = vpop.f32.mrb[6].mxu1  ;;  %v491_v39 = vadd.f32 %v481_v49, %v397_v35 }
 0x21b   :  { %v496_v54 = vmul.f32 0.5, %v488_v47  ;;  %v492_v57 = vadd.f32 %v440_v52, %v398_v44  ;;  %v442_v58 = vpop.f32.mrb[7].mxu0  ;;  %v485_v59 = vpop.f32.mrb[7].mxu1  ;;  %v494_v36 = vadd.f32 %v483_v53, %v400_v61 }
 0x21c   :  { %v504_v60 = vmul.f32 0.5, %v489_v51  ;;  %v493_v62 = vadd.f32 %v442_v58, %v399_v38  ;;  %v495_v40 = vadd.f32 %v485_v59, %v401_v37  ;;  %v514_v47 = vmul.f32 0.5, %v491_v39 }
 0x21d   :  { %2684 = vtanh.f32 %v496_v54  ;;  %v497_v33 = vmul.f32 0.5, %v492_v57 }
 0x21e   :  { %2686 = vtanh.f32 %v504_v60  ;;  %v505_v34 = vmul.f32 0.5, %v493_v62  ;;  %v515_v38 = vmul.f32 0.5, %v495_v40 }
 0x21f   :  { %2688 = vtanh.f32 %v497_v33 }
 0x220   :  { %2690 = vtanh.f32 %v490_v63 }
 0x221   :  { %2692 = vtanh.f32 %v505_v34 }
 0x222   :  { %2694 = vtanh.f32 %v494_v36 }
 0x223   :  { %2696 = vtanh.f32 %v514_v47  ;;  %v536_v47 = vld [vmem:[#allocation4 + $0x50] sm:$0xff] }
 0x224   :  { %2698 = vtanh.f32 %v515_v38  ;;  %v535_v38 = vld [vmem:[#allocation4 + $0x48] sm:$0xff] }
 0x227   :  { %v2685_v43 = vpop.eup %2684 }
 0x228   :  { %v2687_v44 = vpop.eup %2686  ;;  %v500_v45 = vadd.f32 1.0, %v2685_v43 }
 0x229   :  { %v508_v42 = vadd.f32 1.0, %v2687_v44  ;;  %v2689_v51 = vpop.eup %2688 }
 0x22a   :  { %v502_v46 = vmul.f32 0.5, %v500_v45  ;;  %v2691_v48 = vpop.eup %2690  ;;  %v501_v54 = vadd.f32 1.0, %v2689_v51 }
 0x22b   :  { %v510_v52 = vmul.f32 0.5, %v508_v42  ;;  %v2693_v41 = vpop.eup %2692 }
 0x22c   :  { %v524_v57 = vmul.f32 %v2691_v48, %v502_v46  ;;  %v503_v53 = vmul.f32 0.5, %v501_v54  ;;  %v509_v49 = vadd.f32 1.0, %v2693_v41  ;;  %v2695_v58 = vpop.eup %2694  ;;  %v542_v46 = vunpack.c.l.bf16 %v536_v47 }
 0x22d   :  { %v522_v50 = vmul.f32 %v510_v52, %v3317_v55  ;;  %v2697_v33 = vpop.eup %2696  ;;  %v543_v54 = vunpack.c.h.bf16 %v536_v47 }
 0x22e   :  { %v511_v60 = vmul.f32 0.5, %v509_v49  ;;  %v525_v61 = vmul.f32 %v2695_v58, %v503_v53  ;;  %v2699_v34 = vpop.eup %2698  ;;  %v518_v35 = vadd.f32 1.0, %v2697_v33  ;;  %v537_v49 = vld [vmem:[#allocation4 + $0x58] sm:$0xff] }
 0x22f   :  { %v3358_v59 = vadd.f32 %v524_v57, %v522_v50  ;;  %v519_v55 = vadd.f32 1.0, %v2699_v34  ;;  %v540_v57 = vunpack.c.l.bf16 %v535_v38 }
 0x230   :  { %v523_v62 = vmul.f32 %v511_v60, %v3320_v56  ;;  %v520_v37 = vmul.f32 0.5, %v518_v35  ;;  %v534_v56 = vld [vmem:[#allocation4 + $0x40] sm:$0xff] }
 0x231   :  { %2700 = vtanh.f32 %v3358_v59  ;;  %v521_v39 = vmul.f32 0.5, %v519_v55  ;;  %v538_v42 = vunpack.c.l.bf16 %v534_v56  ;;  %v539_v51 = vunpack.c.h.bf16 %v534_v56 }
 0x232   :  { %v3362_v63 = vadd.f32 %v525_v61, %v523_v62  ;;  %v545_v56 = vunpack.c.h.bf16 %v537_v49 }
 0x234   :  { %2702 = vtanh.f32 %v3362_v63 }
 0x23b   :  { %v2701_v36 = vpop.eup %2700 }
 0x23c   :  { %v530_v43 = vmul.f32 %v2701_v36, %v520_v37  ;;  %v544_v36 = vunpack.c.l.bf16 %v537_v49 }
 0x23e   :  { %v2703_v40 = vpop.eup %2702 }
 0x23f   :  { %v531_v44 = vmul.f32 %v2703_v40, %v521_v39 }
 0x241   :  { %v532_v45 = vpack.c.bf16 %v531_v44, %v530_v43  ;;  %v541_v44 = vunpack.c.h.bf16 %v535_v38 }
 0x243   :  { %579 = vmatmul.mubr.bf16.vlgmr.msra.gmra.mrb[8].mxu0 %v532_v45  ;;  %622 = vmatmul.mubr.bf16.vlgmr.msra.gmra.mrb[8].mxu1 %v532_v45 }
 0x244   :  { %691 = vmatpush1.bf16.msra.mxu0 %v3187_v2  ;;  %734 = vmatpush1.bf16.msra.mxu1 %v3197_v6 }
 0x245   :  { %692 = vmatprep.subr.bf16.mxu0 %v3190_v3  ;;  %735 = vmatprep.subr.bf16.mxu1 %v3203_v8 }
 0x246   :  { %722 = vmatprep.mubr.bf16.mxu0 %v3139_v0  ;;  %765 = vmatprep.mubr.bf16.mxu1 %v3139_v0 }
 0x248   :  { %693 = vmatpush1.bf16.msra.mxu0 %v3195_v5  ;;  %736 = vmatpush1.bf16.msra.mxu1 %v3206_v9 }
 0x249   :  { %694 = vmatprep.subr.bf16.mxu0 %v3200_v7  ;;  %737 = vmatprep.subr.bf16.mxu1 %v3215_v12 }
 0x24c   :  { %695 = vmatpush1.bf16.msra.mxu0 %v3210_v10  ;;  %738 = vmatpush1.bf16.msra.mxu1 %v3218_v13 }
 0x24d   :  { %696 = vmatprep.subr.bf16.mxu0 %v3213_v11  ;;  %739 = vmatprep.subr.bf16.mxu1 %v3224_v15 }
 0x250   :  { %697 = vmatpush1.bf16.msra.mxu0 %v3222_v14  ;;  %740 = vmatpush1.bf16.msra.mxu1 %v3232_v18 }
 0x251   :  { %698 = vmatprep.subr.bf16.mxu0 %v3227_v16  ;;  %741 = vmatprep.subr.bf16.mxu1 %v3236_v19 }
 0x254   :  { %699 = vmatpush1.bf16.msra.mxu0 %v3230_v17  ;;  %742 = vmatpush1.bf16.msra.mxu1 %v3242_v21 }
 0x255   :  { %700 = vmatprep.subr.bf16.mxu0 %v3239_v20  ;;  %743 = vmatprep.subr.bf16.mxu1 %v3248_v23 }
 0x258   :  { %701 = vmatpush1.bf16.msra.mxu0 %v3246_v22  ;;  %744 = vmatpush1.bf16.msra.mxu1 %v3254_v25 }
 0x259   :  { %702 = vmatprep.subr.bf16.mxu0 %v3251_v24  ;;  %745 = vmatprep.subr.bf16.mxu1 %v3260_v27 }
 0x25c   :  { %703 = vmatpush1.bf16.msra.mxu0 %v3258_v26  ;;  %746 = vmatpush1.bf16.msra.mxu1 %v3266_v29 }
 0x25d   :  { %704 = vmatprep.subr.bf16.mxu0 %v3263_v28  ;;  %747 = vmatprep.subr.bf16.mxu1 %v3272_v31 }
 0x260   :  { %705 = vmatpush1.bf16.msra.mxu0 %v3270_v30  ;;  %748 = vmatpush1.bf16.msra.mxu1 %v3276_v32 }
 0x261   :  { %834 = vmatprep.subr.bf16.mxu0 %v3185_v1  ;;  %877 = vmatprep.subr.bf16.mxu1 %v3193_v4 }
 0x316   :  { %v580_v48 = vpop.f32.mrb[8].mxu0  ;;  %v623_v52 = vpop.f32.mrb[8].mxu1 }
 0x317   :  { %v632_v41 = vadd.f32 %v580_v48, %v538_v42  ;;  %v582_v50 = vpop.f32.mrb[9].mxu0  ;;  %v625_v53 = vpop.f32.mrb[9].mxu1  ;;  %v634_v39 = vadd.f32 %v623_v52, %v540_v57 }
 0x318   :  { %v633_v58 = vadd.f32 %v582_v50, %v539_v51  ;;  %v584_v60 = vpop.f32.mrb[10].mxu0  ;;  %v627_v61 = vpop.f32.mrb[10].mxu1  ;;  %v635_v47 = vadd.f32 %v625_v53, %v541_v44 }
 0x319   :  { %v640_v62 = vmul.f32 0.5, %v632_v41  ;;  %v636_v33 = vadd.f32 %v584_v60, %v542_v46  ;;  %v586_v34 = vpop.f32.mrb[11].mxu0  ;;  %v629_v35 = vpop.f32.mrb[11].mxu1  ;;  %v638_v45 = vadd.f32 %v627_v61, %v544_v36 }
 0x31a   :  { %v648_v55 = vmul.f32 0.5, %v633_v58  ;;  %v637_v37 = vadd.f32 %v586_v34, %v543_v54  ;;  %v639_v42 = vadd.f32 %v629_v35, %v545_v56  ;;  %v658_v41 = vmul.f32 0.5, %v635_v47 }
 0x31b   :  { %2704 = vtanh.f32 %v640_v62  ;;  %v641_v40 = vmul.f32 0.5, %v636_v33 }
 0x31c   :  { %2706 = vtanh.f32 %v648_v55  ;;  %v649_v43 = vmul.f32 0.5, %v637_v37  ;;  %v659_v54 = vmul.f32 0.5, %v639_v42 }
 0x31d   :  { %2708 = vtanh.f32 %v641_v40 }
 0x31e   :  { %2710 = vtanh.f32 %v634_v39 }
 0x31f   :  { %2712 = vtanh.f32 %v649_v43 }
 0x320   :  { %2714 = vtanh.f32 %v638_v45 }
 0x321   :  { %2716 = vtanh.f32 %v658_v41 }
 0x322   :  { %2718 = vtanh.f32 %v659_v54 }
 0x325   :  { %v2705_v51 = vpop.eup %2704 }
 0x326   :  { %v2707_v46 = vpop.eup %2706  ;;  %v644_v48 = vadd.f32 1.0, %v2705_v51 }
 0x327   :  { %v652_v50 = vadd.f32 1.0, %v2707_v46  ;;  %v2709_v58 = vpop.eup %2708 }
 0x328   :  { %v646_v52 = vmul.f32 0.5, %v644_v48  ;;  %v2711_v57 = vpop.eup %2710  ;;  %v645_v62 = vadd.f32 1.0, %v2709_v58 }
 0x329   :  { %v654_v60 = vmul.f32 0.5, %v652_v50  ;;  %v2713_v38 = vpop.eup %2712 }
 0x32a   :  { %v668_v33 = vmul.f32 %v2711_v57, %v646_v52  ;;  %v647_v61 = vmul.f32 0.5, %v645_v62  ;;  %v653_v53 = vadd.f32 1.0, %v2713_v38  ;;  %v2715_v34 = vpop.eup %2714 }
 0x32b   :  { %v666_v49 = vmul.f32 %v654_v60, %v3358_v59  ;;  %v2717_v40 = vpop.eup %2716 }
 0x32c   :  { %v655_v55 = vmul.f32 0.5, %v653_v53  ;;  %v669_v36 = vmul.f32 %v2715_v34, %v647_v61  ;;  %v2719_v43 = vpop.eup %2718  ;;  %v662_v44 = vadd.f32 1.0, %v2717_v40 }
 0x32d   :  { %v3400_v35 = vadd.f32 %v668_v33, %v666_v49  ;;  %v663_v59 = vadd.f32 1.0, %v2719_v43 }
 0x32e   :  { %v667_v37 = vmul.f32 %v655_v55, %v3362_v63  ;;  %v664_v56 = vmul.f32 0.5, %v662_v44 }
 0x32f   :  { %2720 = vtanh.f32 %v3400_v35  ;;  %v665_v47 = vmul.f32 0.5, %v663_v59 }
 0x330   :  { %v3404_v39 = vadd.f32 %v669_v36, %v667_v37 }
 0x332   :  { %2722 = vtanh.f32 %v3404_v39 }
 0x339   :  { %v2721_v45 = vpop.eup %2720 }
 0x33a   :  { %v674_v51 = vmul.f32 %v2721_v45, %v664_v56 }
 0x33c   :  { %v2723_v42 = vpop.eup %2722 }
 0x33d   :  { %v675_v46 = vmul.f32 %v2723_v42, %v665_v47 }
 0x33f   :  { %v676_v48 = vpack.c.bf16 %v675_v46, %v674_v51 }
 0x341   :  { %723 = vmatmul.mubr.bf16.vlgmr.msra.gmra.mrb[12].mxu0 %v676_v48  ;;  %766 = vmatmul.mubr.bf16.vlgmr.msra.gmra.mrb[12].mxu1 %v676_v48 }
 0x342   :  { %835 = vmatpush1.bf16.msra.mxu0 %v3187_v2  ;;  %878 = vmatpush1.bf16.msra.mxu1 %v3197_v6  ;;  %v678_v2 = vld [vmem:[#allocation4 + $0x60] sm:$0xff]  ;;  %v679_v6 = vld [vmem:[#allocation4 + $0x68] sm:$0xff] }
 0x343   :  { %836 = vmatprep.subr.bf16.mxu0 %v3190_v3  ;;  %879 = vmatprep.subr.bf16.mxu1 %v3203_v8  ;;  %v680_v3 = vld [vmem:[#allocation4 + $0x70] sm:$0xff]  ;;  %v685_v33 = vunpack.c.h.bf16 %v679_v6 }
 0x344   :  { %866 = vmatprep.mubr.bf16.mxu0 %v3139_v0  ;;  %909 = vmatprep.mubr.bf16.mxu1 %v3139_v0  ;;  %v686_v8 = vunpack.c.l.bf16 %v680_v3 }
 0x346   :  { %837 = vmatpush1.bf16.msra.mxu0 %v3195_v5  ;;  %880 = vmatpush1.bf16.msra.mxu1 %v3206_v9  ;;  %v682_v5 = vunpack.c.l.bf16 %v678_v2 }
 0x347   :  { %838 = vmatprep.subr.bf16.mxu0 %v3200_v7  ;;  %881 = vmatprep.subr.bf16.mxu1 %v3215_v12  ;;  %v683_v7 = vunpack.c.h.bf16 %v678_v2 }
 0x34a   :  { %839 = vmatpush1.bf16.msra.mxu0 %v3210_v10  ;;  %882 = vmatpush1.bf16.msra.mxu1 %v3218_v13  ;;  %v684_v13 = vunpack.c.l.bf16 %v679_v6 }
 0x34b   :  { %840 = vmatprep.subr.bf16.mxu0 %v3213_v11  ;;  %883 = vmatprep.subr.bf16.mxu1 %v3224_v15  ;;  %v687_v11 = vunpack.c.h.bf16 %v680_v3 }
 0x34e   :  { %841 = vmatpush1.bf16.msra.mxu0 %v3222_v14  ;;  %884 = vmatpush1.bf16.msra.mxu1 %v3232_v18 }
 0x34f   :  { %842 = vmatprep.subr.bf16.mxu0 %v3227_v16  ;;  %885 = vmatprep.subr.bf16.mxu1 %v3236_v19  ;;  %v681_v16 = vld [vmem:[#allocation4 + $0x78] sm:$0xff] }
 0x350   :  { %v688_v52 = vunpack.c.l.bf16 %v681_v16  ;;  %v689_v61 = vunpack.c.h.bf16 %v681_v16 }
 0x352   :  { %843 = vmatpush1.bf16.msra.mxu0 %v3230_v17  ;;  %886 = vmatpush1.bf16.msra.mxu1 %v3242_v21 }
 0x353   :  { %844 = vmatprep.subr.bf16.mxu0 %v3239_v20  ;;  %887 = vmatprep.subr.bf16.mxu1 %v3248_v23 }
 0x356   :  { %845 = vmatpush1.bf16.msra.mxu0 %v3246_v22  ;;  %888 = vmatpush1.bf16.msra.mxu1 %v3254_v25 }
 0x357   :  { %846 = vmatprep.subr.bf16.mxu0 %v3251_v24  ;;  %889 = vmatprep.subr.bf16.mxu1 %v3260_v27 }
 0x35a   :  { %847 = vmatpush1.bf16.msra.mxu0 %v3258_v26  ;;  %890 = vmatpush1.bf16.msra.mxu1 %v3266_v29 }
 0x35b   :  { %848 = vmatprep.subr.bf16.mxu0 %v3263_v28  ;;  %891 = vmatprep.subr.bf16.mxu1 %v3272_v31 }
 0x35e   :  { %849 = vmatpush1.bf16.msra.mxu0 %v3270_v30  ;;  %892 = vmatpush1.bf16.msra.mxu1 %v3276_v32 }
 0x35f   :  { %978 = vmatprep.subr.bf16.mxu0 %v3185_v1  ;;  %1021 = vmatprep.subr.bf16.mxu1 %v3193_v4 }
 0x414   :  { %v724_v9 = vpop.f32.mrb[12].mxu0  ;;  %v767_v10 = vpop.f32.mrb[12].mxu1 }
 0x415   :  { %v776_v12 = vadd.f32 %v724_v9, %v682_v5  ;;  %v726_v14 = vpop.f32.mrb[13].mxu0  ;;  %v769_v15 = vpop.f32.mrb[13].mxu1  ;;  %v778_v60 = vadd.f32 %v767_v10, %v684_v13 }
 0x416   :  { %v777_v17 = vadd.f32 %v726_v14, %v683_v7  ;;  %v728_v63 = vpop.f32.mrb[14].mxu0  ;;  %v771_v41 = vpop.f32.mrb[14].mxu1  ;;  %v779_v53 = vadd.f32 %v769_v15, %v685_v33  ;;  %v3481_v33 = vld [vmem:[#allocation7 + $0x64] ss:$16 sps:$4 sm:$0xff]  }
 0x417   :  { %v784_v1 = vmul.f32 0.5, %v776_v12  ;;  %v780_v50 = vadd.f32 %v728_v63, %v686_v8  ;;  %v730_v4 = vpop.f32.mrb[15].mxu0  ;;  %v773_v54 = vpop.f32.mrb[15].mxu1  ;;  %v782_v49 = vadd.f32 %v771_v41, %v688_v52  ;;  %v3466_v52 = vld [vmem:[#allocation7 + $0x28] ss:$16 sps:$4 sm:$0xff]  }
 0x418   :  { %v792_v58 = vmul.f32 0.5, %v777_v17  ;;  %v781_v57 = vadd.f32 %v730_v4, %v687_v11  ;;  %v783_v34 = vadd.f32 %v773_v54, %v689_v61  ;;  %v802_v40 = vmul.f32 0.5, %v779_v53  ;;  %v3455_v4 = vld [vmem:[#allocation7 + $0x24] ss:$16 sps:$4 sm:$0xff]   ;;  %v3458_v54 = vld [vmem:[#allocation7 + $0x2c] ss:$16 sps:$4 sm:$0xff]  }
 0x419   :  { %2724 = vtanh.f32 %v784_v1  ;;  %v785_v62 = vmul.f32 0.5, %v780_v50  ;;  %v3452_v50 = vld [vmem:[#allocation7 + $0x8] ss:$16 sps:$4 sm:$0xff]   ;;  %v3487_v61 = vld [vmem:[#allocation7 + $0x60] ss:$16 sps:$4 sm:$0xff]  }
 0x41a   :  { %2726 = vtanh.f32 %v792_v58  ;;  %v793_v38 = vmul.f32 0.5, %v781_v57  ;;  %v803_v44 = vmul.f32 0.5, %v783_v34  ;;  %v3463_v58 = vld [vmem:[#allocation7 + $0x20] ss:$16 sps:$4 sm:$0xff]   ;;  %v3469_v57 = vld [vmem:[#allocation7 + $0x44] ss:$16 sps:$4 sm:$0xff]  }
 0x41b   :  { %2728 = vtanh.f32 %v785_v62  ;;  %v3475_v62 = vld [vmem:[#allocation7 + $0x40] ss:$16 sps:$4 sm:$0xff]   ;;  %v3491_v53 = vld [vmem:[#allocation7 + $0x84] ss:$16 sps:$4 sm:$0xff]  }
 0x41c   :  { %2730 = vtanh.f32 %v778_v60  ;;  %v3472_v60 = vld [vmem:[#allocation7 + $0x4c] ss:$16 sps:$4 sm:$0xff]   ;;  %v3495_v34 = vld [vmem:[#allocation7 + $0x80] ss:$16 sps:$4 sm:$0xff]  }
 0x41d   :  { %2732 = vtanh.f32 %v793_v38  ;;  %v3478_v38 = vld [vmem:[#allocation7 + $0x48] ss:$16 sps:$4 sm:$0xff]  }
 0x41e   :  { %2734 = vtanh.f32 %v782_v49  ;;  %v3484_v49 = vld [vmem:[#allocation7 + $0x6c] ss:$16 sps:$4 sm:$0xff]  }
 0x41f   :  { %2736 = vtanh.f32 %v802_v40 }
 0x420   :  { %2738 = vtanh.f32 %v803_v44 }
 0x423   :  { %v2725_v55 = vpop.eup %2724 }
 0x424   :  { %v2727_v36 = vpop.eup %2726  ;;  %v788_v37 = vadd.f32 1.0, %v2725_v55  ;;  %v825_v55 = vld [vmem:[#allocation4 + $0x98] sm:$0xff] }
 0x425   :  { %v796_v43 = vadd.f32 1.0, %v2727_v36  ;;  %v2729_v59 = vpop.eup %2728 }
 0x426   :  { %v790_v45 = vmul.f32 0.5, %v788_v37  ;;  %v2731_v56 = vpop.eup %2730  ;;  %v789_v42 = vadd.f32 1.0, %v2729_v59 }
 0x427   :  { %v798_v47 = vmul.f32 0.5, %v796_v43  ;;  %v2733_v51 = vpop.eup %2732 }
 0x428   :  { %v812_v46 = vmul.f32 %v2731_v56, %v790_v45  ;;  %v791_v2 = vmul.f32 0.5, %v789_v42  ;;  %v797_v3 = vadd.f32 1.0, %v2733_v51  ;;  %v2735_v5 = vpop.eup %2734 }
 0x429   :  { %v810_v48 = vmul.f32 %v798_v47, %v3400_v35  ;;  %v2737_v11 = vpop.eup %2736  ;;  %v832_v47 = vunpack.c.l.bf16 %v825_v55 }
 0x42a   :  { %v799_v7 = vmul.f32 0.5, %v797_v3  ;;  %v813_v8 = vmul.f32 %v2735_v5, %v791_v2  ;;  %v2739_v12 = vpop.eup %2738  ;;  %v806_v13 = vadd.f32 1.0, %v2737_v11  ;;  %v833_v5 = vunpack.c.h.bf16 %v825_v55 }
 0x42b   :  { %v3442_v6 = vadd.f32 %v812_v46, %v810_v48  ;;  %v807_v35 = vadd.f32 1.0, %v2739_v12 }
 0x42c   :  { %v811_v9 = vmul.f32 %v799_v7, %v3404_v39  ;;  %v808_v15 = vmul.f32 0.5, %v806_v13  ;;  %v3449_v39 = vld [vmem:[#allocation7] ss:$16 sps:$4 sm:$0xff]  }
 0x42d   :  { %2740 = vtanh.f32 %v3442_v6  ;;  %v809_v16 = vmul.f32 0.5, %v807_v35 }
 0x42e   :  { %v3446_v10 = vadd.f32 %v813_v8, %v811_v9 }
 0x430   :  { %2742 = vtanh.f32 %v3446_v10 }
 0x437   :  { %v2741_v14 = vpop.eup %2740 }
 0x438   :  { %v818_v63 = vmul.f32 %v2741_v14, %v808_v15 }
 0x43a   :  { %v2743_v17 = vpop.eup %2742 }
 0x43b   :  { %v819_v41 = vmul.f32 %v2743_v17, %v809_v16 }
 0x43d   :  { %v820_v1 = vpack.c.bf16 %v819_v41, %v818_v63 }
 0x43f   :  { %867 = vmatmul.mubr.bf16.vlgmr.msra.gmra.mrb[16].mxu0 %v820_v1  ;;  %910 = vmatmul.mubr.bf16.vlgmr.msra.gmra.mrb[16].mxu1 %v820_v1 }
 0x440   :  { %979 = vmatpush1.bf16.msra.mxu0 %v3449_v39  ;;  %1022 = vmatpush1.bf16.msra.mxu1 %v3452_v50 }
 0x441   :  { %980 = vmatprep.subr.bf16.mxu0 %v3455_v4  ;;  %1023 = vmatprep.subr.bf16.mxu1 %v3458_v54 }
 0x442   :  { %1010 = vmatprep.mubr.bf16.mxu0 %v3139_v0  ;;  %1053 = vmatprep.mubr.bf16.mxu1 %v3139_v0 }
 0x444   :  { %981 = vmatpush1.bf16.msra.mxu0 %v3463_v58  ;;  %1024 = vmatpush1.bf16.msra.mxu1 %v3466_v52 }
 0x445   :  { %982 = vmatprep.subr.bf16.mxu0 %v3469_v57  ;;  %1025 = vmatprep.subr.bf16.mxu1 %v3472_v60 }
 0x448   :  { %983 = vmatpush1.bf16.msra.mxu0 %v3475_v62  ;;  %1026 = vmatpush1.bf16.msra.mxu1 %v3478_v38 }
 0x449   :  { %984 = vmatprep.subr.bf16.mxu0 %v3481_v33  ;;  %1027 = vmatprep.subr.bf16.mxu1 %v3484_v49 }
 0x44c   :  { %985 = vmatpush1.bf16.msra.mxu0 %v3487_v61  ;;  %1028 = vmatpush1.bf16.msra.mxu1 %v3232_v18  ;;  %v3511_v18 = vld [vmem:[#allocation7 + $0x4] ss:$16 sps:$4 sm:$0xff]  }
 0x44d   :  { %986 = vmatprep.subr.bf16.mxu0 %v3491_v53  ;;  %1029 = vmatprep.subr.bf16.mxu1 %v3236_v19  ;;  %v3514_v19 = vld [vmem:[#allocation7 + $0xc] ss:$16 sps:$4 sm:$0xff]  }
 0x450   :  { %987 = vmatpush1.bf16.msra.mxu0 %v3495_v34  ;;  %1030 = vmatpush1.bf16.msra.mxu1 %v3242_v21  ;;  %v824_v21 = vld [vmem:[#allocation4 + $0x90] sm:$0xff] }
 0x451   :  { %988 = vmatprep.subr.bf16.mxu0 %v3239_v20  ;;  %1031 = vmatprep.subr.bf16.mxu1 %v3248_v23  ;;  %v822_v20 = vld [vmem:[#allocation4 + $0x80] sm:$0xff]  ;;  %v823_v23 = vld [vmem:[#allocation4 + $0x88] sm:$0xff] }
 0x452   :  { %v829_v2 = vunpack.c.h.bf16 %v823_v23 }
 0x454   :  { %989 = vmatpush1.bf16.msra.mxu0 %v3246_v22  ;;  %1032 = vmatpush1.bf16.msra.mxu1 %v3254_v25  ;;  %v826_v22 = vunpack.c.l.bf16 %v822_v20  ;;  %v830_v25 = vunpack.c.l.bf16 %v824_v21 }
 0x455   :  { %990 = vmatprep.subr.bf16.mxu0 %v3251_v24  ;;  %1033 = vmatprep.subr.bf16.mxu1 %v3260_v27  ;;  %v827_v24 = vunpack.c.h.bf16 %v822_v20 }
 0x458   :  { %991 = vmatpush1.bf16.msra.mxu0 %v3258_v26  ;;  %1034 = vmatpush1.bf16.msra.mxu1 %v3266_v29 }
 0x459   :  { %992 = vmatprep.subr.bf16.mxu0 %v3263_v28  ;;  %1035 = vmatprep.subr.bf16.mxu1 %v3272_v31  ;;  %v831_v28 = vunpack.c.h.bf16 %v824_v21 }
 0x45c   :  { %993 = vmatpush1.bf16.msra.mxu0 %v3270_v30  ;;  %1036 = vmatpush1.bf16.msra.mxu1 %v3276_v32  ;;  %v828_v30 = vunpack.c.l.bf16 %v823_v23 }
 0x45d   :  { %1122 = vmatprep.subr.bf16.mxu0 %v3511_v18  ;;  %1165 = vmatprep.subr.bf16.mxu1 %v3514_v19 }
 0x512   :  { %v868_v26 = vpop.f32.mrb[16].mxu0  ;;  %v911_v27 = vpop.f32.mrb[16].mxu1 }
 0x513   :  { %v920_v29 = vadd.f32 %v868_v26, %v826_v22  ;;  %v870_v31 = vpop.f32.mrb[17].mxu0  ;;  %v913_v32 = vpop.f32.mrb[17].mxu1  ;;  %v922_v51 = vadd.f32 %v911_v27, %v828_v30 }
 0x514   :  { %v921_v36 = vadd.f32 %v870_v31, %v827_v24  ;;  %v872_v37 = vpop.f32.mrb[18].mxu0  ;;  %v915_v40 = vpop.f32.mrb[18].mxu1  ;;  %v923_v7 = vadd.f32 %v913_v32, %v829_v2  ;;  %v3566_v2 = vld [vmem:[#allocation7 + $0xcc] ss:$16 sps:$4 sm:$0xff]  }
 0x515   :  { %v928_v43 = vmul.f32 0.5, %v920_v29  ;;  %v924_v44 = vadd.f32 %v872_v37, %v830_v25  ;;  %v874_v59 = vpop.f32.mrb[19].mxu0  ;;  %v917_v45 = vpop.f32.mrb[19].mxu1  ;;  %v926_v3 = vadd.f32 %v915_v40, %v832_v47  ;;  %v3551_v47 = vld [vmem:[#allocation7 + $0xa4] ss:$16 sps:$4 sm:$0xff]  }
 0x516   :  { %v936_v56 = vmul.f32 0.5, %v921_v36  ;;  %v925_v42 = vadd.f32 %v874_v59, %v831_v28  ;;  %v927_v8 = vadd.f32 %v917_v45, %v833_v5  ;;  %v946_v13 = vmul.f32 0.5, %v923_v7  ;;  %v3544_v45 = vld [vmem:[#allocation7 + $0x8c] ss:$16 sps:$4 sm:$0xff]   ;;  %v3572_v5 = vld [vmem:[#allocation7 + $0xc8] ss:$16 sps:$4 sm:$0xff]  }
 0x517   :  { %2744 = vtanh.f32 %v928_v43  ;;  %v929_v46 = vmul.f32 0.5, %v924_v44  ;;  %v3575_v7 = vld [vmem:[#allocation7 + $0xe4] ss:$16 sps:$4 sm:$0xff]  }
 0x518   :  { %2746 = vtanh.f32 %v936_v56  ;;  %v937_v48 = vmul.f32 0.5, %v925_v42  ;;  %v947_v14 = vmul.f32 0.5, %v927_v8  ;;  %v3548_v56 = vld [vmem:[#allocation7 + $0x88] ss:$16 sps:$4 sm:$0xff]   ;;  %v3554_v42 = vld [vmem:[#allocation7 + $0xac] ss:$16 sps:$4 sm:$0xff]  }
 0x519   :  { %2748 = vtanh.f32 %v929_v46  ;;  %v3560_v46 = vld [vmem:[#allocation7 + $0xa8] ss:$16 sps:$4 sm:$0xff]   ;;  %v3578_v8 = vld [vmem:[#allocation7 + $0xec] ss:$16 sps:$4 sm:$0xff]  }
 0x51a   :  { %2750 = vtanh.f32 %v922_v51  ;;  %v3557_v51 = vld [vmem:[#allocation7 + $0xa0] ss:$16 sps:$4 sm:$0xff]  }
 0x51b   :  { %2752 = vtanh.f32 %v937_v48  ;;  %v3563_v48 = vld [vmem:[#allocation7 + $0xc4] ss:$16 sps:$4 sm:$0xff]  }
 0x51c   :  { %2754 = vtanh.f32 %v926_v3  ;;  %v3569_v3 = vld [vmem:[#allocation7 + $0xc0] ss:$16 sps:$4 sm:$0xff]  }
 0x51d   :  { %2756 = vtanh.f32 %v946_v13  ;;  %v968_v13 = vld [vmem:[#allocation4 + $0xb0] sm:$0xff] }
 0x51e   :  { %2758 = vtanh.f32 %v947_v14  ;;  %v967_v14 = vld [vmem:[#allocation4 + $0xa8] sm:$0xff] }
 0x521   :  { %v2745_v9 = vpop.eup %2744 }
 0x522   :  { %v2747_v11 = vpop.eup %2746  ;;  %v932_v12 = vadd.f32 1.0, %v2745_v9  ;;  %v3581_v9 = vld [vmem:[#allocation7 + $0xe0] ss:$16 sps:$4 sm:$0xff]  }
 0x523   :  { %v940_v35 = vadd.f32 1.0, %v2747_v11  ;;  %v2749_v15 = vpop.eup %2748  ;;  %v3584_v11 = vld [vmem:[#allocation7 + $0xe8] ss:$16 sps:$4 sm:$0xff]  }
 0x524   :  { %v934_v16 = vmul.f32 0.5, %v932_v12  ;;  %v2751_v17 = vpop.eup %2750  ;;  %v933_v41 = vadd.f32 1.0, %v2749_v15  ;;  %v966_v12 = vld [vmem:[#allocation4 + $0xa0] sm:$0xff] }
 0x525   :  { %v942_v63 = vmul.f32 0.5, %v940_v35  ;;  %v2753_v1 = vpop.eup %2752  ;;  %v970_v35 = vunpack.c.l.bf16 %v966_v12  ;;  %v971_v15 = vunpack.c.h.bf16 %v966_v12 }
 0x526   :  { %v956_v20 = vmul.f32 %v2751_v17, %v934_v16  ;;  %v935_v22 = vmul.f32 0.5, %v933_v41  ;;  %v941_v23 = vadd.f32 1.0, %v2753_v1  ;;  %v2755_v24 = vpop.eup %2754  ;;  %v974_v16 = vunpack.c.l.bf16 %v968_v13 }
 0x527   :  { %v954_v21 = vmul.f32 %v942_v63, %v3442_v6  ;;  %v2757_v30 = vpop.eup %2756  ;;  %v975_v41 = vunpack.c.h.bf16 %v968_v13 }
 0x528   :  { %v943_v26 = vmul.f32 0.5, %v941_v23  ;;  %v957_v27 = vmul.f32 %v2755_v24, %v935_v22  ;;  %v2759_v31 = vpop.eup %2758  ;;  %v950_v32 = vadd.f32 1.0, %v2757_v30  ;;  %v969_v23 = vld [vmem:[#allocation4 + $0xb8] sm:$0xff] }
 0x529   :  { %v3518_v25 = vadd.f32 %v956_v20, %v954_v21  ;;  %v951_v6 = vadd.f32 1.0, %v2759_v31  ;;  %v972_v20 = vunpack.c.l.bf16 %v967_v14  ;;  %v977_v12 = vunpack.c.h.bf16 %v969_v23 }
 0x52a   :  { %v955_v28 = vmul.f32 %v943_v26, %v3446_v10  ;;  %v952_v36 = vmul.f32 0.5, %v950_v32  ;;  %v3540_v10 = vld [vmem:[#allocation7 + $0x68] ss:$16 sps:$4 sm:$0xff]  }
 0x52b   :  { %2760 = vtanh.f32 %v3518_v25  ;;  %v953_v37 = vmul.f32 0.5, %v951_v6 }
 0x52c   :  { %v3522_v29 = vadd.f32 %v957_v27, %v955_v28 }
 0x52e   :  { %2762 = vtanh.f32 %v3522_v29 }
 0x535   :  { %v2761_v55 = vpop.eup %2760 }
 0x536   :  { %v962_v43 = vmul.f32 %v2761_v55, %v952_v36  ;;  %v976_v55 = vunpack.c.l.bf16 %v969_v23 }
 0x538   :  { %v2763_v40 = vpop.eup %2762 }
 0x539   :  { %v963_v44 = vmul.f32 %v2763_v40, %v953_v37 }
 0x53b   :  { %v964_v59 = vpack.c.bf16 %v963_v44, %v962_v43  ;;  %v973_v44 = vunpack.c.h.bf16 %v967_v14 }
 0x53d   :  { %1011 = vmatmul.mubr.bf16.vlgmr.msra.gmra.mrb[20].mxu0 %v964_v59  ;;  %1054 = vmatmul.mubr.bf16.vlgmr.msra.gmra.mrb[20].mxu1 %v964_v59 }
 0x53e   :  { %1123 = vmatpush1.bf16.msra.mxu0 %v3449_v39  ;;  %1166 = vmatpush1.bf16.msra.mxu1 %v3452_v50 }
 0x53f   :  { %1124 = vmatprep.subr.bf16.mxu0 %v3455_v4  ;;  %1167 = vmatprep.subr.bf16.mxu1 %v3458_v54 }
 0x540   :  { %1154 = vmatprep.mubr.bf16.mxu0 %v3139_v0  ;;  %1197 = vmatprep.mubr.bf16.mxu1 %v3139_v0 }
 0x542   :  { %1125 = vmatpush1.bf16.msra.mxu0 %v3463_v58  ;;  %1168 = vmatpush1.bf16.msra.mxu1 %v3466_v52 }
 0x543   :  { %1126 = vmatprep.subr.bf16.mxu0 %v3469_v57  ;;  %1169 = vmatprep.subr.bf16.mxu1 %v3472_v60 }
 0x546   :  { %1127 = vmatpush1.bf16.msra.mxu0 %v3475_v62  ;;  %1170 = vmatpush1.bf16.msra.mxu1 %v3478_v38 }
 0x547   :  { %1128 = vmatprep.subr.bf16.mxu0 %v3481_v33  ;;  %1171 = vmatprep.subr.bf16.mxu1 %v3484_v49 }
 0x54a   :  { %1129 = vmatpush1.bf16.msra.mxu0 %v3487_v61  ;;  %1172 = vmatpush1.bf16.msra.mxu1 %v3540_v10 }
 0x54b   :  { %1130 = vmatprep.subr.bf16.mxu0 %v3491_v53  ;;  %1173 = vmatprep.subr.bf16.mxu1 %v3544_v45 }
 0x54e   :  { %1131 = vmatpush1.bf16.msra.mxu0 %v3495_v34  ;;  %1174 = vmatpush1.bf16.msra.mxu1 %v3548_v56 }
 0x54f   :  { %1132 = vmatprep.subr.bf16.mxu0 %v3551_v47  ;;  %1175 = vmatprep.subr.bf16.mxu1 %v3554_v42 }
 0x552   :  { %1133 = vmatpush1.bf16.msra.mxu0 %v3557_v51  ;;  %1176 = vmatpush1.bf16.msra.mxu1 %v3560_v46 }
 0x553   :  { %1134 = vmatprep.subr.bf16.mxu0 %v3563_v48  ;;  %1177 = vmatprep.subr.bf16.mxu1 %v3566_v2 }
 0x556   :  { %1135 = vmatpush1.bf16.msra.mxu0 %v3569_v3  ;;  %1178 = vmatpush1.bf16.msra.mxu1 %v3572_v5 }
 0x557   :  { %1136 = vmatprep.subr.bf16.mxu0 %v3575_v7  ;;  %1179 = vmatprep.subr.bf16.mxu1 %v3578_v8 }
 0x55a   :  { %1137 = vmatpush1.bf16.msra.mxu0 %v3581_v9  ;;  %1180 = vmatpush1.bf16.msra.mxu1 %v3584_v11 }
 0x55b   :  { %1266 = vmatprep.subr.bf16.mxu0 %v3511_v18  ;;  %1309 = vmatprep.subr.bf16.mxu1 %v3514_v19 }
 0x610   :  { %v1012_v17 = vpop.f32.mrb[20].mxu0  ;;  %v1055_v63 = vpop.f32.mrb[20].mxu1 }
 0x611   :  { %v1064_v1 = vadd.f32 %v1012_v17, %v970_v35  ;;  %v1014_v21 = vpop.f32.mrb[21].mxu0  ;;  %v1057_v22 = vpop.f32.mrb[21].mxu1  ;;  %v1066_v37 = vadd.f32 %v1055_v63, %v972_v20 }
 0x612   :  { %v1065_v24 = vadd.f32 %v1014_v21, %v971_v15  ;;  %v1016_v26 = vpop.f32.mrb[22].mxu0  ;;  %v1059_v27 = vpop.f32.mrb[22].mxu1  ;;  %v1067_v13 = vadd.f32 %v1057_v22, %v973_v44 }
 0x613   :  { %v1072_v28 = vmul.f32 0.5, %v1064_v1  ;;  %v1068_v30 = vadd.f32 %v1016_v26, %v974_v16  ;;  %v1018_v31 = vpop.f32.mrb[23].mxu0  ;;  %v1061_v32 = vpop.f32.mrb[23].mxu1  ;;  %v1070_v59 = vadd.f32 %v1059_v27, %v976_v55 }
 0x614   :  { %v1080_v6 = vmul.f32 0.5, %v1065_v24  ;;  %v1069_v36 = vadd.f32 %v1018_v31, %v975_v41  ;;  %v1071_v35 = vadd.f32 %v1061_v32, %v977_v12  ;;  %v1090_v1 = vmul.f32 0.5, %v1067_v13 }
 0x615   :  { %2764 = vtanh.f32 %v1072_v28  ;;  %v1073_v40 = vmul.f32 0.5, %v1068_v30 }
 0x616   :  { %2766 = vtanh.f32 %v1080_v6  ;;  %v1081_v43 = vmul.f32 0.5, %v1069_v36  ;;  %v1091_v41 = vmul.f32 0.5, %v1071_v35 }
 0x617   :  { %2768 = vtanh.f32 %v1073_v40 }
 0x618   :  { %2770 = vtanh.f32 %v1066_v37 }
 0x619   :  { %2772 = vtanh.f32 %v1081_v43 }
 0x61a   :  { %2774 = vtanh.f32 %v1070_v59 }
 0x61b   :  { %2776 = vtanh.f32 %v1090_v1  ;;  %v1112_v1 = vld [vmem:[#allocation4 + $0xd0] sm:$0xff] }
 0x61c   :  { %2778 = vtanh.f32 %v1091_v41  ;;  %v1111_v41 = vld [vmem:[#allocation4 + $0xc8] sm:$0xff] }
 0x61f   :  { %v2765_v15 = vpop.eup %2764 }
 0x620   :  { %v2767_v16 = vpop.eup %2766  ;;  %v1076_v17 = vadd.f32 1.0, %v2765_v15 }
 0x621   :  { %v1084_v21 = vadd.f32 1.0, %v2767_v16  ;;  %v2769_v24 = vpop.eup %2768 }
 0x622   :  { %v1078_v63 = vmul.f32 0.5, %v1076_v17  ;;  %v2771_v20 = vpop.eup %2770  ;;  %v1077_v28 = vadd.f32 1.0, %v2769_v24 }
 0x623   :  { %v1086_v26 = vmul.f32 0.5, %v1084_v21  ;;  %v2773_v14 = vpop.eup %2772 }
 0x624   :  { %v1100_v30 = vmul.f32 %v2771_v20, %v1078_v63  ;;  %v1079_v27 = vmul.f32 0.5, %v1077_v28  ;;  %v1085_v22 = vadd.f32 1.0, %v2773_v14  ;;  %v2775_v31 = vpop.eup %2774  ;;  %v1118_v63 = vunpack.c.l.bf16 %v1112_v1 }
 0x625   :  { %v1098_v23 = vmul.f32 %v1086_v26, %v3518_v25  ;;  %v2777_v40 = vpop.eup %2776  ;;  %v1119_v28 = vunpack.c.h.bf16 %v1112_v1 }
 0x626   :  { %v1087_v6 = vmul.f32 0.5, %v1085_v22  ;;  %v1101_v55 = vmul.f32 %v2775_v31, %v1079_v27  ;;  %v2779_v43 = vpop.eup %2778  ;;  %v1094_v44 = vadd.f32 1.0, %v2777_v40  ;;  %v1113_v22 = vld [vmem:[#allocation4 + $0xd8] sm:$0xff] }
 0x627   :  { %v3590_v32 = vadd.f32 %v1100_v30, %v1098_v23  ;;  %v1095_v25 = vadd.f32 1.0, %v2779_v43  ;;  %v1116_v30 = vunpack.c.l.bf16 %v1111_v41 }
 0x628   :  { %v1099_v36 = vmul.f32 %v1087_v6, %v3522_v29  ;;  %v1096_v12 = vmul.f32 0.5, %v1094_v44  ;;  %v1110_v29 = vld [vmem:[#allocation4 + $0xc0] sm:$0xff] }
 0x629   :  { %2780 = vtanh.f32 %v3590_v32  ;;  %v1097_v13 = vmul.f32 0.5, %v1095_v25  ;;  %v1114_v21 = vunpack.c.l.bf16 %v1110_v29  ;;  %v1115_v24 = vunpack.c.h.bf16 %v1110_v29 }
 0x62a   :  { %v3594_v37 = vadd.f32 %v1101_v55, %v1099_v36  ;;  %v1121_v29 = vunpack.c.h.bf16 %v1113_v22 }
 0x62c   :  { %2782 = vtanh.f32 %v3594_v37 }
 0x633   :  { %v2781_v59 = vpop.eup %2780 }
 0x634   :  { %v1106_v15 = vmul.f32 %v2781_v59, %v1096_v12  ;;  %v1120_v59 = vunpack.c.l.bf16 %v1113_v22 }
 0x636   :  { %v2783_v35 = vpop.eup %2782 }
 0x637   :  { %v1107_v16 = vmul.f32 %v2783_v35, %v1097_v13 }
 0x639   :  { %v1108_v17 = vpack.c.bf16 %v1107_v16, %v1106_v15  ;;  %v1117_v16 = vunpack.c.h.bf16 %v1111_v41 }
 0x63b   :  { %1155 = vmatmul.mubr.bf16.vlgmr.msra.gmra.mrb[24].mxu0 %v1108_v17  ;;  %1198 = vmatmul.mubr.bf16.vlgmr.msra.gmra.mrb[24].mxu1 %v1108_v17 }
 0x63c   :  { %1267 = vmatpush1.bf16.msra.mxu0 %v3449_v39  ;;  %1310 = vmatpush1.bf16.msra.mxu1 %v3452_v50 }
 0x63d   :  { %1268 = vmatprep.subr.bf16.mxu0 %v3455_v4  ;;  %1311 = vmatprep.subr.bf16.mxu1 %v3458_v54 }
 0x63e   :  { %1298 = vmatprep.mubr.bf16.mxu0 %v3139_v0  ;;  %1341 = vmatprep.mubr.bf16.mxu1 %v3139_v0 }
 0x640   :  { %1269 = vmatpush1.bf16.msra.mxu0 %v3463_v58  ;;  %1312 = vmatpush1.bf16.msra.mxu1 %v3466_v52 }
 0x641   :  { %1270 = vmatprep.subr.bf16.mxu0 %v3469_v57  ;;  %1313 = vmatprep.subr.bf16.mxu1 %v3472_v60 }
 0x644   :  { %1271 = vmatpush1.bf16.msra.mxu0 %v3475_v62  ;;  %1314 = vmatpush1.bf16.msra.mxu1 %v3478_v38 }
 0x645   :  { %1272 = vmatprep.subr.bf16.mxu0 %v3481_v33  ;;  %1315 = vmatprep.subr.bf16.mxu1 %v3484_v49 }
 0x648   :  { %1273 = vmatpush1.bf16.msra.mxu0 %v3487_v61  ;;  %1316 = vmatpush1.bf16.msra.mxu1 %v3540_v10 }
 0x649   :  { %1274 = vmatprep.subr.bf16.mxu0 %v3491_v53  ;;  %1317 = vmatprep.subr.bf16.mxu1 %v3544_v45 }
 0x64c   :  { %1275 = vmatpush1.bf16.msra.mxu0 %v3495_v34  ;;  %1318 = vmatpush1.bf16.msra.mxu1 %v3548_v56 }
 0x64d   :  { %1276 = vmatprep.subr.bf16.mxu0 %v3551_v47  ;;  %1319 = vmatprep.subr.bf16.mxu1 %v3554_v42 }
 0x650   :  { %1277 = vmatpush1.bf16.msra.mxu0 %v3557_v51  ;;  %1320 = vmatpush1.bf16.msra.mxu1 %v3560_v46 }
 0x651   :  { %1278 = vmatprep.subr.bf16.mxu0 %v3563_v48  ;;  %1321 = vmatprep.subr.bf16.mxu1 %v3566_v2 }
 0x654   :  { %1279 = vmatpush1.bf16.msra.mxu0 %v3569_v3  ;;  %1322 = vmatpush1.bf16.msra.mxu1 %v3572_v5 }
 0x655   :  { %1280 = vmatprep.subr.bf16.mxu0 %v3575_v7  ;;  %1323 = vmatprep.subr.bf16.mxu1 %v3578_v8 }
 0x658   :  { %1281 = vmatpush1.bf16.msra.mxu0 %v3581_v9  ;;  %1324 = vmatpush1.bf16.msra.mxu1 %v3584_v11 }
 0x659   :  { %1410 = vmatprep.subr.bf16.mxu0 %v3511_v18  ;;  %1453 = vmatprep.subr.bf16.mxu1 %v3514_v19 }
 0x70e   :  { %v1156_v20 = vpop.f32.mrb[24].mxu0  ;;  %v1199_v26 = vpop.f32.mrb[24].mxu1 }
 0x70f   :  { %v1208_v14 = vadd.f32 %v1156_v20, %v1114_v21  ;;  %v1158_v23 = vpop.f32.mrb[25].mxu0  ;;  %v1201_v27 = vpop.f32.mrb[25].mxu1  ;;  %v1210_v13 = vadd.f32 %v1199_v26, %v1116_v30 }
 0x710   :  { %v1209_v31 = vadd.f32 %v1158_v23, %v1115_v24  ;;  %v1160_v6 = vpop.f32.mrb[26].mxu0  ;;  %v1203_v55 = vpop.f32.mrb[26].mxu1  ;;  %v1211_v1 = vadd.f32 %v1201_v27, %v1117_v16 }
 0x711   :  { %v1216_v36 = vmul.f32 0.5, %v1208_v14  ;;  %v1212_v40 = vadd.f32 %v1160_v6, %v1118_v63  ;;  %v1162_v43 = vpop.f32.mrb[27].mxu0  ;;  %v1205_v44 = vpop.f32.mrb[27].mxu1  ;;  %v1214_v17 = vadd.f32 %v1203_v55, %v1120_v59 }
 0x712   :  { %v1224_v25 = vmul.f32 0.5, %v1209_v31  ;;  %v1213_v12 = vadd.f32 %v1162_v43, %v1119_v28  ;;  %v1215_v21 = vadd.f32 %v1205_v44, %v1121_v29  ;;  %v1234_v14 = vmul.f32 0.5, %v1211_v1 }
 0x713   :  { %2784 = vtanh.f32 %v1216_v36  ;;  %v1217_v35 = vmul.f32 0.5, %v1212_v40 }
 0x714   :  { %2786 = vtanh.f32 %v1224_v25  ;;  %v1225_v15 = vmul.f32 0.5, %v1213_v12  ;;  %v1235_v28 = vmul.f32 0.5, %v1215_v21 }
 0x715   :  { %2788 = vtanh.f32 %v1217_v35 }
 0x716   :  { %2790 = vtanh.f32 %v1210_v13 }
 0x717   :  { %2792 = vtanh.f32 %v1225_v15 }
 0x718   :  { %2794 = vtanh.f32 %v1214_v17 }
 0x719   :  { %2796 = vtanh.f32 %v1234_v14  ;;  %v1256_v14 = vld [vmem:[#allocation4 + $0xf0] sm:$0xff] }
 0x71a   :  { %2798 = vtanh.f32 %v1235_v28  ;;  %v1255_v28 = vld [vmem:[#allocation4 + $0xe8] sm:$0xff] }
 0x71d   :  { %v2785_v24 = vpop.eup %2784 }
 0x71e   :  { %v2787_v63 = vpop.eup %2786  ;;  %v1220_v20 = vadd.f32 1.0, %v2785_v24 }
 0x71f   :  { %v1228_v23 = vadd.f32 1.0, %v2787_v63  ;;  %v2789_v31 = vpop.eup %2788 }
 0x720   :  { %v1222_v26 = vmul.f32 0.5, %v1220_v20  ;;  %v2791_v30 = vpop.eup %2790  ;;  %v1221_v36 = vadd.f32 1.0, %v2789_v31 }
 0x721   :  { %v1230_v6 = vmul.f32 0.5, %v1228_v23  ;;  %v2793_v41 = vpop.eup %2792 }
 0x722   :  { %v1244_v40 = vmul.f32 %v2791_v30, %v1222_v26  ;;  %v1223_v55 = vmul.f32 0.5, %v1221_v36  ;;  %v1229_v27 = vadd.f32 1.0, %v2793_v41  ;;  %v2795_v43 = vpop.eup %2794  ;;  %v1262_v26 = vunpack.c.l.bf16 %v1256_v14 }
 0x723   :  { %v1242_v22 = vmul.f32 %v1230_v6, %v3590_v32  ;;  %v2797_v35 = vpop.eup %2796  ;;  %v1263_v36 = vunpack.c.h.bf16 %v1256_v14 }
 0x724   :  { %v1231_v25 = vmul.f32 0.5, %v1229_v27  ;;  %v1245_v59 = vmul.f32 %v2795_v43, %v1223_v55  ;;  %v2799_v15 = vpop.eup %2798  ;;  %v1238_v16 = vadd.f32 1.0, %v2797_v35  ;;  %v1257_v27 = vld [vmem:[#allocation4 + $0xf8] sm:$0xff] }
 0x725   :  { %v3632_v44 = vadd.f32 %v1244_v40, %v1242_v22  ;;  %v1239_v32 = vadd.f32 1.0, %v2799_v15  ;;  %v1260_v40 = vunpack.c.l.bf16 %v1255_v28 }
 0x726   :  { %v1243_v12 = vmul.f32 %v1231_v25, %v3594_v37  ;;  %v1240_v29 = vmul.f32 0.5, %v1238_v16  ;;  %v1254_v37 = vld [vmem:[#allocation4 + $0xe0] sm:$0xff] }
 0x727   :  { %2800 = vtanh.f32 %v3632_v44  ;;  %v1241_v1 = vmul.f32 0.5, %v1239_v32  ;;  %v1258_v23 = vunpack.c.l.bf16 %v1254_v37  ;;  %v1259_v31 = vunpack.c.h.bf16 %v1254_v37 }
 0x728   :  { %v3636_v13 = vadd.f32 %v1245_v59, %v1243_v12  ;;  %v1265_v37 = vunpack.c.h.bf16 %v1257_v27 }
 0x72a   :  { %2802 = vtanh.f32 %v3636_v13 }
 0x731   :  { %v2801_v17 = vpop.eup %2800 }
 0x732   :  { %v1250_v24 = vmul.f32 %v2801_v17, %v1240_v29  ;;  %v1264_v17 = vunpack.c.l.bf16 %v1257_v27 }
 0x734   :  { %v2803_v21 = vpop.eup %2802 }
 0x735   :  { %v1251_v63 = vmul.f32 %v2803_v21, %v1241_v1 }
 0x737   :  { %v1252_v20 = vpack.c.bf16 %v1251_v63, %v1250_v24  ;;  %v1261_v63 = vunpack.c.h.bf16 %v1255_v28 }
 0x739   :  { %1299 = vmatmul.mubr.bf16.vlgmr.msra.gmra.mrb[28].mxu0 %v1252_v20  ;;  %1342 = vmatmul.mubr.bf16.vlgmr.msra.gmra.mrb[28].mxu1 %v1252_v20 }
 0x73a   :  { %1411 = vmatpush1.bf16.msra.mxu0 %v3449_v39  ;;  %1454 = vmatpush1.bf16.msra.mxu1 %v3452_v50 }
 0x73b   :  { %1412 = vmatprep.subr.bf16.mxu0 %v3455_v4  ;;  %1455 = vmatprep.subr.bf16.mxu1 %v3458_v54 }
 0x73c   :  { %1442 = vmatprep.mubr.bf16.mxu0 %v3139_v0  ;;  %1485 = vmatprep.mubr.bf16.mxu1 %v3139_v0 }
 0x73e   :  { %1413 = vmatpush1.bf16.msra.mxu0 %v3463_v58  ;;  %1456 = vmatpush1.bf16.msra.mxu1 %v3466_v52 }
 0x73f   :  { %1414 = vmatprep.subr.bf16.mxu0 %v3469_v57  ;;  %1457 = vmatprep.subr.bf16.mxu1 %v3472_v60 }
 0x742   :  { %1415 = vmatpush1.bf16.msra.mxu0 %v3475_v62  ;;  %1458 = vmatpush1.bf16.msra.mxu1 %v3478_v38 }
 0x743   :  { %1416 = vmatprep.subr.bf16.mxu0 %v3481_v33  ;;  %1459 = vmatprep.subr.bf16.mxu1 %v3484_v49 }
 0x746   :  { %1417 = vmatpush1.bf16.msra.mxu0 %v3487_v61  ;;  %1460 = vmatpush1.bf16.msra.mxu1 %v3540_v10 }
 0x747   :  { %1418 = vmatprep.subr.bf16.mxu0 %v3491_v53  ;;  %1461 = vmatprep.subr.bf16.mxu1 %v3544_v45 }
 0x74a   :  { %1419 = vmatpush1.bf16.msra.mxu0 %v3495_v34  ;;  %1462 = vmatpush1.bf16.msra.mxu1 %v3548_v56 }
 0x74b   :  { %1420 = vmatprep.subr.bf16.mxu0 %v3551_v47  ;;  %1463 = vmatprep.subr.bf16.mxu1 %v3554_v42 }
 0x74e   :  { %1421 = vmatpush1.bf16.msra.mxu0 %v3557_v51  ;;  %1464 = vmatpush1.bf16.msra.mxu1 %v3560_v46 }
 0x74f   :  { %1422 = vmatprep.subr.bf16.mxu0 %v3563_v48  ;;  %1465 = vmatprep.subr.bf16.mxu1 %v3566_v2 }
 0x752   :  { %1423 = vmatpush1.bf16.msra.mxu0 %v3569_v3  ;;  %1466 = vmatpush1.bf16.msra.mxu1 %v3572_v5 }
 0x753   :  { %1424 = vmatprep.subr.bf16.mxu0 %v3575_v7  ;;  %1467 = vmatprep.subr.bf16.mxu1 %v3578_v8 }
 0x756   :  { %1425 = vmatpush1.bf16.msra.mxu0 %v3581_v9  ;;  %1468 = vmatpush1.bf16.msra.mxu1 %v3584_v11 }
 0x757   :  { %1554 = vmatprep.subr.bf16.mxu0 %v3511_v18  ;;  %1597 = vmatprep.subr.bf16.mxu1 %v3514_v19 }
 0x80c   :  { %v1300_v30 = vpop.f32.mrb[28].mxu0  ;;  %v1343_v6 = vpop.f32.mrb[28].mxu1 }
 0x80d   :  { %v1352_v41 = vadd.f32 %v1300_v30, %v1258_v23  ;;  %v1302_v22 = vpop.f32.mrb[29].mxu0  ;;  %v1345_v55 = vpop.f32.mrb[29].mxu1  ;;  %v1354_v1 = vadd.f32 %v1343_v6, %v1260_v40 }
 0x80e   :  { %v1353_v43 = vadd.f32 %v1302_v22, %v1259_v31  ;;  %v1304_v25 = vpop.f32.mrb[30].mxu0  ;;  %v1347_v59 = vpop.f32.mrb[30].mxu1  ;;  %v1355_v14 = vadd.f32 %v1345_v55, %v1261_v63 }
 0x80f   :  { %v1360_v12 = vmul.f32 0.5, %v1352_v41  ;;  %v1356_v35 = vadd.f32 %v1304_v25, %v1262_v26  ;;  %v1306_v15 = vpop.f32.mrb[31].mxu0  ;;  %v1349_v16 = vpop.f32.mrb[31].mxu1  ;;  %v1358_v20 = vadd.f32 %v1347_v59, %v1264_v17 }
 0x810   :  { %v1368_v32 = vmul.f32 0.5, %v1353_v43  ;;  %v1357_v29 = vadd.f32 %v1306_v15, %v1263_v36  ;;  %v1359_v23 = vadd.f32 %v1349_v16, %v1265_v37  ;;  %v1378_v41 = vmul.f32 0.5, %v1355_v14 }
 0x811   :  { %2804 = vtanh.f32 %v1360_v12  ;;  %v1361_v21 = vmul.f32 0.5, %v1356_v35 }
 0x812   :  { %2806 = vtanh.f32 %v1368_v32  ;;  %v1369_v24 = vmul.f32 0.5, %v1357_v29  ;;  %v1379_v36 = vmul.f32 0.5, %v1359_v23 }
 0x813   :  { %2808 = vtanh.f32 %v1361_v21 }
 0x814   :  { %2810 = vtanh.f32 %v1354_v1 }
 0x815   :  { %2812 = vtanh.f32 %v1369_v24 }
 0x816   :  { %2814 = vtanh.f32 %v1358_v20 }
 0x817   :  { %2816 = vtanh.f32 %v1378_v41 }
 0x818   :  { %2818 = vtanh.f32 %v1379_v36 }
 0x81b   :  { %v2805_v31 = vpop.eup %2804 }
 0x81c   :  { %v2807_v26 = vpop.eup %2806  ;;  %v1364_v30 = vadd.f32 1.0, %v2805_v31 }
 0x81d   :  { %v1372_v22 = vadd.f32 1.0, %v2807_v26  ;;  %v2809_v43 = vpop.eup %2808 }
 0x81e   :  { %v1366_v6 = vmul.f32 0.5, %v1364_v30  ;;  %v2811_v40 = vpop.eup %2810  ;;  %v1365_v12 = vadd.f32 1.0, %v2809_v43 }
 0x81f   :  { %v1374_v25 = vmul.f32 0.5, %v1372_v22  ;;  %v2813_v28 = vpop.eup %2812 }
 0x820   :  { %v1388_v35 = vmul.f32 %v2811_v40, %v1366_v6  ;;  %v1367_v59 = vmul.f32 0.5, %v1365_v12  ;;  %v1373_v55 = vadd.f32 1.0, %v2813_v28  ;;  %v2815_v15 = vpop.eup %2814 }
 0x821   :  { %v1386_v27 = vmul.f32 %v1374_v25, %v3632_v44  ;;  %v2817_v21 = vpop.eup %2816 }
 0x822   :  { %v1375_v32 = vmul.f32 0.5, %v1373_v55  ;;  %v1389_v17 = vmul.f32 %v2815_v15, %v1367_v59  ;;  %v2819_v24 = vpop.eup %2818  ;;  %v1382_v63 = vadd.f32 1.0, %v2817_v21 }
 0x823   :  { %v3674_v16 = vadd.f32 %v1388_v35, %v1386_v27  ;;  %v1383_v44 = vadd.f32 1.0, %v2819_v24 }
 0x824   :  { %v1387_v29 = vmul.f32 %v1375_v32, %v3636_v13  ;;  %v1384_v37 = vmul.f32 0.5, %v1382_v63 }
 0x825   :  { %2820 = vtanh.f32 %v3674_v16  ;;  %v1385_v14 = vmul.f32 0.5, %v1383_v44 }
 0x826   :  { %v3678_v1 = vadd.f32 %v1389_v17, %v1387_v29 }
 0x828   :  { %2822 = vtanh.f32 %v3678_v1 }
 0x82f   :  { %v2821_v20 = vpop.eup %2820 }
 0x830   :  { %v1394_v31 = vmul.f32 %v2821_v20, %v1384_v37 }
 0x832   :  { %v2823_v23 = vpop.eup %2822 }
 0x833   :  { %v1395_v26 = vmul.f32 %v2823_v23, %v1385_v14 }
 0x835   :  { %v1396_v30 = vpack.c.bf16 %v1395_v26, %v1394_v31 }
 0x837   :  { %1443 = vmatmul.mubr.bf16.vlgmr.msra.gmra.mrb[32].mxu0 %v1396_v30  ;;  %1486 = vmatmul.mubr.bf16.vlgmr.msra.gmra.mrb[32].mxu1 %v1396_v30 }
 0x838   :  { %1555 = vmatpush1.bf16.msra.mxu0 %v3449_v39  ;;  %1598 = vmatpush1.bf16.msra.mxu1 %v3452_v50  ;;  %v1398_v39 = vld [vmem:[#allocation4 + $0x100] sm:$0xff]  ;;  %v1400_v50 = vld [vmem:[#allocation4 + $0x110] sm:$0xff] }
 0x839   :  { %1556 = vmatprep.subr.bf16.mxu0 %v3455_v4  ;;  %1599 = vmatprep.subr.bf16.mxu1 %v3458_v54  ;;  %v1402_v4 = vunpack.c.l.bf16 %v1398_v39  ;;  %v1399_v54 = vld [vmem:[#allocation4 + $0x108] sm:$0xff] }
 0x83a   :  { %1586 = vmatprep.mubr.bf16.mxu0 %v3139_v0  ;;  %1629 = vmatprep.mubr.bf16.mxu1 %v3139_v0  ;;  %v1405_v35 = vunpack.c.h.bf16 %v1399_v54 }
 0x83c   :  { %1557 = vmatpush1.bf16.msra.mxu0 %v3463_v58  ;;  %1600 = vmatpush1.bf16.msra.mxu1 %v3466_v52  ;;  %v1403_v58 = vunpack.c.h.bf16 %v1398_v39  ;;  %v1406_v52 = vunpack.c.l.bf16 %v1400_v50 }
 0x83d   :  { %1558 = vmatprep.subr.bf16.mxu0 %v3469_v57  ;;  %1601 = vmatprep.subr.bf16.mxu1 %v3472_v60 }
 0x840   :  { %1559 = vmatpush1.bf16.msra.mxu0 %v3475_v62  ;;  %1602 = vmatpush1.bf16.msra.mxu1 %v3478_v38  ;;  %v1407_v62 = vunpack.c.h.bf16 %v1400_v50 }
 0x841   :  { %1560 = vmatprep.subr.bf16.mxu0 %v3481_v33  ;;  %1603 = vmatprep.subr.bf16.mxu1 %v3484_v49  ;;  %v1404_v33 = vunpack.c.l.bf16 %v1399_v54 }
 0x844   :  { %1561 = vmatpush1.bf16.msra.mxu0 %v3487_v61  ;;  %1604 = vmatpush1.bf16.msra.mxu1 %v3540_v10 }
 0x845   :  { %1562 = vmatprep.subr.bf16.mxu0 %v3491_v53  ;;  %1605 = vmatprep.subr.bf16.mxu1 %v3544_v45  ;;  %v1401_v53 = vld [vmem:[#allocation4 + $0x118] sm:$0xff] }
 0x846   :  { %v1408_v6 = vunpack.c.l.bf16 %v1401_v53  ;;  %v1409_v59 = vunpack.c.h.bf16 %v1401_v53 }
 0x848   :  { %1563 = vmatpush1.bf16.msra.mxu0 %v3495_v34  ;;  %1606 = vmatpush1.bf16.msra.mxu1 %v3548_v56 }
 0x849   :  { %1564 = vmatprep.subr.bf16.mxu0 %v3551_v47  ;;  %1607 = vmatprep.subr.bf16.mxu1 %v3554_v42 }
 0x84c   :  { %1565 = vmatpush1.bf16.msra.mxu0 %v3557_v51  ;;  %1608 = vmatpush1.bf16.msra.mxu1 %v3560_v46 }
 0x84d   :  { %1566 = vmatprep.subr.bf16.mxu0 %v3563_v48  ;;  %1609 = vmatprep.subr.bf16.mxu1 %v3566_v2 }
 0x850   :  { %1567 = vmatpush1.bf16.msra.mxu0 %v3569_v3  ;;  %1610 = vmatpush1.bf16.msra.mxu1 %v3572_v5 }
 0x851   :  { %1568 = vmatprep.subr.bf16.mxu0 %v3575_v7  ;;  %1611 = vmatprep.subr.bf16.mxu1 %v3578_v8 }
 0x854   :  { %1569 = vmatpush1.bf16.msra.mxu0 %v3581_v9  ;;  %1612 = vmatpush1.bf16.msra.mxu1 %v3584_v11 }
 0x855   :  { %1698 = vmatprep.subr.bf16.mxu0 %v3511_v18  ;;  %1741 = vmatprep.subr.bf16.mxu1 %v3514_v19 }
 0x90a   :  { %v1444_v57 = vpop.f32.mrb[32].mxu0  ;;  %v1487_v60 = vpop.f32.mrb[32].mxu1 }
 0x90b   :  { %v1496_v38 = vadd.f32 %v1444_v57, %v1402_v4  ;;  %v1446_v49 = vpop.f32.mrb[33].mxu0  ;;  %v1489_v61 = vpop.f32.mrb[33].mxu1  ;;  %v1498_v25 = vadd.f32 %v1487_v60, %v1404_v33 }
 0x90c   :  { %v1497_v34 = vadd.f32 %v1446_v49, %v1403_v58  ;;  %v1448_v13 = vpop.f32.mrb[34].mxu0  ;;  %v1491_v41 = vpop.f32.mrb[34].mxu1  ;;  %v1499_v55 = vadd.f32 %v1489_v61, %v1405_v35  ;;  %v3755_v35 = vld [vmem:[#allocation7 + $0x64] ss:$16 sps:$4 sm:$0xff]  }
 0x90d   :  { %v1504_v18 = vmul.f32 0.5, %v1496_v38  ;;  %v1500_v22 = vadd.f32 %v1448_v13, %v1406_v52  ;;  %v1450_v19 = vpop.f32.mrb[35].mxu0  ;;  %v1493_v36 = vpop.f32.mrb[35].mxu1  ;;  %v1502_v27 = vadd.f32 %v1491_v41, %v1408_v6  ;;  %v3740_v6 = vld [vmem:[#allocation7 + $0x28] ss:$16 sps:$4 sm:$0xff]  }
 0x90e   :  { %v1512_v43 = vmul.f32 0.5, %v1497_v34  ;;  %v1501_v40 = vadd.f32 %v1450_v19, %v1407_v62  ;;  %v1503_v15 = vadd.f32 %v1493_v36, %v1409_v59  ;;  %v1522_v21 = vmul.f32 0.5, %v1499_v55  ;;  %v3729_v19 = vld [vmem:[#allocation7 + $0x24] ss:$16 sps:$4 sm:$0xff]   ;;  %v3732_v36 = vld [vmem:[#allocation7 + $0x2c] ss:$16 sps:$4 sm:$0xff]  }
 0x90f   :  { %2824 = vtanh.f32 %v1504_v18  ;;  %v1505_v12 = vmul.f32 0.5, %v1500_v22  ;;  %v3726_v22 = vld [vmem:[#allocation7 + $0x8] ss:$16 sps:$4 sm:$0xff]   ;;  %v3761_v59 = vld [vmem:[#allocation7 + $0x60] ss:$16 sps:$4 sm:$0xff]  }
 0x910   :  { %2826 = vtanh.f32 %v1512_v43  ;;  %v1513_v28 = vmul.f32 0.5, %v1501_v40  ;;  %v1523_v63 = vmul.f32 0.5, %v1503_v15  ;;  %v3737_v43 = vld [vmem:[#allocation7 + $0x20] ss:$16 sps:$4 sm:$0xff]   ;;  %v3743_v40 = vld [vmem:[#allocation7 + $0x44] ss:$16 sps:$4 sm:$0xff]  }
 0x911   :  { %2828 = vtanh.f32 %v1505_v12  ;;  %v3749_v12 = vld [vmem:[#allocation7 + $0x40] ss:$16 sps:$4 sm:$0xff]   ;;  %v3765_v55 = vld [vmem:[#allocation7 + $0x84] ss:$16 sps:$4 sm:$0xff]  }
 0x912   :  { %2830 = vtanh.f32 %v1498_v25  ;;  %v3746_v25 = vld [vmem:[#allocation7 + $0x4c] ss:$16 sps:$4 sm:$0xff]   ;;  %v3769_v15 = vld [vmem:[#allocation7 + $0x80] ss:$16 sps:$4 sm:$0xff]  }
 0x913   :  { %2832 = vtanh.f32 %v1513_v28  ;;  %v3752_v28 = vld [vmem:[#allocation7 + $0x48] ss:$16 sps:$4 sm:$0xff]  }
 0x914   :  { %2834 = vtanh.f32 %v1502_v27  ;;  %v3758_v27 = vld [vmem:[#allocation7 + $0x6c] ss:$16 sps:$4 sm:$0xff]  }
 0x915   :  { %2836 = vtanh.f32 %v1522_v21 }
 0x916   :  { %2838 = vtanh.f32 %v1523_v63 }
 0x919   :  { %v2825_v32 = vpop.eup %2824 }
 0x91a   :  { %v2827_v17 = vpop.eup %2826  ;;  %v1508_v29 = vadd.f32 1.0, %v2825_v32  ;;  %v1545_v32 = vld [vmem:[#allocation4 + $0x138] sm:$0xff] }
 0x91b   :  { %v1516_v24 = vadd.f32 1.0, %v2827_v17  ;;  %v2829_v44 = vpop.eup %2828 }
 0x91c   :  { %v1510_v20 = vmul.f32 0.5, %v1508_v29  ;;  %v2831_v37 = vpop.eup %2830  ;;  %v1509_v23 = vadd.f32 1.0, %v2829_v44 }
 0x91d   :  { %v1518_v14 = vmul.f32 0.5, %v1516_v24  ;;  %v2833_v31 = vpop.eup %2832 }
 0x91e   :  { %v1532_v26 = vmul.f32 %v2831_v37, %v1510_v20  ;;  %v1511_v39 = vmul.f32 0.5, %v1509_v23  ;;  %v1517_v50 = vadd.f32 1.0, %v2833_v31  ;;  %v2835_v4 = vpop.eup %2834 }
 0x91f   :  { %v1530_v30 = vmul.f32 %v1518_v14, %v3674_v16  ;;  %v2837_v62 = vpop.eup %2836  ;;  %v1552_v14 = vunpack.c.l.bf16 %v1545_v32 }
 0x920   :  { %v1519_v58 = vmul.f32 0.5, %v1517_v50  ;;  %v1533_v52 = vmul.f32 %v2835_v4, %v1511_v39  ;;  %v2839_v38 = vpop.eup %2838  ;;  %v1526_v33 = vadd.f32 1.0, %v2837_v62  ;;  %v1553_v4 = vunpack.c.h.bf16 %v1545_v32 }
 0x921   :  { %v3716_v54 = vadd.f32 %v1532_v26, %v1530_v30  ;;  %v1527_v16 = vadd.f32 1.0, %v2839_v38 }
 0x922   :  { %v1531_v57 = vmul.f32 %v1519_v58, %v3678_v1  ;;  %v1528_v61 = vmul.f32 0.5, %v1526_v33  ;;  %v3723_v1 = vld [vmem:[#allocation7] ss:$16 sps:$4 sm:$0xff]  }
 0x923   :  { %2840 = vtanh.f32 %v3716_v54  ;;  %v1529_v53 = vmul.f32 0.5, %v1527_v16 }
 0x924   :  { %v3720_v60 = vadd.f32 %v1533_v52, %v1531_v57 }
 0x926   :  { %2842 = vtanh.f32 %v3720_v60 }
 0x92d   :  { %v2841_v49 = vpop.eup %2840 }
 0x92e   :  { %v1538_v13 = vmul.f32 %v2841_v49, %v1528_v61 }
 0x930   :  { %v2843_v34 = vpop.eup %2842 }
 0x931   :  { %v1539_v41 = vmul.f32 %v2843_v34, %v1529_v53 }
 0x933   :  { %v1540_v18 = vpack.c.bf16 %v1539_v41, %v1538_v13 }
 0x935   :  { %1587 = vmatmul.mubr.bf16.vlgmr.msra.gmra.mrb[36].mxu0 %v1540_v18  ;;  %1630 = vmatmul.mubr.bf16.vlgmr.msra.gmra.mrb[36].mxu1 %v1540_v18 }
 0x936   :  { %1699 = vmatpush1.bf16.msra.mxu0 %v3723_v1  ;;  %1742 = vmatpush1.bf16.msra.mxu1 %v3726_v22 }
 0x937   :  { %1700 = vmatprep.subr.bf16.mxu0 %v3729_v19  ;;  %1743 = vmatprep.subr.bf16.mxu1 %v3732_v36 }
 0x938   :  { %1730 = vmatprep.mubr.bf16.mxu0 %v3139_v0  ;;  %1773 = vmatprep.mubr.bf16.mxu1 %v3139_v0 }
 0x93a   :  { %1701 = vmatpush1.bf16.msra.mxu0 %v3737_v43  ;;  %1744 = vmatpush1.bf16.msra.mxu1 %v3740_v6 }
 0x93b   :  { %1702 = vmatprep.subr.bf16.mxu0 %v3743_v40  ;;  %1745 = vmatprep.subr.bf16.mxu1 %v3746_v25 }
 0x93e   :  { %1703 = vmatpush1.bf16.msra.mxu0 %v3749_v12  ;;  %1746 = vmatpush1.bf16.msra.mxu1 %v3752_v28 }
 0x93f   :  { %1704 = vmatprep.subr.bf16.mxu0 %v3755_v35  ;;  %1747 = vmatprep.subr.bf16.mxu1 %v3758_v27 }
 0x942   :  { %1705 = vmatpush1.bf16.msra.mxu0 %v3761_v59  ;;  %1748 = vmatpush1.bf16.msra.mxu1 %v3540_v10  ;;  %v3785_v10 = vld [vmem:[#allocation7 + $0x4] ss:$16 sps:$4 sm:$0xff]  }
 0x943   :  { %1706 = vmatprep.subr.bf16.mxu0 %v3765_v55  ;;  %1749 = vmatprep.subr.bf16.mxu1 %v3544_v45  ;;  %v3788_v45 = vld [vmem:[#allocation7 + $0xc] ss:$16 sps:$4 sm:$0xff]  }
 0x946   :  { %1707 = vmatpush1.bf16.msra.mxu0 %v3769_v15  ;;  %1750 = vmatpush1.bf16.msra.mxu1 %v3548_v56  ;;  %v1542_v56 = vld [vmem:[#allocation4 + $0x120] sm:$0xff] }
 0x947   :  { %1708 = vmatprep.subr.bf16.mxu0 %v3551_v47  ;;  %1751 = vmatprep.subr.bf16.mxu1 %v3554_v42  ;;  %v1544_v47 = vld [vmem:[#allocation4 + $0x130] sm:$0xff]  ;;  %v1546_v42 = vunpack.c.l.bf16 %v1542_v56 }
 0x94a   :  { %1709 = vmatpush1.bf16.msra.mxu0 %v3557_v51  ;;  %1752 = vmatpush1.bf16.msra.mxu1 %v3560_v46  ;;  %v1543_v51 = vld [vmem:[#allocation4 + $0x128] sm:$0xff]  ;;  %v1547_v46 = vunpack.c.h.bf16 %v1542_v56 }
 0x94b   :  { %1710 = vmatprep.subr.bf16.mxu0 %v3563_v48  ;;  %1753 = vmatprep.subr.bf16.mxu1 %v3566_v2  ;;  %v1550_v48 = vunpack.c.l.bf16 %v1544_v47  ;;  %v1549_v39 = vunpack.c.h.bf16 %v1543_v51 }
 0x94e   :  { %1711 = vmatpush1.bf16.msra.mxu0 %v3569_v3  ;;  %1754 = vmatpush1.bf16.msra.mxu1 %v3572_v5  ;;  %v1551_v5 = vunpack.c.h.bf16 %v1544_v47 }
 0x94f   :  { %1712 = vmatprep.subr.bf16.mxu0 %v3575_v7  ;;  %1755 = vmatprep.subr.bf16.mxu1 %v3578_v8  ;;  %v1548_v8 = vunpack.c.l.bf16 %v1543_v51 }
 0x952   :  { %1713 = vmatpush1.bf16.msra.mxu0 %v3581_v9  ;;  %1756 = vmatpush1.bf16.msra.mxu1 %v3584_v11 }
 0x953   :  { %1842 = vmatprep.subr.bf16.mxu0 %v3785_v10  ;;  %1885 = vmatprep.subr.bf16.mxu1 %v3788_v45 }
 0xa08   :  { %v1588_v2 = vpop.f32.mrb[36].mxu0  ;;  %v1631_v3 = vpop.f32.mrb[36].mxu1 }
 0xa09   :  { %v1640_v7 = vadd.f32 %v1588_v2, %v1546_v42  ;;  %v1590_v9 = vpop.f32.mrb[37].mxu0  ;;  %v1633_v11 = vpop.f32.mrb[37].mxu1  ;;  %v1642_v31 = vadd.f32 %v1631_v3, %v1548_v8 }
 0xa0a   :  { %v1641_v17 = vadd.f32 %v1590_v9, %v1547_v46  ;;  %v1592_v29 = vpop.f32.mrb[38].mxu0  ;;  %v1635_v21 = vpop.f32.mrb[38].mxu1  ;;  %v1643_v58 = vadd.f32 %v1633_v11, %v1549_v39  ;;  %v3840_v39 = vld [vmem:[#allocation7 + $0xcc] ss:$16 sps:$4 sm:$0xff]  }
 0xa0b   :  { %v1648_v24 = vmul.f32 0.5, %v1640_v7  ;;  %v1644_v63 = vadd.f32 %v1592_v29, %v1550_v48  ;;  %v1594_v44 = vpop.f32.mrb[39].mxu0  ;;  %v1637_v20 = vpop.f32.mrb[39].mxu1  ;;  %v1646_v50 = vadd.f32 %v1635_v21, %v1552_v14  ;;  %v3825_v14 = vld [vmem:[#allocation7 + $0xa4] ss:$16 sps:$4 sm:$0xff]  }
 0xa0c   :  { %v1656_v37 = vmul.f32 0.5, %v1641_v17  ;;  %v1645_v23 = vadd.f32 %v1594_v44, %v1551_v5  ;;  %v1647_v52 = vadd.f32 %v1637_v20, %v1553_v4  ;;  %v1666_v33 = vmul.f32 0.5, %v1643_v58  ;;  %v3818_v20 = vld [vmem:[#allocation7 + $0x8c] ss:$16 sps:$4 sm:$0xff]   ;;  %v3846_v4 = vld [vmem:[#allocation7 + $0xc8] ss:$16 sps:$4 sm:$0xff]  }
 0xa0d   :  { %2844 = vtanh.f32 %v1648_v24  ;;  %v1649_v26 = vmul.f32 0.5, %v1644_v63  ;;  %v3849_v58 = vld [vmem:[#allocation7 + $0xe4] ss:$16 sps:$4 sm:$0xff]  }
 0xa0e   :  { %2846 = vtanh.f32 %v1656_v37  ;;  %v1657_v30 = vmul.f32 0.5, %v1645_v23  ;;  %v1667_v49 = vmul.f32 0.5, %v1647_v52  ;;  %v3822_v37 = vld [vmem:[#allocation7 + $0x88] ss:$16 sps:$4 sm:$0xff]   ;;  %v3828_v23 = vld [vmem:[#allocation7 + $0xac] ss:$16 sps:$4 sm:$0xff]  }
 0xa0f   :  { %2848 = vtanh.f32 %v1649_v26  ;;  %v3834_v26 = vld [vmem:[#allocation7 + $0xa8] ss:$16 sps:$4 sm:$0xff]   ;;  %v3852_v52 = vld [vmem:[#allocation7 + $0xec] ss:$16 sps:$4 sm:$0xff]  }
 0xa10   :  { %2850 = vtanh.f32 %v1642_v31  ;;  %v3831_v31 = vld [vmem:[#allocation7 + $0xa0] ss:$16 sps:$4 sm:$0xff]  }
 0xa11   :  { %2852 = vtanh.f32 %v1657_v30  ;;  %v3837_v30 = vld [vmem:[#allocation7 + $0xc4] ss:$16 sps:$4 sm:$0xff]  }
 0xa12   :  { %2854 = vtanh.f32 %v1646_v50  ;;  %v3843_v50 = vld [vmem:[#allocation7 + $0xc0] ss:$16 sps:$4 sm:$0xff]  }
 0xa13   :  { %2856 = vtanh.f32 %v1666_v33  ;;  %v1688_v33 = vld [vmem:[#allocation4 + $0x150] sm:$0xff] }
 0xa14   :  { %2858 = vtanh.f32 %v1667_v49  ;;  %v1687_v49 = vld [vmem:[#allocation4 + $0x148] sm:$0xff] }
 0xa17   :  { %v2845_v57 = vpop.eup %2844 }
 0xa18   :  { %v2847_v62 = vpop.eup %2846  ;;  %v1652_v38 = vadd.f32 1.0, %v2845_v57  ;;  %v3855_v57 = vld [vmem:[#allocation7 + $0xe0] ss:$16 sps:$4 sm:$0xff]  }
 0xa19   :  { %v1660_v16 = vadd.f32 1.0, %v2847_v62  ;;  %v2849_v61 = vpop.eup %2848  ;;  %v3858_v62 = vld [vmem:[#allocation7 + $0xe8] ss:$16 sps:$4 sm:$0xff]  }
 0xa1a   :  { %v1654_v53 = vmul.f32 0.5, %v1652_v38  ;;  %v2851_v34 = vpop.eup %2850  ;;  %v1653_v41 = vadd.f32 1.0, %v2849_v61  ;;  %v1686_v38 = vld [vmem:[#allocation4 + $0x140] sm:$0xff] }
 0xa1b   :  { %v1662_v13 = vmul.f32 0.5, %v1660_v16  ;;  %v2853_v18 = vpop.eup %2852  ;;  %v1690_v16 = vunpack.c.l.bf16 %v1686_v38  ;;  %v1691_v61 = vunpack.c.h.bf16 %v1686_v38 }
 0xa1c   :  { %v1676_v56 = vmul.f32 %v2851_v34, %v1654_v53  ;;  %v1655_v42 = vmul.f32 0.5, %v1653_v41  ;;  %v1661_v51 = vadd.f32 1.0, %v2853_v18  ;;  %v2855_v46 = vpop.eup %2854  ;;  %v1694_v53 = vunpack.c.l.bf16 %v1688_v33 }
 0xa1d   :  { %v1674_v47 = vmul.f32 %v1662_v13, %v3716_v54  ;;  %v2857_v8 = vpop.eup %2856  ;;  %v1695_v41 = vunpack.c.h.bf16 %v1688_v33 }
 0xa1e   :  { %v1663_v2 = vmul.f32 0.5, %v1661_v51  ;;  %v1677_v3 = vmul.f32 %v2855_v46, %v1655_v42  ;;  %v2859_v9 = vpop.eup %2858  ;;  %v1670_v11 = vadd.f32 1.0, %v2857_v8  ;;  %v1689_v51 = vld [vmem:[#allocation4 + $0x158] sm:$0xff] }
 0xa1f   :  { %v3792_v48 = vadd.f32 %v1676_v56, %v1674_v47  ;;  %v1671_v54 = vadd.f32 1.0, %v2859_v9  ;;  %v1692_v56 = vunpack.c.l.bf16 %v1687_v49  ;;  %v1697_v38 = vunpack.c.h.bf16 %v1689_v51 }
 0xa20   :  { %v1675_v5 = vmul.f32 %v1663_v2, %v3720_v60  ;;  %v1672_v17 = vmul.f32 0.5, %v1670_v11  ;;  %v3814_v60 = vld [vmem:[#allocation7 + $0x68] ss:$16 sps:$4 sm:$0xff]  }
 0xa21   :  { %2860 = vtanh.f32 %v3792_v48  ;;  %v1673_v29 = vmul.f32 0.5, %v1671_v54 }
 0xa22   :  { %v3796_v7 = vadd.f32 %v1677_v3, %v1675_v5 }
 0xa24   :  { %2862 = vtanh.f32 %v3796_v7 }
 0xa2b   :  { %v2861_v32 = vpop.eup %2860 }
 0xa2c   :  { %v1682_v24 = vmul.f32 %v2861_v32, %v1672_v17  ;;  %v1696_v32 = vunpack.c.l.bf16 %v1689_v51 }
 0xa2e   :  { %v2863_v21 = vpop.eup %2862 }
 0xa2f   :  { %v1683_v63 = vmul.f32 %v2863_v21, %v1673_v29 }
 0xa31   :  { %v1684_v44 = vpack.c.bf16 %v1683_v63, %v1682_v24  ;;  %v1693_v63 = vunpack.c.h.bf16 %v1687_v49 }
 0xa33   :  { %1731 = vmatmul.mubr.bf16.vlgmr.msra.gmra.mrb[40].mxu0 %v1684_v44  ;;  %1774 = vmatmul.mubr.bf16.vlgmr.msra.gmra.mrb[40].mxu1 %v1684_v44 }
 0xa34   :  { %1843 = vmatpush1.bf16.msra.mxu0 %v3723_v1  ;;  %1886 = vmatpush1.bf16.msra.mxu1 %v3726_v22 }
 0xa35   :  { %1844 = vmatprep.subr.bf16.mxu0 %v3729_v19  ;;  %1887 = vmatprep.subr.bf16.mxu1 %v3732_v36 }
 0xa36   :  { %1874 = vmatprep.mubr.bf16.mxu0 %v3139_v0  ;;  %1917 = vmatprep.mubr.bf16.mxu1 %v3139_v0 }
 0xa38   :  { %1845 = vmatpush1.bf16.msra.mxu0 %v3737_v43  ;;  %1888 = vmatpush1.bf16.msra.mxu1 %v3740_v6 }
 0xa39   :  { %1846 = vmatprep.subr.bf16.mxu0 %v3743_v40  ;;  %1889 = vmatprep.subr.bf16.mxu1 %v3746_v25 }
 0xa3c   :  { %1847 = vmatpush1.bf16.msra.mxu0 %v3749_v12  ;;  %1890 = vmatpush1.bf16.msra.mxu1 %v3752_v28 }
 0xa3d   :  { %1848 = vmatprep.subr.bf16.mxu0 %v3755_v35  ;;  %1891 = vmatprep.subr.bf16.mxu1 %v3758_v27 }
 0xa40   :  { %1849 = vmatpush1.bf16.msra.mxu0 %v3761_v59  ;;  %1892 = vmatpush1.bf16.msra.mxu1 %v3814_v60 }
 0xa41   :  { %1850 = vmatprep.subr.bf16.mxu0 %v3765_v55  ;;  %1893 = vmatprep.subr.bf16.mxu1 %v3818_v20 }
 0xa44   :  { %1851 = vmatpush1.bf16.msra.mxu0 %v3769_v15  ;;  %1894 = vmatpush1.bf16.msra.mxu1 %v3822_v37 }
 0xa45   :  { %1852 = vmatprep.subr.bf16.mxu0 %v3825_v14  ;;  %1895 = vmatprep.subr.bf16.mxu1 %v3828_v23 }
 0xa48   :  { %1853 = vmatpush1.bf16.msra.mxu0 %v3831_v31  ;;  %1896 = vmatpush1.bf16.msra.mxu1 %v3834_v26 }
 0xa49   :  { %1854 = vmatprep.subr.bf16.mxu0 %v3837_v30  ;;  %1897 = vmatprep.subr.bf16.mxu1 %v3840_v39 }
 0xa4c   :  { %1855 = vmatpush1.bf16.msra.mxu0 %v3843_v50  ;;  %1898 = vmatpush1.bf16.msra.mxu1 %v3846_v4 }
 0xa4d   :  { %1856 = vmatprep.subr.bf16.mxu0 %v3849_v58  ;;  %1899 = vmatprep.subr.bf16.mxu1 %v3852_v52 }
 0xa50   :  { %1857 = vmatpush1.bf16.msra.mxu0 %v3855_v57  ;;  %1900 = vmatpush1.bf16.msra.mxu1 %v3858_v62 }
 0xa51   :  { %1986 = vmatprep.subr.bf16.mxu0 %v3785_v10  ;;  %2029 = vmatprep.subr.bf16.mxu1 %v3788_v45 }
 0xb06   :  { %v1732_v34 = vpop.f32.mrb[40].mxu0  ;;  %v1775_v13 = vpop.f32.mrb[40].mxu1 }
 0xb07   :  { %v1784_v18 = vadd.f32 %v1732_v34, %v1690_v16  ;;  %v1734_v47 = vpop.f32.mrb[41].mxu0  ;;  %v1777_v42 = vpop.f32.mrb[41].mxu1  ;;  %v1786_v29 = vadd.f32 %v1775_v13, %v1692_v56 }
 0xb08   :  { %v1785_v46 = vadd.f32 %v1734_v47, %v1691_v61  ;;  %v1736_v2 = vpop.f32.mrb[42].mxu0  ;;  %v1779_v3 = vpop.f32.mrb[42].mxu1  ;;  %v1787_v33 = vadd.f32 %v1777_v42, %v1693_v63 }
 0xb09   :  { %v1792_v5 = vmul.f32 0.5, %v1784_v18  ;;  %v1788_v8 = vadd.f32 %v1736_v2, %v1694_v53  ;;  %v1738_v9 = vpop.f32.mrb[43].mxu0  ;;  %v1781_v11 = vpop.f32.mrb[43].mxu1  ;;  %v1790_v44 = vadd.f32 %v1779_v3, %v1696_v32 }
 0xb0a   :  { %v1800_v54 = vmul.f32 0.5, %v1785_v46  ;;  %v1789_v17 = vadd.f32 %v1738_v9, %v1695_v41  ;;  %v1791_v16 = vadd.f32 %v1781_v11, %v1697_v38  ;;  %v1810_v18 = vmul.f32 0.5, %v1787_v33 }
 0xb0b   :  { %2864 = vtanh.f32 %v1792_v5  ;;  %v1793_v21 = vmul.f32 0.5, %v1788_v8 }
 0xb0c   :  { %2866 = vtanh.f32 %v1800_v54  ;;  %v1801_v24 = vmul.f32 0.5, %v1789_v17  ;;  %v1811_v41 = vmul.f32 0.5, %v1791_v16 }
 0xb0d   :  { %2868 = vtanh.f32 %v1793_v21 }
 0xb0e   :  { %2870 = vtanh.f32 %v1786_v29 }
 0xb0f   :  { %2872 = vtanh.f32 %v1801_v24 }
 0xb10   :  { %2874 = vtanh.f32 %v1790_v44 }
 0xb11   :  { %2876 = vtanh.f32 %v1810_v18  ;;  %v1832_v18 = vld [vmem:[#allocation4 + $0x170] sm:$0xff] }
 0xb12   :  { %2878 = vtanh.f32 %v1811_v41  ;;  %v1831_v41 = vld [vmem:[#allocation4 + $0x168] sm:$0xff] }
 0xb15   :  { %v2865_v61 = vpop.eup %2864 }
 0xb16   :  { %v2867_v53 = vpop.eup %2866  ;;  %v1796_v34 = vadd.f32 1.0, %v2865_v61 }
 0xb17   :  { %v1804_v47 = vadd.f32 1.0, %v2867_v53  ;;  %v2869_v46 = vpop.eup %2868 }
 0xb18   :  { %v1798_v13 = vmul.f32 0.5, %v1796_v34  ;;  %v2871_v56 = vpop.eup %2870  ;;  %v1797_v5 = vadd.f32 1.0, %v2869_v46 }
 0xb19   :  { %v1806_v2 = vmul.f32 0.5, %v1804_v47  ;;  %v2873_v49 = vpop.eup %2872 }
 0xb1a   :  { %v1820_v8 = vmul.f32 %v2871_v56, %v1798_v13  ;;  %v1799_v3 = vmul.f32 0.5, %v1797_v5  ;;  %v1805_v42 = vadd.f32 1.0, %v2873_v49  ;;  %v2875_v9 = vpop.eup %2874  ;;  %v1838_v13 = vunpack.c.l.bf16 %v1832_v18 }
 0xb1b   :  { %v1818_v51 = vmul.f32 %v1806_v2, %v3792_v48  ;;  %v2877_v21 = vpop.eup %2876  ;;  %v1839_v5 = vunpack.c.h.bf16 %v1832_v18 }
 0xb1c   :  { %v1807_v54 = vmul.f32 0.5, %v1805_v42  ;;  %v1821_v32 = vmul.f32 %v2875_v9, %v1799_v3  ;;  %v2879_v24 = vpop.eup %2878  ;;  %v1814_v63 = vadd.f32 1.0, %v2877_v21  ;;  %v1833_v42 = vld [vmem:[#allocation4 + $0x178] sm:$0xff] }
 0xb1d   :  { %v3864_v11 = vadd.f32 %v1820_v8, %v1818_v51  ;;  %v1815_v48 = vadd.f32 1.0, %v2879_v24  ;;  %v1836_v8 = vunpack.c.l.bf16 %v1831_v41 }
 0xb1e   :  { %v1819_v17 = vmul.f32 %v1807_v54, %v3796_v7  ;;  %v1816_v38 = vmul.f32 0.5, %v1814_v63  ;;  %v1830_v7 = vld [vmem:[#allocation4 + $0x160] sm:$0xff] }
 0xb1f   :  { %2880 = vtanh.f32 %v3864_v11  ;;  %v1817_v33 = vmul.f32 0.5, %v1815_v48  ;;  %v1834_v47 = vunpack.c.l.bf16 %v1830_v7  ;;  %v1835_v46 = vunpack.c.h.bf16 %v1830_v7 }
 0xb20   :  { %v3868_v29 = vadd.f32 %v1821_v32, %v1819_v17  ;;  %v1841_v7 = vunpack.c.h.bf16 %v1833_v42 }
 0xb22   :  { %2882 = vtanh.f32 %v3868_v29 }
 0xb29   :  { %v2881_v44 = vpop.eup %2880 }
 0xb2a   :  { %v1826_v61 = vmul.f32 %v2881_v44, %v1816_v38  ;;  %v1840_v44 = vunpack.c.l.bf16 %v1833_v42 }
 0xb2c   :  { %v2883_v16 = vpop.eup %2882 }
 0xb2d   :  { %v1827_v53 = vmul.f32 %v2883_v16, %v1817_v33 }
 0xb2f   :  { %v1828_v34 = vpack.c.bf16 %v1827_v53, %v1826_v61  ;;  %v1837_v53 = vunpack.c.h.bf16 %v1831_v41 }
 0xb31   :  { %1875 = vmatmul.mubr.bf16.vlgmr.msra.gmra.mrb[44].mxu0 %v1828_v34  ;;  %1918 = vmatmul.mubr.bf16.vlgmr.msra.gmra.mrb[44].mxu1 %v1828_v34 }
 0xb32   :  { %1987 = vmatpush1.bf16.msra.mxu0 %v3723_v1  ;;  %2030 = vmatpush1.bf16.msra.mxu1 %v3726_v22 }
 0xb33   :  { %1988 = vmatprep.subr.bf16.mxu0 %v3729_v19  ;;  %2031 = vmatprep.subr.bf16.mxu1 %v3732_v36 }
 0xb34   :  { %2018 = vmatprep.mubr.bf16.mxu0 %v3139_v0  ;;  %2061 = vmatprep.mubr.bf16.mxu1 %v3139_v0 }
 0xb36   :  { %1989 = vmatpush1.bf16.msra.mxu0 %v3737_v43  ;;  %2032 = vmatpush1.bf16.msra.mxu1 %v3740_v6 }
 0xb37   :  { %1990 = vmatprep.subr.bf16.mxu0 %v3743_v40  ;;  %2033 = vmatprep.subr.bf16.mxu1 %v3746_v25 }
 0xb3a   :  { %1991 = vmatpush1.bf16.msra.mxu0 %v3749_v12  ;;  %2034 = vmatpush1.bf16.msra.mxu1 %v3752_v28 }
 0xb3b   :  { %1992 = vmatprep.subr.bf16.mxu0 %v3755_v35  ;;  %2035 = vmatprep.subr.bf16.mxu1 %v3758_v27 }
 0xb3e   :  { %1993 = vmatpush1.bf16.msra.mxu0 %v3761_v59  ;;  %2036 = vmatpush1.bf16.msra.mxu1 %v3814_v60 }
 0xb3f   :  { %1994 = vmatprep.subr.bf16.mxu0 %v3765_v55  ;;  %2037 = vmatprep.subr.bf16.mxu1 %v3818_v20 }
 0xb42   :  { %1995 = vmatpush1.bf16.msra.mxu0 %v3769_v15  ;;  %2038 = vmatpush1.bf16.msra.mxu1 %v3822_v37 }
 0xb43   :  { %1996 = vmatprep.subr.bf16.mxu0 %v3825_v14  ;;  %2039 = vmatprep.subr.bf16.mxu1 %v3828_v23 }
 0xb46   :  { %1997 = vmatpush1.bf16.msra.mxu0 %v3831_v31  ;;  %2040 = vmatpush1.bf16.msra.mxu1 %v3834_v26 }
 0xb47   :  { %1998 = vmatprep.subr.bf16.mxu0 %v3837_v30  ;;  %2041 = vmatprep.subr.bf16.mxu1 %v3840_v39 }
 0xb4a   :  { %1999 = vmatpush1.bf16.msra.mxu0 %v3843_v50  ;;  %2042 = vmatpush1.bf16.msra.mxu1 %v3846_v4 }
 0xb4b   :  { %2000 = vmatprep.subr.bf16.mxu0 %v3849_v58  ;;  %2043 = vmatprep.subr.bf16.mxu1 %v3852_v52 }
 0xb4e   :  { %2001 = vmatpush1.bf16.msra.mxu0 %v3855_v57  ;;  %2044 = vmatpush1.bf16.msra.mxu1 %v3858_v62 }
 0xb4f   :  { %2130 = vmatprep.subr.bf16.mxu0 %v3785_v10  ;;  %2173 = vmatprep.subr.bf16.mxu1 %v3788_v45 }
 0xc04   :  { %v1876_v56 = vpop.f32.mrb[44].mxu0  ;;  %v1919_v2 = vpop.f32.mrb[44].mxu1 }
 0xc05   :  { %v1928_v49 = vadd.f32 %v1876_v56, %v1834_v47  ;;  %v1878_v51 = vpop.f32.mrb[45].mxu0  ;;  %v1921_v3 = vpop.f32.mrb[45].mxu1  ;;  %v1930_v33 = vadd.f32 %v1919_v2, %v1836_v8 }
 0xc06   :  { %v1929_v9 = vadd.f32 %v1878_v51, %v1835_v46  ;;  %v1880_v54 = vpop.f32.mrb[46].mxu0  ;;  %v1923_v32 = vpop.f32.mrb[46].mxu1  ;;  %v1931_v18 = vadd.f32 %v1921_v3, %v1837_v53 }
 0xc07   :  { %v1936_v17 = vmul.f32 0.5, %v1928_v49  ;;  %v1932_v21 = vadd.f32 %v1880_v54, %v1838_v13  ;;  %v1882_v24 = vpop.f32.mrb[47].mxu0  ;;  %v1925_v63 = vpop.f32.mrb[47].mxu1  ;;  %v1934_v34 = vadd.f32 %v1923_v32, %v1840_v44 }
 0xc08   :  { %v1944_v48 = vmul.f32 0.5, %v1929_v9  ;;  %v1933_v38 = vadd.f32 %v1882_v24, %v1839_v5  ;;  %v1935_v47 = vadd.f32 %v1925_v63, %v1841_v7  ;;  %v1954_v49 = vmul.f32 0.5, %v1931_v18 }
 0xc09   :  { %2884 = vtanh.f32 %v1936_v17  ;;  %v1937_v16 = vmul.f32 0.5, %v1932_v21 }
 0xc0a   :  { %2886 = vtanh.f32 %v1944_v48  ;;  %v1945_v61 = vmul.f32 0.5, %v1933_v38  ;;  %v1955_v5 = vmul.f32 0.5, %v1935_v47 }
 0xc0b   :  { %2888 = vtanh.f32 %v1937_v16 }
 0xc0c   :  { %2890 = vtanh.f32 %v1930_v33 }
 0xc0d   :  { %2892 = vtanh.f32 %v1945_v61 }
 0xc0e   :  { %2894 = vtanh.f32 %v1934_v34 }
 0xc0f   :  { %2896 = vtanh.f32 %v1954_v49  ;;  %v1976_v49 = vld [vmem:[#allocation4 + $0x190] sm:$0xff] }
 0xc10   :  { %2898 = vtanh.f32 %v1955_v5  ;;  %v1975_v5 = vld [vmem:[#allocation4 + $0x188] sm:$0xff] }
 0xc13   :  { %v2885_v46 = vpop.eup %2884 }
 0xc14   :  { %v2887_v13 = vpop.eup %2886  ;;  %v1940_v56 = vadd.f32 1.0, %v2885_v46 }
 0xc15   :  { %v1948_v51 = vadd.f32 1.0, %v2887_v13  ;;  %v2889_v9 = vpop.eup %2888 }
 0xc16   :  { %v1942_v2 = vmul.f32 0.5, %v1940_v56  ;;  %v2891_v8 = vpop.eup %2890  ;;  %v1941_v17 = vadd.f32 1.0, %v2889_v9 }
 0xc17   :  { %v1950_v54 = vmul.f32 0.5, %v1948_v51  ;;  %v2893_v41 = vpop.eup %2892 }
 0xc18   :  { %v1964_v21 = vmul.f32 %v2891_v8, %v1942_v2  ;;  %v1943_v32 = vmul.f32 0.5, %v1941_v17  ;;  %v1949_v3 = vadd.f32 1.0, %v2893_v41  ;;  %v2895_v24 = vpop.eup %2894  ;;  %v1982_v2 = vunpack.c.l.bf16 %v1976_v49 }
 0xc19   :  { %v1962_v42 = vmul.f32 %v1950_v54, %v3864_v11  ;;  %v2897_v16 = vpop.eup %2896  ;;  %v1983_v17 = vunpack.c.h.bf16 %v1976_v49 }
 0xc1a   :  { %v1951_v48 = vmul.f32 0.5, %v1949_v3  ;;  %v1965_v44 = vmul.f32 %v2895_v24, %v1943_v32  ;;  %v2899_v61 = vpop.eup %2898  ;;  %v1958_v53 = vadd.f32 1.0, %v2897_v16  ;;  %v1977_v3 = vld [vmem:[#allocation4 + $0x198] sm:$0xff] }
 0xc1b   :  { %v3906_v63 = vadd.f32 %v1964_v21, %v1962_v42  ;;  %v1959_v11 = vadd.f32 1.0, %v2899_v61  ;;  %v1980_v21 = vunpack.c.l.bf16 %v1975_v5 }
 0xc1c   :  { %v1963_v38 = vmul.f32 %v1951_v48, %v3868_v29  ;;  %v1960_v7 = vmul.f32 0.5, %v1958_v53  ;;  %v1974_v29 = vld [vmem:[#allocation4 + $0x180] sm:$0xff] }
 0xc1d   :  { %2900 = vtanh.f32 %v3906_v63  ;;  %v1961_v18 = vmul.f32 0.5, %v1959_v11  ;;  %v1978_v51 = vunpack.c.l.bf16 %v1974_v29  ;;  %v1979_v9 = vunpack.c.h.bf16 %v1974_v29 }
 0xc1e   :  { %v3910_v33 = vadd.f32 %v1965_v44, %v1963_v38  ;;  %v1985_v29 = vunpack.c.h.bf16 %v1977_v3 }
 0xc20   :  { %2902 = vtanh.f32 %v3910_v33 }
 0xc27   :  { %v2901_v34 = vpop.eup %2900 }
 0xc28   :  { %v1970_v46 = vmul.f32 %v2901_v34, %v1960_v7  ;;  %v1984_v34 = vunpack.c.l.bf16 %v1977_v3 }
 0xc2a   :  { %v2903_v47 = vpop.eup %2902 }
 0xc2b   :  { %v1971_v13 = vmul.f32 %v2903_v47, %v1961_v18 }
 0xc2d   :  { %v1972_v56 = vpack.c.bf16 %v1971_v13, %v1970_v46  ;;  %v1981_v13 = vunpack.c.h.bf16 %v1975_v5 }
 0xc2f   :  { %2019 = vmatmul.mubr.bf16.vlgmr.msra.gmra.mrb[48].mxu0 %v1972_v56  ;;  %2062 = vmatmul.mubr.bf16.vlgmr.msra.gmra.mrb[48].mxu1 %v1972_v56 }
 0xc30   :  { %2131 = vmatpush1.bf16.msra.mxu0 %v3723_v1  ;;  %2174 = vmatpush1.bf16.msra.mxu1 %v3726_v22 }
 0xc31   :  { %2132 = vmatprep.subr.bf16.mxu0 %v3729_v19  ;;  %2175 = vmatprep.subr.bf16.mxu1 %v3732_v36 }
 0xc32   :  { %2162 = vmatprep.mubr.bf16.mxu0 %v3139_v0  ;;  %2205 = vmatprep.mubr.bf16.mxu1 %v3139_v0 }
 0xc34   :  { %2133 = vmatpush1.bf16.msra.mxu0 %v3737_v43  ;;  %2176 = vmatpush1.bf16.msra.mxu1 %v3740_v6 }
 0xc35   :  { %2134 = vmatprep.subr.bf16.mxu0 %v3743_v40  ;;  %2177 = vmatprep.subr.bf16.mxu1 %v3746_v25 }
 0xc38   :  { %2135 = vmatpush1.bf16.msra.mxu0 %v3749_v12  ;;  %2178 = vmatpush1.bf16.msra.mxu1 %v3752_v28 }
 0xc39   :  { %2136 = vmatprep.subr.bf16.mxu0 %v3755_v35  ;;  %2179 = vmatprep.subr.bf16.mxu1 %v3758_v27 }
 0xc3c   :  { %2137 = vmatpush1.bf16.msra.mxu0 %v3761_v59  ;;  %2180 = vmatpush1.bf16.msra.mxu1 %v3814_v60 }
 0xc3d   :  { %2138 = vmatprep.subr.bf16.mxu0 %v3765_v55  ;;  %2181 = vmatprep.subr.bf16.mxu1 %v3818_v20 }
 0xc40   :  { %2139 = vmatpush1.bf16.msra.mxu0 %v3769_v15  ;;  %2182 = vmatpush1.bf16.msra.mxu1 %v3822_v37 }
 0xc41   :  { %2140 = vmatprep.subr.bf16.mxu0 %v3825_v14  ;;  %2183 = vmatprep.subr.bf16.mxu1 %v3828_v23 }
 0xc44   :  { %2141 = vmatpush1.bf16.msra.mxu0 %v3831_v31  ;;  %2184 = vmatpush1.bf16.msra.mxu1 %v3834_v26 }
 0xc45   :  { %2142 = vmatprep.subr.bf16.mxu0 %v3837_v30  ;;  %2185 = vmatprep.subr.bf16.mxu1 %v3840_v39 }
 0xc48   :  { %2143 = vmatpush1.bf16.msra.mxu0 %v3843_v50  ;;  %2186 = vmatpush1.bf16.msra.mxu1 %v3846_v4 }
 0xc49   :  { %2144 = vmatprep.subr.bf16.mxu0 %v3849_v58  ;;  %2187 = vmatprep.subr.bf16.mxu1 %v3852_v52 }
 0xc4c   :  { %2145 = vmatpush1.bf16.msra.mxu0 %v3855_v57  ;;  %2188 = vmatpush1.bf16.msra.mxu1 %v3858_v62 }
 0xc4d   :  { %2274 = vmatprep.subr.bf16.mxu0 %v3785_v10  ;;  %2317 = vmatprep.subr.bf16.mxu1 %v3788_v45 }
 0xd02   :  { %v2020_v8 = vpop.f32.mrb[48].mxu0  ;;  %v2063_v54 = vpop.f32.mrb[48].mxu1 }
 0xd03   :  { %v2072_v41 = vadd.f32 %v2020_v8, %v1978_v51  ;;  %v2022_v42 = vpop.f32.mrb[49].mxu0  ;;  %v2065_v32 = vpop.f32.mrb[49].mxu1  ;;  %v2074_v18 = vadd.f32 %v2063_v54, %v1980_v21 }
 0xd04   :  { %v2073_v24 = vadd.f32 %v2022_v42, %v1979_v9  ;;  %v2024_v48 = vpop.f32.mrb[50].mxu0  ;;  %v2067_v44 = vpop.f32.mrb[50].mxu1  ;;  %v2075_v49 = vadd.f32 %v2065_v32, %v1981_v13 }
 0xd05   :  { %v2080_v38 = vmul.f32 0.5, %v2072_v41  ;;  %v2076_v16 = vadd.f32 %v2024_v48, %v1982_v2  ;;  %v2026_v61 = vpop.f32.mrb[51].mxu0  ;;  %v2069_v53 = vpop.f32.mrb[51].mxu1  ;;  %v2078_v56 = vadd.f32 %v2067_v44, %v1984_v34 }
 0xd06   :  { %v2088_v11 = vmul.f32 0.5, %v2073_v24  ;;  %v2077_v7 = vadd.f32 %v2026_v61, %v1983_v17  ;;  %v2079_v51 = vadd.f32 %v2069_v53, %v1985_v29  ;;  %v2098_v41 = vmul.f32 0.5, %v2075_v49 }
 0xd07   :  { %2904 = vtanh.f32 %v2080_v38  ;;  %v2081_v47 = vmul.f32 0.5, %v2076_v16 }
 0xd08   :  { %2906 = vtanh.f32 %v2088_v11  ;;  %v2089_v46 = vmul.f32 0.5, %v2077_v7  ;;  %v2099_v17 = vmul.f32 0.5, %v2079_v51 }
 0xd09   :  { %2908 = vtanh.f32 %v2081_v47 }
 0xd0a   :  { %2910 = vtanh.f32 %v2074_v18 }
 0xd0b   :  { %2912 = vtanh.f32 %v2089_v46 }
 0xd0c   :  { %2914 = vtanh.f32 %v2078_v56 }
 0xd0d   :  { %2916 = vtanh.f32 %v2098_v41 }
 0xd0e   :  { %2918 = vtanh.f32 %v2099_v17 }
 0xd11   :  { %v2905_v9 = vpop.eup %2904 }
 0xd12   :  { %v2907_v2 = vpop.eup %2906  ;;  %v2084_v8 = vadd.f32 1.0, %v2905_v9 }
 0xd13   :  { %v2092_v42 = vadd.f32 1.0, %v2907_v2  ;;  %v2909_v24 = vpop.eup %2908 }
 0xd14   :  { %v2086_v54 = vmul.f32 0.5, %v2084_v8  ;;  %v2911_v21 = vpop.eup %2910  ;;  %v2085_v38 = vadd.f32 1.0, %v2909_v24 }
 0xd15   :  { %v2094_v48 = vmul.f32 0.5, %v2092_v42  ;;  %v2913_v5 = vpop.eup %2912 }
 0xd16   :  { %v2108_v16 = vmul.f32 %v2911_v21, %v2086_v54  ;;  %v2087_v44 = vmul.f32 0.5, %v2085_v38  ;;  %v2093_v32 = vadd.f32 1.0, %v2913_v5  ;;  %v2915_v61 = vpop.eup %2914 }
 0xd17   :  { %v2106_v3 = vmul.f32 %v2094_v48, %v3906_v63  ;;  %v2917_v47 = vpop.eup %2916 }
 0xd18   :  { %v2095_v11 = vmul.f32 0.5, %v2093_v32  ;;  %v2109_v34 = vmul.f32 %v2915_v61, %v2087_v44  ;;  %v2919_v46 = vpop.eup %2918  ;;  %v2102_v13 = vadd.f32 1.0, %v2917_v47 }
 0xd19   :  { %v3948_v53 = vadd.f32 %v2108_v16, %v2106_v3  ;;  %v2103_v63 = vadd.f32 1.0, %v2919_v46 }
 0xd1a   :  { %v2107_v7 = vmul.f32 %v2095_v11, %v3910_v33  ;;  %v2104_v29 = vmul.f32 0.5, %v2102_v13 }
 0xd1b   :  { %2920 = vtanh.f32 %v3948_v53  ;;  %v2105_v49 = vmul.f32 0.5, %v2103_v63 }
 0xd1c   :  { %v3952_v18 = vadd.f32 %v2109_v34, %v2107_v7 }
 0xd1e   :  { %2922 = vtanh.f32 %v3952_v18 }
 0xd25   :  { %v2921_v56 = vpop.eup %2920 }
 0xd26   :  { %v2114_v9 = vmul.f32 %v2921_v56, %v2104_v29 }
 0xd28   :  { %v2923_v51 = vpop.eup %2922 }
 0xd29   :  { %v2115_v2 = vmul.f32 %v2923_v51, %v2105_v49 }
 0xd2b   :  { %v2116_v8 = vpack.c.bf16 %v2115_v2, %v2114_v9 }
 0xd2d   :  { %2163 = vmatmul.mubr.bf16.vlgmr.msra.gmra.mrb[52].mxu0 %v2116_v8  ;;  %2206 = vmatmul.mubr.bf16.vlgmr.msra.gmra.mrb[52].mxu1 %v2116_v8 }
 0xd2e   :  { %2275 = vmatpush1.bf16.msra.mxu0 %v3723_v1  ;;  %2318 = vmatpush1.bf16.msra.mxu1 %v3726_v22  ;;  %v2118_v1 = vld [vmem:[#allocation4 + $0x1a0] sm:$0xff]  ;;  %v2120_v22 = vld [vmem:[#allocation4 + $0x1b0] sm:$0xff] }
 0xd2f   :  { %2276 = vmatprep.subr.bf16.mxu0 %v3729_v19  ;;  %2319 = vmatprep.subr.bf16.mxu1 %v3732_v36  ;;  %v2122_v19 = vunpack.c.l.bf16 %v2118_v1  ;;  %v2119_v36 = vld [vmem:[#allocation4 + $0x1a8] sm:$0xff] }
 0xd30   :  { %2306 = vmatprep.mubr.bf16.mxu0 %v3139_v0  ;;  %2349 = vmatprep.mubr.bf16.mxu1 %v3139_v0  ;;  %v2125_v16 = vunpack.c.h.bf16 %v2119_v36 }
 0xd32   :  { %2277 = vmatpush1.bf16.msra.mxu0 %v3737_v43  ;;  %2320 = vmatpush1.bf16.msra.mxu1 %v3740_v6  ;;  %v2123_v43 = vunpack.c.h.bf16 %v2118_v1  ;;  %v2126_v6 = vunpack.c.l.bf16 %v2120_v22 }
 0xd33   :  { %2278 = vmatprep.subr.bf16.mxu0 %v3743_v40  ;;  %2321 = vmatprep.subr.bf16.mxu1 %v3746_v25 }
 0xd36   :  { %2279 = vmatpush1.bf16.msra.mxu0 %v3749_v12  ;;  %2322 = vmatpush1.bf16.msra.mxu1 %v3752_v28  ;;  %v2127_v12 = vunpack.c.h.bf16 %v2120_v22 }
 0xd37   :  { %2280 = vmatprep.subr.bf16.mxu0 %v3755_v35  ;;  %2323 = vmatprep.subr.bf16.mxu1 %v3758_v27  ;;  %v2124_v35 = vunpack.c.l.bf16 %v2119_v36 }
 0xd3a   :  { %2281 = vmatpush1.bf16.msra.mxu0 %v3761_v59  ;;  %2324 = vmatpush1.bf16.msra.mxu1 %v3814_v60 }
 0xd3b   :  { %2282 = vmatprep.subr.bf16.mxu0 %v3765_v55  ;;  %2325 = vmatprep.subr.bf16.mxu1 %v3818_v20  ;;  %v2121_v55 = vld [vmem:[#allocation4 + $0x1b8] sm:$0xff] }
 0xd3c   :  { %v2128_v54 = vunpack.c.l.bf16 %v2121_v55  ;;  %v2129_v44 = vunpack.c.h.bf16 %v2121_v55 }
 0xd3e   :  { %2283 = vmatpush1.bf16.msra.mxu0 %v3769_v15  ;;  %2326 = vmatpush1.bf16.msra.mxu1 %v3822_v37 }
 0xd3f   :  { %2284 = vmatprep.subr.bf16.mxu0 %v3825_v14  ;;  %2327 = vmatprep.subr.bf16.mxu1 %v3828_v23 }
 0xd42   :  { %2285 = vmatpush1.bf16.msra.mxu0 %v3831_v31  ;;  %2328 = vmatpush1.bf16.msra.mxu1 %v3834_v26 }
 0xd43   :  { %2286 = vmatprep.subr.bf16.mxu0 %v3837_v30  ;;  %2329 = vmatprep.subr.bf16.mxu1 %v3840_v39 }
 0xd46   :  { %2287 = vmatpush1.bf16.msra.mxu0 %v3843_v50  ;;  %2330 = vmatpush1.bf16.msra.mxu1 %v3846_v4 }
 0xd47   :  { %2288 = vmatprep.subr.bf16.mxu0 %v3849_v58  ;;  %2331 = vmatprep.subr.bf16.mxu1 %v3852_v52 }
 0xd4a   :  { %2289 = vmatpush1.bf16.msra.mxu0 %v3855_v57  ;;  %2332 = vmatpush1.bf16.msra.mxu1 %v3858_v62 }
 0xd4b   :  { %2418 = vmatprep.subr.bf16.mxu0 %v3785_v10  ;;  %2461 = vmatprep.subr.bf16.mxu1 %v3788_v45 }
 0xe00   :  { %v2164_v40 = vpop.f32.mrb[52].mxu0  ;;  %v2207_v25 = vpop.f32.mrb[52].mxu1 }
 0xe01   :  { %v2216_v28 = vadd.f32 %v2164_v40, %v2122_v19  ;;  %v2166_v27 = vpop.f32.mrb[53].mxu0  ;;  %v2209_v59 = vpop.f32.mrb[53].mxu1  ;;  %v2218_v48 = vadd.f32 %v2207_v25, %v2124_v35 }
 0xe02   :  { %v2217_v15 = vadd.f32 %v2166_v27, %v2123_v43  ;;  %v2168_v33 = vpop.f32.mrb[54].mxu0  ;;  %v2211_v41 = vpop.f32.mrb[54].mxu1  ;;  %v2219_v32 = vadd.f32 %v2209_v59, %v2125_v16  ;;  %v3058_v16 = vld [vmem:[#allocation7 + $0x64] ss:$16 sps:$4 sm:$0xff]  }
 0xe03   :  { %v2224_v10 = vmul.f32 0.5, %v2216_v28  ;;  %v2220_v42 = vadd.f32 %v2168_v33, %v2126_v6  ;;  %v2170_v45 = vpop.f32.mrb[55].mxu0  ;;  %v2213_v17 = vpop.f32.mrb[55].mxu1  ;;  %v2222_v3 = vadd.f32 %v2211_v41, %v2128_v54  ;;  %v3053_v54 = vld [vmem:[#allocation7 + $0x28] ss:$16 sps:$4 sm:$0xff]  }
 0xe04   :  { %v2232_v24 = vmul.f32 0.5, %v2217_v15  ;;  %v2221_v21 = vadd.f32 %v2170_v45, %v2127_v12  ;;  %v2223_v61 = vadd.f32 %v2213_v17, %v2129_v44  ;;  %v2242_v47 = vmul.f32 0.5, %v2219_v32  ;;  %v3050_v45 = vld [vmem:[#allocation7 + $0x24] ss:$16 sps:$4 sm:$0xff]   ;;  %v3051_v17 = vld [vmem:[#allocation7 + $0x2c] ss:$16 sps:$4 sm:$0xff]  }
 0xe05   :  { %2924 = vtanh.f32 %v2224_v10  ;;  %v2225_v38 = vmul.f32 0.5, %v2220_v42  ;;  %v3049_v42 = vld [vmem:[#allocation7 + $0x8] ss:$16 sps:$4 sm:$0xff]   ;;  %v3060_v44 = vld [vmem:[#allocation7 + $0x60] ss:$16 sps:$4 sm:$0xff]  }
 0xe06   :  { %2926 = vtanh.f32 %v2232_v24  ;;  %v2233_v5 = vmul.f32 0.5, %v2221_v21  ;;  %v2243_v13 = vmul.f32 0.5, %v2223_v61  ;;  %v3052_v24 = vld [vmem:[#allocation7 + $0x20] ss:$16 sps:$4 sm:$0xff]   ;;  %v3054_v21 = vld [vmem:[#allocation7 + $0x44] ss:$16 sps:$4 sm:$0xff]  }
 0xe07   :  { %2928 = vtanh.f32 %v2225_v38  ;;  %v3056_v38 = vld [vmem:[#allocation7 + $0x40] ss:$16 sps:$4 sm:$0xff]  }
 0xe08   :  { %2930 = vtanh.f32 %v2218_v48  ;;  %v3055_v48 = vld [vmem:[#allocation7 + $0x4c] ss:$16 sps:$4 sm:$0xff]   ;;  %v3062_v32 = vld [vmem:[#allocation7 + $0x80] ss:$16 sps:$4 sm:$0xff]  }
 0xe09   :  { %2932 = vtanh.f32 %v2233_v5  ;;  %v3057_v5 = vld [vmem:[#allocation7 + $0x48] ss:$16 sps:$4 sm:$0xff]  }
 0xe0a   :  { %2934 = vtanh.f32 %v2222_v3  ;;  %v3059_v3 = vld [vmem:[#allocation7 + $0x6c] ss:$16 sps:$4 sm:$0xff]  }
 0xe0b   :  { %2936 = vtanh.f32 %v2242_v47 }
 0xe0c   :  { %2938 = vtanh.f32 %v2243_v13 }
 0xe0f   :  { %v2925_v11 = vpop.eup %2924 }
 0xe10   :  { %v2927_v34 = vpop.eup %2926  ;;  %v2228_v7 = vadd.f32 1.0, %v2925_v11 }
 0xe11   :  { %v2236_v46 = vadd.f32 1.0, %v2927_v34  ;;  %v2929_v63 = vpop.eup %2928 }
 0xe12   :  { %v2230_v56 = vmul.f32 0.5, %v2228_v7  ;;  %v2931_v29 = vpop.eup %2930  ;;  %v2229_v51 = vadd.f32 1.0, %v2929_v63 }
 0xe13   :  { %v2238_v49 = vmul.f32 0.5, %v2236_v46  ;;  %v2933_v9 = vpop.eup %2932 }
 0xe14   :  { %v2252_v2 = vmul.f32 %v2931_v29, %v2230_v56  ;;  %v2231_v1 = vmul.f32 0.5, %v2229_v51  ;;  %v2237_v22 = vadd.f32 1.0, %v2933_v9  ;;  %v2935_v19 = vpop.eup %2934 }
 0xe15   :  { %v2250_v8 = vmul.f32 %v2238_v49, %v3948_v53  ;;  %v2937_v12 = vpop.eup %2936 }
 0xe16   :  { %v2239_v43 = vmul.f32 0.5, %v2237_v22  ;;  %v2253_v6 = vmul.f32 %v2935_v19, %v2231_v1  ;;  %v2939_v28 = vpop.eup %2938  ;;  %v2246_v35 = vadd.f32 1.0, %v2937_v12 }
 0xe17   :  { %v3990_v36 = vadd.f32 %v2252_v2, %v2250_v8  ;;  %v2247_v53 = vadd.f32 1.0, %v2939_v28 }
 0xe18   :  { %v2251_v40 = vmul.f32 %v2239_v43, %v3952_v18  ;;  %v2248_v59 = vmul.f32 0.5, %v2246_v35  ;;  %v3048_v18 = vld [vmem:[#allocation7] ss:$16 sps:$4 sm:$0xff]  }
 0xe19   :  { %2940 = vtanh.f32 %v3990_v36  ;;  %v2249_v55 = vmul.f32 0.5, %v2247_v53 }
 0xe1a   :  { %v3994_v25 = vadd.f32 %v2253_v6, %v2251_v40 }
 0xe1c   :  { %2942 = vtanh.f32 %v3994_v25 }
 0xe23   :  { %v2941_v27 = vpop.eup %2940 }
 0xe24   :  { %v2258_v33 = vmul.f32 %v2941_v27, %v2248_v59 }
 0xe26   :  { %v2943_v15 = vpop.eup %2942 }
 0xe27   :  { %v2259_v41 = vmul.f32 %v2943_v15, %v2249_v55 }
 0xe29   :  { %v2260_v10 = vpack.c.bf16 %v2259_v41, %v2258_v33 }
 0xe2b   :  { %2307 = vmatmul.mubr.bf16.vlgmr.msra.gmra.mrb[56].mxu0 %v2260_v10  ;;  %2350 = vmatmul.mubr.bf16.vlgmr.msra.gmra.mrb[56].mxu1 %v2260_v10 }
 0xe2c   :  { %2419 = vmatpush1.bf16.msra.mxu0 %v3048_v18  ;;  %2462 = vmatpush1.bf16.msra.mxu1 %v3049_v42 }
 0xe2d   :  { %2420 = vmatprep.subr.bf16.mxu0 %v3050_v45  ;;  %2463 = vmatprep.subr.bf16.mxu1 %v3051_v17 }
 0xe2e   :  { %2450 = vmatprep.mubr.bf16.mxu0 %v3139_v0  ;;  %2493 = vmatprep.mubr.bf16.mxu1 %v3139_v0  ;;  %v3061_v0 = vld [vmem:[#allocation7 + $0x84] ss:$16 sps:$4 sm:$0xff]  }
 0xe30   :  { %2421 = vmatpush1.bf16.msra.mxu0 %v3052_v24  ;;  %2464 = vmatpush1.bf16.msra.mxu1 %v3053_v54 }
 0xe31   :  { %2422 = vmatprep.subr.bf16.mxu0 %v3054_v21  ;;  %2465 = vmatprep.subr.bf16.mxu1 %v3055_v48 }
 0xe34   :  { %2423 = vmatpush1.bf16.msra.mxu0 %v3056_v38  ;;  %2466 = vmatpush1.bf16.msra.mxu1 %v3057_v5 }
 0xe35   :  { %2424 = vmatprep.subr.bf16.mxu0 %v3058_v16  ;;  %2467 = vmatprep.subr.bf16.mxu1 %v3059_v3 }
 0xe38   :  { %2425 = vmatpush1.bf16.msra.mxu0 %v3060_v44  ;;  %2468 = vmatpush1.bf16.msra.mxu1 %v3814_v60  ;;  %v2262_v60 = vld [vmem:[#allocation4 + $0x1c0] sm:$0xff] }
 0xe39   :  { %2426 = vmatprep.subr.bf16.mxu0 %v3061_v0  ;;  %2469 = vmatprep.subr.bf16.mxu1 %v3818_v20  ;;  %v2264_v20 = vld [vmem:[#allocation4 + $0x1d0] sm:$0xff] }
 0xe3c   :  { %2427 = vmatpush1.bf16.msra.mxu0 %v3062_v32  ;;  %2470 = vmatpush1.bf16.msra.mxu1 %v3822_v37  ;;  %v2266_v37 = vunpack.c.l.bf16 %v2262_v60 }
 0xe3d   :  { %2428 = vmatprep.subr.bf16.mxu0 %v3825_v14  ;;  %2471 = vmatprep.subr.bf16.mxu1 %v3828_v23  ;;  %v2263_v14 = vld [vmem:[#allocation4 + $0x1c8] sm:$0xff]  ;;  %v2267_v23 = vunpack.c.h.bf16 %v2262_v60 }
 0xe3e   :  { %v2268_v61 = vunpack.c.l.bf16 %v2263_v14  ;;  %v2269_v9 = vunpack.c.h.bf16 %v2263_v14 }
 0xe40   :  { %2429 = vmatpush1.bf16.msra.mxu0 %v3831_v31  ;;  %2472 = vmatpush1.bf16.msra.mxu1 %v3834_v26  ;;  %v2270_v31 = vunpack.c.l.bf16 %v2264_v20 }
 0xe41   :  { %2430 = vmatprep.subr.bf16.mxu0 %v3837_v30  ;;  %2473 = vmatprep.subr.bf16.mxu1 %v3840_v39  ;;  %v2271_v39 = vunpack.c.h.bf16 %v2264_v20 }
 0xe44   :  { %2431 = vmatpush1.bf16.msra.mxu0 %v3843_v50  ;;  %2474 = vmatpush1.bf16.msra.mxu1 %v3846_v4 }
 0xe45   :  { %2432 = vmatprep.subr.bf16.mxu0 %v3849_v58  ;;  %2475 = vmatprep.subr.bf16.mxu1 %v3852_v52  ;;  %v2265_v58 = vld [vmem:[#allocation4 + $0x1d8] sm:$0xff] }
 0xe46   :  { %v2272_v63 = vunpack.c.l.bf16 %v2265_v58  ;;  %v2273_v8 = vunpack.c.h.bf16 %v2265_v58 }
 0xe48   :  { %2433 = vmatpush1.bf16.msra.mxu0 %v3855_v57  ;;  %2476 = vmatpush1.bf16.msra.mxu1 %v3858_v62 }
 0xefe   :  { %v2308_v26 = vpop.f32.mrb[56].mxu0  ;;  %v2351_v30 = vpop.f32.mrb[56].mxu1 }
 0xeff   :  { %v2360_v50 = vadd.f32 %v2308_v26, %v2266_v37  ;;  %v2310_v4 = vpop.f32.mrb[57].mxu0  ;;  %v2353_v11 = vpop.f32.mrb[57].mxu1  ;;  %v2362_v29 = vadd.f32 %v2351_v30, %v2268_v61  ;;  %v2408_v37 = vld [vmem:[#allocation4 + $0x1f0] sm:$0xff] }
 0xf00   :  { %v2361_v34 = vadd.f32 %v2310_v4, %v2267_v23  ;;  %v2312_v52 = vpop.f32.mrb[58].mxu0  ;;  %v2355_v7 = vpop.f32.mrb[58].mxu1  ;;  %v2363_v1 = vadd.f32 %v2353_v11, %v2269_v9  ;;  %v2407_v23 = vld [vmem:[#allocation4 + $0x1e8] sm:$0xff]  ;;  %v2414_v26 = vunpack.c.l.bf16 %v2408_v37 }
 0xf01   :  { %v2368_v57 = vmul.f32 0.5, %v2360_v50  ;;  %v2364_v47 = vadd.f32 %v2312_v52, %v2270_v31  ;;  %v2314_v62 = vpop.f32.mrb[59].mxu0  ;;  %v2357_v46 = vpop.f32.mrb[59].mxu1  ;;  %v2366_v2 = vadd.f32 %v2355_v7, %v2272_v63  ;;  %v2415_v50 = vunpack.c.h.bf16 %v2408_v37 }
 0xf02   :  { %v2376_v13 = vmul.f32 0.5, %v2361_v34  ;;  %v2365_v56 = vadd.f32 %v2314_v62, %v2271_v39  ;;  %v2367_v22 = vadd.f32 %v2357_v46, %v2273_v8  ;;  %v2386_v40 = vmul.f32 0.5, %v2363_v1  ;;  %v2409_v34 = vld [vmem:[#allocation4 + $0x1f8] sm:$0xff] }
 0xf03   :  { %2944 = vtanh.f32 %v2368_v57  ;;  %v2369_v49 = vmul.f32 0.5, %v2364_v47  ;;  %v2412_v4 = vunpack.c.l.bf16 %v2407_v23 }
 0xf04   :  { %2946 = vtanh.f32 %v2376_v13  ;;  %v2377_v51 = vmul.f32 0.5, %v2365_v56  ;;  %v2387_v28 = vmul.f32 0.5, %v2367_v22  ;;  %v2416_v56 = vunpack.c.l.bf16 %v2409_v34 }
 0xf05   :  { %2948 = vtanh.f32 %v2369_v49  ;;  %v2417_v22 = vunpack.c.h.bf16 %v2409_v34 }
 0xf06   :  { %2950 = vtanh.f32 %v2362_v29 }
 0xf07   :  { %2952 = vtanh.f32 %v2377_v51  ;;  %v2413_v51 = vunpack.c.h.bf16 %v2407_v23 }
 0xf08   :  { %2954 = vtanh.f32 %v2366_v2 }
 0xf09   :  { %2956 = vtanh.f32 %v2386_v40 }
 0xf0a   :  { %2958 = vtanh.f32 %v2387_v28 }
 0xf0d   :  { %v2945_v19 = vpop.eup %2944 }
 0xf0e   :  { %v2947_v43 = vpop.eup %2946  ;;  %v2372_v6 = vadd.f32 1.0, %v2945_v19 }
 0xf0f   :  { %v2380_v12 = vadd.f32 1.0, %v2947_v43  ;;  %v2949_v35 = vpop.eup %2948 }
 0xf10   :  { %v2374_v53 = vmul.f32 0.5, %v2372_v6  ;;  %v2951_v27 = vpop.eup %2950  ;;  %v2373_v55 = vadd.f32 1.0, %v2949_v35 }
 0xf11   :  { %v2382_v59 = vmul.f32 0.5, %v2380_v12  ;;  %v2953_v15 = vpop.eup %2952 }
 0xf12   :  { %v2396_v33 = vmul.f32 %v2951_v27, %v2374_v53  ;;  %v2375_v10 = vmul.f32 0.5, %v2373_v55  ;;  %v2381_v18 = vadd.f32 1.0, %v2953_v15  ;;  %v2955_v42 = vpop.eup %2954 }
 0xf13   :  { %v2394_v41 = vmul.f32 %v2382_v59, %v3990_v36  ;;  %v2957_v48 = vpop.eup %2956 }
 0xf14   :  { %v2383_v17 = vmul.f32 0.5, %v2381_v18  ;;  %v2397_v24 = vmul.f32 %v2955_v42, %v2375_v10  ;;  %v2959_v38 = vpop.eup %2958  ;;  %v2390_v5 = vadd.f32 1.0, %v2957_v48 }
 0xf15   :  { %v4015_v45 = vadd.f32 %v2396_v33, %v2394_v41  ;;  %v2391_v36 = vadd.f32 1.0, %v2959_v38 }
 0xf16   :  { %v2395_v54 = vmul.f32 %v2383_v17, %v3994_v25  ;;  %v2392_v3 = vmul.f32 0.5, %v2390_v5  ;;  %v2406_v25 = vld [vmem:[#allocation4 + $0x1e0] sm:$0xff] }
 0xf17   :  { %2960 = vtanh.f32 %v4015_v45  ;;  %v2393_v44 = vmul.f32 0.5, %v2391_v36  ;;  %v2410_v14 = vunpack.c.l.bf16 %v2406_v25  ;;  %v2411_v31 = vunpack.c.h.bf16 %v2406_v25 }
 0xf18   :  { %v4019_v21 = vadd.f32 %v2397_v24, %v2395_v54 }
 0xf1a   :  { %2962 = vtanh.f32 %v4019_v21 }
 0xf21   :  { %v2961_v16 = vpop.eup %2960 }
 0xf22   :  { %v2402_v32 = vmul.f32 %v2961_v16, %v2392_v3 }
 0xf24   :  { %v2963_v0 = vpop.eup %2962 }
 0xf25   :  { %v2403_v60 = vmul.f32 %v2963_v0, %v2393_v44 }
 0xf27   :  { %v2404_v20 = vpack.c.bf16 %v2403_v60, %v2402_v32 }
 0xf29   :  { %2451 = vmatmul.mubr.bf16.vlgmr.msra.gmra.mrb[60].mxu0 %v2404_v20  ;;  %2494 = vmatmul.mubr.bf16.vlgmr.msra.gmra.mrb[60].mxu1 %v2404_v20 }
 0xffc   :  { %v2452_v30 = vpop.f32.mrb[60].mxu0  ;;  %v2495_v39 = vpop.f32.mrb[60].mxu1 }
 0xffd   :  { %v2504_v61 = vadd.f32 %v2452_v30, %v2410_v14  ;;  %v2454_v11 = vpop.f32.mrb[61].mxu0  ;;  %v2497_v58 = vpop.f32.mrb[61].mxu1  ;;  %v2506_v49 = vadd.f32 %v2495_v39, %v2412_v4 }
 0xffe   :  { %v2505_v52 = vadd.f32 %v2454_v11, %v2411_v31  ;;  %v2456_v7 = vpop.f32.mrb[62].mxu0  ;;  %v2499_v57 = vpop.f32.mrb[62].mxu1  ;;  %v2507_v1 = vadd.f32 %v2497_v58, %v2413_v51 }
 0xfff   :  { %v2512_v47 = vmul.f32 0.5, %v2504_v61  ;;  %v2508_v62 = vadd.f32 %v2456_v7, %v2414_v26  ;;  %v2458_v46 = vpop.f32.mrb[63].mxu0  ;;  %v2501_v13 = vpop.f32.mrb[63].mxu1  ;;  %v2510_v8 = vadd.f32 %v2499_v57, %v2416_v56 }
0x1000   :  { %v2520_v63 = vmul.f32 0.5, %v2505_v52  ;;  %v2509_v29 = vadd.f32 %v2458_v46, %v2415_v50  ;;  %v2530_v19 = vmul.f32 0.5, %v2507_v1  ;;  %v2511_v43 = vadd.f32 %v2501_v13, %v2417_v22 }
0x1001   :  { %2964 = vtanh.f32 %v2512_v47  ;;  %v2513_v9 = vmul.f32 0.5, %v2508_v62 }
0x1002   :  { %2966 = vtanh.f32 %v2520_v63  ;;  %v2521_v2 = vmul.f32 0.5, %v2509_v29  ;;  %v2531_v35 = vmul.f32 0.5, %v2511_v43 }
0x1003   :  { %2968 = vtanh.f32 %v2513_v9 }
0x1004   :  { %2970 = vtanh.f32 %v2506_v49 }
0x1005   :  { %2972 = vtanh.f32 %v2521_v2 }
0x1006   :  { %2974 = vtanh.f32 %v2510_v8 }
0x1007   :  { %2976 = vtanh.f32 %v2530_v19 }
0x1008   :  { %2978 = vtanh.f32 %v2531_v35 }
0x100b   :  { %v2965_v6 = vpop.eup %2964 }
0x100c   :  { %v2967_v40 = vpop.eup %2966  ;;  %v2516_v12 = vadd.f32 1.0, %v2965_v6 }
0x100d   :  { %v2524_v28 = vadd.f32 1.0, %v2967_v40  ;;  %v2969_v53 = vpop.eup %2968 }
0x100e   :  { %v2518_v27 = vmul.f32 0.5, %v2516_v12  ;;  %v2971_v59 = vpop.eup %2970  ;;  %v2517_v15 = vadd.f32 1.0, %v2969_v53 }
0x100f   :  { %v2526_v55 = vmul.f32 0.5, %v2524_v28  ;;  %v2973_v33 = vpop.eup %2972 }
0x1010   :  { %v2540_v41 = vmul.f32 %v2971_v59, %v2518_v27  ;;  %v2519_v18 = vmul.f32 0.5, %v2517_v15  ;;  %v2525_v42 = vadd.f32 1.0, %v2973_v33  ;;  %v2975_v17 = vpop.eup %2974 }
0x1011   :  { %v2538_v10 = vmul.f32 %v2526_v55, %v4015_v45  ;;  %v2977_v5 = vpop.eup %2976 }
0x1012   :  { %v2527_v54 = vmul.f32 0.5, %v2525_v42  ;;  %v2541_v48 = vmul.f32 %v2975_v17, %v2519_v18  ;;  %v2534_v16 = vadd.f32 1.0, %v2977_v5  ;;  %v2979_v3 = vpop.eup %2978 }
0x1013   :  { %v2542_v24 = vadd.f32 %v2540_v41, %v2538_v10  ;;  %v2535_v0 = vadd.f32 1.0, %v2979_v3 }
0x1014   :  { %v2539_v38 = vmul.f32 %v2527_v54, %v4019_v21  ;;  %v2536_v44 = vmul.f32 0.5, %v2534_v16 }
0x1015   :  { %2980 = vtanh.f32 %v2542_v24  ;;  %v2537_v45 = vmul.f32 0.5, %v2535_v0 }
0x1016   :  { %v2543_v36 = vadd.f32 %v2541_v48, %v2539_v38 }
0x1018   :  { %2982 = vtanh.f32 %v2543_v36 }
0x101f   :  { %v2981_v32 = vpop.eup %2980 }
0x1020   :  { %v2546_v60 = vmul.f32 %v2981_v32, %v2536_v44 }
0x1022   :  { %2555 = vst [vmem:[#allocation9] sm:$0xff] %v2546_v60  ;;  %v2983_v20 = vpop.eup %2982 }
0x1023   :  { %v2547_v25 = vmul.f32 %v2983_v20, %v2537_v45 }
0x1025   :  { %2556 = vst [vmem:[#allocation9 + $0x8] sm:$0xff] %v2547_v25 }
0x1026   :  { %3118 = shalt.err (!%p3115_p6)
}
0x1027   :  { %s3119_s10 = scalar_lea.hbm %s4038_s2, 256 }
0x1028   :  { %p3120_p7 = scmp.ne.s32.totalorder %s4038_s2, %s3119_s10  ;;  %p3123_p8 = scmp.lt.u32.totalorder %s3119_s10, %s4038_s2 }
0x102a   :  { %p3125_p9 = pnand %p3123_p8, %p3120_p7 }
0x102c   :  { %3128 = shalt.err (!%p3125_p9)
}
0x102d   :  { %s3142_s15 = smov 128   ;;  %s3143_s16 = smov 8  }
0x102e   :  { %2568 = dma.vmem_to_hbm [thread:$0]  %s2563_s6, 256, %s4038_s2, [#allocation6], %s3142_s15, %s3142_s15, %s3143_s16  }
0x102f   :  { %3133 = dma.done.wait [#allocation6], 256  }
0x1030   :  { %3134 = vsyncadd [#allocation6], 4294967040 }
0x1031   :  { %2572 = vsyncpa [#allocation5], 1 }
0x1032   :  { %2573 = vsyncpa [#allocation8], 1 }
0x1033   :  { %2574 = vsyncpa [#allocation6], 1 }

</bundles_post_ra>
